<compile_context>
chip_gen: v7x
topology: tpu7x:2x2x1
jax: 0.10.0
libtpu: 0.0.40
codegen_flags: <defaults>
</compile_context>

<pallas_src>
import functools

import jax
import jax.numpy as jnp
from jax import lax
from jax.experimental import pallas as pl
from jax.experimental.pallas import tpu as pltpu


# ----------------------------- fused kernel ---------------------------------
def fused_gru_head_kernel(T, Bp, H, L, x_ref, len_ref, *rest):
    nlw = 12 * L
    layer_refs = rest[:nlw]
    w1_ref, b1_ref, g_ref, be_ref, w2_ref, b2_ref, w3_ref, b3_ref = rest[nlw:nlw + 8]
    out_ref = rest[nlw + 8]
    gi_r, gi_z, gi_n, seq_scr = rest[nlw + 9:nlw + 13]

    lengths = len_ref[...]                      # (Bp, 1) int32

    h_lasts = []
    for l in range(L):
        (wir, wiz, win, whr, whz, whn,
         bir, biz, bin_, bhr, bhz, bhn) = layer_refs[12 * l:12 * (l + 1)]

        xin = x_ref[...] if l == 0 else seq_scr[...]      # (T*Bp, Din_l)

        # ---- hoisted input projection: whole sequence, one matmul per gate ----
        gi_r[...] = jnp.dot(xin, wir[...], preferred_element_type=jnp.float32) + bir[...]
        gi_z[...] = jnp.dot(xin, wiz[...], preferred_element_type=jnp.float32) + biz[...]
        gi_n[...] = jnp.dot(xin, win[...], preferred_element_type=jnp.float32) + bin_[...]

        # Load recurrent weights once (reused across all unrolled steps).
        whr_v, whz_v, whn_v = whr[...], whz[...], whn[...]
        bhr_v, bhz_v, bhn_v = bhr[...], bhz[...], bhn[...]
        write_seq = l < L - 1                    # last layer's y is never read

        def step(t, h):
            off = pl.multiple_of(t * Bp, Bp)     # aligned full (Bp, H) tile
            g_r = gi_r[pl.ds(off, Bp), :]
            g_z = gi_z[pl.ds(off, Bp), :]
            g_n = gi_n[pl.ds(off, Bp), :]
            a_r = jnp.dot(h, whr_v, preferred_element_type=jnp.float32) + bhr_v
            a_z = jnp.dot(h, whz_v, preferred_element_type=jnp.float32) + bhz_v
            a_n = jnp.dot(h, whn_v, preferred_element_type=jnp.float32) + bhn_v
            r = jax.nn.sigmoid(g_r + a_r)
            z = jax.nn.sigmoid(g_z + a_z)
            n = jnp.tanh(g_n + r * a_n)          # b_hh_n inside r*(.) — PyTorch GRU
            h_new = (1.0 - z) * n + z * h
            h_next = jnp.where(t < lengths, h_new, h)   # freeze past sequence end
            if write_seq:
                seq_scr[pl.ds(off, Bp), :] = h_next     # input to next layer
            return h_next

        h0 = jnp.zeros((Bp, H), jnp.float32)
        h_last = lax.fori_loop(0, T, step, h0, unroll=True)
        h_lasts.append(h_last)

    # hidden.permute(1,0,2).view(B, L*H): concat per-layer last hiddens (128 lanes)
    hcat = jnp.concatenate(h_lasts, axis=-1)     # (Bp, L*H)

    gamma = g_ref[...]
    beta = be_ref[...]

    def layer_norm(v):
        mu = jnp.mean(v, axis=-1, keepdims=True)
        var = jnp.mean((v - mu) ** 2, axis=-1, keepdims=True)
        return (v - mu) * lax.rsqrt(var + 1e-5) * gamma + beta

    y = jnp.dot(hcat, w1_ref[...], preferred_element_type=jnp.float32) + b1_ref[...]
    y = jnp.maximum(layer_norm(y), 0.0)
    y = jnp.dot(y, w2_ref[...], preferred_element_type=jnp.float32) + b2_ref[...]
    y = jnp.maximum(layer_norm(y), 0.0)
    out_ref[...] = (jnp.dot(y, w3_ref[...], preferred_element_type=jnp.float32)
                    + b3_ref[...])


# ----------------------------- model forward --------------------------------
def model_forward(params, inputs_btd, lengths):
    B, T, Din = inputs_btd.shape
    L = len(params["gru"])
    H = params["gru"][0]["whh_r"].shape[0]
    Bp = ((B + 7) // 8) * 8                      # pad batch to full 8-sublane tiles

    # time-major, batch-padded, flattened to (T*Bp, Din) for whole-seq matmuls
    x = jnp.transpose(inputs_btd, (1, 0, 2)).astype(jnp.float32)    # (T, B, Din)
    x = jnp.pad(x, ((0, 0), (0, Bp - B), (0, 0))).reshape(T * Bp, Din)
    len_p = jnp.pad(lengths.astype(jnp.int32), (0, Bp - B)).reshape(Bp, 1)

    gate_keys = ("wih_r", "wih_z", "wih_n", "whh_r", "whh_z", "whh_n",
                 "bih_r", "bih_z", "bih_n", "bhh_r", "bhh_z", "bhh_n")
    flat = []
    for layer in params["gru"]:
        flat.extend(layer[k] for k in gate_keys)
    head = params["head"]
    flat.extend(head[k] for k in ("w1", "b1", "gamma", "beta", "w2", "b2", "w3", "b3"))

    out = pl.pallas_call(
        functools.partial(fused_gru_head_kernel, T, Bp, H, L),
        out_shape=jax.ShapeDtypeStruct((Bp, 5), jnp.float32),
        scratch_shapes=[
            pltpu.VMEM((T * Bp, H), jnp.float32),   # gi_r (pre-projected, whole seq)
            pltpu.VMEM((T * Bp, H), jnp.float32),   # gi_z
            pltpu.VMEM((T * Bp, H), jnp.float32),   # gi_n
            pltpu.VMEM((T * Bp, H), jnp.float32),   # layer output seq -> next layer input
        ],
        compiler_params=pltpu.CompilerParams(vmem_limit_bytes=32 * 1024 * 1024),
    )(x, len_p, *flat)
    return out[:B]


# ----------------------------- parameter init -------------------------------
def init_params(key, input_dim, size, layers):
    def uniform(k, shape, fan_in):
        bound = 1.0 / jnp.sqrt(jnp.float32(fan_in))
        return jax.random.uniform(k, shape, jnp.float32, -bound, bound)

    keys = jax.random.split(key, 12 * layers + 6)
    gru = []
    ki = 0
    for l in range(layers):
        din = input_dim if l == 0 else size
        # PyTorch GRU init: U(-1/sqrt(H), 1/sqrt(H)) for all weights & biases.
        # To load real PyTorch weights: wih_r = W_ih[0:H].T, wih_z = W_ih[H:2H].T,
        # wih_n = W_ih[2H:3H].T (same r/z/n row split + transpose for whh_*, b*_*).
        shapes = (("wih_r", (din, size)), ("wih_z", (din, size)), ("wih_n", (din, size)),
                  ("whh_r", (size, size)), ("whh_z", (size, size)), ("whh_n", (size, size)),
                  ("bih_r", (1, size)), ("bih_z", (1, size)), ("bih_n", (1, size)),
                  ("bhh_r", (1, size)), ("bhh_z", (1, size)), ("bhh_n", (1, size)))
        layer = {}
        for name, shape in shapes:
            layer[name] = uniform(keys[ki], shape, size)
            ki += 1
        gru.append(layer)
    head = {
        "w1": uniform(keys[ki + 0], (size * layers, size), size * layers),
        "b1": uniform(keys[ki + 1], (1, size), size * layers),
        "gamma": jnp.ones((1, size), jnp.float32),
        "beta": jnp.zeros((1, size), jnp.float32),
        "w2": uniform(keys[ki + 2], (size, size), size),
        "b2": uniform(keys[ki + 3], (1, size), size),
        "w3": uniform(keys[ki + 4], (size, 5), size),
        "b3": uniform(keys[ki + 5], (1, 5), size),
    }
    return {"gru": gru, "head": head}


if __name__ == "__main__":
    INPUT_DIM, SIZE, LAYERS = 16, 32, 4
    B, T = 4, 8

    key = jax.random.PRNGKey(0)
    pkey, xkey = jax.random.split(key)
    params = init_params(pkey, INPUT_DIM, SIZE, LAYERS)

    inputs = jax.random.normal(xkey, (B, T, INPUT_DIM), jnp.float32)
    lengths = jnp.array([8, 6, 5, 3], dtype=jnp.int32)  # sorted descending (packed)

    out = jax.jit(model_forward)(params, inputs, lengths)
    out = jax.block_until_ready(out)
    assert out.shape == (B, 5)
    print("KERNEL_OK")
</pallas_src>

<mosaic_0001>
module attributes {stable_mosaic.version = 11 : i64} {
  func.func @fused_gru_head_kernel(%arg0: memref<64x16xf32, #tpu.memory_space<vmem>>, %arg1: memref<8x1xi32, #tpu.memory_space<vmem>>, %arg2: memref<16x32xf32, #tpu.memory_space<vmem>>, %arg3: memref<16x32xf32, #tpu.memory_space<vmem>>, %arg4: memref<16x32xf32, #tpu.memory_space<vmem>>, %arg5: memref<32x32xf32, #tpu.memory_space<vmem>>, %arg6: memref<32x32xf32, #tpu.memory_space<vmem>>, %arg7: memref<32x32xf32, #tpu.memory_space<vmem>>, %arg8: memref<1x32xf32, #tpu.memory_space<vmem>>, %arg9: memref<1x32xf32, #tpu.memory_space<vmem>>, %arg10: memref<1x32xf32, #tpu.memory_space<vmem>>, %arg11: memref<1x32xf32, #tpu.memory_space<vmem>>, %arg12: memref<1x32xf32, #tpu.memory_space<vmem>>, %arg13: memref<1x32xf32, #tpu.memory_space<vmem>>, %arg14: memref<32x32xf32, #tpu.memory_space<vmem>>, %arg15: memref<32x32xf32, #tpu.memory_space<vmem>>, %arg16: memref<32x32xf32, #tpu.memory_space<vmem>>, %arg17: memref<32x32xf32, #tpu.memory_space<vmem>>, %arg18: memref<32x32xf32, #tpu.memory_space<vmem>>, %arg19: memref<32x32xf32, #tpu.memory_space<vmem>>, %arg20: memref<1x32xf32, #tpu.memory_space<vmem>>, %arg21: memref<1x32xf32, #tpu.memory_space<vmem>>, %arg22: memref<1x32xf32, #tpu.memory_space<vmem>>, %arg23: memref<1x32xf32, #tpu.memory_space<vmem>>, %arg24: memref<1x32xf32, #tpu.memory_space<vmem>>, %arg25: memref<1x32xf32, #tpu.memory_space<vmem>>, %arg26: memref<32x32xf32, #tpu.memory_space<vmem>>, %arg27: memref<32x32xf32, #tpu.memory_space<vmem>>, %arg28: memref<32x32xf32, #tpu.memory_space<vmem>>, %arg29: memref<32x32xf32, #tpu.memory_space<vmem>>, %arg30: memref<32x32xf32, #tpu.memory_space<vmem>>, %arg31: memref<32x32xf32, #tpu.memory_space<vmem>>, %arg32: memref<1x32xf32, #tpu.memory_space<vmem>>, %arg33: memref<1x32xf32, #tpu.memory_space<vmem>>, %arg34: memref<1x32xf32, #tpu.memory_space<vmem>>, %arg35: memref<1x32xf32, #tpu.memory_space<vmem>>, %arg36: memref<1x32xf32, #tpu.memory_space<vmem>>, %arg37: memref<1x32xf32, #tpu.memory_space<vmem>>, %arg38: memref<32x32xf32, #tpu.memory_space<vmem>>, %arg39: memref<32x32xf32, #tpu.memory_space<vmem>>, %arg40: memref<32x32xf32, #tpu.memory_space<vmem>>, %arg41: memref<32x32xf32, #tpu.memory_space<vmem>>, %arg42: memref<32x32xf32, #tpu.memory_space<vmem>>, %arg43: memref<32x32xf32, #tpu.memory_space<vmem>>, %arg44: memref<1x32xf32, #tpu.memory_space<vmem>>, %arg45: memref<1x32xf32, #tpu.memory_space<vmem>>, %arg46: memref<1x32xf32, #tpu.memory_space<vmem>>, %arg47: memref<1x32xf32, #tpu.memory_space<vmem>>, %arg48: memref<1x32xf32, #tpu.memory_space<vmem>>, %arg49: memref<1x32xf32, #tpu.memory_space<vmem>>, %arg50: memref<128x32xf32, #tpu.memory_space<vmem>>, %arg51: memref<1x32xf32, #tpu.memory_space<vmem>>, %arg52: memref<1x32xf32, #tpu.memory_space<vmem>>, %arg53: memref<1x32xf32, #tpu.memory_space<vmem>>, %arg54: memref<32x32xf32, #tpu.memory_space<vmem>>, %arg55: memref<1x32xf32, #tpu.memory_space<vmem>>, %arg56: memref<32x5xf32, #tpu.memory_space<vmem>>, %arg57: memref<1x5xf32, #tpu.memory_space<vmem>>, %arg58: memref<8x5xf32, #tpu.memory_space<vmem>>, %arg59: memref<64x32xf32, #tpu.memory_space<vmem>>, %arg60: memref<64x32xf32, #tpu.memory_space<vmem>>, %arg61: memref<64x32xf32, #tpu.memory_space<vmem>>, %arg62: memref<64x32xf32, #tpu.memory_space<vmem>>) attributes {dimension_semantics = [], scalar_prefetch = 0 : i64, scratch_operands = 4 : i64, tpu.core_type = #tpu.core_type<tc>} {
    %c0 = arith.constant 0 : index
    %c0_0 = arith.constant 0 : index
    %0 = vector.load %arg1[%c0, %c0_0] : memref<8x1xi32, #tpu.memory_space<vmem>>, vector<8x1xi32>
    %c0_1 = arith.constant 0 : index
    %c0_2 = arith.constant 0 : index
    %1 = vector.load %arg0[%c0_1, %c0_2] : memref<64x16xf32, #tpu.memory_space<vmem>>, vector<64x16xf32>
    %c0_3 = arith.constant 0 : index
    %c0_4 = arith.constant 0 : index
    %2 = vector.load %arg2[%c0_3, %c0_4] : memref<16x32xf32, #tpu.memory_space<vmem>>, vector<16x32xf32>
    %cst = arith.constant dense<0.000000e+00> : vector<64x32xf32>
    %3 = tpu.matmul %1, %2, %cst {dimension_numbers = #tpu.dot_dimension_numbers<[1], [0], [0], [1], [0, 0, 1, 1], [], []>} : vector<64x16xf32>, vector<16x32xf32>, vector<64x32xf32> -> vector<64x32xf32>
    %c0_5 = arith.constant 0 : index
    %c0_6 = arith.constant 0 : index
    %4 = vector.load %arg8[%c0_5, %c0_6] : memref<1x32xf32, #tpu.memory_space<vmem>>, vector<1x32xf32>
    %5 = vector.broadcast %4 : vector<1x32xf32> to vector<64x32xf32>
    %6 = arith.addf %3, %5 : vector<64x32xf32>
    %c0_7 = arith.constant 0 : index
    %c0_8 = arith.constant 0 : index
    %7 = vector.load %arg59[%c0_7, %c0_8] : memref<64x32xf32, #tpu.memory_space<vmem>>, vector<64x32xf32>
    tpu.vector_store %arg59[%c0_7, %c0_8], %6 {strides = array<i32>} : memref<64x32xf32, #tpu.memory_space<vmem>>, vector<64x32xf32>,
    %c0_9 = arith.constant 0 : index
    %c0_10 = arith.constant 0 : index
    %8 = vector.load %arg3[%c0_9, %c0_10] : memref<16x32xf32, #tpu.memory_space<vmem>>, vector<16x32xf32>
    %cst_11 = arith.constant dense<0.000000e+00> : vector<64x32xf32>
    %9 = tpu.matmul %1, %8, %cst_11 {dimension_numbers = #tpu.dot_dimension_numbers<[1], [0], [0], [1], [0, 0, 1, 1], [], []>} : vector<64x16xf32>, vector<16x32xf32>, vector<64x32xf32> -> vector<64x32xf32>
    %c0_12 = arith.constant 0 : index
    %c0_13 = arith.constant 0 : index
    %10 = vector.load %arg9[%c0_12, %c0_13] : memref<1x32xf32, #tpu.memory_space<vmem>>, vector<1x32xf32>
    %11 = vector.broadcast %10 : vector<1x32xf32> to vector<64x32xf32>
    %12 = arith.addf %9, %11 : vector<64x32xf32>
    %c0_14 = arith.constant 0 : index
    %c0_15 = arith.constant 0 : index
    %13 = vector.load %arg60[%c0_14, %c0_15] : memref<64x32xf32, #tpu.memory_space<vmem>>, vector<64x32xf32>
    tpu.vector_store %arg60[%c0_14, %c0_15], %12 {strides = array<i32>} : memref<64x32xf32, #tpu.memory_space<vmem>>, vector<64x32xf32>,
    %c0_16 = arith.constant 0 : index
    %c0_17 = arith.constant 0 : index
    %14 = vector.load %arg4[%c0_16, %c0_17] : memref<16x32xf32, #tpu.memory_space<vmem>>, vector<16x32xf32>
    %cst_18 = arith.constant dense<0.000000e+00> : vector<64x32xf32>
    %15 = tpu.matmul %1, %14, %cst_18 {dimension_numbers = #tpu.dot_dimension_numbers<[1], [0], [0], [1], [0, 0, 1, 1], [], []>} : vector<64x16xf32>, vector<16x32xf32>, vector<64x32xf32> -> vector<64x32xf32>
    %c0_19 = arith.constant 0 : index
    %c0_20 = arith.constant 0 : index
    %16 = vector.load %arg10[%c0_19, %c0_20] : memref<1x32xf32, #tpu.memory_space<vmem>>, vector<1x32xf32>
    %17 = vector.broadcast %16 : vector<1x32xf32> to vector<64x32xf32>
    %18 = arith.addf %15, %17 : vector<64x32xf32>
    %c0_21 = arith.constant 0 : index
    %c0_22 = arith.constant 0 : index
    %19 = vector.load %arg61[%c0_21, %c0_22] : memref<64x32xf32, #tpu.memory_space<vmem>>, vector<64x32xf32>
    tpu.vector_store %arg61[%c0_21, %c0_22], %18 {strides = array<i32>} : memref<64x32xf32, #tpu.memory_space<vmem>>, vector<64x32xf32>,
    %c0_23 = arith.constant 0 : index
    %c0_24 = arith.constant 0 : index
    %20 = vector.load %arg5[%c0_23, %c0_24] : memref<32x32xf32, #tpu.memory_space<vmem>>, vector<32x32xf32>
    %c0_25 = arith.constant 0 : index
    %c0_26 = arith.constant 0 : index
    %21 = vector.load %arg6[%c0_25, %c0_26] : memref<32x32xf32, #tpu.memory_space<vmem>>, vector<32x32xf32>
    %c0_27 = arith.constant 0 : index
    %c0_28 = arith.constant 0 : index
    %22 = vector.load %arg7[%c0_27, %c0_28] : memref<32x32xf32, #tpu.memory_space<vmem>>, vector<32x32xf32>
    %c0_29 = arith.constant 0 : index
    %c0_30 = arith.constant 0 : index
    %23 = vector.load %arg11[%c0_29, %c0_30] : memref<1x32xf32, #tpu.memory_space<vmem>>, vector<1x32xf32>
    %c0_31 = arith.constant 0 : index
    %c0_32 = arith.constant 0 : index
    %24 = vector.load %arg12[%c0_31, %c0_32] : memref<1x32xf32, #tpu.memory_space<vmem>>, vector<1x32xf32>
    %c0_33 = arith.constant 0 : index
    %c0_34 = arith.constant 0 : index
    %25 = vector.load %arg13[%c0_33, %c0_34] : memref<1x32xf32, #tpu.memory_space<vmem>>, vector<1x32xf32>
    %cst_35 = arith.constant 0.000000e+00 : f32
    %26 = vector.broadcast %cst_35 : f32 to vector<8x32xf32>
    %c0_i32 = arith.constant 0 : i32
    %c8_i32 = arith.constant 8 : i32
    %27 = arith.muli %c0_i32, %c8_i32 : i32
    %28 = tpu.assume_multiple %27, 8 : i32
    %29 = arith.index_cast %28 : i32 to index
    %c0_36 = arith.constant 0 : index
    %30 = vector.load %arg59[%29, %c0_36] : memref<64x32xf32, #tpu.memory_space<vmem>>, vector<8x32xf32>
    %31 = arith.index_cast %28 : i32 to index
    %c0_37 = arith.constant 0 : index
    %32 = vector.load %arg60[%31, %c0_37] : memref<64x32xf32, #tpu.memory_space<vmem>>, vector<8x32xf32>
    %33 = arith.index_cast %28 : i32 to index
    %c0_38 = arith.constant 0 : index
    %34 = vector.load %arg61[%33, %c0_38] : memref<64x32xf32, #tpu.memory_space<vmem>>, vector<8x32xf32>
    %cst_39 = arith.constant dense<0.000000e+00> : vector<8x32xf32>
    %35 = tpu.matmul %26, %20, %cst_39 {dimension_numbers = #tpu.dot_dimension_numbers<[1], [0], [0], [1], [0, 0, 1, 1], [], []>} : vector<8x32xf32>, vector<32x32xf32>, vector<8x32xf32> -> vector<8x32xf32>
    %36 = vector.broadcast %23 : vector<1x32xf32> to vector<8x32xf32>
    %37 = arith.addf %35, %36 : vector<8x32xf32>
    %cst_40 = arith.constant dense<0.000000e+00> : vector<8x32xf32>
    %38 = tpu.matmul %26, %21, %cst_40 {dimension_numbers = #tpu.dot_dimension_numbers<[1], [0], [0], [1], [0, 0, 1, 1], [], []>} : vector<8x32xf32>, vector<32x32xf32>, vector<8x32xf32> -> vector<8x32xf32>
    %39 = vector.broadcast %24 : vector<1x32xf32> to vector<8x32xf32>
    %40 = arith.addf %38, %39 : vector<8x32xf32>
    %cst_41 = arith.constant dense<0.000000e+00> : vector<8x32xf32>
    %41 = tpu.matmul %26, %22, %cst_41 {dimension_numbers = #tpu.dot_dimension_numbers<[1], [0], [0], [1], [0, 0, 1, 1], [], []>} : vector<8x32xf32>, vector<32x32xf32>, vector<8x32xf32> -> vector<8x32xf32>
    %42 = vector.broadcast %25 : vector<1x32xf32> to vector<8x32xf32>
    %43 = arith.addf %41, %42 : vector<8x32xf32>
    %44 = arith.addf %30, %37 : vector<8x32xf32>
    %45 = arith.negf %44 : vector<8x32xf32>
    %46 = math.exp %45 : vector<8x32xf32>
    %cst_42 = arith.constant 1.000000e+00 : f32
    %47 = vector.broadcast %cst_42 : f32 to vector<8x32xf32>
    %48 = arith.addf %47, %46 : vector<8x32xf32>
    %49 = arith.divf %47, %48 : vector<8x32xf32>
    %50 = arith.addf %32, %40 : vector<8x32xf32>
    %51 = arith.negf %50 : vector<8x32xf32>
    %52 = math.exp %51 : vector<8x32xf32>
    %cst_43 = arith.constant 1.000000e+00 : f32
    %53 = vector.broadcast %cst_43 : f32 to vector<8x32xf32>
    %54 = arith.addf %53, %52 : vector<8x32xf32>
    %55 = arith.divf %53, %54 : vector<8x32xf32>
    %56 = arith.mulf %49, %43 : vector<8x32xf32>
    %57 = arith.addf %34, %56 : vector<8x32xf32>
    %58 = math.tanh %57 : vector<8x32xf32>
    %cst_44 = arith.constant 1.000000e+00 : f32
    %59 = vector.broadcast %cst_44 : f32 to vector<8x32xf32>
    %60 = arith.subf %59, %55 : vector<8x32xf32>
    %61 = arith.mulf %60, %58 : vector<8x32xf32>
    %62 = arith.mulf %55, %26 : vector<8x32xf32>
    %63 = arith.addf %61, %62 : vector<8x32xf32>
    %64 = vector.broadcast %c0_i32 : i32 to vector<8x1xi32>
    %65 = arith.cmpi slt, %64, %0 : vector<8x1xi32>
    %66 = vector.shape_cast %65 : vector<8x1xi1> to vector<8x1xi1>
    %67 = vector.broadcast %66 : vector<8x1xi1> to vector<8x32xi1>
    %68 = arith.select %67, %63, %26 : vector<8x32xi1>, vector<8x32xf32>
    %69 = arith.index_cast %28 : i32 to index
    %c0_45 = arith.constant 0 : index
    %70 = vector.load %arg62[%69, %c0_45] : memref<64x32xf32, #tpu.memory_space<vmem>>, vector<8x32xf32>
    tpu.vector_store %arg62[%69, %c0_45], %68 {strides = array<i32>} : memref<64x32xf32, #tpu.memory_space<vmem>>, vector<8x32xf32>,
    %c1_i32 = arith.constant 1 : i32
    %c8_i32_46 = arith.constant 8 : i32
    %71 = arith.muli %c1_i32, %c8_i32_46 : i32
    %72 = tpu.assume_multiple %71, 8 : i32
    %73 = arith.index_cast %72 : i32 to index
    %c0_47 = arith.constant 0 : index
    %74 = vector.load %arg59[%73, %c0_47] : memref<64x32xf32, #tpu.memory_space<vmem>>, vector<8x32xf32>
    %75 = arith.index_cast %72 : i32 to index
    %c0_48 = arith.constant 0 : index
    %76 = vector.load %arg60[%75, %c0_48] : memref<64x32xf32, #tpu.memory_space<vmem>>, vector<8x32xf32>
    %77 = arith.index_cast %72 : i32 to index
    %c0_49 = arith.constant 0 : index
    %78 = vector.load %arg61[%77, %c0_49] : memref<64x32xf32, #tpu.memory_space<vmem>>, vector<8x32xf32>
    %cst_50 = arith.constant dense<0.000000e+00> : vector<8x32xf32>
    %79 = tpu.matmul %68, %20, %cst_50 {dimension_numbers = #tpu.dot_dimension_numbers<[1], [0], [0], [1], [0, 0, 1, 1], [], []>} : vector<8x32xf32>, vector<32x32xf32>, vector<8x32xf32> -> vector<8x32xf32>
    %80 = vector.broadcast %23 : vector<1x32xf32> to vector<8x32xf32>
    %81 = arith.addf %79, %80 : vector<8x32xf32>
    %cst_51 = arith.constant dense<0.000000e+00> : vector<8x32xf32>
    %82 = tpu.matmul %68, %21, %cst_51 {dimension_numbers = #tpu.dot_dimension_numbers<[1], [0], [0], [1], [0, 0, 1, 1], [], []>} : vector<8x32xf32>, vector<32x32xf32>, vector<8x32xf32> -> vector<8x32xf32>
    %83 = vector.broadcast %24 : vector<1x32xf32> to vector<8x32xf32>
    %84 = arith.addf %82, %83 : vector<8x32xf32>
    %cst_52 = arith.constant dense<0.000000e+00> : vector<8x32xf32>
    %85 = tpu.matmul %68, %22, %cst_52 {dimension_numbers = #tpu.dot_dimension_numbers<[1], [0], [0], [1], [0, 0, 1, 1], [], []>} : vector<8x32xf32>, vector<32x32xf32>, vector<8x32xf32> -> vector<8x32xf32>
    %86 = vector.broadcast %25 : vector<1x32xf32> to vector<8x32xf32>
    %87 = arith.addf %85, %86 : vector<8x32xf32>
    %88 = arith.addf %74, %81 : vector<8x32xf32>
    %89 = arith.negf %88 : vector<8x32xf32>
    %90 = math.exp %89 : vector<8x32xf32>
    %cst_53 = arith.constant 1.000000e+00 : f32
    %91 = vector.broadcast %cst_53 : f32 to vector<8x32xf32>
    %92 = arith.addf %91, %90 : vector<8x32xf32>
    %93 = arith.divf %91, %92 : vector<8x32xf32>
    %94 = arith.addf %76, %84 : vector<8x32xf32>
    %95 = arith.negf %94 : vector<8x32xf32>
    %96 = math.exp %95 : vector<8x32xf32>
    %cst_54 = arith.constant 1.000000e+00 : f32
    %97 = vector.broadcast %cst_54 : f32 to vector<8x32xf32>
    %98 = arith.addf %97, %96 : vector<8x32xf32>
    %99 = arith.divf %97, %98 : vector<8x32xf32>
    %100 = arith.mulf %93, %87 : vector<8x32xf32>
    %101 = arith.addf %78, %100 : vector<8x32xf32>
    %102 = math.tanh %101 : vector<8x32xf32>
    %cst_55 = arith.constant 1.000000e+00 : f32
    %103 = vector.broadcast %cst_55 : f32 to vector<8x32xf32>
    %104 = arith.subf %103, %99 : vector<8x32xf32>
    %105 = arith.mulf %104, %102 : vector<8x32xf32>
    %106 = arith.mulf %99, %68 : vector<8x32xf32>
    %107 = arith.addf %105, %106 : vector<8x32xf32>
    %108 = vector.broadcast %c1_i32 : i32 to vector<8x1xi32>
    %109 = arith.cmpi slt, %108, %0 : vector<8x1xi32>
    %110 = vector.shape_cast %109 : vector<8x1xi1> to vector<8x1xi1>
    %111 = vector.broadcast %110 : vector<8x1xi1> to vector<8x32xi1>
    %112 = arith.select %111, %107, %68 : vector<8x32xi1>, vector<8x32xf32>
    %113 = arith.index_cast %72 : i32 to index
    %c0_56 = arith.constant 0 : index
    %114 = vector.load %arg62[%113, %c0_56] : memref<64x32xf32, #tpu.memory_space<vmem>>, vector<8x32xf32>
    tpu.vector_store %arg62[%113, %c0_56], %112 {strides = array<i32>} : memref<64x32xf32, #tpu.memory_space<vmem>>, vector<8x32xf32>,
    %c2_i32 = arith.constant 2 : i32
    %c8_i32_57 = arith.constant 8 : i32
    %115 = arith.muli %c2_i32, %c8_i32_57 : i32
    %116 = tpu.assume_multiple %115, 8 : i32
    %117 = arith.index_cast %116 : i32 to index
    %c0_58 = arith.constant 0 : index
    %118 = vector.load %arg59[%117, %c0_58] : memref<64x32xf32, #tpu.memory_space<vmem>>, vector<8x32xf32>
    %119 = arith.index_cast %116 : i32 to index
    %c0_59 = arith.constant 0 : index
    %120 = vector.load %arg60[%119, %c0_59] : memref<64x32xf32, #tpu.memory_space<vmem>>, vector<8x32xf32>
    %121 = arith.index_cast %116 : i32 to index
    %c0_60 = arith.constant 0 : index
    %122 = vector.load %arg61[%121, %c0_60] : memref<64x32xf32, #tpu.memory_space<vmem>>, vector<8x32xf32>
    %cst_61 = arith.constant dense<0.000000e+00> : vector<8x32xf32>
    %123 = tpu.matmul %112, %20, %cst_61 {dimension_numbers = #tpu.dot_dimension_numbers<[1], [0], [0], [1], [0, 0, 1, 1], [], []>} : vector<8x32xf32>, vector<32x32xf32>, vector<8x32xf32> -> vector<8x32xf32>
    %124 = vector.broadcast %23 : vector<1x32xf32> to vector<8x32xf32>
    %125 = arith.addf %123, %124 : vector<8x32xf32>
    %cst_62 = arith.constant dense<0.000000e+00> : vector<8x32xf32>
    %126 = tpu.matmul %112, %21, %cst_62 {dimension_numbers = #tpu.dot_dimension_numbers<[1], [0], [0], [1], [0, 0, 1, 1], [], []>} : vector<8x32xf32>, vector<32x32xf32>, vector<8x32xf32> -> vector<8x32xf32>
    %127 = vector.broadcast %24 : vector<1x32xf32> to vector<8x32xf32>
    %128 = arith.addf %126, %127 : vector<8x32xf32>
    %cst_63 = arith.constant dense<0.000000e+00> : vector<8x32xf32>
    %129 = tpu.matmul %112, %22, %cst_63 {dimension_numbers = #tpu.dot_dimension_numbers<[1], [0], [0], [1], [0, 0, 1, 1], [], []>} : vector<8x32xf32>, vector<32x32xf32>, vector<8x32xf32> -> vector<8x32xf32>
    %130 = vector.broadcast %25 : vector<1x32xf32> to vector<8x32xf32>
    %131 = arith.addf %129, %130 : vector<8x32xf32>
    %132 = arith.addf %118, %125 : vector<8x32xf32>
    %133 = arith.negf %132 : vector<8x32xf32>
    %134 = math.exp %133 : vector<8x32xf32>
    %cst_64 = arith.constant 1.000000e+00 : f32
    %135 = vector.broadcast %cst_64 : f32 to vector<8x32xf32>
    %136 = arith.addf %135, %134 : vector<8x32xf32>
    %137 = arith.divf %135, %136 : vector<8x32xf32>
    %138 = arith.addf %120, %128 : vector<8x32xf32>
    %139 = arith.negf %138 : vector<8x32xf32>
    %140 = math.exp %139 : vector<8x32xf32>
    %cst_65 = arith.constant 1.000000e+00 : f32
    %141 = vector.broadcast %cst_65 : f32 to vector<8x32xf32>
    %142 = arith.addf %141, %140 : vector<8x32xf32>
    %143 = arith.divf %141, %142 : vector<8x32xf32>
    %144 = arith.mulf %137, %131 : vector<8x32xf32>
    %145 = arith.addf %122, %144 : vector<8x32xf32>
    %146 = math.tanh %145 : vector<8x32xf32>
    %cst_66 = arith.constant 1.000000e+00 : f32
    %147 = vector.broadcast %cst_66 : f32 to vector<8x32xf32>
    %148 = arith.subf %147, %143 : vector<8x32xf32>
    %149 = arith.mulf %148, %146 : vector<8x32xf32>
    %150 = arith.mulf %143, %112 : vector<8x32xf32>
    %151 = arith.addf %149, %150 : vector<8x32xf32>
    %152 = vector.broadcast %c2_i32 : i32 to vector<8x1xi32>
    %153 = arith.cmpi slt, %152, %0 : vector<8x1xi32>
    %154 = vector.shape_cast %153 : vector<8x1xi1> to vector<8x1xi1>
    %155 = vector.broadcast %154 : vector<8x1xi1> to vector<8x32xi1>
    %156 = arith.select %155, %151, %112 : vector<8x32xi1>, vector<8x32xf32>
    %157 = arith.index_cast %116 : i32 to index
    %c0_67 = arith.constant 0 : index
    %158 = vector.load %arg62[%157, %c0_67] : memref<64x32xf32, #tpu.memory_space<vmem>>, vector<8x32xf32>
    tpu.vector_store %arg62[%157, %c0_67], %156 {strides = array<i32>} : memref<64x32xf32, #tpu.memory_space<vmem>>, vector<8x32xf32>,
    %c3_i32 = arith.constant 3 : i32
    %c8_i32_68 = arith.constant 8 : i32
    %159 = arith.muli %c3_i32, %c8_i32_68 : i32
    %160 = tpu.assume_multiple %159, 8 : i32
    %161 = arith.index_cast %160 : i32 to index
    %c0_69 = arith.constant 0 : index
    %162 = vector.load %arg59[%161, %c0_69] : memref<64x32xf32, #tpu.memory_space<vmem>>, vector<8x32xf32>
    %163 = arith.index_cast %160 : i32 to index
    %c0_70 = arith.constant 0 : index
    %164 = vector.load %arg60[%163, %c0_70] : memref<64x32xf32, #tpu.memory_space<vmem>>, vector<8x32xf32>
    %165 = arith.index_cast %160 : i32 to index
    %c0_71 = arith.constant 0 : index
    %166 = vector.load %arg61[%165, %c0_71] : memref<64x32xf32, #tpu.memory_space<vmem>>, vector<8x32xf32>
    %cst_72 = arith.constant dense<0.000000e+00> : vector<8x32xf32>
    %167 = tpu.matmul %156, %20, %cst_72 {dimension_numbers = #tpu.dot_dimension_numbers<[1], [0], [0], [1], [0, 0, 1, 1], [], []>} : vector<8x32xf32>, vector<32x32xf32>, vector<8x32xf32> -> vector<8x32xf32>
    %168 = vector.broadcast %23 : vector<1x32xf32> to vector<8x32xf32>
    %169 = arith.addf %167, %168 : vector<8x32xf32>
    %cst_73 = arith.constant dense<0.000000e+00> : vector<8x32xf32>
    %170 = tpu.matmul %156, %21, %cst_73 {dimension_numbers = #tpu.dot_dimension_numbers<[1], [0], [0], [1], [0, 0, 1, 1], [], []>} : vector<8x32xf32>, vector<32x32xf32>, vector<8x32xf32> -> vector<8x32xf32>
    %171 = vector.broadcast %24 : vector<1x32xf32> to vector<8x32xf32>
    %172 = arith.addf %170, %171 : vector<8x32xf32>
    %cst_74 = arith.constant dense<0.000000e+00> : vector<8x32xf32>
    %173 = tpu.matmul %156, %22, %cst_74 {dimension_numbers = #tpu.dot_dimension_numbers<[1], [0], [0], [1], [0, 0, 1, 1], [], []>} : vector<8x32xf32>, vector<32x32xf32>, vector<8x32xf32> -> vector<8x32xf32>
    %174 = vector.broadcast %25 : vector<1x32xf32> to vector<8x32xf32>
    %175 = arith.addf %173, %174 : vector<8x32xf32>
    %176 = arith.addf %162, %169 : vector<8x32xf32>
    %177 = arith.negf %176 : vector<8x32xf32>
    %178 = math.exp %177 : vector<8x32xf32>
    %cst_75 = arith.constant 1.000000e+00 : f32
    %179 = vector.broadcast %cst_75 : f32 to vector<8x32xf32>
    %180 = arith.addf %179, %178 : vector<8x32xf32>
    %181 = arith.divf %179, %180 : vector<8x32xf32>
    %182 = arith.addf %164, %172 : vector<8x32xf32>
    %183 = arith.negf %182 : vector<8x32xf32>
    %184 = math.exp %183 : vector<8x32xf32>
    %cst_76 = arith.constant 1.000000e+00 : f32
    %185 = vector.broadcast %cst_76 : f32 to vector<8x32xf32>
    %186 = arith.addf %185, %184 : vector<8x32xf32>
    %187 = arith.divf %185, %186 : vector<8x32xf32>
    %188 = arith.mulf %181, %175 : vector<8x32xf32>
    %189 = arith.addf %166, %188 : vector<8x32xf32>
    %190 = math.tanh %189 : vector<8x32xf32>
    %cst_77 = arith.constant 1.000000e+00 : f32
    %191 = vector.broadcast %cst_77 : f32 to vector<8x32xf32>
    %192 = arith.subf %191, %187 : vector<8x32xf32>
    %193 = arith.mulf %192, %190 : vector<8x32xf32>
    %194 = arith.mulf %187, %156 : vector<8x32xf32>
    %195 = arith.addf %193, %194 : vector<8x32xf32>
    %196 = vector.broadcast %c3_i32 : i32 to vector<8x1xi32>
    %197 = arith.cmpi slt, %196, %0 : vector<8x1xi32>
    %198 = vector.shape_cast %197 : vector<8x1xi1> to vector<8x1xi1>
    %199 = vector.broadcast %198 : vector<8x1xi1> to vector<8x32xi1>
    %200 = arith.select %199, %195, %156 : vector<8x32xi1>, vector<8x32xf32>
    %201 = arith.index_cast %160 : i32 to index
    %c0_78 = arith.constant 0 : index
    %202 = vector.load %arg62[%201, %c0_78] : memref<64x32xf32, #tpu.memory_space<vmem>>, vector<8x32xf32>
    tpu.vector_store %arg62[%201, %c0_78], %200 {strides = array<i32>} : memref<64x32xf32, #tpu.memory_space<vmem>>, vector<8x32xf32>,
    %c4_i32 = arith.constant 4 : i32
    %c8_i32_79 = arith.constant 8 : i32
    %203 = arith.muli %c4_i32, %c8_i32_79 : i32
    %204 = tpu.assume_multiple %203, 8 : i32
    %205 = arith.index_cast %204 : i32 to index
    %c0_80 = arith.constant 0 : index
    %206 = vector.load %arg59[%205, %c0_80] : memref<64x32xf32, #tpu.memory_space<vmem>>, vector<8x32xf32>
    %207 = arith.index_cast %204 : i32 to index
    %c0_81 = arith.constant 0 : index
    %208 = vector.load %arg60[%207, %c0_81] : memref<64x32xf32, #tpu.memory_space<vmem>>, vector<8x32xf32>
    %209 = arith.index_cast %204 : i32 to index
    %c0_82 = arith.constant 0 : index
    %210 = vector.load %arg61[%209, %c0_82] : memref<64x32xf32, #tpu.memory_space<vmem>>, vector<8x32xf32>
    %cst_83 = arith.constant dense<0.000000e+00> : vector<8x32xf32>
    %211 = tpu.matmul %200, %20, %cst_83 {dimension_numbers = #tpu.dot_dimension_numbers<[1], [0], [0], [1], [0, 0, 1, 1], [], []>} : vector<8x32xf32>, vector<32x32xf32>, vector<8x32xf32> -> vector<8x32xf32>
    %212 = vector.broadcast %23 : vector<1x32xf32> to vector<8x32xf32>
    %213 = arith.addf %211, %212 : vector<8x32xf32>
    %cst_84 = arith.constant dense<0.000000e+00> : vector<8x32xf32>
    %214 = tpu.matmul %200, %21, %cst_84 {dimension_numbers = #tpu.dot_dimension_numbers<[1], [0], [0], [1], [0, 0, 1, 1], [], []>} : vector<8x32xf32>, vector<32x32xf32>, vector<8x32xf32> -> vector<8x32xf32>
    %215 = vector.broadcast %24 : vector<1x32xf32> to vector<8x32xf32>
    %216 = arith.addf %214, %215 : vector<8x32xf32>
    %cst_85 = arith.constant dense<0.000000e+00> : vector<8x32xf32>
    %217 = tpu.matmul %200, %22, %cst_85 {dimension_numbers = #tpu.dot_dimension_numbers<[1], [0], [0], [1], [0, 0, 1, 1], [], []>} : vector<8x32xf32>, vector<32x32xf32>, vector<8x32xf32> -> vector<8x32xf32>
    %218 = vector.broadcast %25 : vector<1x32xf32> to vector<8x32xf32>
    %219 = arith.addf %217, %218 : vector<8x32xf32>
    %220 = arith.addf %206, %213 : vector<8x32xf32>
    %221 = arith.negf %220 : vector<8x32xf32>
    %222 = math.exp %221 : vector<8x32xf32>
    %cst_86 = arith.constant 1.000000e+00 : f32
    %223 = vector.broadcast %cst_86 : f32 to vector<8x32xf32>
    %224 = arith.addf %223, %222 : vector<8x32xf32>
    %225 = arith.divf %223, %224 : vector<8x32xf32>
    %226 = arith.addf %208, %216 : vector<8x32xf32>
    %227 = arith.negf %226 : vector<8x32xf32>
    %228 = math.exp %227 : vector<8x32xf32>
    %cst_87 = arith.constant 1.000000e+00 : f32
    %229 = vector.broadcast %cst_87 : f32 to vector<8x32xf32>
    %230 = arith.addf %229, %228 : vector<8x32xf32>
    %231 = arith.divf %229, %230 : vector<8x32xf32>
    %232 = arith.mulf %225, %219 : vector<8x32xf32>
    %233 = arith.addf %210, %232 : vector<8x32xf32>
    %234 = math.tanh %233 : vector<8x32xf32>
    %cst_88 = arith.constant 1.000000e+00 : f32
    %235 = vector.broadcast %cst_88 : f32 to vector<8x32xf32>
    %236 = arith.subf %235, %231 : vector<8x32xf32>
    %237 = arith.mulf %236, %234 : vector<8x32xf32>
    %238 = arith.mulf %231, %200 : vector<8x32xf32>
    %239 = arith.addf %237, %238 : vector<8x32xf32>
    %240 = vector.broadcast %c4_i32 : i32 to vector<8x1xi32>
    %241 = arith.cmpi slt, %240, %0 : vector<8x1xi32>
    %242 = vector.shape_cast %241 : vector<8x1xi1> to vector<8x1xi1>
    %243 = vector.broadcast %242 : vector<8x1xi1> to vector<8x32xi1>
    %244 = arith.select %243, %239, %200 : vector<8x32xi1>, vector<8x32xf32>
    %245 = arith.index_cast %204 : i32 to index
    %c0_89 = arith.constant 0 : index
    %246 = vector.load %arg62[%245, %c0_89] : memref<64x32xf32, #tpu.memory_space<vmem>>, vector<8x32xf32>
    tpu.vector_store %arg62[%245, %c0_89], %244 {strides = array<i32>} : memref<64x32xf32, #tpu.memory_space<vmem>>, vector<8x32xf32>,
    %c5_i32 = arith.constant 5 : i32
    %c8_i32_90 = arith.constant 8 : i32
    %247 = arith.muli %c5_i32, %c8_i32_90 : i32
    %248 = tpu.assume_multiple %247, 8 : i32
    %249 = arith.index_cast %248 : i32 to index
    %c0_91 = arith.constant 0 : index
    %250 = vector.load %arg59[%249, %c0_91] : memref<64x32xf32, #tpu.memory_space<vmem>>, vector<8x32xf32>
    %251 = arith.index_cast %248 : i32 to index
    %c0_92 = arith.constant 0 : index
    %252 = vector.load %arg60[%251, %c0_92] : memref<64x32xf32, #tpu.memory_space<vmem>>, vector<8x32xf32>
    %253 = arith.index_cast %248 : i32 to index
    %c0_93 = arith.constant 0 : index
    %254 = vector.load %arg61[%253, %c0_93] : memref<64x32xf32, #tpu.memory_space<vmem>>, vector<8x32xf32>
    %cst_94 = arith.constant dense<0.000000e+00> : vector<8x32xf32>
    %255 = tpu.matmul %244, %20, %cst_94 {dimension_numbers = #tpu.dot_dimension_numbers<[1], [0], [0], [1], [0, 0, 1, 1], [], []>} : vector<8x32xf32>, vector<32x32xf32>, vector<8x32xf32> -> vector<8x32xf32>
    %256 = vector.broadcast %23 : vector<1x32xf32> to vector<8x32xf32>
    %257 = arith.addf %255, %256 : vector<8x32xf32>
    %cst_95 = arith.constant dense<0.000000e+00> : vector<8x32xf32>
    %258 = tpu.matmul %244, %21, %cst_95 {dimension_numbers = #tpu.dot_dimension_numbers<[1], [0], [0], [1], [0, 0, 1, 1], [], []>} : vector<8x32xf32>, vector<32x32xf32>, vector<8x32xf32> -> vector<8x32xf32>
    %259 = vector.broadcast %24 : vector<1x32xf32> to vector<8x32xf32>
    %260 = arith.addf %258, %259 : vector<8x32xf32>
    %cst_96 = arith.constant dense<0.000000e+00> : vector<8x32xf32>
    %261 = tpu.matmul %244, %22, %cst_96 {dimension_numbers = #tpu.dot_dimension_numbers<[1], [0], [0], [1], [0, 0, 1, 1], [], []>} : vector<8x32xf32>, vector<32x32xf32>, vector<8x32xf32> -> vector<8x32xf32>
    %262 = vector.broadcast %25 : vector<1x32xf32> to vector<8x32xf32>
    %263 = arith.addf %261, %262 : vector<8x32xf32>
    %264 = arith.addf %250, %257 : vector<8x32xf32>
    %265 = arith.negf %264 : vector<8x32xf32>
    %266 = math.exp %265 : vector<8x32xf32>
    %cst_97 = arith.constant 1.000000e+00 : f32
    %267 = vector.broadcast %cst_97 : f32 to vector<8x32xf32>
    %268 = arith.addf %267, %266 : vector<8x32xf32>
    %269 = arith.divf %267, %268 : vector<8x32xf32>
    %270 = arith.addf %252, %260 : vector<8x32xf32>
    %271 = arith.negf %270 : vector<8x32xf32>
    %272 = math.exp %271 : vector<8x32xf32>
    %cst_98 = arith.constant 1.000000e+00 : f32
    %273 = vector.broadcast %cst_98 : f32 to vector<8x32xf32>
    %274 = arith.addf %273, %272 : vector<8x32xf32>
    %275 = arith.divf %273, %274 : vector<8x32xf32>
    %276 = arith.mulf %269, %263 : vector<8x32xf32>
    %277 = arith.addf %254, %276 : vector<8x32xf32>
    %278 = math.tanh %277 : vector<8x32xf32>
    %cst_99 = arith.constant 1.000000e+00 : f32
    %279 = vector.broadcast %cst_99 : f32 to vector<8x32xf32>
    %280 = arith.subf %279, %275 : vector<8x32xf32>
    %281 = arith.mulf %280, %278 : vector<8x32xf32>
    %282 = arith.mulf %275, %244 : vector<8x32xf32>
    %283 = arith.addf %281, %282 : vector<8x32xf32>
    %284 = vector.broadcast %c5_i32 : i32 to vector<8x1xi32>
    %285 = arith.cmpi slt, %284, %0 : vector<8x1xi32>
    %286 = vector.shape_cast %285 : vector<8x1xi1> to vector<8x1xi1>
    %287 = vector.broadcast %286 : vector<8x1xi1> to vector<8x32xi1>
    %288 = arith.select %287, %283, %244 : vector<8x32xi1>, vector<8x32xf32>
    %289 = arith.index_cast %248 : i32 to index
    %c0_100 = arith.constant 0 : index
    %290 = vector.load %arg62[%289, %c0_100] : memref<64x32xf32, #tpu.memory_space<vmem>>, vector<8x32xf32>
    tpu.vector_store %arg62[%289, %c0_100], %288 {strides = array<i32>} : memref<64x32xf32, #tpu.memory_space<vmem>>, vector<8x32xf32>,
    %c6_i32 = arith.constant 6 : i32
    %c8_i32_101 = arith.constant 8 : i32
    %291 = arith.muli %c6_i32, %c8_i32_101 : i32
    %292 = tpu.assume_multiple %291, 8 : i32
    %293 = arith.index_cast %292 : i32 to index
    %c0_102 = arith.constant 0 : index
    %294 = vector.load %arg59[%293, %c0_102] : memref<64x32xf32, #tpu.memory_space<vmem>>, vector<8x32xf32>
    %295 = arith.index_cast %292 : i32 to index
    %c0_103 = arith.constant 0 : index
    %296 = vector.load %arg60[%295, %c0_103] : memref<64x32xf32, #tpu.memory_space<vmem>>, vector<8x32xf32>
    %297 = arith.index_cast %292 : i32 to index
    %c0_104 = arith.constant 0 : index
    %298 = vector.load %arg61[%297, %c0_104] : memref<64x32xf32, #tpu.memory_space<vmem>>, vector<8x32xf32>
    %cst_105 = arith.constant dense<0.000000e+00> : vector<8x32xf32>
    %299 = tpu.matmul %288, %20, %cst_105 {dimension_numbers = #tpu.dot_dimension_numbers<[1], [0], [0], [1], [0, 0, 1, 1], [], []>} : vector<8x32xf32>, vector<32x32xf32>, vector<8x32xf32> -> vector<8x32xf32>
    %300 = vector.broadcast %23 : vector<1x32xf32> to vector<8x32xf32>
    %301 = arith.addf %299, %300 : vector<8x32xf32>
    %cst_106 = arith.constant dense<0.000000e+00> : vector<8x32xf32>
    %302 = tpu.matmul %288, %21, %cst_106 {dimension_numbers = #tpu.dot_dimension_numbers<[1], [0], [0], [1], [0, 0, 1, 1], [], []>} : vector<8x32xf32>, vector<32x32xf32>, vector<8x32xf32> -> vector<8x32xf32>
    %303 = vector.broadcast %24 : vector<1x32xf32> to vector<8x32xf32>
    %304 = arith.addf %302, %303 : vector<8x32xf32>
    %cst_107 = arith.constant dense<0.000000e+00> : vector<8x32xf32>
    %305 = tpu.matmul %288, %22, %cst_107 {dimension_numbers = #tpu.dot_dimension_numbers<[1], [0], [0], [1], [0, 0, 1, 1], [], []>} : vector<8x32xf32>, vector<32x32xf32>, vector<8x32xf32> -> vector<8x32xf32>
    %306 = vector.broadcast %25 : vector<1x32xf32> to vector<8x32xf32>
    %307 = arith.addf %305, %306 : vector<8x32xf32>
    %308 = arith.addf %294, %301 : vector<8x32xf32>
    %309 = arith.negf %308 : vector<8x32xf32>
    %310 = math.exp %309 : vector<8x32xf32>
    %cst_108 = arith.constant 1.000000e+00 : f32
    %311 = vector.broadcast %cst_108 : f32 to vector<8x32xf32>
    %312 = arith.addf %311, %310 : vector<8x32xf32>
    %313 = arith.divf %311, %312 : vector<8x32xf32>
    %314 = arith.addf %296, %304 : vector<8x32xf32>
    %315 = arith.negf %314 : vector<8x32xf32>
    %316 = math.exp %315 : vector<8x32xf32>
    %cst_109 = arith.constant 1.000000e+00 : f32
    %317 = vector.broadcast %cst_109 : f32 to vector<8x32xf32>
    %318 = arith.addf %317, %316 : vector<8x32xf32>
    %319 = arith.divf %317, %318 : vector<8x32xf32>
    %320 = arith.mulf %313, %307 : vector<8x32xf32>
    %321 = arith.addf %298, %320 : vector<8x32xf32>
    %322 = math.tanh %321 : vector<8x32xf32>
    %cst_110 = arith.constant 1.000000e+00 : f32
    %323 = vector.broadcast %cst_110 : f32 to vector<8x32xf32>
    %324 = arith.subf %323, %319 : vector<8x32xf32>
    %325 = arith.mulf %324, %322 : vector<8x32xf32>
    %326 = arith.mulf %319, %288 : vector<8x32xf32>
    %327 = arith.addf %325, %326 : vector<8x32xf32>
    %328 = vector.broadcast %c6_i32 : i32 to vector<8x1xi32>
    %329 = arith.cmpi slt, %328, %0 : vector<8x1xi32>
    %330 = vector.shape_cast %329 : vector<8x1xi1> to vector<8x1xi1>
    %331 = vector.broadcast %330 : vector<8x1xi1> to vector<8x32xi1>
    %332 = arith.select %331, %327, %288 : vector<8x32xi1>, vector<8x32xf32>
    %333 = arith.index_cast %292 : i32 to index
    %c0_111 = arith.constant 0 : index
    %334 = vector.load %arg62[%333, %c0_111] : memref<64x32xf32, #tpu.memory_space<vmem>>, vector<8x32xf32>
    tpu.vector_store %arg62[%333, %c0_111], %332 {strides = array<i32>} : memref<64x32xf32, #tpu.memory_space<vmem>>, vector<8x32xf32>,
    %c7_i32 = arith.constant 7 : i32
    %c8_i32_112 = arith.constant 8 : i32
    %335 = arith.muli %c7_i32, %c8_i32_112 : i32
    %336 = tpu.assume_multiple %335, 8 : i32
    %337 = arith.index_cast %336 : i32 to index
    %c0_113 = arith.constant 0 : index
    %338 = vector.load %arg59[%337, %c0_113] : memref<64x32xf32, #tpu.memory_space<vmem>>, vector<8x32xf32>
    %339 = arith.index_cast %336 : i32 to index
    %c0_114 = arith.constant 0 : index
    %340 = vector.load %arg60[%339, %c0_114] : memref<64x32xf32, #tpu.memory_space<vmem>>, vector<8x32xf32>
    %341 = arith.index_cast %336 : i32 to index
    %c0_115 = arith.constant 0 : index
    %342 = vector.load %arg61[%341, %c0_115] : memref<64x32xf32, #tpu.memory_space<vmem>>, vector<8x32xf32>
    %cst_116 = arith.constant dense<0.000000e+00> : vector<8x32xf32>
    %343 = tpu.matmul %332, %20, %cst_116 {dimension_numbers = #tpu.dot_dimension_numbers<[1], [0], [0], [1], [0, 0, 1, 1], [], []>} : vector<8x32xf32>, vector<32x32xf32>, vector<8x32xf32> -> vector<8x32xf32>
    %344 = vector.broadcast %23 : vector<1x32xf32> to vector<8x32xf32>
    %345 = arith.addf %343, %344 : vector<8x32xf32>
    %cst_117 = arith.constant dense<0.000000e+00> : vector<8x32xf32>
    %346 = tpu.matmul %332, %21, %cst_117 {dimension_numbers = #tpu.dot_dimension_numbers<[1], [0], [0], [1], [0, 0, 1, 1], [], []>} : vector<8x32xf32>, vector<32x32xf32>, vector<8x32xf32> -> vector<8x32xf32>
    %347 = vector.broadcast %24 : vector<1x32xf32> to vector<8x32xf32>
    %348 = arith.addf %346, %347 : vector<8x32xf32>
    %cst_118 = arith.constant dense<0.000000e+00> : vector<8x32xf32>
    %349 = tpu.matmul %332, %22, %cst_118 {dimension_numbers = #tpu.dot_dimension_numbers<[1], [0], [0], [1], [0, 0, 1, 1], [], []>} : vector<8x32xf32>, vector<32x32xf32>, vector<8x32xf32> -> vector<8x32xf32>
    %350 = vector.broadcast %25 : vector<1x32xf32> to vector<8x32xf32>
    %351 = arith.addf %349, %350 : vector<8x32xf32>
    %352 = arith.addf %338, %345 : vector<8x32xf32>
    %353 = arith.negf %352 : vector<8x32xf32>
    %354 = math.exp %353 : vector<8x32xf32>
    %cst_119 = arith.constant 1.000000e+00 : f32
    %355 = vector.broadcast %cst_119 : f32 to vector<8x32xf32>
    %356 = arith.addf %355, %354 : vector<8x32xf32>
    %357 = arith.divf %355, %356 : vector<8x32xf32>
    %358 = arith.addf %340, %348 : vector<8x32xf32>
    %359 = arith.negf %358 : vector<8x32xf32>
    %360 = math.exp %359 : vector<8x32xf32>
    %cst_120 = arith.constant 1.000000e+00 : f32
    %361 = vector.broadcast %cst_120 : f32 to vector<8x32xf32>
    %362 = arith.addf %361, %360 : vector<8x32xf32>
    %363 = arith.divf %361, %362 : vector<8x32xf32>
    %364 = arith.mulf %357, %351 : vector<8x32xf32>
    %365 = arith.addf %342, %364 : vector<8x32xf32>
    %366 = math.tanh %365 : vector<8x32xf32>
    %cst_121 = arith.constant 1.000000e+00 : f32
    %367 = vector.broadcast %cst_121 : f32 to vector<8x32xf32>
    %368 = arith.subf %367, %363 : vector<8x32xf32>
    %369 = arith.mulf %368, %366 : vector<8x32xf32>
    %370 = arith.mulf %363, %332 : vector<8x32xf32>
    %371 = arith.addf %369, %370 : vector<8x32xf32>
    %372 = vector.broadcast %c7_i32 : i32 to vector<8x1xi32>
    %373 = arith.cmpi slt, %372, %0 : vector<8x1xi32>
    %374 = vector.shape_cast %373 : vector<8x1xi1> to vector<8x1xi1>
    %375 = vector.broadcast %374 : vector<8x1xi1> to vector<8x32xi1>
    %376 = arith.select %375, %371, %332 : vector<8x32xi1>, vector<8x32xf32>
    %377 = arith.index_cast %336 : i32 to index
    %c0_122 = arith.constant 0 : index
    %378 = vector.load %arg62[%377, %c0_122] : memref<64x32xf32, #tpu.memory_space<vmem>>, vector<8x32xf32>
    tpu.vector_store %arg62[%377, %c0_122], %376 {strides = array<i32>} : memref<64x32xf32, #tpu.memory_space<vmem>>, vector<8x32xf32>,
    %c8_i32_123 = arith.constant 8 : i32
    %c0_124 = arith.constant 0 : index
    %c0_125 = arith.constant 0 : index
    %379 = vector.load %arg62[%c0_124, %c0_125] : memref<64x32xf32, #tpu.memory_space<vmem>>, vector<64x32xf32>
    %c0_126 = arith.constant 0 : index
    %c0_127 = arith.constant 0 : index
    %380 = vector.load %arg14[%c0_126, %c0_127] : memref<32x32xf32, #tpu.memory_space<vmem>>, vector<32x32xf32>
    %cst_128 = arith.constant dense<0.000000e+00> : vector<64x32xf32>
    %381 = tpu.matmul %379, %380, %cst_128 {dimension_numbers = #tpu.dot_dimension_numbers<[1], [0], [0], [1], [0, 0, 1, 1], [], []>} : vector<64x32xf32>, vector<32x32xf32>, vector<64x32xf32> -> vector<64x32xf32>
    %c0_129 = arith.constant 0 : index
    %c0_130 = arith.constant 0 : index
    %382 = vector.load %arg20[%c0_129, %c0_130] : memref<1x32xf32, #tpu.memory_space<vmem>>, vector<1x32xf32>
    %383 = vector.broadcast %382 : vector<1x32xf32> to vector<64x32xf32>
    %384 = arith.addf %381, %383 : vector<64x32xf32>
    %c0_131 = arith.constant 0 : index
    %c0_132 = arith.constant 0 : index
    %385 = vector.load %arg59[%c0_131, %c0_132] : memref<64x32xf32, #tpu.memory_space<vmem>>, vector<64x32xf32>
    tpu.vector_store %arg59[%c0_131, %c0_132], %384 {strides = array<i32>} : memref<64x32xf32, #tpu.memory_space<vmem>>, vector<64x32xf32>,
    %c0_133 = arith.constant 0 : index
    %c0_134 = arith.constant 0 : index
    %386 = vector.load %arg15[%c0_133, %c0_134] : memref<32x32xf32, #tpu.memory_space<vmem>>, vector<32x32xf32>
    %cst_135 = arith.constant dense<0.000000e+00> : vector<64x32xf32>
    %387 = tpu.matmul %379, %386, %cst_135 {dimension_numbers = #tpu.dot_dimension_numbers<[1], [0], [0], [1], [0, 0, 1, 1], [], []>} : vector<64x32xf32>, vector<32x32xf32>, vector<64x32xf32> -> vector<64x32xf32>
    %c0_136 = arith.constant 0 : index
    %c0_137 = arith.constant 0 : index
    %388 = vector.load %arg21[%c0_136, %c0_137] : memref<1x32xf32, #tpu.memory_space<vmem>>, vector<1x32xf32>
    %389 = vector.broadcast %388 : vector<1x32xf32> to vector<64x32xf32>
    %390 = arith.addf %387, %389 : vector<64x32xf32>
    %c0_138 = arith.constant 0 : index
    %c0_139 = arith.constant 0 : index
    %391 = vector.load %arg60[%c0_138, %c0_139] : memref<64x32xf32, #tpu.memory_space<vmem>>, vector<64x32xf32>
    tpu.vector_store %arg60[%c0_138, %c0_139], %390 {strides = array<i32>} : memref<64x32xf32, #tpu.memory_space<vmem>>, vector<64x32xf32>,
    %c0_140 = arith.constant 0 : index
    %c0_141 = arith.constant 0 : index
    %392 = vector.load %arg16[%c0_140, %c0_141] : memref<32x32xf32, #tpu.memory_space<vmem>>, vector<32x32xf32>
    %cst_142 = arith.constant dense<0.000000e+00> : vector<64x32xf32>
    %393 = tpu.matmul %379, %392, %cst_142 {dimension_numbers = #tpu.dot_dimension_numbers<[1], [0], [0], [1], [0, 0, 1, 1], [], []>} : vector<64x32xf32>, vector<32x32xf32>, vector<64x32xf32> -> vector<64x32xf32>
    %c0_143 = arith.constant 0 : index
    %c0_144 = arith.constant 0 : index
    %394 = vector.load %arg22[%c0_143, %c0_144] : memref<1x32xf32, #tpu.memory_space<vmem>>, vector<1x32xf32>
    %395 = vector.broadcast %394 : vector<1x32xf32> to vector<64x32xf32>
    %396 = arith.addf %393, %395 : vector<64x32xf32>
    %c0_145 = arith.constant 0 : index
    %c0_146 = arith.constant 0 : index
    %397 = vector.load %arg61[%c0_145, %c0_146] : memref<64x32xf32, #tpu.memory_space<vmem>>, vector<64x32xf32>
    tpu.vector_store %arg61[%c0_145, %c0_146], %396 {strides = array<i32>} : memref<64x32xf32, #tpu.memory_space<vmem>>, vector<64x32xf32>,
    %c0_147 = arith.constant 0 : index
    %c0_148 = arith.constant 0 : index
    %398 = vector.load %arg17[%c0_147, %c0_148] : memref<32x32xf32, #tpu.memory_space<vmem>>, vector<32x32xf32>
    %c0_149 = arith.constant 0 : index
    %c0_150 = arith.constant 0 : index
    %399 = vector.load %arg18[%c0_149, %c0_150] : memref<32x32xf32, #tpu.memory_space<vmem>>, vector<32x32xf32>
    %c0_151 = arith.constant 0 : index
    %c0_152 = arith.constant 0 : index
    %400 = vector.load %arg19[%c0_151, %c0_152] : memref<32x32xf32, #tpu.memory_space<vmem>>, vector<32x32xf32>
    %c0_153 = arith.constant 0 : index
    %c0_154 = arith.constant 0 : index
    %401 = vector.load %arg23[%c0_153, %c0_154] : memref<1x32xf32, #tpu.memory_space<vmem>>, vector<1x32xf32>
    %c0_155 = arith.constant 0 : index
    %c0_156 = arith.constant 0 : index
    %402 = vector.load %arg24[%c0_155, %c0_156] : memref<1x32xf32, #tpu.memory_space<vmem>>, vector<1x32xf32>
    %c0_157 = arith.constant 0 : index
    %c0_158 = arith.constant 0 : index
    %403 = vector.load %arg25[%c0_157, %c0_158] : memref<1x32xf32, #tpu.memory_space<vmem>>, vector<1x32xf32>
    %cst_159 = arith.constant 0.000000e+00 : f32
    %404 = vector.broadcast %cst_159 : f32 to vector<8x32xf32>
    %c0_i32_160 = arith.constant 0 : i32
    %c8_i32_161 = arith.constant 8 : i32
    %405 = arith.muli %c0_i32_160, %c8_i32_161 : i32
    %406 = tpu.assume_multiple %405, 8 : i32
    %407 = arith.index_cast %406 : i32 to index
    %c0_162 = arith.constant 0 : index
    %408 = vector.load %arg59[%407, %c0_162] : memref<64x32xf32, #tpu.memory_space<vmem>>, vector<8x32xf32>
    %409 = arith.index_cast %406 : i32 to index
    %c0_163 = arith.constant 0 : index
    %410 = vector.load %arg60[%409, %c0_163] : memref<64x32xf32, #tpu.memory_space<vmem>>, vector<8x32xf32>
    %411 = arith.index_cast %406 : i32 to index
    %c0_164 = arith.constant 0 : index
    %412 = vector.load %arg61[%411, %c0_164] : memref<64x32xf32, #tpu.memory_space<vmem>>, vector<8x32xf32>
    %cst_165 = arith.constant dense<0.000000e+00> : vector<8x32xf32>
    %413 = tpu.matmul %404, %398, %cst_165 {dimension_numbers = #tpu.dot_dimension_numbers<[1], [0], [0], [1], [0, 0, 1, 1], [], []>} : vector<8x32xf32>, vector<32x32xf32>, vector<8x32xf32> -> vector<8x32xf32>
    %414 = vector.broadcast %401 : vector<1x32xf32> to vector<8x32xf32>
    %415 = arith.addf %413, %414 : vector<8x32xf32>
    %cst_166 = arith.constant dense<0.000000e+00> : vector<8x32xf32>
    %416 = tpu.matmul %404, %399, %cst_166 {dimension_numbers = #tpu.dot_dimension_numbers<[1], [0], [0], [1], [0, 0, 1, 1], [], []>} : vector<8x32xf32>, vector<32x32xf32>, vector<8x32xf32> -> vector<8x32xf32>
    %417 = vector.broadcast %402 : vector<1x32xf32> to vector<8x32xf32>
    %418 = arith.addf %416, %417 : vector<8x32xf32>
    %cst_167 = arith.constant dense<0.000000e+00> : vector<8x32xf32>
    %419 = tpu.matmul %404, %400, %cst_167 {dimension_numbers = #tpu.dot_dimension_numbers<[1], [0], [0], [1], [0, 0, 1, 1], [], []>} : vector<8x32xf32>, vector<32x32xf32>, vector<8x32xf32> -> vector<8x32xf32>
    %420 = vector.broadcast %403 : vector<1x32xf32> to vector<8x32xf32>
    %421 = arith.addf %419, %420 : vector<8x32xf32>
    %422 = arith.addf %408, %415 : vector<8x32xf32>
    %423 = arith.negf %422 : vector<8x32xf32>
    %424 = math.exp %423 : vector<8x32xf32>
    %cst_168 = arith.constant 1.000000e+00 : f32
    %425 = vector.broadcast %cst_168 : f32 to vector<8x32xf32>
    %426 = arith.addf %425, %424 : vector<8x32xf32>
    %427 = arith.divf %425, %426 : vector<8x32xf32>
    %428 = arith.addf %410, %418 : vector<8x32xf32>
    %429 = arith.negf %428 : vector<8x32xf32>
    %430 = math.exp %429 : vector<8x32xf32>
    %cst_169 = arith.constant 1.000000e+00 : f32
    %431 = vector.broadcast %cst_169 : f32 to vector<8x32xf32>
    %432 = arith.addf %431, %430 : vector<8x32xf32>
    %433 = arith.divf %431, %432 : vector<8x32xf32>
    %434 = arith.mulf %427, %421 : vector<8x32xf32>
    %435 = arith.addf %412, %434 : vector<8x32xf32>
    %436 = math.tanh %435 : vector<8x32xf32>
    %cst_170 = arith.constant 1.000000e+00 : f32
    %437 = vector.broadcast %cst_170 : f32 to vector<8x32xf32>
    %438 = arith.subf %437, %433 : vector<8x32xf32>
    %439 = arith.mulf %438, %436 : vector<8x32xf32>
    %440 = arith.mulf %433, %404 : vector<8x32xf32>
    %441 = arith.addf %439, %440 : vector<8x32xf32>
    %442 = vector.broadcast %c0_i32_160 : i32 to vector<8x1xi32>
    %443 = arith.cmpi slt, %442, %0 : vector<8x1xi32>
    %444 = vector.shape_cast %443 : vector<8x1xi1> to vector<8x1xi1>
    %445 = vector.broadcast %444 : vector<8x1xi1> to vector<8x32xi1>
    %446 = arith.select %445, %441, %404 : vector<8x32xi1>, vector<8x32xf32>
    %447 = arith.index_cast %406 : i32 to index
    %c0_171 = arith.constant 0 : index
    %448 = vector.load %arg62[%447, %c0_171] : memref<64x32xf32, #tpu.memory_space<vmem>>, vector<8x32xf32>
    tpu.vector_store %arg62[%447, %c0_171], %446 {strides = array<i32>} : memref<64x32xf32, #tpu.memory_space<vmem>>, vector<8x32xf32>,
    %c1_i32_172 = arith.constant 1 : i32
    %c8_i32_173 = arith.constant 8 : i32
    %449 = arith.muli %c1_i32_172, %c8_i32_173 : i32
    %450 = tpu.assume_multiple %449, 8 : i32
    %451 = arith.index_cast %450 : i32 to index
    %c0_174 = arith.constant 0 : index
    %452 = vector.load %arg59[%451, %c0_174] : memref<64x32xf32, #tpu.memory_space<vmem>>, vector<8x32xf32>
    %453 = arith.index_cast %450 : i32 to index
    %c0_175 = arith.constant 0 : index
    %454 = vector.load %arg60[%453, %c0_175] : memref<64x32xf32, #tpu.memory_space<vmem>>, vector<8x32xf32>
    %455 = arith.index_cast %450 : i32 to index
    %c0_176 = arith.constant 0 : index
    %456 = vector.load %arg61[%455, %c0_176] : memref<64x32xf32, #tpu.memory_space<vmem>>, vector<8x32xf32>
    %cst_177 = arith.constant dense<0.000000e+00> : vector<8x32xf32>
    %457 = tpu.matmul %446, %398, %cst_177 {dimension_numbers = #tpu.dot_dimension_numbers<[1], [0], [0], [1], [0, 0, 1, 1], [], []>} : vector<8x32xf32>, vector<32x32xf32>, vector<8x32xf32> -> vector<8x32xf32>
    %458 = vector.broadcast %401 : vector<1x32xf32> to vector<8x32xf32>
    %459 = arith.addf %457, %458 : vector<8x32xf32>
    %cst_178 = arith.constant dense<0.000000e+00> : vector<8x32xf32>
    %460 = tpu.matmul %446, %399, %cst_178 {dimension_numbers = #tpu.dot_dimension_numbers<[1], [0], [0], [1], [0, 0, 1, 1], [], []>} : vector<8x32xf32>, vector<32x32xf32>, vector<8x32xf32> -> vector<8x32xf32>
    %461 = vector.broadcast %402 : vector<1x32xf32> to vector<8x32xf32>
    %462 = arith.addf %460, %461 : vector<8x32xf32>
    %cst_179 = arith.constant dense<0.000000e+00> : vector<8x32xf32>
    %463 = tpu.matmul %446, %400, %cst_179 {dimension_numbers = #tpu.dot_dimension_numbers<[1], [0], [0], [1], [0, 0, 1, 1], [], []>} : vector<8x32xf32>, vector<32x32xf32>, vector<8x32xf32> -> vector<8x32xf32>
    %464 = vector.broadcast %403 : vector<1x32xf32> to vector<8x32xf32>
    %465 = arith.addf %463, %464 : vector<8x32xf32>
    %466 = arith.addf %452, %459 : vector<8x32xf32>
    %467 = arith.negf %466 : vector<8x32xf32>
    %468 = math.exp %467 : vector<8x32xf32>
    %cst_180 = arith.constant 1.000000e+00 : f32
    %469 = vector.broadcast %cst_180 : f32 to vector<8x32xf32>
    %470 = arith.addf %469, %468 : vector<8x32xf32>
    %471 = arith.divf %469, %470 : vector<8x32xf32>
    %472 = arith.addf %454, %462 : vector<8x32xf32>
    %473 = arith.negf %472 : vector<8x32xf32>
    %474 = math.exp %473 : vector<8x32xf32>
    %cst_181 = arith.constant 1.000000e+00 : f32
    %475 = vector.broadcast %cst_181 : f32 to vector<8x32xf32>
    %476 = arith.addf %475, %474 : vector<8x32xf32>
    %477 = arith.divf %475, %476 : vector<8x32xf32>
    %478 = arith.mulf %471, %465 : vector<8x32xf32>
    %479 = arith.addf %456, %478 : vector<8x32xf32>
    %480 = math.tanh %479 : vector<8x32xf32>
    %cst_182 = arith.constant 1.000000e+00 : f32
    %481 = vector.broadcast %cst_182 : f32 to vector<8x32xf32>
    %482 = arith.subf %481, %477 : vector<8x32xf32>
    %483 = arith.mulf %482, %480 : vector<8x32xf32>
    %484 = arith.mulf %477, %446 : vector<8x32xf32>
    %485 = arith.addf %483, %484 : vector<8x32xf32>
    %486 = vector.broadcast %c1_i32_172 : i32 to vector<8x1xi32>
    %487 = arith.cmpi slt, %486, %0 : vector<8x1xi32>
    %488 = vector.shape_cast %487 : vector<8x1xi1> to vector<8x1xi1>
    %489 = vector.broadcast %488 : vector<8x1xi1> to vector<8x32xi1>
    %490 = arith.select %489, %485, %446 : vector<8x32xi1>, vector<8x32xf32>
    %491 = arith.index_cast %450 : i32 to index
    %c0_183 = arith.constant 0 : index
    %492 = vector.load %arg62[%491, %c0_183] : memref<64x32xf32, #tpu.memory_space<vmem>>, vector<8x32xf32>
    tpu.vector_store %arg62[%491, %c0_183], %490 {strides = array<i32>} : memref<64x32xf32, #tpu.memory_space<vmem>>, vector<8x32xf32>,
    %c2_i32_184 = arith.constant 2 : i32
    %c8_i32_185 = arith.constant 8 : i32
    %493 = arith.muli %c2_i32_184, %c8_i32_185 : i32
    %494 = tpu.assume_multiple %493, 8 : i32
    %495 = arith.index_cast %494 : i32 to index
    %c0_186 = arith.constant 0 : index
    %496 = vector.load %arg59[%495, %c0_186] : memref<64x32xf32, #tpu.memory_space<vmem>>, vector<8x32xf32>
    %497 = arith.index_cast %494 : i32 to index
    %c0_187 = arith.constant 0 : index
    %498 = vector.load %arg60[%497, %c0_187] : memref<64x32xf32, #tpu.memory_space<vmem>>, vector<8x32xf32>
    %499 = arith.index_cast %494 : i32 to index
    %c0_188 = arith.constant 0 : index
    %500 = vector.load %arg61[%499, %c0_188] : memref<64x32xf32, #tpu.memory_space<vmem>>, vector<8x32xf32>
    %cst_189 = arith.constant dense<0.000000e+00> : vector<8x32xf32>
    %501 = tpu.matmul %490, %398, %cst_189 {dimension_numbers = #tpu.dot_dimension_numbers<[1], [0], [0], [1], [0, 0, 1, 1], [], []>} : vector<8x32xf32>, vector<32x32xf32>, vector<8x32xf32> -> vector<8x32xf32>
    %502 = vector.broadcast %401 : vector<1x32xf32> to vector<8x32xf32>
    %503 = arith.addf %501, %502 : vector<8x32xf32>
    %cst_190 = arith.constant dense<0.000000e+00> : vector<8x32xf32>
    %504 = tpu.matmul %490, %399, %cst_190 {dimension_numbers = #tpu.dot_dimension_numbers<[1], [0], [0], [1], [0, 0, 1, 1], [], []>} : vector<8x32xf32>, vector<32x32xf32>, vector<8x32xf32> -> vector<8x32xf32>
    %505 = vector.broadcast %402 : vector<1x32xf32> to vector<8x32xf32>
    %506 = arith.addf %504, %505 : vector<8x32xf32>
    %cst_191 = arith.constant dense<0.000000e+00> : vector<8x32xf32>
    %507 = tpu.matmul %490, %400, %cst_191 {dimension_numbers = #tpu.dot_dimension_numbers<[1], [0], [0], [1], [0, 0, 1, 1], [], []>} : vector<8x32xf32>, vector<32x32xf32>, vector<8x32xf32> -> vector<8x32xf32>
    %508 = vector.broadcast %403 : vector<1x32xf32> to vector<8x32xf32>
    %509 = arith.addf %507, %508 : vector<8x32xf32>
    %510 = arith.addf %496, %503 : vector<8x32xf32>
    %511 = arith.negf %510 : vector<8x32xf32>
    %512 = math.exp %511 : vector<8x32xf32>
    %cst_192 = arith.constant 1.000000e+00 : f32
    %513 = vector.broadcast %cst_192 : f32 to vector<8x32xf32>
    %514 = arith.addf %513, %512 : vector<8x32xf32>
    %515 = arith.divf %513, %514 : vector<8x32xf32>
    %516 = arith.addf %498, %506 : vector<8x32xf32>
    %517 = arith.negf %516 : vector<8x32xf32>
    %518 = math.exp %517 : vector<8x32xf32>
    %cst_193 = arith.constant 1.000000e+00 : f32
    %519 = vector.broadcast %cst_193 : f32 to vector<8x32xf32>
    %520 = arith.addf %519, %518 : vector<8x32xf32>
    %521 = arith.divf %519, %520 : vector<8x32xf32>
    %522 = arith.mulf %515, %509 : vector<8x32xf32>
    %523 = arith.addf %500, %522 : vector<8x32xf32>
    %524 = math.tanh %523 : vector<8x32xf32>
    %cst_194 = arith.constant 1.000000e+00 : f32
    %525 = vector.broadcast %cst_194 : f32 to vector<8x32xf32>
    %526 = arith.subf %525, %521 : vector<8x32xf32>
    %527 = arith.mulf %526, %524 : vector<8x32xf32>
    %528 = arith.mulf %521, %490 : vector<8x32xf32>
    %529 = arith.addf %527, %528 : vector<8x32xf32>
    %530 = vector.broadcast %c2_i32_184 : i32 to vector<8x1xi32>
    %531 = arith.cmpi slt, %530, %0 : vector<8x1xi32>
    %532 = vector.shape_cast %531 : vector<8x1xi1> to vector<8x1xi1>
    %533 = vector.broadcast %532 : vector<8x1xi1> to vector<8x32xi1>
    %534 = arith.select %533, %529, %490 : vector<8x32xi1>, vector<8x32xf32>
    %535 = arith.index_cast %494 : i32 to index
    %c0_195 = arith.constant 0 : index
    %536 = vector.load %arg62[%535, %c0_195] : memref<64x32xf32, #tpu.memory_space<vmem>>, vector<8x32xf32>
    tpu.vector_store %arg62[%535, %c0_195], %534 {strides = array<i32>} : memref<64x32xf32, #tpu.memory_space<vmem>>, vector<8x32xf32>,
    %c3_i32_196 = arith.constant 3 : i32
    %c8_i32_197 = arith.constant 8 : i32
    %537 = arith.muli %c3_i32_196, %c8_i32_197 : i32
    %538 = tpu.assume_multiple %537, 8 : i32
    %539 = arith.index_cast %538 : i32 to index
    %c0_198 = arith.constant 0 : index
    %540 = vector.load %arg59[%539, %c0_198] : memref<64x32xf32, #tpu.memory_space<vmem>>, vector<8x32xf32>
    %541 = arith.index_cast %538 : i32 to index
    %c0_199 = arith.constant 0 : index
    %542 = vector.load %arg60[%541, %c0_199] : memref<64x32xf32, #tpu.memory_space<vmem>>, vector<8x32xf32>
    %543 = arith.index_cast %538 : i32 to index
    %c0_200 = arith.constant 0 : index
    %544 = vector.load %arg61[%543, %c0_200] : memref<64x32xf32, #tpu.memory_space<vmem>>, vector<8x32xf32>
    %cst_201 = arith.constant dense<0.000000e+00> : vector<8x32xf32>
    %545 = tpu.matmul %534, %398, %cst_201 {dimension_numbers = #tpu.dot_dimension_numbers<[1], [0], [0], [1], [0, 0, 1, 1], [], []>} : vector<8x32xf32>, vector<32x32xf32>, vector<8x32xf32> -> vector<8x32xf32>
    %546 = vector.broadcast %401 : vector<1x32xf32> to vector<8x32xf32>
    %547 = arith.addf %545, %546 : vector<8x32xf32>
    %cst_202 = arith.constant dense<0.000000e+00> : vector<8x32xf32>
    %548 = tpu.matmul %534, %399, %cst_202 {dimension_numbers = #tpu.dot_dimension_numbers<[1], [0], [0], [1], [0, 0, 1, 1], [], []>} : vector<8x32xf32>, vector<32x32xf32>, vector<8x32xf32> -> vector<8x32xf32>
    %549 = vector.broadcast %402 : vector<1x32xf32> to vector<8x32xf32>
    %550 = arith.addf %548, %549 : vector<8x32xf32>
    %cst_203 = arith.constant dense<0.000000e+00> : vector<8x32xf32>
    %551 = tpu.matmul %534, %400, %cst_203 {dimension_numbers = #tpu.dot_dimension_numbers<[1], [0], [0], [1], [0, 0, 1, 1], [], []>} : vector<8x32xf32>, vector<32x32xf32>, vector<8x32xf32> -> vector<8x32xf32>
    %552 = vector.broadcast %403 : vector<1x32xf32> to vector<8x32xf32>
    %553 = arith.addf %551, %552 : vector<8x32xf32>
    %554 = arith.addf %540, %547 : vector<8x32xf32>
    %555 = arith.negf %554 : vector<8x32xf32>
    %556 = math.exp %555 : vector<8x32xf32>
    %cst_204 = arith.constant 1.000000e+00 : f32
    %557 = vector.broadcast %cst_204 : f32 to vector<8x32xf32>
    %558 = arith.addf %557, %556 : vector<8x32xf32>
    %559 = arith.divf %557, %558 : vector<8x32xf32>
    %560 = arith.addf %542, %550 : vector<8x32xf32>
    %561 = arith.negf %560 : vector<8x32xf32>
    %562 = math.exp %561 : vector<8x32xf32>
    %cst_205 = arith.constant 1.000000e+00 : f32
    %563 = vector.broadcast %cst_205 : f32 to vector<8x32xf32>
    %564 = arith.addf %563, %562 : vector<8x32xf32>
    %565 = arith.divf %563, %564 : vector<8x32xf32>
    %566 = arith.mulf %559, %553 : vector<8x32xf32>
    %567 = arith.addf %544, %566 : vector<8x32xf32>
    %568 = math.tanh %567 : vector<8x32xf32>
    %cst_206 = arith.constant 1.000000e+00 : f32
    %569 = vector.broadcast %cst_206 : f32 to vector<8x32xf32>
    %570 = arith.subf %569, %565 : vector<8x32xf32>
    %571 = arith.mulf %570, %568 : vector<8x32xf32>
    %572 = arith.mulf %565, %534 : vector<8x32xf32>
    %573 = arith.addf %571, %572 : vector<8x32xf32>
    %574 = vector.broadcast %c3_i32_196 : i32 to vector<8x1xi32>
    %575 = arith.cmpi slt, %574, %0 : vector<8x1xi32>
    %576 = vector.shape_cast %575 : vector<8x1xi1> to vector<8x1xi1>
    %577 = vector.broadcast %576 : vector<8x1xi1> to vector<8x32xi1>
    %578 = arith.select %577, %573, %534 : vector<8x32xi1>, vector<8x32xf32>
    %579 = arith.index_cast %538 : i32 to index
    %c0_207 = arith.constant 0 : index
    %580 = vector.load %arg62[%579, %c0_207] : memref<64x32xf32, #tpu.memory_space<vmem>>, vector<8x32xf32>
    tpu.vector_store %arg62[%579, %c0_207], %578 {strides = array<i32>} : memref<64x32xf32, #tpu.memory_space<vmem>>, vector<8x32xf32>,
    %c4_i32_208 = arith.constant 4 : i32
    %c8_i32_209 = arith.constant 8 : i32
    %581 = arith.muli %c4_i32_208, %c8_i32_209 : i32
    %582 = tpu.assume_multiple %581, 8 : i32
    %583 = arith.index_cast %582 : i32 to index
    %c0_210 = arith.constant 0 : index
    %584 = vector.load %arg59[%583, %c0_210] : memref<64x32xf32, #tpu.memory_space<vmem>>, vector<8x32xf32>
    %585 = arith.index_cast %582 : i32 to index
    %c0_211 = arith.constant 0 : index
    %586 = vector.load %arg60[%585, %c0_211] : memref<64x32xf32, #tpu.memory_space<vmem>>, vector<8x32xf32>
    %587 = arith.index_cast %582 : i32 to index
    %c0_212 = arith.constant 0 : index
    %588 = vector.load %arg61[%587, %c0_212] : memref<64x32xf32, #tpu.memory_space<vmem>>, vector<8x32xf32>
    %cst_213 = arith.constant dense<0.000000e+00> : vector<8x32xf32>
    %589 = tpu.matmul %578, %398, %cst_213 {dimension_numbers = #tpu.dot_dimension_numbers<[1], [0], [0], [1], [0, 0, 1, 1], [], []>} : vector<8x32xf32>, vector<32x32xf32>, vector<8x32xf32> -> vector<8x32xf32>
    %590 = vector.broadcast %401 : vector<1x32xf32> to vector<8x32xf32>
    %591 = arith.addf %589, %590 : vector<8x32xf32>
    %cst_214 = arith.constant dense<0.000000e+00> : vector<8x32xf32>
    %592 = tpu.matmul %578, %399, %cst_214 {dimension_numbers = #tpu.dot_dimension_numbers<[1], [0], [0], [1], [0, 0, 1, 1], [], []>} : vector<8x32xf32>, vector<32x32xf32>, vector<8x32xf32> -> vector<8x32xf32>
    %593 = vector.broadcast %402 : vector<1x32xf32> to vector<8x32xf32>
    %594 = arith.addf %592, %593 : vector<8x32xf32>
    %cst_215 = arith.constant dense<0.000000e+00> : vector<8x32xf32>
    %595 = tpu.matmul %578, %400, %cst_215 {dimension_numbers = #tpu.dot_dimension_numbers<[1], [0], [0], [1], [0, 0, 1, 1], [], []>} : vector<8x32xf32>, vector<32x32xf32>, vector<8x32xf32> -> vector<8x32xf32>
    %596 = vector.broadcast %403 : vector<1x32xf32> to vector<8x32xf32>
    %597 = arith.addf %595, %596 : vector<8x32xf32>
    %598 = arith.addf %584, %591 : vector<8x32xf32>
    %599 = arith.negf %598 : vector<8x32xf32>
    %600 = math.exp %599 : vector<8x32xf32>
    %cst_216 = arith.constant 1.000000e+00 : f32
    %601 = vector.broadcast %cst_216 : f32 to vector<8x32xf32>
    %602 = arith.addf %601, %600 : vector<8x32xf32>
    %603 = arith.divf %601, %602 : vector<8x32xf32>
    %604 = arith.addf %586, %594 : vector<8x32xf32>
    %605 = arith.negf %604 : vector<8x32xf32>
    %606 = math.exp %605 : vector<8x32xf32>
    %cst_217 = arith.constant 1.000000e+00 : f32
    %607 = vector.broadcast %cst_217 : f32 to vector<8x32xf32>
    %608 = arith.addf %607, %606 : vector<8x32xf32>
    %609 = arith.divf %607, %608 : vector<8x32xf32>
    %610 = arith.mulf %603, %597 : vector<8x32xf32>
    %611 = arith.addf %588, %610 : vector<8x32xf32>
    %612 = math.tanh %611 : vector<8x32xf32>
    %cst_218 = arith.constant 1.000000e+00 : f32
    %613 = vector.broadcast %cst_218 : f32 to vector<8x32xf32>
    %614 = arith.subf %613, %609 : vector<8x32xf32>
    %615 = arith.mulf %614, %612 : vector<8x32xf32>
    %616 = arith.mulf %609, %578 : vector<8x32xf32>
    %617 = arith.addf %615, %616 : vector<8x32xf32>
    %618 = vector.broadcast %c4_i32_208 : i32 to vector<8x1xi32>
    %619 = arith.cmpi slt, %618, %0 : vector<8x1xi32>
    %620 = vector.shape_cast %619 : vector<8x1xi1> to vector<8x1xi1>
    %621 = vector.broadcast %620 : vector<8x1xi1> to vector<8x32xi1>
    %622 = arith.select %621, %617, %578 : vector<8x32xi1>, vector<8x32xf32>
    %623 = arith.index_cast %582 : i32 to index
    %c0_219 = arith.constant 0 : index
    %624 = vector.load %arg62[%623, %c0_219] : memref<64x32xf32, #tpu.memory_space<vmem>>, vector<8x32xf32>
    tpu.vector_store %arg62[%623, %c0_219], %622 {strides = array<i32>} : memref<64x32xf32, #tpu.memory_space<vmem>>, vector<8x32xf32>,
    %c5_i32_220 = arith.constant 5 : i32
    %c8_i32_221 = arith.constant 8 : i32
    %625 = arith.muli %c5_i32_220, %c8_i32_221 : i32
    %626 = tpu.assume_multiple %625, 8 : i32
    %627 = arith.index_cast %626 : i32 to index
    %c0_222 = arith.constant 0 : index
    %628 = vector.load %arg59[%627, %c0_222] : memref<64x32xf32, #tpu.memory_space<vmem>>, vector<8x32xf32>
    %629 = arith.index_cast %626 : i32 to index
    %c0_223 = arith.constant 0 : index
    %630 = vector.load %arg60[%629, %c0_223] : memref<64x32xf32, #tpu.memory_space<vmem>>, vector<8x32xf32>
    %631 = arith.index_cast %626 : i32 to index
    %c0_224 = arith.constant 0 : index
    %632 = vector.load %arg61[%631, %c0_224] : memref<64x32xf32, #tpu.memory_space<vmem>>, vector<8x32xf32>
    %cst_225 = arith.constant dense<0.000000e+00> : vector<8x32xf32>
    %633 = tpu.matmul %622, %398, %cst_225 {dimension_numbers = #tpu.dot_dimension_numbers<[1], [0], [0], [1], [0, 0, 1, 1], [], []>} : vector<8x32xf32>, vector<32x32xf32>, vector<8x32xf32> -> vector<8x32xf32>
    %634 = vector.broadcast %401 : vector<1x32xf32> to vector<8x32xf32>
    %635 = arith.addf %633, %634 : vector<8x32xf32>
    %cst_226 = arith.constant dense<0.000000e+00> : vector<8x32xf32>
    %636 = tpu.matmul %622, %399, %cst_226 {dimension_numbers = #tpu.dot_dimension_numbers<[1], [0], [0], [1], [0, 0, 1, 1], [], []>} : vector<8x32xf32>, vector<32x32xf32>, vector<8x32xf32> -> vector<8x32xf32>
    %637 = vector.broadcast %402 : vector<1x32xf32> to vector<8x32xf32>
    %638 = arith.addf %636, %637 : vector<8x32xf32>
    %cst_227 = arith.constant dense<0.000000e+00> : vector<8x32xf32>
    %639 = tpu.matmul %622, %400, %cst_227 {dimension_numbers = #tpu.dot_dimension_numbers<[1], [0], [0], [1], [0, 0, 1, 1], [], []>} : vector<8x32xf32>, vector<32x32xf32>, vector<8x32xf32> -> vector<8x32xf32>
    %640 = vector.broadcast %403 : vector<1x32xf32> to vector<8x32xf32>
    %641 = arith.addf %639, %640 : vector<8x32xf32>
    %642 = arith.addf %628, %635 : vector<8x32xf32>
    %643 = arith.negf %642 : vector<8x32xf32>
    %644 = math.exp %643 : vector<8x32xf32>
    %cst_228 = arith.constant 1.000000e+00 : f32
    %645 = vector.broadcast %cst_228 : f32 to vector<8x32xf32>
    %646 = arith.addf %645, %644 : vector<8x32xf32>
    %647 = arith.divf %645, %646 : vector<8x32xf32>
    %648 = arith.addf %630, %638 : vector<8x32xf32>
    %649 = arith.negf %648 : vector<8x32xf32>
    %650 = math.exp %649 : vector<8x32xf32>
    %cst_229 = arith.constant 1.000000e+00 : f32
    %651 = vector.broadcast %cst_229 : f32 to vector<8x32xf32>
    %652 = arith.addf %651, %650 : vector<8x32xf32>
    %653 = arith.divf %651, %652 : vector<8x32xf32>
    %654 = arith.mulf %647, %641 : vector<8x32xf32>
    %655 = arith.addf %632, %654 : vector<8x32xf32>
    %656 = math.tanh %655 : vector<8x32xf32>
    %cst_230 = arith.constant 1.000000e+00 : f32
    %657 = vector.broadcast %cst_230 : f32 to vector<8x32xf32>
    %658 = arith.subf %657, %653 : vector<8x32xf32>
    %659 = arith.mulf %658, %656 : vector<8x32xf32>
    %660 = arith.mulf %653, %622 : vector<8x32xf32>
    %661 = arith.addf %659, %660 : vector<8x32xf32>
    %662 = vector.broadcast %c5_i32_220 : i32 to vector<8x1xi32>
    %663 = arith.cmpi slt, %662, %0 : vector<8x1xi32>
    %664 = vector.shape_cast %663 : vector<8x1xi1> to vector<8x1xi1>
    %665 = vector.broadcast %664 : vector<8x1xi1> to vector<8x32xi1>
    %666 = arith.select %665, %661, %622 : vector<8x32xi1>, vector<8x32xf32>
    %667 = arith.index_cast %626 : i32 to index
    %c0_231 = arith.constant 0 : index
    %668 = vector.load %arg62[%667, %c0_231] : memref<64x32xf32, #tpu.memory_space<vmem>>, vector<8x32xf32>
    tpu.vector_store %arg62[%667, %c0_231], %666 {strides = array<i32>} : memref<64x32xf32, #tpu.memory_space<vmem>>, vector<8x32xf32>,
    %c6_i32_232 = arith.constant 6 : i32
    %c8_i32_233 = arith.constant 8 : i32
    %669 = arith.muli %c6_i32_232, %c8_i32_233 : i32
    %670 = tpu.assume_multiple %669, 8 : i32
    %671 = arith.index_cast %670 : i32 to index
    %c0_234 = arith.constant 0 : index
    %672 = vector.load %arg59[%671, %c0_234] : memref<64x32xf32, #tpu.memory_space<vmem>>, vector<8x32xf32>
    %673 = arith.index_cast %670 : i32 to index
    %c0_235 = arith.constant 0 : index
    %674 = vector.load %arg60[%673, %c0_235] : memref<64x32xf32, #tpu.memory_space<vmem>>, vector<8x32xf32>
    %675 = arith.index_cast %670 : i32 to index
    %c0_236 = arith.constant 0 : index
    %676 = vector.load %arg61[%675, %c0_236] : memref<64x32xf32, #tpu.memory_space<vmem>>, vector<8x32xf32>
    %cst_237 = arith.constant dense<0.000000e+00> : vector<8x32xf32>
    %677 = tpu.matmul %666, %398, %cst_237 {dimension_numbers = #tpu.dot_dimension_numbers<[1], [0], [0], [1], [0, 0, 1, 1], [], []>} : vector<8x32xf32>, vector<32x32xf32>, vector<8x32xf32> -> vector<8x32xf32>
    %678 = vector.broadcast %401 : vector<1x32xf32> to vector<8x32xf32>
    %679 = arith.addf %677, %678 : vector<8x32xf32>
    %cst_238 = arith.constant dense<0.000000e+00> : vector<8x32xf32>
    %680 = tpu.matmul %666, %399, %cst_238 {dimension_numbers = #tpu.dot_dimension_numbers<[1], [0], [0], [1], [0, 0, 1, 1], [], []>} : vector<8x32xf32>, vector<32x32xf32>, vector<8x32xf32> -> vector<8x32xf32>
    %681 = vector.broadcast %402 : vector<1x32xf32> to vector<8x32xf32>
    %682 = arith.addf %680, %681 : vector<8x32xf32>
    %cst_239 = arith.constant dense<0.000000e+00> : vector<8x32xf32>
    %683 = tpu.matmul %666, %400, %cst_239 {dimension_numbers = #tpu.dot_dimension_numbers<[1], [0], [0], [1], [0, 0, 1, 1], [], []>} : vector<8x32xf32>, vector<32x32xf32>, vector<8x32xf32> -> vector<8x32xf32>
    %684 = vector.broadcast %403 : vector<1x32xf32> to vector<8x32xf32>
    %685 = arith.addf %683, %684 : vector<8x32xf32>
    %686 = arith.addf %672, %679 : vector<8x32xf32>
    %687 = arith.negf %686 : vector<8x32xf32>
    %688 = math.exp %687 : vector<8x32xf32>
    %cst_240 = arith.constant 1.000000e+00 : f32
    %689 = vector.broadcast %cst_240 : f32 to vector<8x32xf32>
    %690 = arith.addf %689, %688 : vector<8x32xf32>
    %691 = arith.divf %689, %690 : vector<8x32xf32>
    %692 = arith.addf %674, %682 : vector<8x32xf32>
    %693 = arith.negf %692 : vector<8x32xf32>
    %694 = math.exp %693 : vector<8x32xf32>
    %cst_241 = arith.constant 1.000000e+00 : f32
    %695 = vector.broadcast %cst_241 : f32 to vector<8x32xf32>
    %696 = arith.addf %695, %694 : vector<8x32xf32>
    %697 = arith.divf %695, %696 : vector<8x32xf32>
    %698 = arith.mulf %691, %685 : vector<8x32xf32>
    %699 = arith.addf %676, %698 : vector<8x32xf32>
    %700 = math.tanh %699 : vector<8x32xf32>
    %cst_242 = arith.constant 1.000000e+00 : f32
    %701 = vector.broadcast %cst_242 : f32 to vector<8x32xf32>
    %702 = arith.subf %701, %697 : vector<8x32xf32>
    %703 = arith.mulf %702, %700 : vector<8x32xf32>
    %704 = arith.mulf %697, %666 : vector<8x32xf32>
    %705 = arith.addf %703, %704 : vector<8x32xf32>
    %706 = vector.broadcast %c6_i32_232 : i32 to vector<8x1xi32>
    %707 = arith.cmpi slt, %706, %0 : vector<8x1xi32>
    %708 = vector.shape_cast %707 : vector<8x1xi1> to vector<8x1xi1>
    %709 = vector.broadcast %708 : vector<8x1xi1> to vector<8x32xi1>
    %710 = arith.select %709, %705, %666 : vector<8x32xi1>, vector<8x32xf32>
    %711 = arith.index_cast %670 : i32 to index
    %c0_243 = arith.constant 0 : index
    %712 = vector.load %arg62[%711, %c0_243] : memref<64x32xf32, #tpu.memory_space<vmem>>, vector<8x32xf32>
    tpu.vector_store %arg62[%711, %c0_243], %710 {strides = array<i32>} : memref<64x32xf32, #tpu.memory_space<vmem>>, vector<8x32xf32>,
    %c7_i32_244 = arith.constant 7 : i32
    %c8_i32_245 = arith.constant 8 : i32
    %713 = arith.muli %c7_i32_244, %c8_i32_245 : i32
    %714 = tpu.assume_multiple %713, 8 : i32
    %715 = arith.index_cast %714 : i32 to index
    %c0_246 = arith.constant 0 : index
    %716 = vector.load %arg59[%715, %c0_246] : memref<64x32xf32, #tpu.memory_space<vmem>>, vector<8x32xf32>
    %717 = arith.index_cast %714 : i32 to index
    %c0_247 = arith.constant 0 : index
    %718 = vector.load %arg60[%717, %c0_247] : memref<64x32xf32, #tpu.memory_space<vmem>>, vector<8x32xf32>
    %719 = arith.index_cast %714 : i32 to index
    %c0_248 = arith.constant 0 : index
    %720 = vector.load %arg61[%719, %c0_248] : memref<64x32xf32, #tpu.memory_space<vmem>>, vector<8x32xf32>
    %cst_249 = arith.constant dense<0.000000e+00> : vector<8x32xf32>
    %721 = tpu.matmul %710, %398, %cst_249 {dimension_numbers = #tpu.dot_dimension_numbers<[1], [0], [0], [1], [0, 0, 1, 1], [], []>} : vector<8x32xf32>, vector<32x32xf32>, vector<8x32xf32> -> vector<8x32xf32>
    %722 = vector.broadcast %401 : vector<1x32xf32> to vector<8x32xf32>
    %723 = arith.addf %721, %722 : vector<8x32xf32>
    %cst_250 = arith.constant dense<0.000000e+00> : vector<8x32xf32>
    %724 = tpu.matmul %710, %399, %cst_250 {dimension_numbers = #tpu.dot_dimension_numbers<[1], [0], [0], [1], [0, 0, 1, 1], [], []>} : vector<8x32xf32>, vector<32x32xf32>, vector<8x32xf32> -> vector<8x32xf32>
    %725 = vector.broadcast %402 : vector<1x32xf32> to vector<8x32xf32>
    %726 = arith.addf %724, %725 : vector<8x32xf32>
    %cst_251 = arith.constant dense<0.000000e+00> : vector<8x32xf32>
    %727 = tpu.matmul %710, %400, %cst_251 {dimension_numbers = #tpu.dot_dimension_numbers<[1], [0], [0], [1], [0, 0, 1, 1], [], []>} : vector<8x32xf32>, vector<32x32xf32>, vector<8x32xf32> -> vector<8x32xf32>
    %728 = vector.broadcast %403 : vector<1x32xf32> to vector<8x32xf32>
    %729 = arith.addf %727, %728 : vector<8x32xf32>
    %730 = arith.addf %716, %723 : vector<8x32xf32>
    %731 = arith.negf %730 : vector<8x32xf32>
    %732 = math.exp %731 : vector<8x32xf32>
    %cst_252 = arith.constant 1.000000e+00 : f32
    %733 = vector.broadcast %cst_252 : f32 to vector<8x32xf32>
    %734 = arith.addf %733, %732 : vector<8x32xf32>
    %735 = arith.divf %733, %734 : vector<8x32xf32>
    %736 = arith.addf %718, %726 : vector<8x32xf32>
    %737 = arith.negf %736 : vector<8x32xf32>
    %738 = math.exp %737 : vector<8x32xf32>
    %cst_253 = arith.constant 1.000000e+00 : f32
    %739 = vector.broadcast %cst_253 : f32 to vector<8x32xf32>
    %740 = arith.addf %739, %738 : vector<8x32xf32>
    %741 = arith.divf %739, %740 : vector<8x32xf32>
    %742 = arith.mulf %735, %729 : vector<8x32xf32>
    %743 = arith.addf %720, %742 : vector<8x32xf32>
    %744 = math.tanh %743 : vector<8x32xf32>
    %cst_254 = arith.constant 1.000000e+00 : f32
    %745 = vector.broadcast %cst_254 : f32 to vector<8x32xf32>
    %746 = arith.subf %745, %741 : vector<8x32xf32>
    %747 = arith.mulf %746, %744 : vector<8x32xf32>
    %748 = arith.mulf %741, %710 : vector<8x32xf32>
    %749 = arith.addf %747, %748 : vector<8x32xf32>
    %750 = vector.broadcast %c7_i32_244 : i32 to vector<8x1xi32>
    %751 = arith.cmpi slt, %750, %0 : vector<8x1xi32>
    %752 = vector.shape_cast %751 : vector<8x1xi1> to vector<8x1xi1>
    %753 = vector.broadcast %752 : vector<8x1xi1> to vector<8x32xi1>
    %754 = arith.select %753, %749, %710 : vector<8x32xi1>, vector<8x32xf32>
    %755 = arith.index_cast %714 : i32 to index
    %c0_255 = arith.constant 0 : index
    %756 = vector.load %arg62[%755, %c0_255] : memref<64x32xf32, #tpu.memory_space<vmem>>, vector<8x32xf32>
    tpu.vector_store %arg62[%755, %c0_255], %754 {strides = array<i32>} : memref<64x32xf32, #tpu.memory_space<vmem>>, vector<8x32xf32>,
    %c8_i32_256 = arith.constant 8 : i32
    %c0_257 = arith.constant 0 : index
    %c0_258 = arith.constant 0 : index
    %757 = vector.load %arg62[%c0_257, %c0_258] : memref<64x32xf32, #tpu.memory_space<vmem>>, vector<64x32xf32>
    %c0_259 = arith.constant 0 : index
    %c0_260 = arith.constant 0 : index
    %758 = vector.load %arg26[%c0_259, %c0_260] : memref<32x32xf32, #tpu.memory_space<vmem>>, vector<32x32xf32>
    %cst_261 = arith.constant dense<0.000000e+00> : vector<64x32xf32>
    %759 = tpu.matmul %757, %758, %cst_261 {dimension_numbers = #tpu.dot_dimension_numbers<[1], [0], [0], [1], [0, 0, 1, 1], [], []>} : vector<64x32xf32>, vector<32x32xf32>, vector<64x32xf32> -> vector<64x32xf32>
    %c0_262 = arith.constant 0 : index
    %c0_263 = arith.constant 0 : index
    %760 = vector.load %arg32[%c0_262, %c0_263] : memref<1x32xf32, #tpu.memory_space<vmem>>, vector<1x32xf32>
    %761 = vector.broadcast %760 : vector<1x32xf32> to vector<64x32xf32>
    %762 = arith.addf %759, %761 : vector<64x32xf32>
    %c0_264 = arith.constant 0 : index
    %c0_265 = arith.constant 0 : index
    %763 = vector.load %arg59[%c0_264, %c0_265] : memref<64x32xf32, #tpu.memory_space<vmem>>, vector<64x32xf32>
    tpu.vector_store %arg59[%c0_264, %c0_265], %762 {strides = array<i32>} : memref<64x32xf32, #tpu.memory_space<vmem>>, vector<64x32xf32>,
    %c0_266 = arith.constant 0 : index
    %c0_267 = arith.constant 0 : index
    %764 = vector.load %arg27[%c0_266, %c0_267] : memref<32x32xf32, #tpu.memory_space<vmem>>, vector<32x32xf32>
    %cst_268 = arith.constant dense<0.000000e+00> : vector<64x32xf32>
    %765 = tpu.matmul %757, %764, %cst_268 {dimension_numbers = #tpu.dot_dimension_numbers<[1], [0], [0], [1], [0, 0, 1, 1], [], []>} : vector<64x32xf32>, vector<32x32xf32>, vector<64x32xf32> -> vector<64x32xf32>
    %c0_269 = arith.constant 0 : index
    %c0_270 = arith.constant 0 : index
    %766 = vector.load %arg33[%c0_269, %c0_270] : memref<1x32xf32, #tpu.memory_space<vmem>>, vector<1x32xf32>
    %767 = vector.broadcast %766 : vector<1x32xf32> to vector<64x32xf32>
    %768 = arith.addf %765, %767 : vector<64x32xf32>
    %c0_271 = arith.constant 0 : index
    %c0_272 = arith.constant 0 : index
    %769 = vector.load %arg60[%c0_271, %c0_272] : memref<64x32xf32, #tpu.memory_space<vmem>>, vector<64x32xf32>
    tpu.vector_store %arg60[%c0_271, %c0_272], %768 {strides = array<i32>} : memref<64x32xf32, #tpu.memory_space<vmem>>, vector<64x32xf32>,
    %c0_273 = arith.constant 0 : index
    %c0_274 = arith.constant 0 : index
    %770 = vector.load %arg28[%c0_273, %c0_274] : memref<32x32xf32, #tpu.memory_space<vmem>>, vector<32x32xf32>
    %cst_275 = arith.constant dense<0.000000e+00> : vector<64x32xf32>
    %771 = tpu.matmul %757, %770, %cst_275 {dimension_numbers = #tpu.dot_dimension_numbers<[1], [0], [0], [1], [0, 0, 1, 1], [], []>} : vector<64x32xf32>, vector<32x32xf32>, vector<64x32xf32> -> vector<64x32xf32>
    %c0_276 = arith.constant 0 : index
    %c0_277 = arith.constant 0 : index
    %772 = vector.load %arg34[%c0_276, %c0_277] : memref<1x32xf32, #tpu.memory_space<vmem>>, vector<1x32xf32>
    %773 = vector.broadcast %772 : vector<1x32xf32> to vector<64x32xf32>
    %774 = arith.addf %771, %773 : vector<64x32xf32>
    %c0_278 = arith.constant 0 : index
    %c0_279 = arith.constant 0 : index
    %775 = vector.load %arg61[%c0_278, %c0_279] : memref<64x32xf32, #tpu.memory_space<vmem>>, vector<64x32xf32>
    tpu.vector_store %arg61[%c0_278, %c0_279], %774 {strides = array<i32>} : memref<64x32xf32, #tpu.memory_space<vmem>>, vector<64x32xf32>,
    %c0_280 = arith.constant 0 : index
    %c0_281 = arith.constant 0 : index
    %776 = vector.load %arg29[%c0_280, %c0_281] : memref<32x32xf32, #tpu.memory_space<vmem>>, vector<32x32xf32>
    %c0_282 = arith.constant 0 : index
    %c0_283 = arith.constant 0 : index
    %777 = vector.load %arg30[%c0_282, %c0_283] : memref<32x32xf32, #tpu.memory_space<vmem>>, vector<32x32xf32>
    %c0_284 = arith.constant 0 : index
    %c0_285 = arith.constant 0 : index
    %778 = vector.load %arg31[%c0_284, %c0_285] : memref<32x32xf32, #tpu.memory_space<vmem>>, vector<32x32xf32>
    %c0_286 = arith.constant 0 : index
    %c0_287 = arith.constant 0 : index
    %779 = vector.load %arg35[%c0_286, %c0_287] : memref<1x32xf32, #tpu.memory_space<vmem>>, vector<1x32xf32>
    %c0_288 = arith.constant 0 : index
    %c0_289 = arith.constant 0 : index
    %780 = vector.load %arg36[%c0_288, %c0_289] : memref<1x32xf32, #tpu.memory_space<vmem>>, vector<1x32xf32>
    %c0_290 = arith.constant 0 : index
    %c0_291 = arith.constant 0 : index
    %781 = vector.load %arg37[%c0_290, %c0_291] : memref<1x32xf32, #tpu.memory_space<vmem>>, vector<1x32xf32>
    %cst_292 = arith.constant 0.000000e+00 : f32
    %782 = vector.broadcast %cst_292 : f32 to vector<8x32xf32>
    %c0_i32_293 = arith.constant 0 : i32
    %c8_i32_294 = arith.constant 8 : i32
    %783 = arith.muli %c0_i32_293, %c8_i32_294 : i32
    %784 = tpu.assume_multiple %783, 8 : i32
    %785 = arith.index_cast %784 : i32 to index
    %c0_295 = arith.constant 0 : index
    %786 = vector.load %arg59[%785, %c0_295] : memref<64x32xf32, #tpu.memory_space<vmem>>, vector<8x32xf32>
    %787 = arith.index_cast %784 : i32 to index
    %c0_296 = arith.constant 0 : index
    %788 = vector.load %arg60[%787, %c0_296] : memref<64x32xf32, #tpu.memory_space<vmem>>, vector<8x32xf32>
    %789 = arith.index_cast %784 : i32 to index
    %c0_297 = arith.constant 0 : index
    %790 = vector.load %arg61[%789, %c0_297] : memref<64x32xf32, #tpu.memory_space<vmem>>, vector<8x32xf32>
    %cst_298 = arith.constant dense<0.000000e+00> : vector<8x32xf32>
    %791 = tpu.matmul %782, %776, %cst_298 {dimension_numbers = #tpu.dot_dimension_numbers<[1], [0], [0], [1], [0, 0, 1, 1], [], []>} : vector<8x32xf32>, vector<32x32xf32>, vector<8x32xf32> -> vector<8x32xf32>
    %792 = vector.broadcast %779 : vector<1x32xf32> to vector<8x32xf32>
    %793 = arith.addf %791, %792 : vector<8x32xf32>
    %cst_299 = arith.constant dense<0.000000e+00> : vector<8x32xf32>
    %794 = tpu.matmul %782, %777, %cst_299 {dimension_numbers = #tpu.dot_dimension_numbers<[1], [0], [0], [1], [0, 0, 1, 1], [], []>} : vector<8x32xf32>, vector<32x32xf32>, vector<8x32xf32> -> vector<8x32xf32>
    %795 = vector.broadcast %780 : vector<1x32xf32> to vector<8x32xf32>
    %796 = arith.addf %794, %795 : vector<8x32xf32>
    %cst_300 = arith.constant dense<0.000000e+00> : vector<8x32xf32>
    %797 = tpu.matmul %782, %778, %cst_300 {dimension_numbers = #tpu.dot_dimension_numbers<[1], [0], [0], [1], [0, 0, 1, 1], [], []>} : vector<8x32xf32>, vector<32x32xf32>, vector<8x32xf32> -> vector<8x32xf32>
    %798 = vector.broadcast %781 : vector<1x32xf32> to vector<8x32xf32>
    %799 = arith.addf %797, %798 : vector<8x32xf32>
    %800 = arith.addf %786, %793 : vector<8x32xf32>
    %801 = arith.negf %800 : vector<8x32xf32>
    %802 = math.exp %801 : vector<8x32xf32>
    %cst_301 = arith.constant 1.000000e+00 : f32
    %803 = vector.broadcast %cst_301 : f32 to vector<8x32xf32>
    %804 = arith.addf %803, %802 : vector<8x32xf32>
    %805 = arith.divf %803, %804 : vector<8x32xf32>
    %806 = arith.addf %788, %796 : vector<8x32xf32>
    %807 = arith.negf %806 : vector<8x32xf32>
    %808 = math.exp %807 : vector<8x32xf32>
    %cst_302 = arith.constant 1.000000e+00 : f32
    %809 = vector.broadcast %cst_302 : f32 to vector<8x32xf32>
    %810 = arith.addf %809, %808 : vector<8x32xf32>
    %811 = arith.divf %809, %810 : vector<8x32xf32>
    %812 = arith.mulf %805, %799 : vector<8x32xf32>
    %813 = arith.addf %790, %812 : vector<8x32xf32>
    %814 = math.tanh %813 : vector<8x32xf32>
    %cst_303 = arith.constant 1.000000e+00 : f32
    %815 = vector.broadcast %cst_303 : f32 to vector<8x32xf32>
    %816 = arith.subf %815, %811 : vector<8x32xf32>
    %817 = arith.mulf %816, %814 : vector<8x32xf32>
    %818 = arith.mulf %811, %782 : vector<8x32xf32>
    %819 = arith.addf %817, %818 : vector<8x32xf32>
    %820 = vector.broadcast %c0_i32_293 : i32 to vector<8x1xi32>
    %821 = arith.cmpi slt, %820, %0 : vector<8x1xi32>
    %822 = vector.shape_cast %821 : vector<8x1xi1> to vector<8x1xi1>
    %823 = vector.broadcast %822 : vector<8x1xi1> to vector<8x32xi1>
    %824 = arith.select %823, %819, %782 : vector<8x32xi1>, vector<8x32xf32>
    %825 = arith.index_cast %784 : i32 to index
    %c0_304 = arith.constant 0 : index
    %826 = vector.load %arg62[%825, %c0_304] : memref<64x32xf32, #tpu.memory_space<vmem>>, vector<8x32xf32>
    tpu.vector_store %arg62[%825, %c0_304], %824 {strides = array<i32>} : memref<64x32xf32, #tpu.memory_space<vmem>>, vector<8x32xf32>,
    %c1_i32_305 = arith.constant 1 : i32
    %c8_i32_306 = arith.constant 8 : i32
    %827 = arith.muli %c1_i32_305, %c8_i32_306 : i32
    %828 = tpu.assume_multiple %827, 8 : i32
    %829 = arith.index_cast %828 : i32 to index
    %c0_307 = arith.constant 0 : index
    %830 = vector.load %arg59[%829, %c0_307] : memref<64x32xf32, #tpu.memory_space<vmem>>, vector<8x32xf32>
    %831 = arith.index_cast %828 : i32 to index
    %c0_308 = arith.constant 0 : index
    %832 = vector.load %arg60[%831, %c0_308] : memref<64x32xf32, #tpu.memory_space<vmem>>, vector<8x32xf32>
    %833 = arith.index_cast %828 : i32 to index
    %c0_309 = arith.constant 0 : index
    %834 = vector.load %arg61[%833, %c0_309] : memref<64x32xf32, #tpu.memory_space<vmem>>, vector<8x32xf32>
    %cst_310 = arith.constant dense<0.000000e+00> : vector<8x32xf32>
    %835 = tpu.matmul %824, %776, %cst_310 {dimension_numbers = #tpu.dot_dimension_numbers<[1], [0], [0], [1], [0, 0, 1, 1], [], []>} : vector<8x32xf32>, vector<32x32xf32>, vector<8x32xf32> -> vector<8x32xf32>
    %836 = vector.broadcast %779 : vector<1x32xf32> to vector<8x32xf32>
    %837 = arith.addf %835, %836 : vector<8x32xf32>
    %cst_311 = arith.constant dense<0.000000e+00> : vector<8x32xf32>
    %838 = tpu.matmul %824, %777, %cst_311 {dimension_numbers = #tpu.dot_dimension_numbers<[1], [0], [0], [1], [0, 0, 1, 1], [], []>} : vector<8x32xf32>, vector<32x32xf32>, vector<8x32xf32> -> vector<8x32xf32>
    %839 = vector.broadcast %780 : vector<1x32xf32> to vector<8x32xf32>
    %840 = arith.addf %838, %839 : vector<8x32xf32>
    %cst_312 = arith.constant dense<0.000000e+00> : vector<8x32xf32>
    %841 = tpu.matmul %824, %778, %cst_312 {dimension_numbers = #tpu.dot_dimension_numbers<[1], [0], [0], [1], [0, 0, 1, 1], [], []>} : vector<8x32xf32>, vector<32x32xf32>, vector<8x32xf32> -> vector<8x32xf32>
    %842 = vector.broadcast %781 : vector<1x32xf32> to vector<8x32xf32>
    %843 = arith.addf %841, %842 : vector<8x32xf32>
    %844 = arith.addf %830, %837 : vector<8x32xf32>
    %845 = arith.negf %844 : vector<8x32xf32>
    %846 = math.exp %845 : vector<8x32xf32>
    %cst_313 = arith.constant 1.000000e+00 : f32
    %847 = vector.broadcast %cst_313 : f32 to vector<8x32xf32>
    %848 = arith.addf %847, %846 : vector<8x32xf32>
    %849 = arith.divf %847, %848 : vector<8x32xf32>
    %850 = arith.addf %832, %840 : vector<8x32xf32>
    %851 = arith.negf %850 : vector<8x32xf32>
    %852 = math.exp %851 : vector<8x32xf32>
    %cst_314 = arith.constant 1.000000e+00 : f32
    %853 = vector.broadcast %cst_314 : f32 to vector<8x32xf32>
    %854 = arith.addf %853, %852 : vector<8x32xf32>
    %855 = arith.divf %853, %854 : vector<8x32xf32>
    %856 = arith.mulf %849, %843 : vector<8x32xf32>
    %857 = arith.addf %834, %856 : vector<8x32xf32>
    %858 = math.tanh %857 : vector<8x32xf32>
    %cst_315 = arith.constant 1.000000e+00 : f32
    %859 = vector.broadcast %cst_315 : f32 to vector<8x32xf32>
    %860 = arith.subf %859, %855 : vector<8x32xf32>
    %861 = arith.mulf %860, %858 : vector<8x32xf32>
    %862 = arith.mulf %855, %824 : vector<8x32xf32>
    %863 = arith.addf %861, %862 : vector<8x32xf32>
    %864 = vector.broadcast %c1_i32_305 : i32 to vector<8x1xi32>
    %865 = arith.cmpi slt, %864, %0 : vector<8x1xi32>
    %866 = vector.shape_cast %865 : vector<8x1xi1> to vector<8x1xi1>
    %867 = vector.broadcast %866 : vector<8x1xi1> to vector<8x32xi1>
    %868 = arith.select %867, %863, %824 : vector<8x32xi1>, vector<8x32xf32>
    %869 = arith.index_cast %828 : i32 to index
    %c0_316 = arith.constant 0 : index
    %870 = vector.load %arg62[%869, %c0_316] : memref<64x32xf32, #tpu.memory_space<vmem>>, vector<8x32xf32>
    tpu.vector_store %arg62[%869, %c0_316], %868 {strides = array<i32>} : memref<64x32xf32, #tpu.memory_space<vmem>>, vector<8x32xf32>,
    %c2_i32_317 = arith.constant 2 : i32
    %c8_i32_318 = arith.constant 8 : i32
    %871 = arith.muli %c2_i32_317, %c8_i32_318 : i32
    %872 = tpu.assume_multiple %871, 8 : i32
    %873 = arith.index_cast %872 : i32 to index
    %c0_319 = arith.constant 0 : index
    %874 = vector.load %arg59[%873, %c0_319] : memref<64x32xf32, #tpu.memory_space<vmem>>, vector<8x32xf32>
    %875 = arith.index_cast %872 : i32 to index
    %c0_320 = arith.constant 0 : index
    %876 = vector.load %arg60[%875, %c0_320] : memref<64x32xf32, #tpu.memory_space<vmem>>, vector<8x32xf32>
    %877 = arith.index_cast %872 : i32 to index
    %c0_321 = arith.constant 0 : index
    %878 = vector.load %arg61[%877, %c0_321] : memref<64x32xf32, #tpu.memory_space<vmem>>, vector<8x32xf32>
    %cst_322 = arith.constant dense<0.000000e+00> : vector<8x32xf32>
    %879 = tpu.matmul %868, %776, %cst_322 {dimension_numbers = #tpu.dot_dimension_numbers<[1], [0], [0], [1], [0, 0, 1, 1], [], []>} : vector<8x32xf32>, vector<32x32xf32>, vector<8x32xf32> -> vector<8x32xf32>
    %880 = vector.broadcast %779 : vector<1x32xf32> to vector<8x32xf32>
    %881 = arith.addf %879, %880 : vector<8x32xf32>
    %cst_323 = arith.constant dense<0.000000e+00> : vector<8x32xf32>
    %882 = tpu.matmul %868, %777, %cst_323 {dimension_numbers = #tpu.dot_dimension_numbers<[1], [0], [0], [1], [0, 0, 1, 1], [], []>} : vector<8x32xf32>, vector<32x32xf32>, vector<8x32xf32> -> vector<8x32xf32>
    %883 = vector.broadcast %780 : vector<1x32xf32> to vector<8x32xf32>
    %884 = arith.addf %882, %883 : vector<8x32xf32>
    %cst_324 = arith.constant dense<0.000000e+00> : vector<8x32xf32>
    %885 = tpu.matmul %868, %778, %cst_324 {dimension_numbers = #tpu.dot_dimension_numbers<[1], [0], [0], [1], [0, 0, 1, 1], [], []>} : vector<8x32xf32>, vector<32x32xf32>, vector<8x32xf32> -> vector<8x32xf32>
    %886 = vector.broadcast %781 : vector<1x32xf32> to vector<8x32xf32>
    %887 = arith.addf %885, %886 : vector<8x32xf32>
    %888 = arith.addf %874, %881 : vector<8x32xf32>
    %889 = arith.negf %888 : vector<8x32xf32>
    %890 = math.exp %889 : vector<8x32xf32>
    %cst_325 = arith.constant 1.000000e+00 : f32
    %891 = vector.broadcast %cst_325 : f32 to vector<8x32xf32>
    %892 = arith.addf %891, %890 : vector<8x32xf32>
    %893 = arith.divf %891, %892 : vector<8x32xf32>
    %894 = arith.addf %876, %884 : vector<8x32xf32>
    %895 = arith.negf %894 : vector<8x32xf32>
    %896 = math.exp %895 : vector<8x32xf32>
    %cst_326 = arith.constant 1.000000e+00 : f32
    %897 = vector.broadcast %cst_326 : f32 to vector<8x32xf32>
    %898 = arith.addf %897, %896 : vector<8x32xf32>
    %899 = arith.divf %897, %898 : vector<8x32xf32>
    %900 = arith.mulf %893, %887 : vector<8x32xf32>
    %901 = arith.addf %878, %900 : vector<8x32xf32>
    %902 = math.tanh %901 : vector<8x32xf32>
    %cst_327 = arith.constant 1.000000e+00 : f32
    %903 = vector.broadcast %cst_327 : f32 to vector<8x32xf32>
    %904 = arith.subf %903, %899 : vector<8x32xf32>
    %905 = arith.mulf %904, %902 : vector<8x32xf32>
    %906 = arith.mulf %899, %868 : vector<8x32xf32>
    %907 = arith.addf %905, %906 : vector<8x32xf32>
    %908 = vector.broadcast %c2_i32_317 : i32 to vector<8x1xi32>
    %909 = arith.cmpi slt, %908, %0 : vector<8x1xi32>
    %910 = vector.shape_cast %909 : vector<8x1xi1> to vector<8x1xi1>
    %911 = vector.broadcast %910 : vector<8x1xi1> to vector<8x32xi1>
    %912 = arith.select %911, %907, %868 : vector<8x32xi1>, vector<8x32xf32>
    %913 = arith.index_cast %872 : i32 to index
    %c0_328 = arith.constant 0 : index
    %914 = vector.load %arg62[%913, %c0_328] : memref<64x32xf32, #tpu.memory_space<vmem>>, vector<8x32xf32>
    tpu.vector_store %arg62[%913, %c0_328], %912 {strides = array<i32>} : memref<64x32xf32, #tpu.memory_space<vmem>>, vector<8x32xf32>,
    %c3_i32_329 = arith.constant 3 : i32
    %c8_i32_330 = arith.constant 8 : i32
    %915 = arith.muli %c3_i32_329, %c8_i32_330 : i32
    %916 = tpu.assume_multiple %915, 8 : i32
    %917 = arith.index_cast %916 : i32 to index
    %c0_331 = arith.constant 0 : index
    %918 = vector.load %arg59[%917, %c0_331] : memref<64x32xf32, #tpu.memory_space<vmem>>, vector<8x32xf32>
    %919 = arith.index_cast %916 : i32 to index
    %c0_332 = arith.constant 0 : index
    %920 = vector.load %arg60[%919, %c0_332] : memref<64x32xf32, #tpu.memory_space<vmem>>, vector<8x32xf32>
    %921 = arith.index_cast %916 : i32 to index
    %c0_333 = arith.constant 0 : index
    %922 = vector.load %arg61[%921, %c0_333] : memref<64x32xf32, #tpu.memory_space<vmem>>, vector<8x32xf32>
    %cst_334 = arith.constant dense<0.000000e+00> : vector<8x32xf32>
    %923 = tpu.matmul %912, %776, %cst_334 {dimension_numbers = #tpu.dot_dimension_numbers<[1], [0], [0], [1], [0, 0, 1, 1], [], []>} : vector<8x32xf32>, vector<32x32xf32>, vector<8x32xf32> -> vector<8x32xf32>
    %924 = vector.broadcast %779 : vector<1x32xf32> to vector<8x32xf32>
    %925 = arith.addf %923, %924 : vector<8x32xf32>
    %cst_335 = arith.constant dense<0.000000e+00> : vector<8x32xf32>
    %926 = tpu.matmul %912, %777, %cst_335 {dimension_numbers = #tpu.dot_dimension_numbers<[1], [0], [0], [1], [0, 0, 1, 1], [], []>} : vector<8x32xf32>, vector<32x32xf32>, vector<8x32xf32> -> vector<8x32xf32>
    %927 = vector.broadcast %780 : vector<1x32xf32> to vector<8x32xf32>
    %928 = arith.addf %926, %927 : vector<8x32xf32>
    %cst_336 = arith.constant dense<0.000000e+00> : vector<8x32xf32>
    %929 = tpu.matmul %912, %778, %cst_336 {dimension_numbers = #tpu.dot_dimension_numbers<[1], [0], [0], [1], [0, 0, 1, 1], [], []>} : vector<8x32xf32>, vector<32x32xf32>, vector<8x32xf32> -> vector<8x32xf32>
    %930 = vector.broadcast %781 : vector<1x32xf32> to vector<8x32xf32>
    %931 = arith.addf %929, %930 : vector<8x32xf32>
    %932 = arith.addf %918, %925 : vector<8x32xf32>
    %933 = arith.negf %932 : vector<8x32xf32>
    %934 = math.exp %933 : vector<8x32xf32>
    %cst_337 = arith.constant 1.000000e+00 : f32
    %935 = vector.broadcast %cst_337 : f32 to vector<8x32xf32>
    %936 = arith.addf %935, %934 : vector<8x32xf32>
    %937 = arith.divf %935, %936 : vector<8x32xf32>
    %938 = arith.addf %920, %928 : vector<8x32xf32>
    %939 = arith.negf %938 : vector<8x32xf32>
    %940 = math.exp %939 : vector<8x32xf32>
    %cst_338 = arith.constant 1.000000e+00 : f32
    %941 = vector.broadcast %cst_338 : f32 to vector<8x32xf32>
    %942 = arith.addf %941, %940 : vector<8x32xf32>
    %943 = arith.divf %941, %942 : vector<8x32xf32>
    %944 = arith.mulf %937, %931 : vector<8x32xf32>
    %945 = arith.addf %922, %944 : vector<8x32xf32>
    %946 = math.tanh %945 : vector<8x32xf32>
    %cst_339 = arith.constant 1.000000e+00 : f32
    %947 = vector.broadcast %cst_339 : f32 to vector<8x32xf32>
    %948 = arith.subf %947, %943 : vector<8x32xf32>
    %949 = arith.mulf %948, %946 : vector<8x32xf32>
    %950 = arith.mulf %943, %912 : vector<8x32xf32>
    %951 = arith.addf %949, %950 : vector<8x32xf32>
    %952 = vector.broadcast %c3_i32_329 : i32 to vector<8x1xi32>
    %953 = arith.cmpi slt, %952, %0 : vector<8x1xi32>
    %954 = vector.shape_cast %953 : vector<8x1xi1> to vector<8x1xi1>
    %955 = vector.broadcast %954 : vector<8x1xi1> to vector<8x32xi1>
    %956 = arith.select %955, %951, %912 : vector<8x32xi1>, vector<8x32xf32>
    %957 = arith.index_cast %916 : i32 to index
    %c0_340 = arith.constant 0 : index
    %958 = vector.load %arg62[%957, %c0_340] : memref<64x32xf32, #tpu.memory_space<vmem>>, vector<8x32xf32>
    tpu.vector_store %arg62[%957, %c0_340], %956 {strides = array<i32>} : memref<64x32xf32, #tpu.memory_space<vmem>>, vector<8x32xf32>,
    %c4_i32_341 = arith.constant 4 : i32
    %c8_i32_342 = arith.constant 8 : i32
    %959 = arith.muli %c4_i32_341, %c8_i32_342 : i32
    %960 = tpu.assume_multiple %959, 8 : i32
    %961 = arith.index_cast %960 : i32 to index
    %c0_343 = arith.constant 0 : index
    %962 = vector.load %arg59[%961, %c0_343] : memref<64x32xf32, #tpu.memory_space<vmem>>, vector<8x32xf32>
    %963 = arith.index_cast %960 : i32 to index
    %c0_344 = arith.constant 0 : index
    %964 = vector.load %arg60[%963, %c0_344] : memref<64x32xf32, #tpu.memory_space<vmem>>, vector<8x32xf32>
    %965 = arith.index_cast %960 : i32 to index
    %c0_345 = arith.constant 0 : index
    %966 = vector.load %arg61[%965, %c0_345] : memref<64x32xf32, #tpu.memory_space<vmem>>, vector<8x32xf32>
    %cst_346 = arith.constant dense<0.000000e+00> : vector<8x32xf32>
    %967 = tpu.matmul %956, %776, %cst_346 {dimension_numbers = #tpu.dot_dimension_numbers<[1], [0], [0], [1], [0, 0, 1, 1], [], []>} : vector<8x32xf32>, vector<32x32xf32>, vector<8x32xf32> -> vector<8x32xf32>
    %968 = vector.broadcast %779 : vector<1x32xf32> to vector<8x32xf32>
    %969 = arith.addf %967, %968 : vector<8x32xf32>
    %cst_347 = arith.constant dense<0.000000e+00> : vector<8x32xf32>
    %970 = tpu.matmul %956, %777, %cst_347 {dimension_numbers = #tpu.dot_dimension_numbers<[1], [0], [0], [1], [0, 0, 1, 1], [], []>} : vector<8x32xf32>, vector<32x32xf32>, vector<8x32xf32> -> vector<8x32xf32>
    %971 = vector.broadcast %780 : vector<1x32xf32> to vector<8x32xf32>
    %972 = arith.addf %970, %971 : vector<8x32xf32>
    %cst_348 = arith.constant dense<0.000000e+00> : vector<8x32xf32>
    %973 = tpu.matmul %956, %778, %cst_348 {dimension_numbers = #tpu.dot_dimension_numbers<[1], [0], [0], [1], [0, 0, 1, 1], [], []>} : vector<8x32xf32>, vector<32x32xf32>, vector<8x32xf32> -> vector<8x32xf32>
    %974 = vector.broadcast %781 : vector<1x32xf32> to vector<8x32xf32>
    %975 = arith.addf %973, %974 : vector<8x32xf32>
    %976 = arith.addf %962, %969 : vector<8x32xf32>
    %977 = arith.negf %976 : vector<8x32xf32>
    %978 = math.exp %977 : vector<8x32xf32>
    %cst_349 = arith.constant 1.000000e+00 : f32
    %979 = vector.broadcast %cst_349 : f32 to vector<8x32xf32>
    %980 = arith.addf %979, %978 : vector<8x32xf32>
    %981 = arith.divf %979, %980 : vector<8x32xf32>
    %982 = arith.addf %964, %972 : vector<8x32xf32>
    %983 = arith.negf %982 : vector<8x32xf32>
    %984 = math.exp %983 : vector<8x32xf32>
    %cst_350 = arith.constant 1.000000e+00 : f32
    %985 = vector.broadcast %cst_350 : f32 to vector<8x32xf32>
    %986 = arith.addf %985, %984 : vector<8x32xf32>
    %987 = arith.divf %985, %986 : vector<8x32xf32>
    %988 = arith.mulf %981, %975 : vector<8x32xf32>
    %989 = arith.addf %966, %988 : vector<8x32xf32>
    %990 = math.tanh %989 : vector<8x32xf32>
    %cst_351 = arith.constant 1.000000e+00 : f32
    %991 = vector.broadcast %cst_351 : f32 to vector<8x32xf32>
    %992 = arith.subf %991, %987 : vector<8x32xf32>
    %993 = arith.mulf %992, %990 : vector<8x32xf32>
    %994 = arith.mulf %987, %956 : vector<8x32xf32>
    %995 = arith.addf %993, %994 : vector<8x32xf32>
    %996 = vector.broadcast %c4_i32_341 : i32 to vector<8x1xi32>
    %997 = arith.cmpi slt, %996, %0 : vector<8x1xi32>
    %998 = vector.shape_cast %997 : vector<8x1xi1> to vector<8x1xi1>
    %999 = vector.broadcast %998 : vector<8x1xi1> to vector<8x32xi1>
    %1000 = arith.select %999, %995, %956 : vector<8x32xi1>, vector<8x32xf32>
    %1001 = arith.index_cast %960 : i32 to index
    %c0_352 = arith.constant 0 : index
    %1002 = vector.load %arg62[%1001, %c0_352] : memref<64x32xf32, #tpu.memory_space<vmem>>, vector<8x32xf32>
    tpu.vector_store %arg62[%1001, %c0_352], %1000 {strides = array<i32>} : memref<64x32xf32, #tpu.memory_space<vmem>>, vector<8x32xf32>,
    %c5_i32_353 = arith.constant 5 : i32
    %c8_i32_354 = arith.constant 8 : i32
    %1003 = arith.muli %c5_i32_353, %c8_i32_354 : i32
    %1004 = tpu.assume_multiple %1003, 8 : i32
    %1005 = arith.index_cast %1004 : i32 to index
    %c0_355 = arith.constant 0 : index
    %1006 = vector.load %arg59[%1005, %c0_355] : memref<64x32xf32, #tpu.memory_space<vmem>>, vector<8x32xf32>
    %1007 = arith.index_cast %1004 : i32 to index
    %c0_356 = arith.constant 0 : index
    %1008 = vector.load %arg60[%1007, %c0_356] : memref<64x32xf32, #tpu.memory_space<vmem>>, vector<8x32xf32>
    %1009 = arith.index_cast %1004 : i32 to index
    %c0_357 = arith.constant 0 : index
    %1010 = vector.load %arg61[%1009, %c0_357] : memref<64x32xf32, #tpu.memory_space<vmem>>, vector<8x32xf32>
    %cst_358 = arith.constant dense<0.000000e+00> : vector<8x32xf32>
    %1011 = tpu.matmul %1000, %776, %cst_358 {dimension_numbers = #tpu.dot_dimension_numbers<[1], [0], [0], [1], [0, 0, 1, 1], [], []>} : vector<8x32xf32>, vector<32x32xf32>, vector<8x32xf32> -> vector<8x32xf32>
    %1012 = vector.broadcast %779 : vector<1x32xf32> to vector<8x32xf32>
    %1013 = arith.addf %1011, %1012 : vector<8x32xf32>
    %cst_359 = arith.constant dense<0.000000e+00> : vector<8x32xf32>
    %1014 = tpu.matmul %1000, %777, %cst_359 {dimension_numbers = #tpu.dot_dimension_numbers<[1], [0], [0], [1], [0, 0, 1, 1], [], []>} : vector<8x32xf32>, vector<32x32xf32>, vector<8x32xf32> -> vector<8x32xf32>
    %1015 = vector.broadcast %780 : vector<1x32xf32> to vector<8x32xf32>
    %1016 = arith.addf %1014, %1015 : vector<8x32xf32>
    %cst_360 = arith.constant dense<0.000000e+00> : vector<8x32xf32>
    %1017 = tpu.matmul %1000, %778, %cst_360 {dimension_numbers = #tpu.dot_dimension_numbers<[1], [0], [0], [1], [0, 0, 1, 1], [], []>} : vector<8x32xf32>, vector<32x32xf32>, vector<8x32xf32> -> vector<8x32xf32>
    %1018 = vector.broadcast %781 : vector<1x32xf32> to vector<8x32xf32>
    %1019 = arith.addf %1017, %1018 : vector<8x32xf32>
    %1020 = arith.addf %1006, %1013 : vector<8x32xf32>
    %1021 = arith.negf %1020 : vector<8x32xf32>
    %1022 = math.exp %1021 : vector<8x32xf32>
    %cst_361 = arith.constant 1.000000e+00 : f32
    %1023 = vector.broadcast %cst_361 : f32 to vector<8x32xf32>
    %1024 = arith.addf %1023, %1022 : vector<8x32xf32>
    %1025 = arith.divf %1023, %1024 : vector<8x32xf32>
    %1026 = arith.addf %1008, %1016 : vector<8x32xf32>
    %1027 = arith.negf %1026 : vector<8x32xf32>
    %1028 = math.exp %1027 : vector<8x32xf32>
    %cst_362 = arith.constant 1.000000e+00 : f32
    %1029 = vector.broadcast %cst_362 : f32 to vector<8x32xf32>
    %1030 = arith.addf %1029, %1028 : vector<8x32xf32>
    %1031 = arith.divf %1029, %1030 : vector<8x32xf32>
    %1032 = arith.mulf %1025, %1019 : vector<8x32xf32>
    %1033 = arith.addf %1010, %1032 : vector<8x32xf32>
    %1034 = math.tanh %1033 : vector<8x32xf32>
    %cst_363 = arith.constant 1.000000e+00 : f32
    %1035 = vector.broadcast %cst_363 : f32 to vector<8x32xf32>
    %1036 = arith.subf %1035, %1031 : vector<8x32xf32>
    %1037 = arith.mulf %1036, %1034 : vector<8x32xf32>
    %1038 = arith.mulf %1031, %1000 : vector<8x32xf32>
    %1039 = arith.addf %1037, %1038 : vector<8x32xf32>
    %1040 = vector.broadcast %c5_i32_353 : i32 to vector<8x1xi32>
    %1041 = arith.cmpi slt, %1040, %0 : vector<8x1xi32>
    %1042 = vector.shape_cast %1041 : vector<8x1xi1> to vector<8x1xi1>
    %1043 = vector.broadcast %1042 : vector<8x1xi1> to vector<8x32xi1>
    %1044 = arith.select %1043, %1039, %1000 : vector<8x32xi1>, vector<8x32xf32>
    %1045 = arith.index_cast %1004 : i32 to index
    %c0_364 = arith.constant 0 : index
    %1046 = vector.load %arg62[%1045, %c0_364] : memref<64x32xf32, #tpu.memory_space<vmem>>, vector<8x32xf32>
    tpu.vector_store %arg62[%1045, %c0_364], %1044 {strides = array<i32>} : memref<64x32xf32, #tpu.memory_space<vmem>>, vector<8x32xf32>,
    %c6_i32_365 = arith.constant 6 : i32
    %c8_i32_366 = arith.constant 8 : i32
    %1047 = arith.muli %c6_i32_365, %c8_i32_366 : i32
    %1048 = tpu.assume_multiple %1047, 8 : i32
    %1049 = arith.index_cast %1048 : i32 to index
    %c0_367 = arith.constant 0 : index
    %1050 = vector.load %arg59[%1049, %c0_367] : memref<64x32xf32, #tpu.memory_space<vmem>>, vector<8x32xf32>
    %1051 = arith.index_cast %1048 : i32 to index
    %c0_368 = arith.constant 0 : index
    %1052 = vector.load %arg60[%1051, %c0_368] : memref<64x32xf32, #tpu.memory_space<vmem>>, vector<8x32xf32>
    %1053 = arith.index_cast %1048 : i32 to index
    %c0_369 = arith.constant 0 : index
    %1054 = vector.load %arg61[%1053, %c0_369] : memref<64x32xf32, #tpu.memory_space<vmem>>, vector<8x32xf32>
    %cst_370 = arith.constant dense<0.000000e+00> : vector<8x32xf32>
    %1055 = tpu.matmul %1044, %776, %cst_370 {dimension_numbers = #tpu.dot_dimension_numbers<[1], [0], [0], [1], [0, 0, 1, 1], [], []>} : vector<8x32xf32>, vector<32x32xf32>, vector<8x32xf32> -> vector<8x32xf32>
    %1056 = vector.broadcast %779 : vector<1x32xf32> to vector<8x32xf32>
    %1057 = arith.addf %1055, %1056 : vector<8x32xf32>
    %cst_371 = arith.constant dense<0.000000e+00> : vector<8x32xf32>
    %1058 = tpu.matmul %1044, %777, %cst_371 {dimension_numbers = #tpu.dot_dimension_numbers<[1], [0], [0], [1], [0, 0, 1, 1], [], []>} : vector<8x32xf32>, vector<32x32xf32>, vector<8x32xf32> -> vector<8x32xf32>
    %1059 = vector.broadcast %780 : vector<1x32xf32> to vector<8x32xf32>
    %1060 = arith.addf %1058, %1059 : vector<8x32xf32>
    %cst_372 = arith.constant dense<0.000000e+00> : vector<8x32xf32>
    %1061 = tpu.matmul %1044, %778, %cst_372 {dimension_numbers = #tpu.dot_dimension_numbers<[1], [0], [0], [1], [0, 0, 1, 1], [], []>} : vector<8x32xf32>, vector<32x32xf32>, vector<8x32xf32> -> vector<8x32xf32>
    %1062 = vector.broadcast %781 : vector<1x32xf32> to vector<8x32xf32>
    %1063 = arith.addf %1061, %1062 : vector<8x32xf32>
    %1064 = arith.addf %1050, %1057 : vector<8x32xf32>
    %1065 = arith.negf %1064 : vector<8x32xf32>
    %1066 = math.exp %1065 : vector<8x32xf32>
    %cst_373 = arith.constant 1.000000e+00 : f32
    %1067 = vector.broadcast %cst_373 : f32 to vector<8x32xf32>
    %1068 = arith.addf %1067, %1066 : vector<8x32xf32>
    %1069 = arith.divf %1067, %1068 : vector<8x32xf32>
    %1070 = arith.addf %1052, %1060 : vector<8x32xf32>
    %1071 = arith.negf %1070 : vector<8x32xf32>
    %1072 = math.exp %1071 : vector<8x32xf32>
    %cst_374 = arith.constant 1.000000e+00 : f32
    %1073 = vector.broadcast %cst_374 : f32 to vector<8x32xf32>
    %1074 = arith.addf %1073, %1072 : vector<8x32xf32>
    %1075 = arith.divf %1073, %1074 : vector<8x32xf32>
    %1076 = arith.mulf %1069, %1063 : vector<8x32xf32>
    %1077 = arith.addf %1054, %1076 : vector<8x32xf32>
    %1078 = math.tanh %1077 : vector<8x32xf32>
    %cst_375 = arith.constant 1.000000e+00 : f32
    %1079 = vector.broadcast %cst_375 : f32 to vector<8x32xf32>
    %1080 = arith.subf %1079, %1075 : vector<8x32xf32>
    %1081 = arith.mulf %1080, %1078 : vector<8x32xf32>
    %1082 = arith.mulf %1075, %1044 : vector<8x32xf32>
    %1083 = arith.addf %1081, %1082 : vector<8x32xf32>
    %1084 = vector.broadcast %c6_i32_365 : i32 to vector<8x1xi32>
    %1085 = arith.cmpi slt, %1084, %0 : vector<8x1xi32>
    %1086 = vector.shape_cast %1085 : vector<8x1xi1> to vector<8x1xi1>
    %1087 = vector.broadcast %1086 : vector<8x1xi1> to vector<8x32xi1>
    %1088 = arith.select %1087, %1083, %1044 : vector<8x32xi1>, vector<8x32xf32>
    %1089 = arith.index_cast %1048 : i32 to index
    %c0_376 = arith.constant 0 : index
    %1090 = vector.load %arg62[%1089, %c0_376] : memref<64x32xf32, #tpu.memory_space<vmem>>, vector<8x32xf32>
    tpu.vector_store %arg62[%1089, %c0_376], %1088 {strides = array<i32>} : memref<64x32xf32, #tpu.memory_space<vmem>>, vector<8x32xf32>,
    %c7_i32_377 = arith.constant 7 : i32
    %c8_i32_378 = arith.constant 8 : i32
    %1091 = arith.muli %c7_i32_377, %c8_i32_378 : i32
    %1092 = tpu.assume_multiple %1091, 8 : i32
    %1093 = arith.index_cast %1092 : i32 to index
    %c0_379 = arith.constant 0 : index
    %1094 = vector.load %arg59[%1093, %c0_379] : memref<64x32xf32, #tpu.memory_space<vmem>>, vector<8x32xf32>
    %1095 = arith.index_cast %1092 : i32 to index
    %c0_380 = arith.constant 0 : index
    %1096 = vector.load %arg60[%1095, %c0_380] : memref<64x32xf32, #tpu.memory_space<vmem>>, vector<8x32xf32>
    %1097 = arith.index_cast %1092 : i32 to index
    %c0_381 = arith.constant 0 : index
    %1098 = vector.load %arg61[%1097, %c0_381] : memref<64x32xf32, #tpu.memory_space<vmem>>, vector<8x32xf32>
    %cst_382 = arith.constant dense<0.000000e+00> : vector<8x32xf32>
    %1099 = tpu.matmul %1088, %776, %cst_382 {dimension_numbers = #tpu.dot_dimension_numbers<[1], [0], [0], [1], [0, 0, 1, 1], [], []>} : vector<8x32xf32>, vector<32x32xf32>, vector<8x32xf32> -> vector<8x32xf32>
    %1100 = vector.broadcast %779 : vector<1x32xf32> to vector<8x32xf32>
    %1101 = arith.addf %1099, %1100 : vector<8x32xf32>
    %cst_383 = arith.constant dense<0.000000e+00> : vector<8x32xf32>
    %1102 = tpu.matmul %1088, %777, %cst_383 {dimension_numbers = #tpu.dot_dimension_numbers<[1], [0], [0], [1], [0, 0, 1, 1], [], []>} : vector<8x32xf32>, vector<32x32xf32>, vector<8x32xf32> -> vector<8x32xf32>
    %1103 = vector.broadcast %780 : vector<1x32xf32> to vector<8x32xf32>
    %1104 = arith.addf %1102, %1103 : vector<8x32xf32>
    %cst_384 = arith.constant dense<0.000000e+00> : vector<8x32xf32>
    %1105 = tpu.matmul %1088, %778, %cst_384 {dimension_numbers = #tpu.dot_dimension_numbers<[1], [0], [0], [1], [0, 0, 1, 1], [], []>} : vector<8x32xf32>, vector<32x32xf32>, vector<8x32xf32> -> vector<8x32xf32>
    %1106 = vector.broadcast %781 : vector<1x32xf32> to vector<8x32xf32>
    %1107 = arith.addf %1105, %1106 : vector<8x32xf32>
    %1108 = arith.addf %1094, %1101 : vector<8x32xf32>
    %1109 = arith.negf %1108 : vector<8x32xf32>
    %1110 = math.exp %1109 : vector<8x32xf32>
    %cst_385 = arith.constant 1.000000e+00 : f32
    %1111 = vector.broadcast %cst_385 : f32 to vector<8x32xf32>
    %1112 = arith.addf %1111, %1110 : vector<8x32xf32>
    %1113 = arith.divf %1111, %1112 : vector<8x32xf32>
    %1114 = arith.addf %1096, %1104 : vector<8x32xf32>
    %1115 = arith.negf %1114 : vector<8x32xf32>
    %1116 = math.exp %1115 : vector<8x32xf32>
    %cst_386 = arith.constant 1.000000e+00 : f32
    %1117 = vector.broadcast %cst_386 : f32 to vector<8x32xf32>
    %1118 = arith.addf %1117, %1116 : vector<8x32xf32>
    %1119 = arith.divf %1117, %1118 : vector<8x32xf32>
    %1120 = arith.mulf %1113, %1107 : vector<8x32xf32>
    %1121 = arith.addf %1098, %1120 : vector<8x32xf32>
    %1122 = math.tanh %1121 : vector<8x32xf32>
    %cst_387 = arith.constant 1.000000e+00 : f32
    %1123 = vector.broadcast %cst_387 : f32 to vector<8x32xf32>
    %1124 = arith.subf %1123, %1119 : vector<8x32xf32>
    %1125 = arith.mulf %1124, %1122 : vector<8x32xf32>
    %1126 = arith.mulf %1119, %1088 : vector<8x32xf32>
    %1127 = arith.addf %1125, %1126 : vector<8x32xf32>
    %1128 = vector.broadcast %c7_i32_377 : i32 to vector<8x1xi32>
    %1129 = arith.cmpi slt, %1128, %0 : vector<8x1xi32>
    %1130 = vector.shape_cast %1129 : vector<8x1xi1> to vector<8x1xi1>
    %1131 = vector.broadcast %1130 : vector<8x1xi1> to vector<8x32xi1>
    %1132 = arith.select %1131, %1127, %1088 : vector<8x32xi1>, vector<8x32xf32>
    %1133 = arith.index_cast %1092 : i32 to index
    %c0_388 = arith.constant 0 : index
    %1134 = vector.load %arg62[%1133, %c0_388] : memref<64x32xf32, #tpu.memory_space<vmem>>, vector<8x32xf32>
    tpu.vector_store %arg62[%1133, %c0_388], %1132 {strides = array<i32>} : memref<64x32xf32, #tpu.memory_space<vmem>>, vector<8x32xf32>,
    %c8_i32_389 = arith.constant 8 : i32
    %c0_390 = arith.constant 0 : index
    %c0_391 = arith.constant 0 : index
    %1135 = vector.load %arg62[%c0_390, %c0_391] : memref<64x32xf32, #tpu.memory_space<vmem>>, vector<64x32xf32>
    %c0_392 = arith.constant 0 : index
    %c0_393 = arith.constant 0 : index
    %1136 = vector.load %arg38[%c0_392, %c0_393] : memref<32x32xf32, #tpu.memory_space<vmem>>, vector<32x32xf32>
    %cst_394 = arith.constant dense<0.000000e+00> : vector<64x32xf32>
    %1137 = tpu.matmul %1135, %1136, %cst_394 {dimension_numbers = #tpu.dot_dimension_numbers<[1], [0], [0], [1], [0, 0, 1, 1], [], []>} : vector<64x32xf32>, vector<32x32xf32>, vector<64x32xf32> -> vector<64x32xf32>
    %c0_395 = arith.constant 0 : index
    %c0_396 = arith.constant 0 : index
    %1138 = vector.load %arg44[%c0_395, %c0_396] : memref<1x32xf32, #tpu.memory_space<vmem>>, vector<1x32xf32>
    %1139 = vector.broadcast %1138 : vector<1x32xf32> to vector<64x32xf32>
    %1140 = arith.addf %1137, %1139 : vector<64x32xf32>
    %c0_397 = arith.constant 0 : index
    %c0_398 = arith.constant 0 : index
    %1141 = vector.load %arg59[%c0_397, %c0_398] : memref<64x32xf32, #tpu.memory_space<vmem>>, vector<64x32xf32>
    tpu.vector_store %arg59[%c0_397, %c0_398], %1140 {strides = array<i32>} : memref<64x32xf32, #tpu.memory_space<vmem>>, vector<64x32xf32>,
    %c0_399 = arith.constant 0 : index
    %c0_400 = arith.constant 0 : index
    %1142 = vector.load %arg39[%c0_399, %c0_400] : memref<32x32xf32, #tpu.memory_space<vmem>>, vector<32x32xf32>
    %cst_401 = arith.constant dense<0.000000e+00> : vector<64x32xf32>
    %1143 = tpu.matmul %1135, %1142, %cst_401 {dimension_numbers = #tpu.dot_dimension_numbers<[1], [0], [0], [1], [0, 0, 1, 1], [], []>} : vector<64x32xf32>, vector<32x32xf32>, vector<64x32xf32> -> vector<64x32xf32>
    %c0_402 = arith.constant 0 : index
    %c0_403 = arith.constant 0 : index
    %1144 = vector.load %arg45[%c0_402, %c0_403] : memref<1x32xf32, #tpu.memory_space<vmem>>, vector<1x32xf32>
    %1145 = vector.broadcast %1144 : vector<1x32xf32> to vector<64x32xf32>
    %1146 = arith.addf %1143, %1145 : vector<64x32xf32>
    %c0_404 = arith.constant 0 : index
    %c0_405 = arith.constant 0 : index
    %1147 = vector.load %arg60[%c0_404, %c0_405] : memref<64x32xf32, #tpu.memory_space<vmem>>, vector<64x32xf32>
    tpu.vector_store %arg60[%c0_404, %c0_405], %1146 {strides = array<i32>} : memref<64x32xf32, #tpu.memory_space<vmem>>, vector<64x32xf32>,
    %c0_406 = arith.constant 0 : index
    %c0_407 = arith.constant 0 : index
    %1148 = vector.load %arg40[%c0_406, %c0_407] : memref<32x32xf32, #tpu.memory_space<vmem>>, vector<32x32xf32>
    %cst_408 = arith.constant dense<0.000000e+00> : vector<64x32xf32>
    %1149 = tpu.matmul %1135, %1148, %cst_408 {dimension_numbers = #tpu.dot_dimension_numbers<[1], [0], [0], [1], [0, 0, 1, 1], [], []>} : vector<64x32xf32>, vector<32x32xf32>, vector<64x32xf32> -> vector<64x32xf32>
    %c0_409 = arith.constant 0 : index
    %c0_410 = arith.constant 0 : index
    %1150 = vector.load %arg46[%c0_409, %c0_410] : memref<1x32xf32, #tpu.memory_space<vmem>>, vector<1x32xf32>
    %1151 = vector.broadcast %1150 : vector<1x32xf32> to vector<64x32xf32>
    %1152 = arith.addf %1149, %1151 : vector<64x32xf32>
    %c0_411 = arith.constant 0 : index
    %c0_412 = arith.constant 0 : index
    %1153 = vector.load %arg61[%c0_411, %c0_412] : memref<64x32xf32, #tpu.memory_space<vmem>>, vector<64x32xf32>
    tpu.vector_store %arg61[%c0_411, %c0_412], %1152 {strides = array<i32>} : memref<64x32xf32, #tpu.memory_space<vmem>>, vector<64x32xf32>,
    %c0_413 = arith.constant 0 : index
    %c0_414 = arith.constant 0 : index
    %1154 = vector.load %arg41[%c0_413, %c0_414] : memref<32x32xf32, #tpu.memory_space<vmem>>, vector<32x32xf32>
    %c0_415 = arith.constant 0 : index
    %c0_416 = arith.constant 0 : index
    %1155 = vector.load %arg42[%c0_415, %c0_416] : memref<32x32xf32, #tpu.memory_space<vmem>>, vector<32x32xf32>
    %c0_417 = arith.constant 0 : index
    %c0_418 = arith.constant 0 : index
    %1156 = vector.load %arg43[%c0_417, %c0_418] : memref<32x32xf32, #tpu.memory_space<vmem>>, vector<32x32xf32>
    %c0_419 = arith.constant 0 : index
    %c0_420 = arith.constant 0 : index
    %1157 = vector.load %arg47[%c0_419, %c0_420] : memref<1x32xf32, #tpu.memory_space<vmem>>, vector<1x32xf32>
    %c0_421 = arith.constant 0 : index
    %c0_422 = arith.constant 0 : index
    %1158 = vector.load %arg48[%c0_421, %c0_422] : memref<1x32xf32, #tpu.memory_space<vmem>>, vector<1x32xf32>
    %c0_423 = arith.constant 0 : index
    %c0_424 = arith.constant 0 : index
    %1159 = vector.load %arg49[%c0_423, %c0_424] : memref<1x32xf32, #tpu.memory_space<vmem>>, vector<1x32xf32>
    %cst_425 = arith.constant 0.000000e+00 : f32
    %1160 = vector.broadcast %cst_425 : f32 to vector<8x32xf32>
    %c0_i32_426 = arith.constant 0 : i32
    %c8_i32_427 = arith.constant 8 : i32
    %1161 = arith.muli %c0_i32_426, %c8_i32_427 : i32
    %1162 = tpu.assume_multiple %1161, 8 : i32
    %1163 = arith.index_cast %1162 : i32 to index
    %c0_428 = arith.constant 0 : index
    %1164 = vector.load %arg59[%1163, %c0_428] : memref<64x32xf32, #tpu.memory_space<vmem>>, vector<8x32xf32>
    %1165 = arith.index_cast %1162 : i32 to index
    %c0_429 = arith.constant 0 : index
    %1166 = vector.load %arg60[%1165, %c0_429] : memref<64x32xf32, #tpu.memory_space<vmem>>, vector<8x32xf32>
    %1167 = arith.index_cast %1162 : i32 to index
    %c0_430 = arith.constant 0 : index
    %1168 = vector.load %arg61[%1167, %c0_430] : memref<64x32xf32, #tpu.memory_space<vmem>>, vector<8x32xf32>
    %cst_431 = arith.constant dense<0.000000e+00> : vector<8x32xf32>
    %1169 = tpu.matmul %1160, %1154, %cst_431 {dimension_numbers = #tpu.dot_dimension_numbers<[1], [0], [0], [1], [0, 0, 1, 1], [], []>} : vector<8x32xf32>, vector<32x32xf32>, vector<8x32xf32> -> vector<8x32xf32>
    %1170 = vector.broadcast %1157 : vector<1x32xf32> to vector<8x32xf32>
    %1171 = arith.addf %1169, %1170 : vector<8x32xf32>
    %cst_432 = arith.constant dense<0.000000e+00> : vector<8x32xf32>
    %1172 = tpu.matmul %1160, %1155, %cst_432 {dimension_numbers = #tpu.dot_dimension_numbers<[1], [0], [0], [1], [0, 0, 1, 1], [], []>} : vector<8x32xf32>, vector<32x32xf32>, vector<8x32xf32> -> vector<8x32xf32>
    %1173 = vector.broadcast %1158 : vector<1x32xf32> to vector<8x32xf32>
    %1174 = arith.addf %1172, %1173 : vector<8x32xf32>
    %cst_433 = arith.constant dense<0.000000e+00> : vector<8x32xf32>
    %1175 = tpu.matmul %1160, %1156, %cst_433 {dimension_numbers = #tpu.dot_dimension_numbers<[1], [0], [0], [1], [0, 0, 1, 1], [], []>} : vector<8x32xf32>, vector<32x32xf32>, vector<8x32xf32> -> vector<8x32xf32>
    %1176 = vector.broadcast %1159 : vector<1x32xf32> to vector<8x32xf32>
    %1177 = arith.addf %1175, %1176 : vector<8x32xf32>
    %1178 = arith.addf %1164, %1171 : vector<8x32xf32>
    %1179 = arith.negf %1178 : vector<8x32xf32>
    %1180 = math.exp %1179 : vector<8x32xf32>
    %cst_434 = arith.constant 1.000000e+00 : f32
    %1181 = vector.broadcast %cst_434 : f32 to vector<8x32xf32>
    %1182 = arith.addf %1181, %1180 : vector<8x32xf32>
    %1183 = arith.divf %1181, %1182 : vector<8x32xf32>
    %1184 = arith.addf %1166, %1174 : vector<8x32xf32>
    %1185 = arith.negf %1184 : vector<8x32xf32>
    %1186 = math.exp %1185 : vector<8x32xf32>
    %cst_435 = arith.constant 1.000000e+00 : f32
    %1187 = vector.broadcast %cst_435 : f32 to vector<8x32xf32>
    %1188 = arith.addf %1187, %1186 : vector<8x32xf32>
    %1189 = arith.divf %1187, %1188 : vector<8x32xf32>
    %1190 = arith.mulf %1183, %1177 : vector<8x32xf32>
    %1191 = arith.addf %1168, %1190 : vector<8x32xf32>
    %1192 = math.tanh %1191 : vector<8x32xf32>
    %cst_436 = arith.constant 1.000000e+00 : f32
    %1193 = vector.broadcast %cst_436 : f32 to vector<8x32xf32>
    %1194 = arith.subf %1193, %1189 : vector<8x32xf32>
    %1195 = arith.mulf %1194, %1192 : vector<8x32xf32>
    %1196 = arith.mulf %1189, %1160 : vector<8x32xf32>
    %1197 = arith.addf %1195, %1196 : vector<8x32xf32>
    %1198 = vector.broadcast %c0_i32_426 : i32 to vector<8x1xi32>
    %1199 = arith.cmpi slt, %1198, %0 : vector<8x1xi32>
    %1200 = vector.shape_cast %1199 : vector<8x1xi1> to vector<8x1xi1>
    %1201 = vector.broadcast %1200 : vector<8x1xi1> to vector<8x32xi1>
    %1202 = arith.select %1201, %1197, %1160 : vector<8x32xi1>, vector<8x32xf32>
    %c1_i32_437 = arith.constant 1 : i32
    %c8_i32_438 = arith.constant 8 : i32
    %1203 = arith.muli %c1_i32_437, %c8_i32_438 : i32
    %1204 = tpu.assume_multiple %1203, 8 : i32
    %1205 = arith.index_cast %1204 : i32 to index
    %c0_439 = arith.constant 0 : index
    %1206 = vector.load %arg59[%1205, %c0_439] : memref<64x32xf32, #tpu.memory_space<vmem>>, vector<8x32xf32>
    %1207 = arith.index_cast %1204 : i32 to index
    %c0_440 = arith.constant 0 : index
    %1208 = vector.load %arg60[%1207, %c0_440] : memref<64x32xf32, #tpu.memory_space<vmem>>, vector<8x32xf32>
    %1209 = arith.index_cast %1204 : i32 to index
    %c0_441 = arith.constant 0 : index
    %1210 = vector.load %arg61[%1209, %c0_441] : memref<64x32xf32, #tpu.memory_space<vmem>>, vector<8x32xf32>
    %cst_442 = arith.constant dense<0.000000e+00> : vector<8x32xf32>
    %1211 = tpu.matmul %1202, %1154, %cst_442 {dimension_numbers = #tpu.dot_dimension_numbers<[1], [0], [0], [1], [0, 0, 1, 1], [], []>} : vector<8x32xf32>, vector<32x32xf32>, vector<8x32xf32> -> vector<8x32xf32>
    %1212 = vector.broadcast %1157 : vector<1x32xf32> to vector<8x32xf32>
    %1213 = arith.addf %1211, %1212 : vector<8x32xf32>
    %cst_443 = arith.constant dense<0.000000e+00> : vector<8x32xf32>
    %1214 = tpu.matmul %1202, %1155, %cst_443 {dimension_numbers = #tpu.dot_dimension_numbers<[1], [0], [0], [1], [0, 0, 1, 1], [], []>} : vector<8x32xf32>, vector<32x32xf32>, vector<8x32xf32> -> vector<8x32xf32>
    %1215 = vector.broadcast %1158 : vector<1x32xf32> to vector<8x32xf32>
    %1216 = arith.addf %1214, %1215 : vector<8x32xf32>
    %cst_444 = arith.constant dense<0.000000e+00> : vector<8x32xf32>
    %1217 = tpu.matmul %1202, %1156, %cst_444 {dimension_numbers = #tpu.dot_dimension_numbers<[1], [0], [0], [1], [0, 0, 1, 1], [], []>} : vector<8x32xf32>, vector<32x32xf32>, vector<8x32xf32> -> vector<8x32xf32>
    %1218 = vector.broadcast %1159 : vector<1x32xf32> to vector<8x32xf32>
    %1219 = arith.addf %1217, %1218 : vector<8x32xf32>
    %1220 = arith.addf %1206, %1213 : vector<8x32xf32>
    %1221 = arith.negf %1220 : vector<8x32xf32>
    %1222 = math.exp %1221 : vector<8x32xf32>
    %cst_445 = arith.constant 1.000000e+00 : f32
    %1223 = vector.broadcast %cst_445 : f32 to vector<8x32xf32>
    %1224 = arith.addf %1223, %1222 : vector<8x32xf32>
    %1225 = arith.divf %1223, %1224 : vector<8x32xf32>
    %1226 = arith.addf %1208, %1216 : vector<8x32xf32>
    %1227 = arith.negf %1226 : vector<8x32xf32>
    %1228 = math.exp %1227 : vector<8x32xf32>
    %cst_446 = arith.constant 1.000000e+00 : f32
    %1229 = vector.broadcast %cst_446 : f32 to vector<8x32xf32>
    %1230 = arith.addf %1229, %1228 : vector<8x32xf32>
    %1231 = arith.divf %1229, %1230 : vector<8x32xf32>
    %1232 = arith.mulf %1225, %1219 : vector<8x32xf32>
    %1233 = arith.addf %1210, %1232 : vector<8x32xf32>
    %1234 = math.tanh %1233 : vector<8x32xf32>
    %cst_447 = arith.constant 1.000000e+00 : f32
    %1235 = vector.broadcast %cst_447 : f32 to vector<8x32xf32>
    %1236 = arith.subf %1235, %1231 : vector<8x32xf32>
    %1237 = arith.mulf %1236, %1234 : vector<8x32xf32>
    %1238 = arith.mulf %1231, %1202 : vector<8x32xf32>
    %1239 = arith.addf %1237, %1238 : vector<8x32xf32>
    %1240 = vector.broadcast %c1_i32_437 : i32 to vector<8x1xi32>
    %1241 = arith.cmpi slt, %1240, %0 : vector<8x1xi32>
    %1242 = vector.shape_cast %1241 : vector<8x1xi1> to vector<8x1xi1>
    %1243 = vector.broadcast %1242 : vector<8x1xi1> to vector<8x32xi1>
    %1244 = arith.select %1243, %1239, %1202 : vector<8x32xi1>, vector<8x32xf32>
    %c2_i32_448 = arith.constant 2 : i32
    %c8_i32_449 = arith.constant 8 : i32
    %1245 = arith.muli %c2_i32_448, %c8_i32_449 : i32
    %1246 = tpu.assume_multiple %1245, 8 : i32
    %1247 = arith.index_cast %1246 : i32 to index
    %c0_450 = arith.constant 0 : index
    %1248 = vector.load %arg59[%1247, %c0_450] : memref<64x32xf32, #tpu.memory_space<vmem>>, vector<8x32xf32>
    %1249 = arith.index_cast %1246 : i32 to index
    %c0_451 = arith.constant 0 : index
    %1250 = vector.load %arg60[%1249, %c0_451] : memref<64x32xf32, #tpu.memory_space<vmem>>, vector<8x32xf32>
    %1251 = arith.index_cast %1246 : i32 to index
    %c0_452 = arith.constant 0 : index
    %1252 = vector.load %arg61[%1251, %c0_452] : memref<64x32xf32, #tpu.memory_space<vmem>>, vector<8x32xf32>
    %cst_453 = arith.constant dense<0.000000e+00> : vector<8x32xf32>
    %1253 = tpu.matmul %1244, %1154, %cst_453 {dimension_numbers = #tpu.dot_dimension_numbers<[1], [0], [0], [1], [0, 0, 1, 1], [], []>} : vector<8x32xf32>, vector<32x32xf32>, vector<8x32xf32> -> vector<8x32xf32>
    %1254 = vector.broadcast %1157 : vector<1x32xf32> to vector<8x32xf32>
    %1255 = arith.addf %1253, %1254 : vector<8x32xf32>
    %cst_454 = arith.constant dense<0.000000e+00> : vector<8x32xf32>
    %1256 = tpu.matmul %1244, %1155, %cst_454 {dimension_numbers = #tpu.dot_dimension_numbers<[1], [0], [0], [1], [0, 0, 1, 1], [], []>} : vector<8x32xf32>, vector<32x32xf32>, vector<8x32xf32> -> vector<8x32xf32>
    %1257 = vector.broadcast %1158 : vector<1x32xf32> to vector<8x32xf32>
    %1258 = arith.addf %1256, %1257 : vector<8x32xf32>
    %cst_455 = arith.constant dense<0.000000e+00> : vector<8x32xf32>
    %1259 = tpu.matmul %1244, %1156, %cst_455 {dimension_numbers = #tpu.dot_dimension_numbers<[1], [0], [0], [1], [0, 0, 1, 1], [], []>} : vector<8x32xf32>, vector<32x32xf32>, vector<8x32xf32> -> vector<8x32xf32>
    %1260 = vector.broadcast %1159 : vector<1x32xf32> to vector<8x32xf32>
    %1261 = arith.addf %1259, %1260 : vector<8x32xf32>
    %1262 = arith.addf %1248, %1255 : vector<8x32xf32>
    %1263 = arith.negf %1262 : vector<8x32xf32>
    %1264 = math.exp %1263 : vector<8x32xf32>
    %cst_456 = arith.constant 1.000000e+00 : f32
    %1265 = vector.broadcast %cst_456 : f32 to vector<8x32xf32>
    %1266 = arith.addf %1265, %1264 : vector<8x32xf32>
    %1267 = arith.divf %1265, %1266 : vector<8x32xf32>
    %1268 = arith.addf %1250, %1258 : vector<8x32xf32>
    %1269 = arith.negf %1268 : vector<8x32xf32>
    %1270 = math.exp %1269 : vector<8x32xf32>
    %cst_457 = arith.constant 1.000000e+00 : f32
    %1271 = vector.broadcast %cst_457 : f32 to vector<8x32xf32>
    %1272 = arith.addf %1271, %1270 : vector<8x32xf32>
    %1273 = arith.divf %1271, %1272 : vector<8x32xf32>
    %1274 = arith.mulf %1267, %1261 : vector<8x32xf32>
    %1275 = arith.addf %1252, %1274 : vector<8x32xf32>
    %1276 = math.tanh %1275 : vector<8x32xf32>
    %cst_458 = arith.constant 1.000000e+00 : f32
    %1277 = vector.broadcast %cst_458 : f32 to vector<8x32xf32>
    %1278 = arith.subf %1277, %1273 : vector<8x32xf32>
    %1279 = arith.mulf %1278, %1276 : vector<8x32xf32>
    %1280 = arith.mulf %1273, %1244 : vector<8x32xf32>
    %1281 = arith.addf %1279, %1280 : vector<8x32xf32>
    %1282 = vector.broadcast %c2_i32_448 : i32 to vector<8x1xi32>
    %1283 = arith.cmpi slt, %1282, %0 : vector<8x1xi32>
    %1284 = vector.shape_cast %1283 : vector<8x1xi1> to vector<8x1xi1>
    %1285 = vector.broadcast %1284 : vector<8x1xi1> to vector<8x32xi1>
    %1286 = arith.select %1285, %1281, %1244 : vector<8x32xi1>, vector<8x32xf32>
    %c3_i32_459 = arith.constant 3 : i32
    %c8_i32_460 = arith.constant 8 : i32
    %1287 = arith.muli %c3_i32_459, %c8_i32_460 : i32
    %1288 = tpu.assume_multiple %1287, 8 : i32
    %1289 = arith.index_cast %1288 : i32 to index
    %c0_461 = arith.constant 0 : index
    %1290 = vector.load %arg59[%1289, %c0_461] : memref<64x32xf32, #tpu.memory_space<vmem>>, vector<8x32xf32>
    %1291 = arith.index_cast %1288 : i32 to index
    %c0_462 = arith.constant 0 : index
    %1292 = vector.load %arg60[%1291, %c0_462] : memref<64x32xf32, #tpu.memory_space<vmem>>, vector<8x32xf32>
    %1293 = arith.index_cast %1288 : i32 to index
    %c0_463 = arith.constant 0 : index
    %1294 = vector.load %arg61[%1293, %c0_463] : memref<64x32xf32, #tpu.memory_space<vmem>>, vector<8x32xf32>
    %cst_464 = arith.constant dense<0.000000e+00> : vector<8x32xf32>
    %1295 = tpu.matmul %1286, %1154, %cst_464 {dimension_numbers = #tpu.dot_dimension_numbers<[1], [0], [0], [1], [0, 0, 1, 1], [], []>} : vector<8x32xf32>, vector<32x32xf32>, vector<8x32xf32> -> vector<8x32xf32>
    %1296 = vector.broadcast %1157 : vector<1x32xf32> to vector<8x32xf32>
    %1297 = arith.addf %1295, %1296 : vector<8x32xf32>
    %cst_465 = arith.constant dense<0.000000e+00> : vector<8x32xf32>
    %1298 = tpu.matmul %1286, %1155, %cst_465 {dimension_numbers = #tpu.dot_dimension_numbers<[1], [0], [0], [1], [0, 0, 1, 1], [], []>} : vector<8x32xf32>, vector<32x32xf32>, vector<8x32xf32> -> vector<8x32xf32>
    %1299 = vector.broadcast %1158 : vector<1x32xf32> to vector<8x32xf32>
    %1300 = arith.addf %1298, %1299 : vector<8x32xf32>
    %cst_466 = arith.constant dense<0.000000e+00> : vector<8x32xf32>
    %1301 = tpu.matmul %1286, %1156, %cst_466 {dimension_numbers = #tpu.dot_dimension_numbers<[1], [0], [0], [1], [0, 0, 1, 1], [], []>} : vector<8x32xf32>, vector<32x32xf32>, vector<8x32xf32> -> vector<8x32xf32>
    %1302 = vector.broadcast %1159 : vector<1x32xf32> to vector<8x32xf32>
    %1303 = arith.addf %1301, %1302 : vector<8x32xf32>
    %1304 = arith.addf %1290, %1297 : vector<8x32xf32>
    %1305 = arith.negf %1304 : vector<8x32xf32>
    %1306 = math.exp %1305 : vector<8x32xf32>
    %cst_467 = arith.constant 1.000000e+00 : f32
    %1307 = vector.broadcast %cst_467 : f32 to vector<8x32xf32>
    %1308 = arith.addf %1307, %1306 : vector<8x32xf32>
    %1309 = arith.divf %1307, %1308 : vector<8x32xf32>
    %1310 = arith.addf %1292, %1300 : vector<8x32xf32>
    %1311 = arith.negf %1310 : vector<8x32xf32>
    %1312 = math.exp %1311 : vector<8x32xf32>
    %cst_468 = arith.constant 1.000000e+00 : f32
    %1313 = vector.broadcast %cst_468 : f32 to vector<8x32xf32>
    %1314 = arith.addf %1313, %1312 : vector<8x32xf32>
    %1315 = arith.divf %1313, %1314 : vector<8x32xf32>
    %1316 = arith.mulf %1309, %1303 : vector<8x32xf32>
    %1317 = arith.addf %1294, %1316 : vector<8x32xf32>
    %1318 = math.tanh %1317 : vector<8x32xf32>
    %cst_469 = arith.constant 1.000000e+00 : f32
    %1319 = vector.broadcast %cst_469 : f32 to vector<8x32xf32>
    %1320 = arith.subf %1319, %1315 : vector<8x32xf32>
    %1321 = arith.mulf %1320, %1318 : vector<8x32xf32>
    %1322 = arith.mulf %1315, %1286 : vector<8x32xf32>
    %1323 = arith.addf %1321, %1322 : vector<8x32xf32>
    %1324 = vector.broadcast %c3_i32_459 : i32 to vector<8x1xi32>
    %1325 = arith.cmpi slt, %1324, %0 : vector<8x1xi32>
    %1326 = vector.shape_cast %1325 : vector<8x1xi1> to vector<8x1xi1>
    %1327 = vector.broadcast %1326 : vector<8x1xi1> to vector<8x32xi1>
    %1328 = arith.select %1327, %1323, %1286 : vector<8x32xi1>, vector<8x32xf32>
    %c4_i32_470 = arith.constant 4 : i32
    %c8_i32_471 = arith.constant 8 : i32
    %1329 = arith.muli %c4_i32_470, %c8_i32_471 : i32
    %1330 = tpu.assume_multiple %1329, 8 : i32
    %1331 = arith.index_cast %1330 : i32 to index
    %c0_472 = arith.constant 0 : index
    %1332 = vector.load %arg59[%1331, %c0_472] : memref<64x32xf32, #tpu.memory_space<vmem>>, vector<8x32xf32>
    %1333 = arith.index_cast %1330 : i32 to index
    %c0_473 = arith.constant 0 : index
    %1334 = vector.load %arg60[%1333, %c0_473] : memref<64x32xf32, #tpu.memory_space<vmem>>, vector<8x32xf32>
    %1335 = arith.index_cast %1330 : i32 to index
    %c0_474 = arith.constant 0 : index
    %1336 = vector.load %arg61[%1335, %c0_474] : memref<64x32xf32, #tpu.memory_space<vmem>>, vector<8x32xf32>
    %cst_475 = arith.constant dense<0.000000e+00> : vector<8x32xf32>
    %1337 = tpu.matmul %1328, %1154, %cst_475 {dimension_numbers = #tpu.dot_dimension_numbers<[1], [0], [0], [1], [0, 0, 1, 1], [], []>} : vector<8x32xf32>, vector<32x32xf32>, vector<8x32xf32> -> vector<8x32xf32>
    %1338 = vector.broadcast %1157 : vector<1x32xf32> to vector<8x32xf32>
    %1339 = arith.addf %1337, %1338 : vector<8x32xf32>
    %cst_476 = arith.constant dense<0.000000e+00> : vector<8x32xf32>
    %1340 = tpu.matmul %1328, %1155, %cst_476 {dimension_numbers = #tpu.dot_dimension_numbers<[1], [0], [0], [1], [0, 0, 1, 1], [], []>} : vector<8x32xf32>, vector<32x32xf32>, vector<8x32xf32> -> vector<8x32xf32>
    %1341 = vector.broadcast %1158 : vector<1x32xf32> to vector<8x32xf32>
    %1342 = arith.addf %1340, %1341 : vector<8x32xf32>
    %cst_477 = arith.constant dense<0.000000e+00> : vector<8x32xf32>
    %1343 = tpu.matmul %1328, %1156, %cst_477 {dimension_numbers = #tpu.dot_dimension_numbers<[1], [0], [0], [1], [0, 0, 1, 1], [], []>} : vector<8x32xf32>, vector<32x32xf32>, vector<8x32xf32> -> vector<8x32xf32>
    %1344 = vector.broadcast %1159 : vector<1x32xf32> to vector<8x32xf32>
    %1345 = arith.addf %1343, %1344 : vector<8x32xf32>
    %1346 = arith.addf %1332, %1339 : vector<8x32xf32>
    %1347 = arith.negf %1346 : vector<8x32xf32>
    %1348 = math.exp %1347 : vector<8x32xf32>
    %cst_478 = arith.constant 1.000000e+00 : f32
    %1349 = vector.broadcast %cst_478 : f32 to vector<8x32xf32>
    %1350 = arith.addf %1349, %1348 : vector<8x32xf32>
    %1351 = arith.divf %1349, %1350 : vector<8x32xf32>
    %1352 = arith.addf %1334, %1342 : vector<8x32xf32>
    %1353 = arith.negf %1352 : vector<8x32xf32>
    %1354 = math.exp %1353 : vector<8x32xf32>
    %cst_479 = arith.constant 1.000000e+00 : f32
    %1355 = vector.broadcast %cst_479 : f32 to vector<8x32xf32>
    %1356 = arith.addf %1355, %1354 : vector<8x32xf32>
    %1357 = arith.divf %1355, %1356 : vector<8x32xf32>
    %1358 = arith.mulf %1351, %1345 : vector<8x32xf32>
    %1359 = arith.addf %1336, %1358 : vector<8x32xf32>
    %1360 = math.tanh %1359 : vector<8x32xf32>
    %cst_480 = arith.constant 1.000000e+00 : f32
    %1361 = vector.broadcast %cst_480 : f32 to vector<8x32xf32>
    %1362 = arith.subf %1361, %1357 : vector<8x32xf32>
    %1363 = arith.mulf %1362, %1360 : vector<8x32xf32>
    %1364 = arith.mulf %1357, %1328 : vector<8x32xf32>
    %1365 = arith.addf %1363, %1364 : vector<8x32xf32>
    %1366 = vector.broadcast %c4_i32_470 : i32 to vector<8x1xi32>
    %1367 = arith.cmpi slt, %1366, %0 : vector<8x1xi32>
    %1368 = vector.shape_cast %1367 : vector<8x1xi1> to vector<8x1xi1>
    %1369 = vector.broadcast %1368 : vector<8x1xi1> to vector<8x32xi1>
    %1370 = arith.select %1369, %1365, %1328 : vector<8x32xi1>, vector<8x32xf32>
    %c5_i32_481 = arith.constant 5 : i32
    %c8_i32_482 = arith.constant 8 : i32
    %1371 = arith.muli %c5_i32_481, %c8_i32_482 : i32
    %1372 = tpu.assume_multiple %1371, 8 : i32
    %1373 = arith.index_cast %1372 : i32 to index
    %c0_483 = arith.constant 0 : index
    %1374 = vector.load %arg59[%1373, %c0_483] : memref<64x32xf32, #tpu.memory_space<vmem>>, vector<8x32xf32>
    %1375 = arith.index_cast %1372 : i32 to index
    %c0_484 = arith.constant 0 : index
    %1376 = vector.load %arg60[%1375, %c0_484] : memref<64x32xf32, #tpu.memory_space<vmem>>, vector<8x32xf32>
    %1377 = arith.index_cast %1372 : i32 to index
    %c0_485 = arith.constant 0 : index
    %1378 = vector.load %arg61[%1377, %c0_485] : memref<64x32xf32, #tpu.memory_space<vmem>>, vector<8x32xf32>
    %cst_486 = arith.constant dense<0.000000e+00> : vector<8x32xf32>
    %1379 = tpu.matmul %1370, %1154, %cst_486 {dimension_numbers = #tpu.dot_dimension_numbers<[1], [0], [0], [1], [0, 0, 1, 1], [], []>} : vector<8x32xf32>, vector<32x32xf32>, vector<8x32xf32> -> vector<8x32xf32>
    %1380 = vector.broadcast %1157 : vector<1x32xf32> to vector<8x32xf32>
    %1381 = arith.addf %1379, %1380 : vector<8x32xf32>
    %cst_487 = arith.constant dense<0.000000e+00> : vector<8x32xf32>
    %1382 = tpu.matmul %1370, %1155, %cst_487 {dimension_numbers = #tpu.dot_dimension_numbers<[1], [0], [0], [1], [0, 0, 1, 1], [], []>} : vector<8x32xf32>, vector<32x32xf32>, vector<8x32xf32> -> vector<8x32xf32>
    %1383 = vector.broadcast %1158 : vector<1x32xf32> to vector<8x32xf32>
    %1384 = arith.addf %1382, %1383 : vector<8x32xf32>
    %cst_488 = arith.constant dense<0.000000e+00> : vector<8x32xf32>
    %1385 = tpu.matmul %1370, %1156, %cst_488 {dimension_numbers = #tpu.dot_dimension_numbers<[1], [0], [0], [1], [0, 0, 1, 1], [], []>} : vector<8x32xf32>, vector<32x32xf32>, vector<8x32xf32> -> vector<8x32xf32>
    %1386 = vector.broadcast %1159 : vector<1x32xf32> to vector<8x32xf32>
    %1387 = arith.addf %1385, %1386 : vector<8x32xf32>
    %1388 = arith.addf %1374, %1381 : vector<8x32xf32>
    %1389 = arith.negf %1388 : vector<8x32xf32>
    %1390 = math.exp %1389 : vector<8x32xf32>
    %cst_489 = arith.constant 1.000000e+00 : f32
    %1391 = vector.broadcast %cst_489 : f32 to vector<8x32xf32>
    %1392 = arith.addf %1391, %1390 : vector<8x32xf32>
    %1393 = arith.divf %1391, %1392 : vector<8x32xf32>
    %1394 = arith.addf %1376, %1384 : vector<8x32xf32>
    %1395 = arith.negf %1394 : vector<8x32xf32>
    %1396 = math.exp %1395 : vector<8x32xf32>
    %cst_490 = arith.constant 1.000000e+00 : f32
    %1397 = vector.broadcast %cst_490 : f32 to vector<8x32xf32>
    %1398 = arith.addf %1397, %1396 : vector<8x32xf32>
    %1399 = arith.divf %1397, %1398 : vector<8x32xf32>
    %1400 = arith.mulf %1393, %1387 : vector<8x32xf32>
    %1401 = arith.addf %1378, %1400 : vector<8x32xf32>
    %1402 = math.tanh %1401 : vector<8x32xf32>
    %cst_491 = arith.constant 1.000000e+00 : f32
    %1403 = vector.broadcast %cst_491 : f32 to vector<8x32xf32>
    %1404 = arith.subf %1403, %1399 : vector<8x32xf32>
    %1405 = arith.mulf %1404, %1402 : vector<8x32xf32>
    %1406 = arith.mulf %1399, %1370 : vector<8x32xf32>
    %1407 = arith.addf %1405, %1406 : vector<8x32xf32>
    %1408 = vector.broadcast %c5_i32_481 : i32 to vector<8x1xi32>
    %1409 = arith.cmpi slt, %1408, %0 : vector<8x1xi32>
    %1410 = vector.shape_cast %1409 : vector<8x1xi1> to vector<8x1xi1>
    %1411 = vector.broadcast %1410 : vector<8x1xi1> to vector<8x32xi1>
    %1412 = arith.select %1411, %1407, %1370 : vector<8x32xi1>, vector<8x32xf32>
    %c6_i32_492 = arith.constant 6 : i32
    %c8_i32_493 = arith.constant 8 : i32
    %1413 = arith.muli %c6_i32_492, %c8_i32_493 : i32
    %1414 = tpu.assume_multiple %1413, 8 : i32
    %1415 = arith.index_cast %1414 : i32 to index
    %c0_494 = arith.constant 0 : index
    %1416 = vector.load %arg59[%1415, %c0_494] : memref<64x32xf32, #tpu.memory_space<vmem>>, vector<8x32xf32>
    %1417 = arith.index_cast %1414 : i32 to index
    %c0_495 = arith.constant 0 : index
    %1418 = vector.load %arg60[%1417, %c0_495] : memref<64x32xf32, #tpu.memory_space<vmem>>, vector<8x32xf32>
    %1419 = arith.index_cast %1414 : i32 to index
    %c0_496 = arith.constant 0 : index
    %1420 = vector.load %arg61[%1419, %c0_496] : memref<64x32xf32, #tpu.memory_space<vmem>>, vector<8x32xf32>
    %cst_497 = arith.constant dense<0.000000e+00> : vector<8x32xf32>
    %1421 = tpu.matmul %1412, %1154, %cst_497 {dimension_numbers = #tpu.dot_dimension_numbers<[1], [0], [0], [1], [0, 0, 1, 1], [], []>} : vector<8x32xf32>, vector<32x32xf32>, vector<8x32xf32> -> vector<8x32xf32>
    %1422 = vector.broadcast %1157 : vector<1x32xf32> to vector<8x32xf32>
    %1423 = arith.addf %1421, %1422 : vector<8x32xf32>
    %cst_498 = arith.constant dense<0.000000e+00> : vector<8x32xf32>
    %1424 = tpu.matmul %1412, %1155, %cst_498 {dimension_numbers = #tpu.dot_dimension_numbers<[1], [0], [0], [1], [0, 0, 1, 1], [], []>} : vector<8x32xf32>, vector<32x32xf32>, vector<8x32xf32> -> vector<8x32xf32>
    %1425 = vector.broadcast %1158 : vector<1x32xf32> to vector<8x32xf32>
    %1426 = arith.addf %1424, %1425 : vector<8x32xf32>
    %cst_499 = arith.constant dense<0.000000e+00> : vector<8x32xf32>
    %1427 = tpu.matmul %1412, %1156, %cst_499 {dimension_numbers = #tpu.dot_dimension_numbers<[1], [0], [0], [1], [0, 0, 1, 1], [], []>} : vector<8x32xf32>, vector<32x32xf32>, vector<8x32xf32> -> vector<8x32xf32>
    %1428 = vector.broadcast %1159 : vector<1x32xf32> to vector<8x32xf32>
    %1429 = arith.addf %1427, %1428 : vector<8x32xf32>
    %1430 = arith.addf %1416, %1423 : vector<8x32xf32>
    %1431 = arith.negf %1430 : vector<8x32xf32>
    %1432 = math.exp %1431 : vector<8x32xf32>
    %cst_500 = arith.constant 1.000000e+00 : f32
    %1433 = vector.broadcast %cst_500 : f32 to vector<8x32xf32>
    %1434 = arith.addf %1433, %1432 : vector<8x32xf32>
    %1435 = arith.divf %1433, %1434 : vector<8x32xf32>
    %1436 = arith.addf %1418, %1426 : vector<8x32xf32>
    %1437 = arith.negf %1436 : vector<8x32xf32>
    %1438 = math.exp %1437 : vector<8x32xf32>
    %cst_501 = arith.constant 1.000000e+00 : f32
    %1439 = vector.broadcast %cst_501 : f32 to vector<8x32xf32>
    %1440 = arith.addf %1439, %1438 : vector<8x32xf32>
    %1441 = arith.divf %1439, %1440 : vector<8x32xf32>
    %1442 = arith.mulf %1435, %1429 : vector<8x32xf32>
    %1443 = arith.addf %1420, %1442 : vector<8x32xf32>
    %1444 = math.tanh %1443 : vector<8x32xf32>
    %cst_502 = arith.constant 1.000000e+00 : f32
    %1445 = vector.broadcast %cst_502 : f32 to vector<8x32xf32>
    %1446 = arith.subf %1445, %1441 : vector<8x32xf32>
    %1447 = arith.mulf %1446, %1444 : vector<8x32xf32>
    %1448 = arith.mulf %1441, %1412 : vector<8x32xf32>
    %1449 = arith.addf %1447, %1448 : vector<8x32xf32>
    %1450 = vector.broadcast %c6_i32_492 : i32 to vector<8x1xi32>
    %1451 = arith.cmpi slt, %1450, %0 : vector<8x1xi32>
    %1452 = vector.shape_cast %1451 : vector<8x1xi1> to vector<8x1xi1>
    %1453 = vector.broadcast %1452 : vector<8x1xi1> to vector<8x32xi1>
    %1454 = arith.select %1453, %1449, %1412 : vector<8x32xi1>, vector<8x32xf32>
    %c7_i32_503 = arith.constant 7 : i32
    %c8_i32_504 = arith.constant 8 : i32
    %1455 = arith.muli %c7_i32_503, %c8_i32_504 : i32
    %1456 = tpu.assume_multiple %1455, 8 : i32
    %1457 = arith.index_cast %1456 : i32 to index
    %c0_505 = arith.constant 0 : index
    %1458 = vector.load %arg59[%1457, %c0_505] : memref<64x32xf32, #tpu.memory_space<vmem>>, vector<8x32xf32>
    %1459 = arith.index_cast %1456 : i32 to index
    %c0_506 = arith.constant 0 : index
    %1460 = vector.load %arg60[%1459, %c0_506] : memref<64x32xf32, #tpu.memory_space<vmem>>, vector<8x32xf32>
    %1461 = arith.index_cast %1456 : i32 to index
    %c0_507 = arith.constant 0 : index
    %1462 = vector.load %arg61[%1461, %c0_507] : memref<64x32xf32, #tpu.memory_space<vmem>>, vector<8x32xf32>
    %cst_508 = arith.constant dense<0.000000e+00> : vector<8x32xf32>
    %1463 = tpu.matmul %1454, %1154, %cst_508 {dimension_numbers = #tpu.dot_dimension_numbers<[1], [0], [0], [1], [0, 0, 1, 1], [], []>} : vector<8x32xf32>, vector<32x32xf32>, vector<8x32xf32> -> vector<8x32xf32>
    %1464 = vector.broadcast %1157 : vector<1x32xf32> to vector<8x32xf32>
    %1465 = arith.addf %1463, %1464 : vector<8x32xf32>
    %cst_509 = arith.constant dense<0.000000e+00> : vector<8x32xf32>
    %1466 = tpu.matmul %1454, %1155, %cst_509 {dimension_numbers = #tpu.dot_dimension_numbers<[1], [0], [0], [1], [0, 0, 1, 1], [], []>} : vector<8x32xf32>, vector<32x32xf32>, vector<8x32xf32> -> vector<8x32xf32>
    %1467 = vector.broadcast %1158 : vector<1x32xf32> to vector<8x32xf32>
    %1468 = arith.addf %1466, %1467 : vector<8x32xf32>
    %cst_510 = arith.constant dense<0.000000e+00> : vector<8x32xf32>
    %1469 = tpu.matmul %1454, %1156, %cst_510 {dimension_numbers = #tpu.dot_dimension_numbers<[1], [0], [0], [1], [0, 0, 1, 1], [], []>} : vector<8x32xf32>, vector<32x32xf32>, vector<8x32xf32> -> vector<8x32xf32>
    %1470 = vector.broadcast %1159 : vector<1x32xf32> to vector<8x32xf32>
    %1471 = arith.addf %1469, %1470 : vector<8x32xf32>
    %1472 = arith.addf %1458, %1465 : vector<8x32xf32>
    %1473 = arith.negf %1472 : vector<8x32xf32>
    %1474 = math.exp %1473 : vector<8x32xf32>
    %cst_511 = arith.constant 1.000000e+00 : f32
    %1475 = vector.broadcast %cst_511 : f32 to vector<8x32xf32>
    %1476 = arith.addf %1475, %1474 : vector<8x32xf32>
    %1477 = arith.divf %1475, %1476 : vector<8x32xf32>
    %1478 = arith.addf %1460, %1468 : vector<8x32xf32>
    %1479 = arith.negf %1478 : vector<8x32xf32>
    %1480 = math.exp %1479 : vector<8x32xf32>
    %cst_512 = arith.constant 1.000000e+00 : f32
    %1481 = vector.broadcast %cst_512 : f32 to vector<8x32xf32>
    %1482 = arith.addf %1481, %1480 : vector<8x32xf32>
    %1483 = arith.divf %1481, %1482 : vector<8x32xf32>
    %1484 = arith.mulf %1477, %1471 : vector<8x32xf32>
    %1485 = arith.addf %1462, %1484 : vector<8x32xf32>
    %1486 = math.tanh %1485 : vector<8x32xf32>
    %cst_513 = arith.constant 1.000000e+00 : f32
    %1487 = vector.broadcast %cst_513 : f32 to vector<8x32xf32>
    %1488 = arith.subf %1487, %1483 : vector<8x32xf32>
    %1489 = arith.mulf %1488, %1486 : vector<8x32xf32>
    %1490 = arith.mulf %1483, %1454 : vector<8x32xf32>
    %1491 = arith.addf %1489, %1490 : vector<8x32xf32>
    %1492 = vector.broadcast %c7_i32_503 : i32 to vector<8x1xi32>
    %1493 = arith.cmpi slt, %1492, %0 : vector<8x1xi32>
    %1494 = vector.shape_cast %1493 : vector<8x1xi1> to vector<8x1xi1>
    %1495 = vector.broadcast %1494 : vector<8x1xi1> to vector<8x32xi1>
    %1496 = arith.select %1495, %1491, %1454 : vector<8x32xi1>, vector<8x32xf32>
    %c8_i32_514 = arith.constant 8 : i32
    %1497 = tpu.concatenate %376, %754, %1132, %1496 in 1 : vector<8x32xf32>, vector<8x32xf32>, vector<8x32xf32>, vector<8x32xf32> -> vector<8x128xf32>
    %c0_515 = arith.constant 0 : index
    %c0_516 = arith.constant 0 : index
    %1498 = vector.load %arg52[%c0_515, %c0_516] : memref<1x32xf32, #tpu.memory_space<vmem>>, vector<1x32xf32>
    %c0_517 = arith.constant 0 : index
    %c0_518 = arith.constant 0 : index
    %1499 = vector.load %arg53[%c0_517, %c0_518] : memref<1x32xf32, #tpu.memory_space<vmem>>, vector<1x32xf32>
    %c0_519 = arith.constant 0 : index
    %c0_520 = arith.constant 0 : index
    %1500 = vector.load %arg50[%c0_519, %c0_520] : memref<128x32xf32, #tpu.memory_space<vmem>>, vector<128x32xf32>
    %cst_521 = arith.constant dense<0.000000e+00> : vector<8x32xf32>
    %1501 = tpu.matmul %1497, %1500, %cst_521 {dimension_numbers = #tpu.dot_dimension_numbers<[1], [0], [0], [1], [0, 0, 1, 1], [], []>} : vector<8x128xf32>, vector<128x32xf32>, vector<8x32xf32> -> vector<8x32xf32>
    %c0_522 = arith.constant 0 : index
    %c0_523 = arith.constant 0 : index
    %1502 = vector.load %arg51[%c0_522, %c0_523] : memref<1x32xf32, #tpu.memory_space<vmem>>, vector<1x32xf32>
    %1503 = vector.broadcast %1502 : vector<1x32xf32> to vector<8x32xf32>
    %1504 = arith.addf %1501, %1503 : vector<8x32xf32>
    %cst_524 = arith.constant dense<0.000000e+00> : vector<8xf32>
    %1505 = vector.multi_reduction <add>, %1504, %cst_524 [1] : vector<8x32xf32> to vector<8xf32>
    %1506 = vector.shape_cast %1505 : vector<8xf32> to vector<8x1xf32>
    %cst_525 = arith.constant 3.200000e+01 : f32
    %1507 = vector.broadcast %cst_525 : f32 to vector<8x1xf32>
    %1508 = arith.divf %1506, %1507 : vector<8x1xf32>
    %1509 = vector.broadcast %1508 : vector<8x1xf32> to vector<8x32xf32>
    %1510 = arith.subf %1504, %1509 : vector<8x32xf32>
    %1511 = arith.mulf %1510, %1510 : vector<8x32xf32>
    %cst_526 = arith.constant dense<0.000000e+00> : vector<8xf32>
    %1512 = vector.multi_reduction <add>, %1511, %cst_526 [1] : vector<8x32xf32> to vector<8xf32>
    %1513 = vector.shape_cast %1512 : vector<8xf32> to vector<8x1xf32>
    %cst_527 = arith.constant 3.200000e+01 : f32
    %1514 = vector.broadcast %cst_527 : f32 to vector<8x1xf32>
    %1515 = arith.divf %1513, %1514 : vector<8x1xf32>
    %1516 = vector.broadcast %1508 : vector<8x1xf32> to vector<8x32xf32>
    %1517 = arith.subf %1504, %1516 : vector<8x32xf32>
    %cst_528 = arith.constant 9.99999974E-6 : f32
    %1518 = vector.broadcast %cst_528 : f32 to vector<8x1xf32>
    %1519 = arith.addf %1515, %1518 : vector<8x1xf32>
    %1520 = math.rsqrt %1519 : vector<8x1xf32>
    %1521 = vector.broadcast %1520 : vector<8x1xf32> to vector<8x32xf32>
    %1522 = arith.mulf %1517, %1521 : vector<8x32xf32>
    %1523 = vector.broadcast %1498 : vector<1x32xf32> to vector<8x32xf32>
    %1524 = arith.mulf %1522, %1523 : vector<8x32xf32>
    %1525 = vector.broadcast %1499 : vector<1x32xf32> to vector<8x32xf32>
    %1526 = arith.addf %1524, %1525 : vector<8x32xf32>
    %cst_529 = arith.constant 0.000000e+00 : f32
    %1527 = vector.broadcast %cst_529 : f32 to vector<8x32xf32>
    %1528 = arith.maximumf %1526, %1527 : vector<8x32xf32>
    %c0_530 = arith.constant 0 : index
    %c0_531 = arith.constant 0 : index
    %1529 = vector.load %arg54[%c0_530, %c0_531] : memref<32x32xf32, #tpu.memory_space<vmem>>, vector<32x32xf32>
    %cst_532 = arith.constant dense<0.000000e+00> : vector<8x32xf32>
    %1530 = tpu.matmul %1528, %1529, %cst_532 {dimension_numbers = #tpu.dot_dimension_numbers<[1], [0], [0], [1], [0, 0, 1, 1], [], []>} : vector<8x32xf32>, vector<32x32xf32>, vector<8x32xf32> -> vector<8x32xf32>
    %c0_533 = arith.constant 0 : index
    %c0_534 = arith.constant 0 : index
    %1531 = vector.load %arg55[%c0_533, %c0_534] : memref<1x32xf32, #tpu.memory_space<vmem>>, vector<1x32xf32>
    %1532 = vector.broadcast %1531 : vector<1x32xf32> to vector<8x32xf32>
    %1533 = arith.addf %1530, %1532 : vector<8x32xf32>
    %cst_535 = arith.constant dense<0.000000e+00> : vector<8xf32>
    %1534 = vector.multi_reduction <add>, %1533, %cst_535 [1] : vector<8x32xf32> to vector<8xf32>
    %1535 = vector.shape_cast %1534 : vector<8xf32> to vector<8x1xf32>
    %cst_536 = arith.constant 3.200000e+01 : f32
    %1536 = vector.broadcast %cst_536 : f32 to vector<8x1xf32>
    %1537 = arith.divf %1535, %1536 : vector<8x1xf32>
    %1538 = vector.broadcast %1537 : vector<8x1xf32> to vector<8x32xf32>
    %1539 = arith.subf %1533, %1538 : vector<8x32xf32>
    %1540 = arith.mulf %1539, %1539 : vector<8x32xf32>
    %cst_537 = arith.constant dense<0.000000e+00> : vector<8xf32>
    %1541 = vector.multi_reduction <add>, %1540, %cst_537 [1] : vector<8x32xf32> to vector<8xf32>
    %1542 = vector.shape_cast %1541 : vector<8xf32> to vector<8x1xf32>
    %cst_538 = arith.constant 3.200000e+01 : f32
    %1543 = vector.broadcast %cst_538 : f32 to vector<8x1xf32>
    %1544 = arith.divf %1542, %1543 : vector<8x1xf32>
    %1545 = vector.broadcast %1537 : vector<8x1xf32> to vector<8x32xf32>
    %1546 = arith.subf %1533, %1545 : vector<8x32xf32>
    %cst_539 = arith.constant 9.99999974E-6 : f32
    %1547 = vector.broadcast %cst_539 : f32 to vector<8x1xf32>
    %1548 = arith.addf %1544, %1547 : vector<8x1xf32>
    %1549 = math.rsqrt %1548 : vector<8x1xf32>
    %1550 = vector.broadcast %1549 : vector<8x1xf32> to vector<8x32xf32>
    %1551 = arith.mulf %1546, %1550 : vector<8x32xf32>
    %1552 = vector.broadcast %1498 : vector<1x32xf32> to vector<8x32xf32>
    %1553 = arith.mulf %1551, %1552 : vector<8x32xf32>
    %1554 = vector.broadcast %1499 : vector<1x32xf32> to vector<8x32xf32>
    %1555 = arith.addf %1553, %1554 : vector<8x32xf32>
    %cst_540 = arith.constant 0.000000e+00 : f32
    %1556 = vector.broadcast %cst_540 : f32 to vector<8x32xf32>
    %1557 = arith.maximumf %1555, %1556 : vector<8x32xf32>
    %c0_541 = arith.constant 0 : index
    %c0_542 = arith.constant 0 : index
    %1558 = vector.load %arg56[%c0_541, %c0_542] : memref<32x5xf32, #tpu.memory_space<vmem>>, vector<32x5xf32>
    %cst_543 = arith.constant dense<0.000000e+00> : vector<8x5xf32>
    %1559 = tpu.matmul %1557, %1558, %cst_543 {dimension_numbers = #tpu.dot_dimension_numbers<[1], [0], [0], [1], [0, 0, 1, 1], [], []>} : vector<8x32xf32>, vector<32x5xf32>, vector<8x5xf32> -> vector<8x5xf32>
    %c0_544 = arith.constant 0 : index
    %c0_545 = arith.constant 0 : index
    %1560 = vector.load %arg57[%c0_544, %c0_545] : memref<1x5xf32, #tpu.memory_space<vmem>>, vector<1x5xf32>
    %1561 = vector.broadcast %1560 : vector<1x5xf32> to vector<8x5xf32>
    %1562 = arith.addf %1559, %1561 : vector<8x5xf32>
    %c0_546 = arith.constant 0 : index
    %c0_547 = arith.constant 0 : index
    %1563 = vector.load %arg58[%c0_546, %c0_547] : memref<8x5xf32, #tpu.memory_space<vmem>>, vector<8x5xf32>
    tpu.vector_store %arg58[%c0_546, %c0_547], %1562 {strides = array<i32>} : memref<8x5xf32, #tpu.memory_space<vmem>>, vector<8x5xf32>,
    return
  }
}

</mosaic_0001>

<bundles_post_ra>
// kernel: model_forward.1
= control target key start
LH: loop header
LB: loop body
LE: loop exit
PB: predicated region body
PF: predicated region fallthrough
CT: control target
= control target key end

     0   :  { %s14781_s6 = smov 1   ;;  %s14782_s10 = smov 2   ;;  %s16898_s0 = inlined_call_operand.smem [shape: u32[59], index: -1, kind: input, shape index: {}] }
   0x1   :  { %s14893_s5 = sld [smem:[%s16898_s0]]   ;;  %s14783_s14 = smov 3  }
   0x2   :  { %s14898_s9 = sld [smem:[%s16898_s0 + %s14781_s6]]   ;;  %s14784_s18 = smov 4  }
   0x3   :  { %s14903_s13 = sld [smem:[%s16898_s0 + %s14782_s10]]   ;;  %s14785_s22 = smov 5  }
   0x4   :  { %s14908_s17 = sld [smem:[%s16898_s0 + %s14783_s14]]   ;;  %s14786_s26 = smov 6  }
   0x5   :  { %s14913_s21 = sld [smem:[%s16898_s0 + %s14784_s18]]   ;;  %s14787_s30 = smov 7  }
   0x6   :  { %s14918_s25 = sld [smem:[%s16898_s0 + %s14785_s22]]   ;;  %s14788_s4 = smov 8  }
   0x7   :  { %16939 = sst [smem:[#allocation81_spill]] %s14893_s5  ;;  %s14789_s10 = smov 9  }
   0x8   :  { %16940 = sst [smem:[#allocation82_spill]] %s14898_s9  ;;  %s14790_s15 = smov 10  }
   0x9   :  { %16941 = sst [smem:[#allocation83_spill]] %s14903_s13  ;;  %s14791_s20 = smov 11  }
   0xa   :  { %s14923_s29 = sld [smem:[%s16898_s0 + %s14786_s26]]   ;;  %s14792_s26 = smov 12  }
   0xb   :  { %16942 = sst [smem:[#allocation84_spill]] %s14913_s21  ;;  %s14793_s1 = smov 13  }
   0xc   :  { %16943 = sst [smem:[#allocation85_spill]] %s14918_s25  ;;  %s14794_s7 = smov 14  }
   0xd   :  { %s14928_s3 = sld [smem:[%s16898_s0 + %s14787_s30]]   ;;  %s14796_s22 = smov 16  }
   0xe   :  { %s14933_s8 = sld [smem:[%s16898_s0 + %s14788_s4]]   ;;  %s14797_s28 = smov 17  }
   0xf   :  { %s14938_s14 = sld [smem:[%s16898_s0 + %s14789_s10]]  }
  0x10   :  { %16944 = sst [smem:[#allocation86_spill]] %s14923_s29 }
  0x11   :  { %s14943_s19 = sld [smem:[%s16898_s0 + %s14790_s15]]   ;;  %s14795_s15 = smov 15  }
  0x12   :  { %s14948_s24 = sld [smem:[%s16898_s0 + %s14791_s20]]  }
  0x13   :  { %16945 = sst [smem:[#allocation87_spill]] %s14928_s3 }
  0x14   :  { %s14953_s30 = sld [smem:[%s16898_s0 + %s14792_s26]]  }
  0x15   :  { %16946 = sst [smem:[#allocation88_spill]] %s14938_s14 }
  0x16   :  { %s14958_s6 = sld [smem:[%s16898_s0 + %s14793_s1]]  }
  0x17   :  { %s14963_s12 = sld [smem:[%s16898_s0 + %s14794_s7]]   ;;  %s14798_s7 = smov 18  }
  0x18   :  { %16947 = sst [smem:[#allocation89_spill]] %s14948_s24 }
  0x19   :  { %s14968_s20 = sld [smem:[%s16898_s0 + %s14795_s15]]   ;;  %s14799_s15 = smov 19  }
  0x1a   :  { %s14973_s27 = sld [smem:[%s16898_s0 + %s14796_s22]]   ;;  %s14800_s22 = smov 20  }
  0x1b   :  { %s14978_s4 = sld [smem:[%s16898_s0 + %s14797_s28]]   ;;  %s14801_s28 = smov 21  }
  0x1c   :  { %16948 = sst [smem:[#allocation90_spill]] %s14958_s6 }
  0x1d   :  { %16949 = sst [smem:[#allocation91_spill]] %s14963_s12 }
  0x1e   :  { %s14983_s12 = sld [smem:[%s16898_s0 + %s14798_s7]]   ;;  %s14802_s7 = smov 22  }
  0x1f   :  { %16950 = sst [smem:[#allocation92_spill]] %s14968_s20 }
  0x20   :  { %16951 = sst [smem:[#allocation93_spill]] %s14973_s27 }
  0x21   :  { %16952 = sst [smem:[#allocation94_spill]] %s14978_s4 }
  0x22   :  { %s14988_s20 = sld [smem:[%s16898_s0 + %s14799_s15]]   ;;  %s14803_s15 = smov 23  }
  0x23   :  { %s14993_s27 = sld [smem:[%s16898_s0 + %s14800_s22]]   ;;  %s14804_s22 = smov 24  }
  0x24   :  { %16953 = sst [smem:[#allocation95_spill]] %s14983_s12 }
  0x25   :  { %s14998_s4 = sld [smem:[%s16898_s0 + %s14801_s28]]   ;;  %s14805_s28 = smov 25  }
  0x26   :  { %s15003_s12 = sld [smem:[%s16898_s0 + %s14802_s7]]   ;;  %s14806_s7 = smov 26  }
  0x27   :  { %s15013_s29 = sld [smem:[%s16898_s0 + %s14804_s22]]   ;;  %s14808_s22 = smov 28  }
  0x28   :  { %16954 = sst [smem:[#allocation96_spill]] %s14988_s20 }
  0x29   :  { %s15008_s20 = sld [smem:[%s16898_s0 + %s14803_s15]]   ;;  %s14807_s15 = smov 27  }
  0x2a   :  { %s15018_s3 = sld [smem:[%s16898_s0 + %s14805_s28]]   ;;  %s14809_s28 = smov 29  }
  0x2b   :  { %16955 = sst [smem:[#allocation97_spill]] %s14998_s4 }
  0x2c   :  { %s15023_s25 = sld [smem:[%s16898_s0 + %s14806_s7]]   ;;  %s14810_s7 = smov 30  }
  0x2d   :  { %s15028_s9 = sld [smem:[%s16898_s0 + %s14807_s15]]   ;;  %s14811_s15 = smov 31  }
  0x2e   :  { %s15033_s5 = sld [smem:[%s16898_s0 + %s14808_s22]]   ;;  %s14812_s22 = smov 32  }
  0x2f   :  { %16956 = sst [smem:[#allocation98_spill]] %s15008_s20 }
  0x30   :  { %16957 = sst [smem:[#allocation99_spill]] %s15018_s3 }
  0x31   :  { %s15038_s3 = sld [smem:[%s16898_s0 + %s14809_s28]]   ;;  %s14813_s28 = smov 33  }
  0x32   :  { %16958 = sst [smem:[#allocation100_spill]] %s15023_s25 }
  0x33   :  { %16959 = sst [smem:[#allocation101_spill]] %s15028_s9 }
  0x34   :  { %16960 = sst [smem:[#allocation102_spill]] %s15033_s5 }
  0x35   :  { %s15043_s25 = sld [smem:[%s16898_s0 + %s14810_s7]]   ;;  %s14814_s7 = smov 34  }
  0x36   :  { %s15048_s9 = sld [smem:[%s16898_s0 + %s14811_s15]]   ;;  %s14815_s15 = smov 35  }
  0x37   :  { %16961 = sst [smem:[#allocation103_spill]] %s15038_s3 }
  0x38   :  { %s15053_s5 = sld [smem:[%s16898_s0 + %s14812_s22]]   ;;  %s14816_s22 = smov 36  }
  0x39   :  { %s15058_s3 = sld [smem:[%s16898_s0 + %s14813_s28]]   ;;  %s14817_s28 = smov 37  }
  0x3a   :  { %s15068_s20 = sld [smem:[%s16898_s0 + %s14815_s15]]   ;;  %s14819_s15 = smov 39  }
  0x3b   :  { %16962 = sst [smem:[#allocation104_spill]] %s15043_s25 }
  0x3c   :  { %s15063_s25 = sld [smem:[%s16898_s0 + %s14814_s7]]   ;;  %s14818_s7 = smov 38  }
  0x3d   :  { %s15078_s4 = sld [smem:[%s16898_s0 + %s14817_s28]]   ;;  %s14821_s28 = smov 41  }
  0x3e   :  { %16963 = sst [smem:[#allocation105_spill]] %s15053_s5 }
  0x3f   :  { %s15073_s5 = sld [smem:[%s16898_s0 + %s14816_s22]]   ;;  %s14820_s22 = smov 40  }
  0x40   :  { %s15088_s6 = sld [smem:[%s16898_s0 + %s14819_s15]]   ;;  %s14823_s15 = smov 43  }
  0x41   :  { %s15098_s24 = sld [smem:[%s16898_s0 + %s14821_s28]]   ;;  %s14825_s28 = smov 45  }
  0x42   :  { %16964 = sst [smem:[#allocation106_spill]] %s15063_s25 }
  0x43   :  { %s15083_s25 = sld [smem:[%s16898_s0 + %s14818_s7]]   ;;  %s14822_s7 = smov 42  }
  0x44   :  { %s15118_s14 = sld [smem:[%s16898_s0 + %s14825_s28]]   ;;  %s14829_s28 = smov 49  }
  0x45   :  { %16965 = sst [smem:[#allocation107_spill]] %s15073_s5 }
  0x46   :  { %16967 = sst [smem:[#allocation109_spill]] %s15088_s6 }
  0x47   :  { %s15093_s5 = sld [smem:[%s16898_s0 + %s14820_s22]]   ;;  %s14824_s22 = smov 44  }
  0x48   :  { %s15108_s6 = sld [smem:[%s16898_s0 + %s14823_s15]]   ;;  %s14827_s15 = smov 47  }
  0x49   :  { %16966 = sst [smem:[#allocation108_spill]] %s15083_s25 }
  0x4a   :  { %s15103_s25 = sld [smem:[%s16898_s0 + %s14822_s7]]   ;;  %s14826_s7 = smov 46  }
  0x4b   :  { %s15128_s21 = sld [smem:[%s16898_s0 + %s14827_s15]]   ;;  %s14831_s15 = smov 51  }
  0x4c   :  { %s15138_s13 = sld [smem:[%s16898_s0 + %s14829_s28]]   ;;  %s14833_s28 = smov 53  }
  0x4d   :  { %16968 = sst [smem:[#allocation110_spill]] %s15093_s5 }
  0x4e   :  { %s15113_s5 = sld [smem:[%s16898_s0 + %s14824_s22]]   ;;  %s14828_s22 = smov 48  }
  0x50   :  { %16969 = sst [smem:[#allocation111_spill]] %s15103_s25 }
  0x51   :  { %s15123_s25 = sld [smem:[%s16898_s0 + %s14826_s7]]   ;;  %s14830_s7 = smov 50  }
  0x52   :  { %16972 = sst [smem:[#allocation114_spill]] %s15128_s21 }
  0x53   :  { %16974 = sst [smem:[#allocation116_spill]] %s15138_s13 }
  0x54   :  { %16970 = sst [smem:[#allocation112_spill]] %s15113_s5 }
  0x55   :  { %s15133_s5 = sld [smem:[%s16898_s0 + %s14828_s22]]   ;;  %s14832_s22 = smov 52  }
  0x56   :  { %s15148_s21 = sld [smem:[%s16898_s0 + %s14831_s15]]   ;;  %s14835_s15 = smov 55  }
  0x57   :  { %16971 = sst [smem:[#allocation113_spill]] %s15123_s25 }
  0x58   :  { %s15143_s25 = sld [smem:[%s16898_s0 + %s14830_s7]]   ;;  %s14834_s7 = smov 54  }
  0x59   :  { %s15158_s13 = sld [smem:[%s16898_s0 + %s14833_s28]]   ;;  %s14837_s28 = smov 57  }
  0x5b   :  { %16973 = sst [smem:[#allocation115_spill]] %s15133_s5 }
  0x5c   :  { %16976 = sst [smem:[#allocation118_spill]] %s15148_s21 }
  0x5d   :  { %s15153_s5 = sld [smem:[%s16898_s0 + %s14832_s22]]   ;;  %s14836_s22 = smov 56  }
  0x5e   :  { %16975 = sst [smem:[#allocation117_spill]] %s15143_s25 }
  0x5f   :  { %16978 = sst [smem:[#allocation120_spill]] %s15158_s13 }
  0x60   :  { %s15163_s25 = sld [smem:[%s16898_s0 + %s14834_s7]]   ;;  %s14838_s7 = smov 58  }
  0x61   :  { %s15168_s21 = sld [smem:[%s16898_s0 + %s14835_s15]]  }
  0x62   :  { %s15178_s13 = sld [smem:[%s16898_s0 + %s14837_s28]]  }
  0x63   :  { %16977 = sst [smem:[#allocation119_spill]] %s15153_s5 }
  0x64   :  { %s15173_s5 = sld [smem:[%s16898_s0 + %s14836_s22]]  }
  0x66   :  { %16979 = sst [smem:[#allocation121_spill]] %s15163_s25 }
  0x67   :  { %s15183_s25 = sld [smem:[%s16898_s0 + %s14838_s7]]  }
  0x68   :  { %122 = vsyncpa [#allocation7], 0 }
  0x69   :  { %123 = vsyncpa [#allocation9], 0 }
  0x6a   :  { %124 = vsyncpa [#allocation12], 0 }
  0x6b   :  { %125 = vsyncpa [#allocation15], 0 }
  0x6c   :  { %126 = vsyncpa [#allocation18], 0 }
  0x6d   :  { %127 = vsyncpa [#allocation21], 0 }
  0x6e   :  { %128 = vsyncpa [#allocation24], 0 }
  0x6f   :  { %129 = vsyncpa [#allocation27], 0 }
  0x70   :  { %130 = vsyncpa [#allocation30], 0 }
  0x71   :  { %131 = vsyncpa [#allocation33], 0 }
  0x72   :  { %132 = vsyncpa [#allocation36], 0 }
  0x73   :  { %133 = vsyncpa [#allocation39], 0 }
  0x74   :  { %134 = vsyncpa [#allocation42], 0 }
  0x75   :  { %135 = vsyncpa [#allocation45], 0 }
  0x76   :  { %136 = vsyncpa [#allocation48], 0 }
  0x77   :  { %137 = vsyncpa [#allocation51], 0 }
  0x78   :  { %138 = vsyncpa [#allocation54], 0 }
  0x79   :  { %139 = vsyncpa [#allocation57], 0 }
  0x7a   :  { %140 = vsyncpa [#allocation60], 0  ;;  %s14839_s0 = smov [#allocation8]   ;;  %s14840_s16 = smov [#allocation11]  }
  0x7b   :  { %s162_s15 = sshll.u32 %s14839_s0, 4  ;;  %s193_s18 = sshll.u32 %s14840_s16, 4  ;;  %s163_s15 = int_to_ptr.vmem [resolvable:$true] %s162_s15  ;;  %s15185_s18 = int_to_ptr.vmem [resolvable:$true] %s193_s18 }
  0x7c   :  { %s13929_s22 = scalar_lea.hbm %s14908_s17, 256 }
  0x7d   :  { %p13930_p0 = scmp.ne.s32.totalorder %s14908_s17, %s13929_s22  ;;  %p13933_p1 = scmp.lt.u32.totalorder %s13929_s22, %s14908_s17 }
  0x7f   :  { %p13935_p2 = pnand %p13933_p1, %p13930_p0 }
  0x81   :  { %13938 = shalt.err (!%p13935_p2)
}
  0x82   :  { %s13939_s23 = scalar_lea.vmem %s163_s15, 256  ;;  %p13944_p4 = scmp.lt.s32.totalorder %s163_s15, %s163_s15 }
  0x83   :  { %p13940_p3 = scmp.ne.s32.totalorder %s163_s15, %s13939_s23  ;;  %p13945_p5 = scmp.lt.s32.totalorder %s13939_s23, %s13939_s23 }
  0x85   :  { %p13946_p6 = por %p13945_p5, %p13944_p4 }
  0x87   :  { %p13947_p7 = pnand %p13946_p6, %p13940_p3 }
  0x89   :  { %13950 = shalt.err (!%p13947_p7)
}
  0x8a   :  { %s14841_s26 = smov 128   ;;  %s14842_s28 = smov 8  }
  0x8b   :  { %168 = dma.hbm_to_vmem [thread:$0]  %s14908_s17, 256, %s163_s15, [#allocation9], %s14841_s26, %s14841_s26, %s14842_s28  }
  0x8c   :  { %s13951_s1 = scalar_lea.hbm %s14933_s8, 16 }
  0x8d   :  { %p13952_p8 = scmp.ne.s32.totalorder %s14933_s8, %s13951_s1  ;;  %p13955_p9 = scmp.lt.u32.totalorder %s13951_s1, %s14933_s8 }
  0x8f   :  { %p13957_p10 = pnand %p13955_p9, %p13952_p8 }
  0x91   :  { %13960 = shalt.err (!%p13957_p10)
}
  0x92   :  { %s13961_s2 = scalar_lea.vmem %s15185_s18, 16  ;;  %s13965_s7 = scalar_lea.vmem %s15185_s18, 32 }
  0x93   :  { %p13962_p11 = scmp.ne.s32.totalorder %s15185_s18, %s13961_s2  ;;  %p13966_p12 = scmp.lt.s32.totalorder %s15185_s18, %s15185_s18 }
  0x94   :  { %p13967_p13 = scmp.lt.s32.totalorder %s13965_s7, %s13961_s2 }
  0x96   :  { %p13968_p0 = por %p13967_p13, %p13966_p12 }
  0x98   :  { %p13969_p1 = pnand %p13968_p0, %p13962_p11 }
  0x9a   :  { %13972 = shalt.err (!%p13969_p1)
}
  0x9b   :  { %196 = dma.hbm_to_vmem [thread:$0]  %s14933_s8, 16, %s15185_s18, [#allocation12]  }
  0x9c   :  { %s14843_s17 = smov [#allocation14]   ;;  %s14844_s11 = smov [#allocation17]  }
  0x9d   :  { %s213_s10 = sshll.u32 %s14843_s17, 4  ;;  %s233_s0 = sshll.u32 %s14844_s11, 4  ;;  %s214_s10 = int_to_ptr.vmem [resolvable:$true] %s213_s10  ;;  %s234_s0 = int_to_ptr.vmem [resolvable:$true] %s233_s0 }
  0x9e   :  { %s13973_s15 = scalar_lea.hbm %s14943_s19, 16 }
  0x9f   :  { %p13974_p2 = scmp.ne.s32.totalorder %s14943_s19, %s13973_s15  ;;  %p13977_p3 = scmp.lt.u32.totalorder %s13973_s15, %s14943_s19 }
  0xa1   :  { %p13979_p4 = pnand %p13977_p3, %p13974_p2 }
  0xa3   :  { %13982 = shalt.err (!%p13979_p4)
}
  0xa4   :  { %s13983_s16 = scalar_lea.vmem %s214_s10, 16  ;;  %s13987_s22 = scalar_lea.vmem %s214_s10, 32 }
  0xa5   :  { %p13984_p5 = scmp.ne.s32.totalorder %s214_s10, %s13983_s16  ;;  %p13988_p6 = scmp.lt.s32.totalorder %s214_s10, %s214_s10 }
  0xa6   :  { %p13989_p7 = scmp.lt.s32.totalorder %s13987_s22, %s13983_s16 }
  0xa8   :  { %p13990_p8 = por %p13989_p7, %p13988_p6 }
  0xaa   :  { %p13991_p9 = pnand %p13990_p8, %p13984_p5 }
  0xac   :  { %13994 = shalt.err (!%p13991_p9)
}
  0xad   :  { %216 = dma.hbm_to_vmem [thread:$0]  %s14943_s19, 16, %s214_s10, [#allocation15]  }
  0xae   :  { %s13995_s8 = scalar_lea.hbm %s14953_s30, 16 }
  0xaf   :  { %p13996_p10 = scmp.ne.s32.totalorder %s14953_s30, %s13995_s8  ;;  %p13999_p11 = scmp.lt.u32.totalorder %s13995_s8, %s14953_s30 }
  0xb1   :  { %p14001_p12 = pnand %p13999_p11, %p13996_p10 }
  0xb3   :  { %14004 = shalt.err (!%p14001_p12)
}
  0xb4   :  { %s14005_s18 = scalar_lea.vmem %s234_s0, 16  ;;  %s14009_s23 = scalar_lea.vmem %s234_s0, 32 }
  0xb5   :  { %p14006_p13 = scmp.ne.s32.totalorder %s234_s0, %s14005_s18  ;;  %p14010_p0 = scmp.lt.s32.totalorder %s234_s0, %s234_s0 }
  0xb6   :  { %p14011_p1 = scmp.lt.s32.totalorder %s14009_s23, %s14005_s18 }
  0xb8   :  { %p14012_p2 = por %p14011_p1, %p14010_p0 }
  0xba   :  { %p14013_p3 = pnand %p14012_p2, %p14006_p13 }
  0xbc   :  { %14016 = shalt.err (!%p14013_p3)
}
  0xbd   :  { %236 = dma.hbm_to_vmem [thread:$0]  %s14953_s30, 16, %s234_s0, [#allocation18]  }
  0xbe   :  { %s14845_s1 = smov [#allocation20]   ;;  %s14846_s2 = smov [#allocation23]  }
  0xbf   :  { %s265_s19 = sshll.u32 %s14845_s1, 4  ;;  %s285_s7 = sshll.u32 %s14846_s2, 4  ;;  %s266_s19 = int_to_ptr.vmem [resolvable:$true] %s265_s19  ;;  %s286_s7 = int_to_ptr.vmem [resolvable:$true] %s285_s7 }
  0xc0   :  { %s14017_s17 = scalar_lea.hbm %s14993_s27, 16 }
  0xc1   :  { %p14018_p4 = scmp.ne.s32.totalorder %s14993_s27, %s14017_s17  ;;  %p14021_p5 = scmp.lt.u32.totalorder %s14017_s17, %s14993_s27 }
  0xc3   :  { %p14023_p6 = pnand %p14021_p5, %p14018_p4 }
  0xc5   :  { %14026 = shalt.err (!%p14023_p6)
}
  0xc6   :  { %s14027_s10 = scalar_lea.vmem %s266_s19, 16  ;;  %s14031_s11 = scalar_lea.vmem %s266_s19, 32 }
  0xc7   :  { %p14028_p7 = scmp.ne.s32.totalorder %s266_s19, %s14027_s10  ;;  %p14032_p8 = scmp.lt.s32.totalorder %s266_s19, %s266_s19 }
  0xc8   :  { %p14033_p9 = scmp.lt.s32.totalorder %s14031_s11, %s14027_s10 }
  0xca   :  { %p14034_p10 = por %p14033_p9, %p14032_p8 }
  0xcc   :  { %p14035_p11 = pnand %p14034_p10, %p14028_p7 }
  0xce   :  { %14038 = shalt.err (!%p14035_p11)
}
  0xcf   :  { %268 = dma.hbm_to_vmem [thread:$0]  %s14993_s27, 16, %s266_s19, [#allocation21]  }
  0xd0   :  { %s14039_s30 = scalar_lea.hbm %s15003_s12, 16 }
  0xd1   :  { %p14040_p12 = scmp.ne.s32.totalorder %s15003_s12, %s14039_s30  ;;  %p14043_p13 = scmp.lt.u32.totalorder %s14039_s30, %s15003_s12 }
  0xd3   :  { %p14045_p0 = pnand %p14043_p13, %p14040_p12 }
  0xd5   :  { %14048 = shalt.err (!%p14045_p0)
}
  0xd6   :  { %s14049_s0 = scalar_lea.vmem %s286_s7, 16  ;;  %s14053_s15 = scalar_lea.vmem %s286_s7, 32 }
  0xd7   :  { %p14050_p1 = scmp.ne.s32.totalorder %s286_s7, %s14049_s0  ;;  %p14054_p2 = scmp.lt.s32.totalorder %s286_s7, %s286_s7 }
  0xd8   :  { %p14055_p3 = scmp.lt.s32.totalorder %s14053_s15, %s14049_s0 }
  0xda   :  { %p14056_p4 = por %p14055_p3, %p14054_p2 }
  0xdc   :  { %p14057_p5 = pnand %p14056_p4, %p14050_p1 }
  0xde   :  { %14060 = shalt.err (!%p14057_p5)
}
  0xdf   :  { %288 = dma.hbm_to_vmem [thread:$0]  %s15003_s12, 16, %s286_s7, [#allocation24]  }
  0xe0   :  { %s14847_s16 = smov [#allocation26]   ;;  %s14848_s22 = smov [#allocation29]  }
  0xe1   :  { %s305_s27 = sshll.u32 %s14847_s16, 4  ;;  %s334_s8 = sshll.u32 %s14848_s22, 4  ;;  %s306_s27 = int_to_ptr.vmem [resolvable:$true] %s305_s27  ;;  %s15220_s8 = int_to_ptr.vmem [resolvable:$true] %s334_s8 }
  0xe2   :  { %s14061_s18 = scalar_lea.hbm %s15013_s29, 16 }
  0xe3   :  { %p14062_p6 = scmp.ne.s32.totalorder %s15013_s29, %s14061_s18  ;;  %p14065_p7 = scmp.lt.u32.totalorder %s14061_s18, %s15013_s29 }
  0xe5   :  { %p14067_p8 = pnand %p14065_p7, %p14062_p6 }
  0xe7   :  { %14070 = shalt.err (!%p14067_p8)
}
  0xe8   :  { %s14071_s23 = scalar_lea.vmem %s306_s27, 16  ;;  %s14075_s1 = scalar_lea.vmem %s306_s27, 32 }
  0xe9   :  { %p14072_p9 = scmp.ne.s32.totalorder %s306_s27, %s14071_s23  ;;  %p14076_p10 = scmp.lt.s32.totalorder %s306_s27, %s306_s27 }
  0xea   :  { %p14077_p11 = scmp.lt.s32.totalorder %s14075_s1, %s14071_s23 }
  0xec   :  { %p14078_p12 = por %p14077_p11, %p14076_p10 }
  0xee   :  { %p14079_p13 = pnand %p14078_p12, %p14072_p9 }
  0xf0   :  { %14082 = shalt.err (!%p14079_p13)
}
  0xf1   :  { %308 = dma.hbm_to_vmem [thread:$0]  %s15013_s29, 16, %s306_s27, [#allocation27]  }
  0xf2   :  { %s14083_s12 = scalar_lea.hbm %s15048_s9, 512 }
  0xf3   :  { %p14084_p0 = scmp.ne.s32.totalorder %s15048_s9, %s14083_s12  ;;  %p14087_p1 = scmp.lt.u32.totalorder %s14083_s12, %s15048_s9 }
  0xf5   :  { %p14089_p2 = pnand %p14087_p1, %p14084_p0 }
  0xf7   :  { %14092 = shalt.err (!%p14089_p2)
}
  0xf8   :  { %s14093_s19 = scalar_lea.vmem %s15220_s8, 512  ;;  %p14098_p4 = scmp.lt.s32.totalorder %s15220_s8, %s15220_s8 }
  0xf9   :  { %p14094_p3 = scmp.ne.s32.totalorder %s15220_s8, %s14093_s19  ;;  %p14099_p5 = scmp.lt.s32.totalorder %s14093_s19, %s14093_s19 }
  0xfb   :  { %p14100_p6 = por %p14099_p5, %p14098_p4 }
  0xfd   :  { %p14101_p7 = pnand %p14100_p6, %p14094_p3 }
  0xff   :  { %14104 = shalt.err (!%p14101_p7)
}
 0x100   :  { %340 = dma.hbm_to_vmem [thread:$0]  %s15048_s9, 512, %s15220_s8, [#allocation30], %s14841_s26, %s14841_s26, %s14842_s28  }
 0x101   :  { %s14849_s29 = smov [#allocation32]   ;;  %s14850_s7 = smov [#allocation35]  }
 0x102   :  { %s357_s2 = sshll.u32 %s14849_s29, 4  ;;  %s377_s17 = sshll.u32 %s14850_s7, 4  ;;  %s358_s2 = int_to_ptr.vmem [resolvable:$true] %s357_s2  ;;  %s378_s17 = int_to_ptr.vmem [resolvable:$true] %s377_s17 }
 0x103   :  { %s14105_s10 = scalar_lea.hbm %s15058_s3, 16 }
 0x104   :  { %p14106_p8 = scmp.ne.s32.totalorder %s15058_s3, %s14105_s10  ;;  %p14109_p9 = scmp.lt.u32.totalorder %s14105_s10, %s15058_s3 }
 0x106   :  { %p14111_p10 = pnand %p14109_p9, %p14106_p8 }
 0x108   :  { %14114 = shalt.err (!%p14111_p10)
}
 0x109   :  { %s14115_s11 = scalar_lea.vmem %s358_s2, 16  ;;  %s14119_s30 = scalar_lea.vmem %s358_s2, 32 }
 0x10a   :  { %p14116_p11 = scmp.ne.s32.totalorder %s358_s2, %s14115_s11  ;;  %p14120_p12 = scmp.lt.s32.totalorder %s358_s2, %s358_s2 }
 0x10b   :  { %p14121_p13 = scmp.lt.s32.totalorder %s14119_s30, %s14115_s11 }
 0x10d   :  { %p14122_p0 = por %p14121_p13, %p14120_p12 }
 0x10f   :  { %p14123_p1 = pnand %p14122_p0, %p14116_p11 }
 0x111   :  { %14126 = shalt.err (!%p14123_p1)
}
 0x112   :  { %360 = dma.hbm_to_vmem [thread:$0]  %s15058_s3, 16, %s358_s2, [#allocation33]  }
 0x113   :  { %s14127_s9 = scalar_lea.hbm %s15068_s20, 16 }
 0x114   :  { %p14128_p2 = scmp.ne.s32.totalorder %s15068_s20, %s14127_s9  ;;  %p14131_p3 = scmp.lt.u32.totalorder %s14127_s9, %s15068_s20 }
 0x116   :  { %p14133_p4 = pnand %p14131_p3, %p14128_p2 }
 0x118   :  { %14136 = shalt.err (!%p14133_p4)
}
 0x119   :  { %s14137_s0 = scalar_lea.vmem %s378_s17, 16  ;;  %s14141_s15 = scalar_lea.vmem %s378_s17, 32 }
 0x11a   :  { %p14138_p5 = scmp.ne.s32.totalorder %s378_s17, %s14137_s0  ;;  %p14142_p6 = scmp.lt.s32.totalorder %s378_s17, %s378_s17 }
 0x11b   :  { %p14143_p7 = scmp.lt.s32.totalorder %s14141_s15, %s14137_s0 }
 0x11d   :  { %p14144_p8 = por %p14143_p7, %p14142_p6 }
 0x11f   :  { %p14145_p9 = pnand %p14144_p8, %p14138_p5 }
 0x121   :  { %14148 = shalt.err (!%p14145_p9)
}
 0x122   :  { %380 = dma.hbm_to_vmem [thread:$0]  %s15068_s20, 16, %s378_s17, [#allocation36]  }
 0x123   :  { %s14851_s16 = smov [#allocation38]   ;;  %s14852_s27 = smov [#allocation41]  }
 0x124   :  { %s397_s3 = sshll.u32 %s14851_s16, 4  ;;  %s422_s22 = sshll.u32 %s14852_s27, 4  ;;  %s398_s3 = int_to_ptr.vmem [resolvable:$true] %s397_s3  ;;  %s15246_s22 = int_to_ptr.vmem [resolvable:$true] %s422_s22 }
 0x125   :  { %s14149_s8 = scalar_lea.hbm %s15078_s4, 16 }
 0x126   :  { %p14150_p10 = scmp.ne.s32.totalorder %s15078_s4, %s14149_s8  ;;  %p14153_p11 = scmp.lt.u32.totalorder %s14149_s8, %s15078_s4 }
 0x128   :  { %p14155_p12 = pnand %p14153_p11, %p14150_p10 }
 0x12a   :  { %14158 = shalt.err (!%p14155_p12)
}
 0x12b   :  { %s14159_s18 = scalar_lea.vmem %s398_s3, 16  ;;  %s14163_s23 = scalar_lea.vmem %s398_s3, 32 }
 0x12c   :  { %p14160_p13 = scmp.ne.s32.totalorder %s398_s3, %s14159_s18  ;;  %p14164_p0 = scmp.lt.s32.totalorder %s398_s3, %s398_s3 }
 0x12d   :  { %p14165_p1 = scmp.lt.s32.totalorder %s14163_s23, %s14159_s18 }
 0x12f   :  { %p14166_p2 = por %p14165_p1, %p14164_p0 }
 0x131   :  { %p14167_p3 = pnand %p14166_p2, %p14160_p13 }
 0x133   :  { %14170 = shalt.err (!%p14167_p3)
}
 0x134   :  { %400 = dma.hbm_to_vmem [thread:$0]  %s15078_s4, 16, %s398_s3, [#allocation39]  }
 0x135   :  { %s14171_s20 = scalar_lea.hbm %s15098_s24, 512 }
 0x136   :  { %p14172_p4 = scmp.ne.s32.totalorder %s15098_s24, %s14171_s20  ;;  %p14175_p5 = scmp.lt.u32.totalorder %s14171_s20, %s15098_s24 }
 0x138   :  { %p14177_p6 = pnand %p14175_p5, %p14172_p4 }
 0x13a   :  { %14180 = shalt.err (!%p14177_p6)
}
 0x13b   :  { %s14181_s1 = scalar_lea.vmem %s15246_s22, 512  ;;  %p14186_p8 = scmp.lt.s32.totalorder %s15246_s22, %s15246_s22 }
 0x13c   :  { %p14182_p7 = scmp.ne.s32.totalorder %s15246_s22, %s14181_s1  ;;  %p14187_p9 = scmp.lt.s32.totalorder %s14181_s1, %s14181_s1 }
 0x13e   :  { %p14188_p10 = por %p14187_p9, %p14186_p8 }
 0x140   :  { %p14189_p11 = pnand %p14188_p10, %p14182_p7 }
 0x142   :  { %14192 = shalt.err (!%p14189_p11)
}
 0x143   :  { %428 = dma.hbm_to_vmem [thread:$0]  %s15098_s24, 512, %s15246_s22, [#allocation42], %s14841_s26, %s14841_s26, %s14842_s28  }
 0x144   :  { %s14853_s4 = smov [#allocation44]   ;;  %s14854_s19 = smov [#allocation47]  }
 0x145   :  { %s446_s12 = sshll.u32 %s14853_s4, 4  ;;  %s469_s29 = sshll.u32 %s14854_s19, 4  ;;  %s447_s12 = int_to_ptr.vmem [resolvable:$true] %s446_s12  ;;  %s470_s29 = int_to_ptr.vmem [resolvable:$true] %s469_s29 }
 0x146   :  { %s14193_s2 = scalar_lea.hbm %s15108_s6, 512 }
 0x147   :  { %p14194_p12 = scmp.ne.s32.totalorder %s15108_s6, %s14193_s2  ;;  %p14197_p13 = scmp.lt.u32.totalorder %s14193_s2, %s15108_s6 }
 0x149   :  { %p14199_p0 = pnand %p14197_p13, %p14194_p12 }
 0x14b   :  { %14202 = shalt.err (!%p14199_p0)
}
 0x14c   :  { %s14203_s7 = scalar_lea.vmem %s447_s12, 512  ;;  %p14208_p2 = scmp.lt.s32.totalorder %s447_s12, %s447_s12 }
 0x14d   :  { %p14204_p1 = scmp.ne.s32.totalorder %s447_s12, %s14203_s7  ;;  %p14209_p3 = scmp.lt.s32.totalorder %s14203_s7, %s14203_s7 }
 0x14f   :  { %p14210_p4 = por %p14209_p3, %p14208_p2 }
 0x151   :  { %p14211_p5 = pnand %p14210_p4, %p14204_p1 }
 0x153   :  { %14214 = shalt.err (!%p14211_p5)
}
 0x154   :  { %452 = dma.hbm_to_vmem [thread:$0]  %s15108_s6, 512, %s447_s12, [#allocation45], %s14841_s26, %s14841_s26, %s14842_s28  }
 0x155   :  { %s14215_s24 = scalar_lea.hbm %s15118_s14, 16 }
 0x156   :  { %p14216_p6 = scmp.ne.s32.totalorder %s15118_s14, %s14215_s24  ;;  %p14219_p7 = scmp.lt.u32.totalorder %s14215_s24, %s15118_s14 }
 0x158   :  { %p14221_p8 = pnand %p14219_p7, %p14216_p6 }
 0x15a   :  { %14224 = shalt.err (!%p14221_p8)
}
 0x15b   :  { %s14225_s17 = scalar_lea.vmem %s470_s29, 16  ;;  %s14229_s10 = scalar_lea.vmem %s470_s29, 32 }
 0x15c   :  { %p14226_p9 = scmp.ne.s32.totalorder %s470_s29, %s14225_s17  ;;  %p14230_p10 = scmp.lt.s32.totalorder %s470_s29, %s470_s29 }
 0x15d   :  { %p14231_p11 = scmp.lt.s32.totalorder %s14229_s10, %s14225_s17 }
 0x15f   :  { %p14232_p12 = por %p14231_p11, %p14230_p10 }
 0x161   :  { %p14233_p13 = pnand %p14232_p12, %p14226_p9 }
 0x163   :  { %14236 = shalt.err (!%p14233_p13)
}
 0x164   :  { %s16980_s11 = sld [smem:[#allocation114_spill]]  ;;  %s14855_s30 = smov [#allocation50]  }
 0x165   :  { %472 = dma.hbm_to_vmem [thread:$0]  %s15118_s14, 16, %s470_s29, [#allocation48]  }
 0x166   :  { %s489_s6 = sshll.u32 %s14855_s30, 4  ;;  %s14856_s9 = smov [#allocation53]   ;;  %s490_s6 = int_to_ptr.vmem [resolvable:$true] %s489_s6 }
 0x167   :  { %s509_s0 = sshll.u32 %s14856_s9, 4  ;;  %s510_s0 = int_to_ptr.vmem [resolvable:$true] %s509_s0 }
 0x16a   :  { %s14237_s15 = scalar_lea.hbm %s16980_s11, 16 }
 0x16b   :  { %p14238_p0 = scmp.ne.s32.totalorder %s16980_s11, %s14237_s15  ;;  %p14241_p1 = scmp.lt.u32.totalorder %s14237_s15, %s16980_s11 }
 0x16d   :  { %p14243_p2 = pnand %p14241_p1, %p14238_p0 }
 0x16f   :  { %14246 = shalt.err (!%p14243_p2)
}
 0x170   :  { %s14247_s16 = scalar_lea.vmem %s490_s6, 16  ;;  %s14251_s3 = scalar_lea.vmem %s490_s6, 32 }
 0x171   :  { %p14248_p3 = scmp.ne.s32.totalorder %s490_s6, %s14247_s16  ;;  %p14252_p4 = scmp.lt.s32.totalorder %s490_s6, %s490_s6 }
 0x172   :  { %p14253_p5 = scmp.lt.s32.totalorder %s14251_s3, %s14247_s16 }
 0x174   :  { %p14254_p6 = por %p14253_p5, %p14252_p4 }
 0x176   :  { %p14255_p7 = pnand %p14254_p6, %p14248_p3 }
 0x178   :  { %14258 = shalt.err (!%p14255_p7)
}
 0x179   :  { %s16981_s14 = sld [smem:[#allocation116_spill]] }
 0x17a   :  { %492 = dma.hbm_to_vmem [thread:$0]  %s16980_s11, 16, %s490_s6, [#allocation51]  }
 0x17f   :  { %s14259_s27 = scalar_lea.hbm %s16981_s14, 16 }
 0x180   :  { %p14260_p8 = scmp.ne.s32.totalorder %s16981_s14, %s14259_s27  ;;  %p14263_p9 = scmp.lt.u32.totalorder %s14259_s27, %s16981_s14 }
 0x182   :  { %p14265_p10 = pnand %p14263_p9, %p14260_p8 }
 0x184   :  { %14268 = shalt.err (!%p14265_p10)
}
 0x185   :  { %s14269_s22 = scalar_lea.vmem %s510_s0, 16  ;;  %s14273_s8 = scalar_lea.vmem %s510_s0, 32 }
 0x186   :  { %p14270_p11 = scmp.ne.s32.totalorder %s510_s0, %s14269_s22  ;;  %p14274_p12 = scmp.lt.s32.totalorder %s510_s0, %s510_s0 }
 0x187   :  { %p14275_p13 = scmp.lt.s32.totalorder %s14273_s8, %s14269_s22 }
 0x189   :  { %p14276_p0 = por %p14275_p13, %p14274_p12 }
 0x18b   :  { %p14277_p1 = pnand %p14276_p0, %p14270_p11 }
 0x18d   :  { %14280 = shalt.err (!%p14277_p1)
}
 0x18e   :  { %s16982_s18 = sld [smem:[#allocation119_spill]]  ;;  %s14857_s23 = smov [#allocation56]  }
 0x18f   :  { %512 = dma.hbm_to_vmem [thread:$0]  %s16981_s14, 16, %s510_s0, [#allocation54]  }
 0x190   :  { %s531_s20 = sshll.u32 %s14857_s23, 4  ;;  %s14858_s1 = smov [#allocation59]   ;;  %s532_s20 = int_to_ptr.vmem [resolvable:$true] %s531_s20 }
 0x191   :  { %s553_s4 = sshll.u32 %s14858_s1, 4  ;;  %s554_s4 = int_to_ptr.vmem [resolvable:$true] %s553_s4 }
 0x194   :  { %s14281_s12 = scalar_lea.hbm %s16982_s18, 16 }
 0x195   :  { %p14282_p2 = scmp.ne.s32.totalorder %s16982_s18, %s14281_s12  ;;  %p14285_p3 = scmp.lt.u32.totalorder %s14281_s12, %s16982_s18 }
 0x197   :  { %p14287_p4 = pnand %p14285_p3, %p14282_p2 }
 0x199   :  { %14290 = shalt.err (!%p14287_p4)
}
 0x19a   :  { %s14291_s19 = scalar_lea.vmem %s532_s20, 16  ;;  %s14295_s29 = scalar_lea.vmem %s532_s20, 32 }
 0x19b   :  { %p14292_p5 = scmp.ne.s32.totalorder %s532_s20, %s14291_s19  ;;  %p14296_p6 = scmp.lt.s32.totalorder %s532_s20, %s532_s20 }
 0x19c   :  { %p14297_p7 = scmp.lt.s32.totalorder %s14295_s29, %s14291_s19 }
 0x19e   :  { %p14298_p8 = por %p14297_p7, %p14296_p6 }
 0x1a0   :  { %p14299_p9 = pnand %p14298_p8, %p14292_p5 }
 0x1a2   :  { %14302 = shalt.err (!%p14299_p9)
}
 0x1a3   :  { %534 = dma.hbm_to_vmem [thread:$0]  %s16982_s18, 16, %s532_s20, [#allocation57]  }
 0x1a4   :  { %s14303_s2 = scalar_lea.hbm %s15168_s21, 16 }
 0x1a5   :  { %p14304_p10 = scmp.ne.s32.totalorder %s15168_s21, %s14303_s2  ;;  %p14307_p11 = scmp.lt.u32.totalorder %s14303_s2, %s15168_s21 }
 0x1a7   :  { %p14309_p12 = pnand %p14307_p11, %p14304_p10 }
 0x1a9   :  { %14312 = shalt.err (!%p14309_p12)
}
 0x1aa   :  { %s14313_s7 = scalar_lea.vmem %s554_s4, 16  ;;  %s14317_s24 = scalar_lea.vmem %s554_s4, 32 }
 0x1ab   :  { %p14314_p13 = scmp.ne.s32.totalorder %s554_s4, %s14313_s7  ;;  %p14318_p0 = scmp.lt.s32.totalorder %s554_s4, %s554_s4 }
 0x1ac   :  { %p14319_p1 = scmp.lt.s32.totalorder %s14317_s24, %s14313_s7 }
 0x1ae   :  { %p14320_p2 = por %p14319_p1, %p14318_p0 }
 0x1b0   :  { %p14321_p3 = pnand %p14320_p2, %p14314_p13 }
 0x1b2   :  { %14324 = shalt.err (!%p14321_p3)
}
 0x1b3   :  { %s16983_s17 = sld [smem:[#allocation83_spill]]  ;;  %s14859_s10 = smov [#allocation6]  }
 0x1b4   :  { %556 = dma.hbm_to_vmem [thread:$0]  %s15168_s21, 16, %s554_s4, [#allocation60]  }
 0x1b5   :  { %s150_s11 = sshll.u32 %s14859_s10, 4  ;;  %s14860_s30 = smov [#allocation10]   ;;  %s151_s11 = int_to_ptr.vmem [resolvable:$true] %s150_s11 }
 0x1b6   :  { %s174_s6 = sshll.u32 %s14860_s30, 4  ;;  %s15291_s6 = int_to_ptr.vmem [resolvable:$true] %s174_s6 }
 0x1b9   :  { %s14325_s9 = scalar_lea.hbm %s16983_s17, 256 }
 0x1ba   :  { %p14326_p4 = scmp.ne.s32.totalorder %s16983_s17, %s14325_s9  ;;  %p14329_p5 = scmp.lt.u32.totalorder %s14325_s9, %s16983_s17 }
 0x1bc   :  { %p14331_p6 = pnand %p14329_p5, %p14326_p4 }
 0x1be   :  { %14334 = shalt.err (!%p14331_p6)
}
 0x1bf   :  { %s14335_s0 = scalar_lea.vmem %s151_s11, 256  ;;  %p14340_p8 = scmp.lt.s32.totalorder %s151_s11, %s151_s11 }
 0x1c0   :  { %p14336_p7 = scmp.ne.s32.totalorder %s151_s11, %s14335_s0  ;;  %p14341_p9 = scmp.lt.s32.totalorder %s14335_s0, %s14335_s0 }
 0x1c2   :  { %p14342_p10 = por %p14341_p9, %p14340_p8 }
 0x1c4   :  { %p14343_p11 = pnand %p14342_p10, %p14336_p7 }
 0x1c6   :  { %14346 = shalt.err (!%p14343_p11)
}
 0x1c7   :  { %s16984_s21 = sld [smem:[#allocation84_spill]] }
 0x1c8   :  { %156 = dma.hbm_to_vmem [thread:$0]  %s16983_s17, 256, %s151_s11, [#allocation7], %s14841_s26, %s14841_s26, %s14842_s28  }
 0x1cd   :  { %s14347_s15 = scalar_lea.hbm %s16984_s21, 256 }
 0x1ce   :  { %p14348_p12 = scmp.ne.s32.totalorder %s16984_s21, %s14347_s15  ;;  %p14351_p13 = scmp.lt.u32.totalorder %s14347_s15, %s16984_s21 }
 0x1d0   :  { %p14353_p0 = pnand %p14351_p13, %p14348_p12 }
 0x1d2   :  { %14356 = shalt.err (!%p14353_p0)
}
 0x1d3   :  { %s14357_s16 = scalar_lea.vmem %s15291_s6, 256  ;;  %p14362_p2 = scmp.lt.s32.totalorder %s15291_s6, %s15291_s6 }
 0x1d4   :  { %p14358_p1 = scmp.ne.s32.totalorder %s15291_s6, %s14357_s16  ;;  %p14363_p3 = scmp.lt.s32.totalorder %s14357_s16, %s14357_s16 }
 0x1d6   :  { %p14364_p4 = por %p14363_p3, %p14362_p2 }
 0x1d8   :  { %p14365_p5 = pnand %p14364_p4, %p14358_p1 }
 0x1da   :  { %14368 = shalt.err (!%p14365_p5)
}
 0x1db   :  { %s16985_s3 = sld [smem:[#allocation88_spill]]  ;;  %s14861_s14 = smov [#allocation13]  }
 0x1dc   :  { %180 = dma.hbm_to_vmem [thread:$0]  %s16984_s21, 256, %s15291_s6, [#allocation9], %s14841_s26, %s14841_s26, %s14842_s28  }
 0x1dd   :  { %s203_s27 = sshll.u32 %s14861_s14, 4  ;;  %s14862_s22 = smov [#allocation16]   ;;  %s204_s27 = int_to_ptr.vmem [resolvable:$true] %s203_s27 }
 0x1de   :  { %s223_s8 = sshll.u32 %s14862_s22, 4  ;;  %s224_s8 = int_to_ptr.vmem [resolvable:$true] %s223_s8 }
 0x1e1   :  { %s14369_s18 = scalar_lea.hbm %s16985_s3, 16 }
 0x1e2   :  { %p14370_p6 = scmp.ne.s32.totalorder %s16985_s3, %s14369_s18  ;;  %p14373_p7 = scmp.lt.u32.totalorder %s14369_s18, %s16985_s3 }
 0x1e4   :  { %p14375_p8 = pnand %p14373_p7, %p14370_p6 }
 0x1e6   :  { %14378 = shalt.err (!%p14375_p8)
}
 0x1e7   :  { %s14379_s23 = scalar_lea.vmem %s204_s27, 16  ;;  %s14383_s20 = scalar_lea.vmem %s204_s27, 32 }
 0x1e8   :  { %p14380_p9 = scmp.ne.s32.totalorder %s204_s27, %s14379_s23  ;;  %p14384_p10 = scmp.lt.s32.totalorder %s204_s27, %s204_s27 }
 0x1e9   :  { %p14385_p11 = scmp.lt.s32.totalorder %s14383_s20, %s14379_s23 }
 0x1eb   :  { %p14386_p12 = por %p14385_p11, %p14384_p10 }
 0x1ed   :  { %p14387_p13 = pnand %p14386_p12, %p14380_p9 }
 0x1ef   :  { %14390 = shalt.err (!%p14387_p13)
}
 0x1f0   :  { %s16986_s1 = sld [smem:[#allocation89_spill]] }
 0x1f1   :  { %206 = dma.hbm_to_vmem [thread:$0]  %s16985_s3, 16, %s204_s27, [#allocation12]  }
 0x1f6   :  { %s14391_s4 = scalar_lea.hbm %s16986_s1, 16 }
 0x1f7   :  { %p14392_p0 = scmp.ne.s32.totalorder %s16986_s1, %s14391_s4  ;;  %p14395_p1 = scmp.lt.u32.totalorder %s14391_s4, %s16986_s1 }
 0x1f9   :  { %p14397_p2 = pnand %p14395_p1, %p14392_p0 }
 0x1fb   :  { %14400 = shalt.err (!%p14397_p2)
}
 0x1fc   :  { %s14401_s12 = scalar_lea.vmem %s224_s8, 16  ;;  %s14405_s19 = scalar_lea.vmem %s224_s8, 32 }
 0x1fd   :  { %p14402_p3 = scmp.ne.s32.totalorder %s224_s8, %s14401_s12  ;;  %p14406_p4 = scmp.lt.s32.totalorder %s224_s8, %s224_s8 }
 0x1fe   :  { %p14407_p5 = scmp.lt.s32.totalorder %s14405_s19, %s14401_s12 }
 0x200   :  { %p14408_p6 = por %p14407_p5, %p14406_p4 }
 0x202   :  { %p14409_p7 = pnand %p14408_p6, %p14402_p3 }
 0x204   :  { %14412 = shalt.err (!%p14409_p7)
}
 0x205   :  { %s16987_s29 = sld [smem:[#allocation90_spill]]  ;;  %s14863_s2 = smov [#allocation19]  }
 0x206   :  { %226 = dma.hbm_to_vmem [thread:$0]  %s16986_s1, 16, %s224_s8, [#allocation15]  }
 0x207   :  { %s243_s7 = sshll.u32 %s14863_s2, 4  ;;  %s14864_s24 = smov [#allocation22]   ;;  %s244_s7 = int_to_ptr.vmem [resolvable:$true] %s243_s7 }
 0x208   :  { %s275_s17 = sshll.u32 %s14864_s24, 4  ;;  %s276_s17 = int_to_ptr.vmem [resolvable:$true] %s275_s17 }
 0x20b   :  { %s14413_s10 = scalar_lea.hbm %s16987_s29, 16 }
 0x20c   :  { %p14414_p8 = scmp.ne.s32.totalorder %s16987_s29, %s14413_s10  ;;  %p14417_p9 = scmp.lt.u32.totalorder %s14413_s10, %s16987_s29 }
 0x20e   :  { %p14419_p10 = pnand %p14417_p9, %p14414_p8 }
 0x210   :  { %14422 = shalt.err (!%p14419_p10)
}
 0x211   :  { %s14423_s11 = scalar_lea.vmem %s244_s7, 16  ;;  %s14427_s30 = scalar_lea.vmem %s244_s7, 32 }
 0x212   :  { %p14424_p11 = scmp.ne.s32.totalorder %s244_s7, %s14423_s11  ;;  %p14428_p12 = scmp.lt.s32.totalorder %s244_s7, %s244_s7 }
 0x213   :  { %p14429_p13 = scmp.lt.s32.totalorder %s14427_s30, %s14423_s11 }
 0x215   :  { %p14430_p0 = por %p14429_p13, %p14428_p12 }
 0x217   :  { %p14431_p1 = pnand %p14430_p0, %p14424_p11 }
 0x219   :  { %14434 = shalt.err (!%p14431_p1)
}
 0x21a   :  { %s16988_s6 = sld [smem:[#allocation97_spill]] }
 0x21b   :  { %246 = dma.hbm_to_vmem [thread:$0]  %s16987_s29, 16, %s244_s7, [#allocation18]  }
 0x220   :  { %s14435_s9 = scalar_lea.hbm %s16988_s6, 16 }
 0x221   :  { %p14436_p2 = scmp.ne.s32.totalorder %s16988_s6, %s14435_s9  ;;  %p14439_p3 = scmp.lt.u32.totalorder %s14435_s9, %s16988_s6 }
 0x223   :  { %p14441_p4 = pnand %p14439_p3, %p14436_p2 }
 0x225   :  { %14444 = shalt.err (!%p14441_p4)
}
 0x226   :  { %s14445_s0 = scalar_lea.vmem %s276_s17, 16  ;;  %s14449_s21 = scalar_lea.vmem %s276_s17, 32 }
 0x227   :  { %p14446_p5 = scmp.ne.s32.totalorder %s276_s17, %s14445_s0  ;;  %p14450_p6 = scmp.lt.s32.totalorder %s276_s17, %s276_s17 }
 0x228   :  { %p14451_p7 = scmp.lt.s32.totalorder %s14449_s21, %s14445_s0 }
 0x22a   :  { %p14452_p8 = por %p14451_p7, %p14450_p6 }
 0x22c   :  { %p14453_p9 = pnand %p14452_p8, %p14446_p5 }
 0x22e   :  { %14456 = shalt.err (!%p14453_p9)
}
 0x22f   :  { %s16989_s15 = sld [smem:[#allocation98_spill]]  ;;  %s14865_s16 = smov [#allocation25]  }
 0x230   :  { %278 = dma.hbm_to_vmem [thread:$0]  %s16988_s6, 16, %s276_s17, [#allocation21]  }
 0x231   :  { %s295_s3 = sshll.u32 %s14865_s16, 4  ;;  %s14866_s14 = smov [#allocation28]   ;;  %s296_s3 = int_to_ptr.vmem [resolvable:$true] %s295_s3 }
 0x232   :  { %s315_s27 = sshll.u32 %s14866_s14, 4  ;;  %s316_s27 = int_to_ptr.vmem [resolvable:$true] %s315_s27 }
 0x235   :  { %s14457_s22 = scalar_lea.hbm %s16989_s15, 16 }
 0x236   :  { %p14458_p10 = scmp.ne.s32.totalorder %s16989_s15, %s14457_s22  ;;  %p14461_p11 = scmp.lt.u32.totalorder %s14457_s22, %s16989_s15 }
 0x238   :  { %p14463_p12 = pnand %p14461_p11, %p14458_p10 }
 0x23a   :  { %14466 = shalt.err (!%p14463_p12)
}
 0x23b   :  { %s14467_s8 = scalar_lea.vmem %s296_s3, 16  ;;  %s14471_s18 = scalar_lea.vmem %s296_s3, 32 }
 0x23c   :  { %p14468_p13 = scmp.ne.s32.totalorder %s296_s3, %s14467_s8  ;;  %p14472_p0 = scmp.lt.s32.totalorder %s296_s3, %s296_s3 }
 0x23d   :  { %p14473_p1 = scmp.lt.s32.totalorder %s14471_s18, %s14467_s8 }
 0x23f   :  { %p14474_p2 = por %p14473_p1, %p14472_p0 }
 0x241   :  { %p14475_p3 = pnand %p14474_p2, %p14468_p13 }
 0x243   :  { %14478 = shalt.err (!%p14475_p3)
}
 0x244   :  { %s16990_s23 = sld [smem:[#allocation99_spill]] }
 0x245   :  { %298 = dma.hbm_to_vmem [thread:$0]  %s16989_s15, 16, %s296_s3, [#allocation24]  }
 0x24a   :  { %s14479_s20 = scalar_lea.hbm %s16990_s23, 16 }
 0x24b   :  { %p14480_p4 = scmp.ne.s32.totalorder %s16990_s23, %s14479_s20  ;;  %p14483_p5 = scmp.lt.u32.totalorder %s14479_s20, %s16990_s23 }
 0x24d   :  { %p14485_p6 = pnand %p14483_p5, %p14480_p4 }
 0x24f   :  { %14488 = shalt.err (!%p14485_p6)
}
 0x250   :  { %s14489_s1 = scalar_lea.vmem %s316_s27, 16  ;;  %s14493_s4 = scalar_lea.vmem %s316_s27, 32 }
 0x251   :  { %p14490_p7 = scmp.ne.s32.totalorder %s316_s27, %s14489_s1  ;;  %p14494_p8 = scmp.lt.s32.totalorder %s316_s27, %s316_s27 }
 0x252   :  { %p14495_p9 = scmp.lt.s32.totalorder %s14493_s4, %s14489_s1 }
 0x254   :  { %p14496_p10 = por %p14495_p9, %p14494_p8 }
 0x256   :  { %p14497_p11 = pnand %p14496_p10, %p14490_p7 }
 0x258   :  { %14500 = shalt.err (!%p14497_p11)
}
 0x259   :  { %s16991_s12 = sld [smem:[#allocation105_spill]]  ;;  %s14867_s19 = smov [#allocation31]  }
 0x25a   :  { %318 = dma.hbm_to_vmem [thread:$0]  %s16990_s23, 16, %s316_s27, [#allocation27]  }
 0x25b   :  { %s347_s29 = sshll.u32 %s14867_s19, 4  ;;  %s14868_s2 = smov [#allocation34]   ;;  %s348_s29 = int_to_ptr.vmem [resolvable:$true] %s347_s29 }
 0x25c   :  { %s367_s7 = sshll.u32 %s14868_s2, 4  ;;  %s368_s7 = int_to_ptr.vmem [resolvable:$true] %s367_s7 }
 0x25f   :  { %s14501_s24 = scalar_lea.hbm %s16991_s12, 16 }
 0x260   :  { %p14502_p12 = scmp.ne.s32.totalorder %s16991_s12, %s14501_s24  ;;  %p14505_p13 = scmp.lt.u32.totalorder %s14501_s24, %s16991_s12 }
 0x262   :  { %p14507_p0 = pnand %p14505_p13, %p14502_p12 }
 0x264   :  { %14510 = shalt.err (!%p14507_p0)
}
 0x265   :  { %s14511_s17 = scalar_lea.vmem %s348_s29, 16  ;;  %s14515_s10 = scalar_lea.vmem %s348_s29, 32 }
 0x266   :  { %p14512_p1 = scmp.ne.s32.totalorder %s348_s29, %s14511_s17  ;;  %p14516_p2 = scmp.lt.s32.totalorder %s348_s29, %s348_s29 }
 0x267   :  { %p14517_p3 = scmp.lt.s32.totalorder %s14515_s10, %s14511_s17 }
 0x269   :  { %p14518_p4 = por %p14517_p3, %p14516_p2 }
 0x26b   :  { %p14519_p5 = pnand %p14518_p4, %p14512_p1 }
 0x26d   :  { %14522 = shalt.err (!%p14519_p5)
}
 0x26e   :  { %s16992_s11 = sld [smem:[#allocation106_spill]] }
 0x26f   :  { %350 = dma.hbm_to_vmem [thread:$0]  %s16991_s12, 16, %s348_s29, [#allocation30]  }
 0x274   :  { %s14523_s30 = scalar_lea.hbm %s16992_s11, 16 }
 0x275   :  { %p14524_p6 = scmp.ne.s32.totalorder %s16992_s11, %s14523_s30  ;;  %p14527_p7 = scmp.lt.u32.totalorder %s14523_s30, %s16992_s11 }
 0x277   :  { %p14529_p8 = pnand %p14527_p7, %p14524_p6 }
 0x279   :  { %14532 = shalt.err (!%p14529_p8)
}
 0x27a   :  { %s14533_s6 = scalar_lea.vmem %s368_s7, 16  ;;  %s14537_s9 = scalar_lea.vmem %s368_s7, 32 }
 0x27b   :  { %p14534_p9 = scmp.ne.s32.totalorder %s368_s7, %s14533_s6  ;;  %p14538_p10 = scmp.lt.s32.totalorder %s368_s7, %s368_s7 }
 0x27c   :  { %p14539_p11 = scmp.lt.s32.totalorder %s14537_s9, %s14533_s6 }
 0x27e   :  { %p14540_p12 = por %p14539_p11, %p14538_p10 }
 0x280   :  { %p14541_p13 = pnand %p14540_p12, %p14534_p9 }
 0x282   :  { %14544 = shalt.err (!%p14541_p13)
}
 0x283   :  { %s16993_s0 = sld [smem:[#allocation107_spill]]  ;;  %s14869_s21 = smov [#allocation37]  }
 0x284   :  { %370 = dma.hbm_to_vmem [thread:$0]  %s16992_s11, 16, %s368_s7, [#allocation33]  }
 0x285   :  { %s387_s15 = sshll.u32 %s14869_s21, 4  ;;  %s14870_s16 = smov [#allocation40]   ;;  %s388_s15 = int_to_ptr.vmem [resolvable:$true] %s387_s15 }
 0x286   :  { %s410_s3 = sshll.u32 %s14870_s16, 4  ;;  %s15344_s3 = int_to_ptr.vmem [resolvable:$true] %s410_s3 }
 0x289   :  { %s14545_s14 = scalar_lea.hbm %s16993_s0, 16 }
 0x28a   :  { %p14546_p0 = scmp.ne.s32.totalorder %s16993_s0, %s14545_s14  ;;  %p14549_p1 = scmp.lt.u32.totalorder %s14545_s14, %s16993_s0 }
 0x28c   :  { %p14551_p2 = pnand %p14549_p1, %p14546_p0 }
 0x28e   :  { %14554 = shalt.err (!%p14551_p2)
}
 0x28f   :  { %s14555_s27 = scalar_lea.vmem %s388_s15, 16  ;;  %s14559_s22 = scalar_lea.vmem %s388_s15, 32 }
 0x290   :  { %p14556_p3 = scmp.ne.s32.totalorder %s388_s15, %s14555_s27  ;;  %p14560_p4 = scmp.lt.s32.totalorder %s388_s15, %s388_s15 }
 0x291   :  { %p14561_p5 = scmp.lt.s32.totalorder %s14559_s22, %s14555_s27 }
 0x293   :  { %p14562_p6 = por %p14561_p5, %p14560_p4 }
 0x295   :  { %p14563_p7 = pnand %p14562_p6, %p14556_p3 }
 0x297   :  { %14566 = shalt.err (!%p14563_p7)
}
 0x298   :  { %s16994_s8 = sld [smem:[#allocation110_spill]] }
 0x299   :  { %390 = dma.hbm_to_vmem [thread:$0]  %s16993_s0, 16, %s388_s15, [#allocation36]  }
 0x29e   :  { %s14567_s18 = scalar_lea.hbm %s16994_s8, 512 }
 0x29f   :  { %p14568_p8 = scmp.ne.s32.totalorder %s16994_s8, %s14567_s18  ;;  %p14571_p9 = scmp.lt.u32.totalorder %s14567_s18, %s16994_s8 }
 0x2a1   :  { %p14573_p10 = pnand %p14571_p9, %p14568_p8 }
 0x2a3   :  { %14576 = shalt.err (!%p14573_p10)
}
 0x2a4   :  { %s14577_s23 = scalar_lea.vmem %s15344_s3, 512  ;;  %p14582_p12 = scmp.lt.s32.totalorder %s15344_s3, %s15344_s3 }
 0x2a5   :  { %p14578_p11 = scmp.ne.s32.totalorder %s15344_s3, %s14577_s23  ;;  %p14583_p13 = scmp.lt.s32.totalorder %s14577_s23, %s14577_s23 }
 0x2a7   :  { %p14584_p0 = por %p14583_p13, %p14582_p12 }
 0x2a9   :  { %p14585_p1 = pnand %p14584_p0, %p14578_p11 }
 0x2ab   :  { %14588 = shalt.err (!%p14585_p1)
}
 0x2ac   :  { %s16995_s20 = sld [smem:[#allocation111_spill]]  ;;  %s14871_s1 = smov [#allocation43]  }
 0x2ad   :  { %416 = dma.hbm_to_vmem [thread:$0]  %s16994_s8, 512, %s15344_s3, [#allocation39], %s14841_s26, %s14841_s26, %s14842_s28  }
 0x2ae   :  { %s434_s4 = sshll.u32 %s14871_s1, 4  ;;  %s14872_s12 = smov [#allocation46]   ;;  %s435_s4 = int_to_ptr.vmem [resolvable:$true] %s434_s4 }
 0x2af   :  { %s459_s19 = sshll.u32 %s14872_s12, 4  ;;  %s460_s19 = int_to_ptr.vmem [resolvable:$true] %s459_s19 }
 0x2b2   :  { %s14589_s29 = scalar_lea.hbm %s16995_s20, 512 }
 0x2b3   :  { %p14590_p2 = scmp.ne.s32.totalorder %s16995_s20, %s14589_s29  ;;  %p14593_p3 = scmp.lt.u32.totalorder %s14589_s29, %s16995_s20 }
 0x2b5   :  { %p14595_p4 = pnand %p14593_p3, %p14590_p2 }
 0x2b7   :  { %14598 = shalt.err (!%p14595_p4)
}
 0x2b8   :  { %s14599_s2 = scalar_lea.vmem %s435_s4, 512  ;;  %p14604_p6 = scmp.lt.s32.totalorder %s435_s4, %s435_s4 }
 0x2b9   :  { %p14600_p5 = scmp.ne.s32.totalorder %s435_s4, %s14599_s2  ;;  %p14605_p7 = scmp.lt.s32.totalorder %s14599_s2, %s14599_s2 }
 0x2bb   :  { %p14606_p8 = por %p14605_p7, %p14604_p6 }
 0x2bd   :  { %p14607_p9 = pnand %p14606_p8, %p14600_p5 }
 0x2bf   :  { %14610 = shalt.err (!%p14607_p9)
}
 0x2c0   :  { %s16996_s7 = sld [smem:[#allocation112_spill]] }
 0x2c1   :  { %440 = dma.hbm_to_vmem [thread:$0]  %s16995_s20, 512, %s435_s4, [#allocation42], %s14841_s26, %s14841_s26, %s14842_s28  }
 0x2c6   :  { %s14611_s24 = scalar_lea.hbm %s16996_s7, 16 }
 0x2c7   :  { %p14612_p10 = scmp.ne.s32.totalorder %s16996_s7, %s14611_s24  ;;  %p14615_p11 = scmp.lt.u32.totalorder %s14611_s24, %s16996_s7 }
 0x2c9   :  { %p14617_p12 = pnand %p14615_p11, %p14612_p10 }
 0x2cb   :  { %14620 = shalt.err (!%p14617_p12)
}
 0x2cc   :  { %s14621_s17 = scalar_lea.vmem %s460_s19, 16  ;;  %s14625_s10 = scalar_lea.vmem %s460_s19, 32 }
 0x2cd   :  { %p14622_p13 = scmp.ne.s32.totalorder %s460_s19, %s14621_s17  ;;  %p14626_p0 = scmp.lt.s32.totalorder %s460_s19, %s460_s19 }
 0x2ce   :  { %p14627_p1 = scmp.lt.s32.totalorder %s14625_s10, %s14621_s17 }
 0x2d0   :  { %p14628_p2 = por %p14627_p1, %p14626_p0 }
 0x2d2   :  { %p14629_p3 = pnand %p14628_p2, %p14622_p13 }
 0x2d4   :  { %14632 = shalt.err (!%p14629_p3)
}
 0x2d5   :  { %s16997_s11 = sld [smem:[#allocation113_spill]]  ;;  %s14873_s30 = smov [#allocation49]  }
 0x2d6   :  { %462 = dma.hbm_to_vmem [thread:$0]  %s16996_s7, 16, %s460_s19, [#allocation45]  }
 0x2d7   :  { %s479_s26 = sshll.u32 %s14873_s30, 4  ;;  %s14874_s28 = smov [#allocation52]   ;;  %s480_s26 = int_to_ptr.vmem [resolvable:$true] %s479_s26 }
 0x2d8   :  { %s499_s6 = sshll.u32 %s14874_s28, 4  ;;  %s500_s6 = int_to_ptr.vmem [resolvable:$true] %s499_s6 }
 0x2db   :  { %s14633_s9 = scalar_lea.hbm %s16997_s11, 16 }
 0x2dc   :  { %p14634_p4 = scmp.ne.s32.totalorder %s16997_s11, %s14633_s9  ;;  %p14637_p5 = scmp.lt.u32.totalorder %s14633_s9, %s16997_s11 }
 0x2de   :  { %p14639_p6 = pnand %p14637_p5, %p14634_p4 }
 0x2e0   :  { %14642 = shalt.err (!%p14639_p6)
}
 0x2e1   :  { %s14643_s0 = scalar_lea.vmem %s480_s26, 16  ;;  %s14647_s21 = scalar_lea.vmem %s480_s26, 32 }
 0x2e2   :  { %p14644_p7 = scmp.ne.s32.totalorder %s480_s26, %s14643_s0  ;;  %p14648_p8 = scmp.lt.s32.totalorder %s480_s26, %s480_s26 }
 0x2e3   :  { %p14649_p9 = scmp.lt.s32.totalorder %s14647_s21, %s14643_s0 }
 0x2e5   :  { %p14650_p10 = por %p14649_p9, %p14648_p8 }
 0x2e7   :  { %p14651_p11 = pnand %p14650_p10, %p14644_p7 }
 0x2e9   :  { %14654 = shalt.err (!%p14651_p11)
}
 0x2ea   :  { %s16998_s15 = sld [smem:[#allocation115_spill]] }
 0x2eb   :  { %482 = dma.hbm_to_vmem [thread:$0]  %s16997_s11, 16, %s480_s26, [#allocation48]  }
 0x2f0   :  { %s14655_s16 = scalar_lea.hbm %s16998_s15, 16 }
 0x2f1   :  { %p14656_p12 = scmp.ne.s32.totalorder %s16998_s15, %s14655_s16  ;;  %p14659_p13 = scmp.lt.u32.totalorder %s14655_s16, %s16998_s15 }
 0x2f3   :  { %p14661_p0 = pnand %p14659_p13, %p14656_p12 }
 0x2f5   :  { %14664 = shalt.err (!%p14661_p0)
}
 0x2f6   :  { %s14665_s3 = scalar_lea.vmem %s500_s6, 16  ;;  %s14669_s14 = scalar_lea.vmem %s500_s6, 32 }
 0x2f7   :  { %p14666_p1 = scmp.ne.s32.totalorder %s500_s6, %s14665_s3  ;;  %p14670_p2 = scmp.lt.s32.totalorder %s500_s6, %s500_s6 }
 0x2f8   :  { %p14671_p3 = scmp.lt.s32.totalorder %s14669_s14, %s14665_s3 }
 0x2fa   :  { %p14672_p4 = por %p14671_p3, %p14670_p2 }
 0x2fc   :  { %p14673_p5 = pnand %p14672_p4, %p14666_p1 }
 0x2fe   :  { %14676 = shalt.err (!%p14673_p5)
}
 0x2ff   :  { %s16999_s27 = sld [smem:[#allocation118_spill]]  ;;  %s14875_s22 = smov [#allocation55]  }
 0x300   :  { %502 = dma.hbm_to_vmem [thread:$0]  %s16998_s15, 16, %s500_s6, [#allocation51]  }
 0x301   :  { %s521_s8 = sshll.u32 %s14875_s22, 4  ;;  %s14876_s18 = smov [#allocation58]   ;;  %s522_s8 = int_to_ptr.vmem [resolvable:$true] %s521_s8 }
 0x302   :  { %s541_s23 = sshll.u32 %s14876_s18, 4  ;;  %s542_s23 = int_to_ptr.vmem [resolvable:$true] %s541_s23 }
 0x305   :  { %s14677_s20 = scalar_lea.hbm %s16999_s27, 16 }
 0x306   :  { %p14678_p6 = scmp.ne.s32.totalorder %s16999_s27, %s14677_s20  ;;  %p14681_p7 = scmp.lt.u32.totalorder %s14677_s20, %s16999_s27 }
 0x308   :  { %p14683_p8 = pnand %p14681_p7, %p14678_p6 }
 0x30a   :  { %14686 = shalt.err (!%p14683_p8)
}
 0x30b   :  { %s14687_s1 = scalar_lea.vmem %s522_s8, 16  ;;  %s14691_s4 = scalar_lea.vmem %s522_s8, 32 }
 0x30c   :  { %p14688_p9 = scmp.ne.s32.totalorder %s522_s8, %s14687_s1  ;;  %p14692_p10 = scmp.lt.s32.totalorder %s522_s8, %s522_s8 }
 0x30d   :  { %p14693_p11 = scmp.lt.s32.totalorder %s14691_s4, %s14687_s1 }
 0x30f   :  { %p14694_p12 = por %p14693_p11, %p14692_p10 }
 0x311   :  { %p14695_p13 = pnand %p14694_p12, %p14688_p9 }
 0x313   :  { %14698 = shalt.err (!%p14695_p13)
}
 0x314   :  { %s17000_s12 = sld [smem:[#allocation120_spill]] }
 0x315   :  { %524 = dma.hbm_to_vmem [thread:$0]  %s16999_s27, 16, %s522_s8, [#allocation54]  }
 0x31a   :  { %s14699_s19 = scalar_lea.hbm %s17000_s12, 16 }
 0x31b   :  { %p14700_p0 = scmp.ne.s32.totalorder %s17000_s12, %s14699_s19  ;;  %p14703_p1 = scmp.lt.u32.totalorder %s14699_s19, %s17000_s12 }
 0x31d   :  { %p14705_p2 = pnand %p14703_p1, %p14700_p0 }
 0x31f   :  { %14708 = shalt.err (!%p14705_p2)
}
 0x320   :  { %s14709_s29 = scalar_lea.vmem %s542_s23, 16  ;;  %s14713_s2 = scalar_lea.vmem %s542_s23, 32 }
 0x321   :  { %p14710_p3 = scmp.ne.s32.totalorder %s542_s23, %s14709_s29  ;;  %p14714_p4 = scmp.lt.s32.totalorder %s542_s23, %s542_s23 }
 0x322   :  { %p14715_p5 = scmp.lt.s32.totalorder %s14713_s2, %s14709_s29 }
 0x324   :  { %p14716_p6 = por %p14715_p5, %p14714_p4 }
 0x326   :  { %p14717_p7 = pnand %p14716_p6, %p14710_p3 }
 0x328   :  { %14720 = shalt.err (!%p14717_p7)
}
 0x329   :  { %544 = dma.hbm_to_vmem [thread:$0]  %s17000_s12, 16, %s542_s23, [#allocation57]  }
 0x32a   :  { %s14877_s7 = smov [#allocation61]   ;;  %s14721_s17 = scalar_lea.hbm %s15178_s13, 16 }
 0x32b   :  { %s565_s24 = sshll.u32 %s14877_s7, 4  ;;  %p14722_p8 = scmp.ne.s32.totalorder %s15178_s13, %s14721_s17  ;;  %s566_s24 = int_to_ptr.vmem [resolvable:$true] %s565_s24 }
 0x32c   :  { %p14725_p9 = scmp.lt.u32.totalorder %s14721_s17, %s15178_s13 }
 0x32e   :  { %p14727_p10 = pnand %p14725_p9, %p14722_p8 }
 0x330   :  { %14730 = shalt.err (!%p14727_p10)
}
 0x331   :  { %s14731_s10 = scalar_lea.vmem %s566_s24, 16  ;;  %s14735_s11 = scalar_lea.vmem %s566_s24, 32 }
 0x332   :  { %p14732_p11 = scmp.ne.s32.totalorder %s566_s24, %s14731_s10  ;;  %p14736_p12 = scmp.lt.s32.totalorder %s566_s24, %s566_s24 }
 0x333   :  { %p14737_p13 = scmp.lt.s32.totalorder %s14735_s11, %s14731_s10 }
 0x335   :  { %p14738_p0 = por %p14737_p13, %p14736_p12 }
 0x337   :  { %p14739_p1 = pnand %p14738_p0, %p14732_p11 }
 0x339   :  { %14742 = shalt.err (!%p14739_p1)
}
 0x33a   :  { %568 = dma.hbm_to_vmem [thread:$0]  %s15178_s13, 16, %s566_s24, [#allocation60]  }
 0x33b   :  { %14743 = dma.done.wait [#allocation7], 256  }
 0x33c   :  { %14744 = vsyncadd [#allocation7], 4294967040 }
 0x33d   :  { %14745 = dma.done.wait [#allocation9], 512  }
 0x33e   :  { %14746 = vsyncadd [#allocation9], 4294966784 }
 0x33f   :  { %14747 = dma.done.wait [#allocation12], 32  }
 0x340   :  { %14748 = vsyncadd [#allocation12], 4294967264 }
 0x341   :  { %14749 = dma.done.wait [#allocation15], 32  }
 0x342   :  { %14750 = vsyncadd [#allocation15], 4294967264 }
 0x343   :  { %14751 = dma.done.wait [#allocation18], 32  }
 0x344   :  { %14752 = vsyncadd [#allocation18], 4294967264 }
 0x345   :  { %14753 = dma.done.wait [#allocation21], 32  }
 0x346   :  { %14754 = vsyncadd [#allocation21], 4294967264 }
 0x347   :  { %14755 = dma.done.wait [#allocation24], 32  }
 0x348   :  { %14756 = vsyncadd [#allocation24], 4294967264 }
 0x349   :  { %14757 = dma.done.wait [#allocation27], 32  }
 0x34a   :  { %14758 = vsyncadd [#allocation27], 4294967264 }
 0x34b   :  { %14759 = dma.done.wait [#allocation30], 528  }
 0x34c   :  { %14760 = vsyncadd [#allocation30], 4294966768 }
 0x34d   :  { %14761 = dma.done.wait [#allocation33], 32  }
 0x34e   :  { %14762 = vsyncadd [#allocation33], 4294967264 }
 0x34f   :  { %14763 = dma.done.wait [#allocation36], 32  }
 0x350   :  { %14764 = vsyncadd [#allocation36], 4294967264 }
 0x351   :  { %14765 = dma.done.wait [#allocation39], 528  }
 0x352   :  { %14766 = vsyncadd [#allocation39], 4294966768 }
 0x353   :  { %14767 = dma.done.wait [#allocation42], 1024  }
 0x354   :  { %14768 = vsyncadd [#allocation42], 4294966272 }
 0x355   :  { %14769 = dma.done.wait [#allocation45], 528  }
 0x356   :  { %14770 = vsyncadd [#allocation45], 4294966768 }
 0x357   :  { %14771 = dma.done.wait [#allocation48], 32  }
 0x358   :  { %14772 = vsyncadd [#allocation48], 4294967264 }
 0x359   :  { %14773 = dma.done.wait [#allocation51], 32  }
 0x35a   :  { %14774 = vsyncadd [#allocation51], 4294967264 }
 0x35b   :  { %14775 = dma.done.wait [#allocation54], 32  }
 0x35c   :  { %14776 = vsyncadd [#allocation54], 4294967264 }
 0x35d   :  { %14777 = dma.done.wait [#allocation57], 32  }
 0x35e   :  { %14778 = vsyncadd [#allocation57], 4294967264 }
 0x35f   :  { %14779 = dma.done.wait [#allocation60], 32  }
 0x360   :  { %14780 = vsyncadd [#allocation60], 4294967264  ;;  %s17001_s13 = sld [smem:[#allocation81_spill]]  ;;  %v14878_v0 = vmov 0   ;;  %vm698_vm0 = vcmask 130048   ;;  %v689_v1 = vld [vmem:[#allocation6] sm:$0xff] }
 0x361   :  { %13603 = vset.pattern.permute.xlu0 %v14878_v0  ;;  %13604 = vset.pattern.permute.xlu1 %v14878_v0  ;;  %v690_v2 = vld [vmem:[#allocation6 + $0x8] sm:$0xff]  ;;  %v837_v5 = vld [vmem:[#allocation8] sm:$0xff]  ;;  %v838_v6 = vld [vmem:[#allocation8 + $0x8] sm:$0xff]  ;;  %s17002_s30 = sld [smem:[#allocation82_spill]]  ;;  %s17003_s26 = sld [smem:[#allocation85_spill]]  ;;  %v14879_v17 = vmov 0.0|0.0  }
 0x362   :  { %v12801_v4 = vpack.c.bf16 %v690_v2, %v689_v1  ;;  %v12805_v7 = vpack.c.bf16 %v838_v6, %v837_v5  ;;  %v959_v12 = vld [vmem:[#allocation10] sm:$0xff]  ;;  %v960_v13 = vld [vmem:[#allocation10 + $0x8] sm:$0xff]  ;;  %s17004_s28 = sld [smem:[#allocation87_spill]]  ;;  %s17005_s6 = sld [smem:[#allocation86_spill]]  ;;  %vm14880_vm5 = vmmov 0   ;;  %v14881_v38 = vmov 0.0  }
 0x363   :  { %v12809_v14 = vpack.c.bf16 %v960_v13, %v959_v12  ;;  %v10540_v43 = vld [vmem:[#allocation11] ss:$0 sm:$0xff]  ;;  %vm828_vm6 = vcmask 261120   ;;  %v10549_v59 = vld [vmem:[#allocation13] ss:$0 sm:$0xff]  ;;  %s17006_s9 = sld [smem:[#allocation91_spill]] }
 0x364   :  { %13497 = vmatprep.subr.bf16.mxu1 %v12801_v4  ;;  %12802 = vmatprep.subr.bf16.mxu0 %v12801_v4  ;;  %v10558_v61 = vld [vmem:[#allocation14] ss:$0 sm:$0xff]  ;;  %s17007_s0 = sld [smem:[#allocation92_spill]]  ;;  %s17008_s21 = sld [smem:[#allocation94_spill]] }
 0x365   :  { %13498 = vmatpush3.bf16.msra.mxu1 %v12801_v4  ;;  %12804 = vmatpush3.bf16.msra.mxu0 %v12801_v4  ;;  %s17009_s15 = sld [smem:[#allocation93_spill]]  ;;  %s17010_s16 = sld [smem:[#allocation95_spill]] }
 0x366   :  { %v15396_v3 = vld [vmem:[%s17001_s13 + $0x20] sm:$0xff]  ;;  %v15401_v8 = vld [vmem:[%s17001_s13 + $0x28] sm:$0xff]  ;;  %12806 = vmatprep.subr.bf16.mxu1 %v12805_v7  ;;  %v687_v10 = vld [vmem:[%s17001_s13 + $0x30] sm:$0xff]  ;;  %12810 = vmatprep.subr.bf16.mxu0 %v12809_v14  ;;  %s17011_s3 = sld [smem:[#allocation96_spill]]  ;;  %s17012_s14 = sld [smem:[#allocation100_spill]] }
 0x367   :  { %11470 = vmatprep.mubr.msk.f32.mxu1 %vm698_vm0, %v15396_v3  ;;  %v681_v9 = vld [vmem:[%s17001_s13] sm:$0xff]  ;;  %v682_v11 = vld [vmem:[%s17001_s13 + $0x8] sm:$0xff]  ;;  %v688_v15 = vld [vmem:[%s17001_s13 + $0x38] sm:$0xff]  ;;  %s17013_s27 = sld [smem:[#allocation101_spill]]  ;;  %s17014_s22 = sld [smem:[#allocation103_spill]] }
 0x368   :  { %11464 = vmatprep.mubr.msk.f32.mxu0 %vm698_vm0, %v681_v9  ;;  %11471 = vmatmul.mubr.msk.f32.vlgmr.msra.gmra.mrb[0].mxu1 %vm698_vm0, %v15401_v8  ;;  %v15413_v16 = vld [vmem:[%s17002_s30] sm:$0xff]  ;;  %v1082_v19 = vld [vmem:[%s17003_s26 + $0x8] sm:$0xff]  ;;  %v683_v20 = vld [vmem:[%s17001_s13 + $0x10] sm:$0xff]  ;;  %s17015_s8 = sld [smem:[#allocation102_spill]]  ;;  %s17016_s18 = sld [smem:[#allocation104_spill]] }
 0x369   :  { %11465 = vmatmul.mubr.msk.f32.vlgmr.msra.gmra.mrb[0].mxu0 %vm698_vm0, %v682_v11  ;;  %12808 = vmatpush3.bf16.msra.mxu1 %v12805_v7  ;;  %v1081_v18 = vld [vmem:[%s17003_s26] sm:$0xff]  ;;  %vm1351_vm1 = vcmp.gt.s32.totalorder %v15413_v16, 0  ;;  %v684_v21 = vld [vmem:[%s17001_s13 + $0x18] sm:$0xff]  ;;  %v1090_v23 = vld [vmem:[%s17004_s28 + $0x8] sm:$0xff]  ;;  %vm1599_vm2 = vcmp.gt.s32.totalorder %v15413_v16, 1  ;;  %vm2346_vm3 = vcmp.gt.s32.totalorder %v15413_v16, 4 }
 0x36a   :  { %11473 = vmatprep.mubr.msk.f32.mxu1 %vm698_vm0, %v687_v10  ;;  %12813 = vmatprep.subr.bf16.mxu1 %v14879_v17  ;;  %v1089_v22 = vld [vmem:[%s17004_s28] sm:$0xff]  ;;  %v1352_v24 = vsel %vm1351_vm1, 1, %v14878_v0  ;;  %v15428_v25 = vpack.c.bf16 %v1082_v19, %v1081_v18  ;;  %v1083_v26 = vld [vmem:[%s17003_s26 + $0x10] sm:$0xff]  ;;  %v1084_v27 = vld [vmem:[%s17003_s26 + $0x18] sm:$0xff]  ;;  %v1600_v33 = vsel %vm1599_vm2, 1, %v14878_v0  ;;  %v2347_v34 = vsel %vm2346_vm3, 1, %v14878_v0 }
 0x36b   :  { %12812 = vmatpush3.bf16.msra.mxu0 %v12809_v14  ;;  %11467 = vmatprep.mubr.msk.f32.mxu0 %vm698_vm0, %v683_v20  ;;  %v15434_v28 = vpack.c.bf16 %v1090_v23, %v1089_v22  ;;  %v1091_v29 = vld [vmem:[%s17004_s28 + $0x10] sm:$0xff]  ;;  %v1092_v30 = vld [vmem:[%s17004_s28 + $0x18] sm:$0xff]  ;;  %v15442_v31 = vpack.c.bf16 %v1084_v27, %v1083_v26  ;;  %vm2844_vm4 = vcmp.gt.s32.totalorder %v15413_v16, 6  ;;  %v1085_v35 = vld [vmem:[%s17005_s6] sm:$0xff]  ;;  %vm1848_vm8 = vcmp.gt.s32.totalorder %v15413_v16, 2  ;;  %s14882_s23 = smov 32  }
 0x36c   :  { %11474 = vmatmul.mubr.msk.f32.gmra.mrb[2].mxu1 %vm698_vm0, %v688_v15  ;;  %12825 = vmatprep.subr.bf16.mxu0 %v14879_v17  ;;  %v15449_v32 = vpack.c.bf16 %v1092_v30, %v1091_v29  ;;  %v1086_v36 = vld [vmem:[%s17005_s6 + $0x8] sm:$0xff]  ;;  %v2845_v37 = vsel %vm2844_vm4, 1, %v14878_v0  ;;  %v1087_v40 = vld [vmem:[%s17005_s6 + $0x10] sm:$0xff]  ;;  %v1088_v41 = vld [vmem:[%s17005_s6 + $0x18] sm:$0xff]  ;;  %vm2097_vm9 = vcmp.gt.s32.totalorder %v15413_v16, 3  ;;  %vm2595_vm10 = vcmp.gt.s32.totalorder %v15413_v16, 5 }
 0x36d   :  { %11468 = vmatmul.mubr.msk.f32.gmra.mrb[2].mxu0 %vm698_vm0, %v684_v21  ;;  %11480 = vmatprep.mubr.msk.f32.mxu1 %vm698_vm0, %v681_v9  ;;  %v15478_v39 = vpack.c.bf16 %v1086_v36, %v1085_v35  ;;  %v15487_v42 = vpack.c.bf16 %v1088_v41, %v1087_v40  ;;  %v15527_v36 = vld [vmem:[#allocation16] ss:$0 sm:$0xff]  ;;  %vm3093_vm11 = vcmp.gt.s32.totalorder %v15413_v16, 7  ;;  %s17017_s20 = sld [smem:[#allocation108_spill]]  ;;  %s17018_s1 = sld [smem:[#allocation109_spill]]  ;;  %vm10145_vm3 = vcmask 523264  }
 0x36e   :  { %11496 = vmatprep.mubr.msk.f32.mxu0 %vm698_vm0, %v681_v9  ;;  %1354 = vperm.xlu0 %13603, %v1352_v24   ;;  %s14883_s4 = smov 64   ;;  %s17019_s12 = sld [smem:[#allocation117_spill]]  ;;  %vm10147_vm4 = vcmask 785408  }
 0x36f   :  { %s14884_s19 = smov 96   ;;  %s17020_s29 = sld [smem:[#allocation121_spill]] }
 0x370   :  { %11481 = vmatmul.mubr.msk.f32.vlgmr.msra.gmra.mrb[4].mxu1 %vm698_vm0, %v682_v11 }
 0x371   :  { %11497 = vmatmul.mubr.msk.f32.vlgmr.msra.gmra.mrb[4].mxu0 %vm698_vm0, %v682_v11  ;;  %12815 = vmatpush3.bf16.msra.mxu1 %v15428_v25 }
 0x372   :  { %11483 = vmatprep.mubr.msk.f32.mxu1 %vm698_vm0, %v683_v20  ;;  %12816 = vmatprep.subr.bf16.mxu1 %v14879_v17 }
 0x373   :  { %12827 = vmatpush3.bf16.msra.mxu0 %v15434_v28  ;;  %11499 = vmatprep.mubr.msk.f32.mxu0 %vm698_vm0, %v683_v20 }
 0x374   :  { %12828 = vmatprep.subr.bf16.mxu0 %v14879_v17  ;;  %11484 = vmatmul.mubr.msk.f32.gmra.mrb[6].mxu1 %vm698_vm0, %v684_v21 }
 0x375   :  { %11500 = vmatmul.mubr.msk.f32.gmra.mrb[6].mxu0 %vm698_vm0, %v684_v21  ;;  %11486 = vmatprep.mubr.msk.f32.mxu1 %vm698_vm0, %v15396_v3 }
 0x376   :  { %12818 = vmatpush3.bf16.msra.mxu1 %v15442_v31  ;;  %11502 = vmatprep.mubr.msk.f32.mxu0 %vm698_vm0, %v15396_v3 }
 0x377   :  { %12819 = vmatprep.subr.bf16.mxu1 %v14879_v17  ;;  %12830 = vmatpush3.bf16.msra.mxu0 %v15449_v32 }
 0x378   :  { %1602 = vperm.xlu0 %13603, %v1600_v33   ;;  %11487 = vmatmul.mubr.msk.f32.gmra.mrb[8].mxu1 %vm698_vm0, %v15401_v8 }
 0x379   :  { %11503 = vmatmul.mubr.msk.f32.gmra.mrb[8].mxu0 %vm698_vm0, %v15401_v8  ;;  %11489 = vmatprep.mubr.msk.f32.mxu1 %vm698_vm0, %v687_v10 }
 0x37a   :  { %11505 = vmatprep.mubr.msk.f32.mxu0 %vm698_vm0, %v687_v10  ;;  %12837 = vmatprep.subr.bf16.mxu0 %v14879_v17 }
 0x37c   :  { %2349 = vperm.xlu0 %13603, %v2347_v34   ;;  %11490 = vmatmul.mubr.msk.f32.gmra.mrb[10].mxu1 %vm698_vm0, %v688_v15 }
 0x37d   :  { %11506 = vmatmul.mubr.msk.f32.gmra.mrb[10].mxu0 %vm698_vm0, %v688_v15  ;;  %11516 = vmatprep.mubr.msk.f32.mxu1 %vm14880_vm5, %v14881_v38 }
 0x37e   :  { %11538 = vmatprep.mubr.msk.f32.mxu0 %vm14880_vm5, %v14881_v38 }
 0x380   :  { %2847 = vperm.xlu0 %13603, %v2845_v37   ;;  %11517 = vmatmul.mubr.f32.vlgmr.msra.gmra.mrb[12].mxu1 %v14881_v38 }
 0x381   :  { %11539 = vmatmul.mubr.f32.vlgmr.msra.gmra.mrb[12].mxu0 %v14881_v38  ;;  %12821 = vmatpush3.bf16.msra.mxu1 %v15478_v39 }
 0x382   :  { %11527 = vmatprep.mubr.msk.f32.mxu1 %vm14880_vm5, %v14881_v38  ;;  %12822 = vmatprep.subr.bf16.mxu1 %v14879_v17 }
 0x383   :  { %12839 = vmatpush3.bf16.msra.mxu0 %v15478_v39  ;;  %11560 = vmatprep.mubr.msk.f32.mxu0 %vm14880_vm5, %v14881_v38 }
 0x384   :  { %12840 = vmatprep.subr.bf16.mxu0 %v14879_v17 }
 0x385   :  { %12824 = vmatpush3.bf16.msra.mxu1 %v15487_v42 }
 0x386   :  { %12831 = vmatprep.subr.bf16.mxu1 %v14879_v17 }
 0x387   :  { %12842 = vmatpush3.bf16.msra.mxu0 %v15487_v42 }
 0x388   :  { %12849 = vmatprep.subr.bf16.mxu0 %v14879_v17  ;;  %11528 = vmatmul.mubr.f32.vlgmr.msra.gmra.mrb[14].mxu1 %v14881_v38 }
 0x389   :  { %12833 = vmatpush3.bf16.msra.mxu1 %v15428_v25  ;;  %11549 = vmatprep.mubr.msk.f32.mxu1 %vm14880_vm5, %v14881_v38 }
 0x38a   :  { %12834 = vmatprep.subr.bf16.mxu1 %v14879_v17 }
 0x38d   :  { %12836 = vmatpush3.bf16.msra.mxu1 %v15442_v31 }
 0x38e   :  { %12843 = vmatprep.subr.bf16.mxu1 %v14879_v17 }
 0x43b   :  { %v11472_v44 = vpop.f32.mrb[0].mxu1 }
 0x43c   :  { %v11466_v45 = vpop.f32.mrb[0].mxu0  ;;  %v815_v46 = vadd.f32 %v11472_v44, %v10540_v43  ;;  %v809_v47 = vpop.f32.mrb[1].mxu1 }
 0x43d   :  { %v795_v48 = vadd.f32 %v11466_v45, %v10540_v43  ;;  %v789_v49 = vpop.f32.mrb[1].mxu0  ;;  %v810_v50 = vadd.f32 %v10540_v43, %v809_v47 }
 0x43e   :  { %v790_v51 = vadd.f32 %v10540_v43, %v789_v49  ;;  %834 = vst.msk [vmem:[#allocation2 + $0x28] sm:$0xff] %vm828_vm6, %v815_v46  ;;  %v15534_v49 = vld [vmem:[#allocation17] ss:$0 sm:$0xff] }
 0x43f   :  { %830 = vst.msk [vmem:[#allocation2 + $0x8] sm:$0xff] %vm828_vm6, %v795_v48  ;;  %833 = vst.msk [vmem:[#allocation2 + $0x20] sm:$0xff] %vm828_vm6, %v810_v50  ;;  %v11475_v52 = vpop.f32.mrb[2].mxu1 }
 0x440   :  { %829 = vst.msk [vmem:[#allocation2] sm:$0xff] %vm828_vm6, %v790_v51  ;;  %v11469_v53 = vpop.f32.mrb[2].mxu0  ;;  %v825_v54 = vadd.f32 %v11475_v52, %v10540_v43  ;;  %v819_v55 = vpop.f32.mrb[3].mxu1 }
 0x441   :  { %v805_v56 = vadd.f32 %v11469_v53, %v10540_v43  ;;  %v799_v57 = vpop.f32.mrb[3].mxu0  ;;  %v820_v58 = vadd.f32 %v10540_v43, %v819_v55 }
 0x442   :  { %v800_v60 = vadd.f32 %v10540_v43, %v799_v57  ;;  %836 = vst.msk [vmem:[#allocation2 + $0x38] sm:$0xff] %vm828_vm6, %v825_v54 }
 0x443   :  { %832 = vst.msk [vmem:[#allocation2 + $0x18] sm:$0xff] %vm828_vm6, %v805_v56  ;;  %835 = vst.msk [vmem:[#allocation2 + $0x30] sm:$0xff] %vm828_vm6, %v820_v58  ;;  %v11482_v62 = vpop.f32.mrb[4].mxu1  ;;  %v15537_v58 = vld [vmem:[#allocation19] ss:$0 sm:$0xff] }
 0x444   :  { %831 = vst.msk [vmem:[#allocation2 + $0x10] sm:$0xff] %vm828_vm6, %v800_v60  ;;  %v11498_v63 = vpop.f32.mrb[4].mxu0  ;;  %v918_v1 = vadd.f32 %v11482_v62, %v10549_v59  ;;  %v912_v2 = vpop.f32.mrb[5].mxu1 }
 0x445   :  { %v1040_v3 = vadd.f32 %v11498_v63, %v10558_v61  ;;  %v1034_v4 = vpop.f32.mrb[5].mxu0  ;;  %v913_v5 = vadd.f32 %v10549_v59, %v912_v2 }
 0x446   :  { %v1035_v6 = vadd.f32 %v10558_v61, %v1034_v4  ;;  %952 = vst.msk [vmem:[#allocation3 + $0x8] sm:$0xff] %vm828_vm6, %v918_v1 }
 0x447   :  { %1074 = vst.msk [vmem:[#allocation4 + $0x8] sm:$0xff] %vm828_vm6, %v1040_v3  ;;  %951 = vst.msk [vmem:[#allocation3] sm:$0xff] %vm828_vm6, %v913_v5  ;;  %v11485_v7 = vpop.f32.mrb[6].mxu1  ;;  %v1096_v40 = vld [vmem:[#allocation2] sm:$0xff] }
 0x448   :  { %1073 = vst.msk [vmem:[#allocation4] sm:$0xff] %vm828_vm6, %v1035_v6  ;;  %v11501_v8 = vpop.f32.mrb[6].mxu0  ;;  %v928_v9 = vadd.f32 %v11485_v7, %v10549_v59  ;;  %v922_v10 = vpop.f32.mrb[7].mxu1 }
 0x449   :  { %v1050_v11 = vadd.f32 %v11501_v8, %v10558_v61  ;;  %v1044_v12 = vpop.f32.mrb[7].mxu0  ;;  %v923_v13 = vadd.f32 %v10549_v59, %v922_v10  ;;  %v15540_v8 = vpop.permute.xlu0 %1354 }
 0x44a   :  { %v1045_v14 = vadd.f32 %v10558_v61, %v1044_v12  ;;  %954 = vst.msk [vmem:[#allocation3 + $0x18] sm:$0xff] %vm828_vm6, %v928_v9  ;;  %vm1356_vm7 = vcmp.eq.s32.totalorder %v15540_v8, 1  ;;  %v2098_v12 = vsel %vm2097_vm9, 1, %v14878_v0 }
 0x44b   :  { %1076 = vst.msk [vmem:[#allocation4 + $0x18] sm:$0xff] %vm828_vm6, %v1050_v11  ;;  %953 = vst.msk [vmem:[#allocation3 + $0x10] sm:$0xff] %vm828_vm6, %v923_v13  ;;  %v11488_v15 = vpop.f32.mrb[8].mxu1  ;;  %v1849_v11 = vsel %vm1848_vm8, 1, %v14878_v0  ;;  %v2596_v13 = vsel %vm2595_vm10, 1, %v14878_v0 }
 0x44c   :  { %1075 = vst.msk [vmem:[#allocation4 + $0x10] sm:$0xff] %vm828_vm6, %v1045_v14  ;;  %v11504_v18 = vpop.f32.mrb[8].mxu0  ;;  %v938_v19 = vadd.f32 %v11488_v15, %v10549_v59  ;;  %v932_v20 = vpop.f32.mrb[9].mxu1  ;;  %1851 = vperm.xlu1 %13604, %v1849_v11   ;;  %v3094_v14 = vsel %vm3093_vm11, 1, %v14878_v0 }
 0x44d   :  { %v1060_v21 = vadd.f32 %v11504_v18, %v10558_v61  ;;  %v1054_v22 = vpop.f32.mrb[9].mxu0  ;;  %v933_v23 = vadd.f32 %v10549_v59, %v932_v20 }
 0x44e   :  { %v1055_v24 = vadd.f32 %v10558_v61, %v1054_v22  ;;  %956 = vst.msk [vmem:[#allocation3 + $0x28] sm:$0xff] %vm828_vm6, %v938_v19  ;;  %v1097_v53 = vld [vmem:[#allocation3] sm:$0xff]  ;;  %v1360_v22 = vld [vmem:[#allocation2 + $0x8] sm:$0xff] }
 0x44f   :  { %1078 = vst.msk [vmem:[#allocation4 + $0x28] sm:$0xff] %vm828_vm6, %v1060_v21  ;;  %955 = vst.msk [vmem:[#allocation3 + $0x20] sm:$0xff] %vm828_vm6, %v933_v23  ;;  %v11491_v26 = vpop.f32.mrb[10].mxu1  ;;  %v1098_v1 = vld [vmem:[#allocation4] sm:$0xff] }
 0x450   :  { %1077 = vst.msk [vmem:[#allocation4 + $0x20] sm:$0xff] %vm828_vm6, %v1055_v24  ;;  %v11507_v27 = vpop.f32.mrb[10].mxu0  ;;  %v948_v29 = vadd.f32 %v11491_v26, %v10549_v59  ;;  %v942_v30 = vpop.f32.mrb[11].mxu1  ;;  %2100 = vperm.xlu1 %13604, %v2098_v12  }
 0x451   :  { %v1070_v33 = vadd.f32 %v11507_v27, %v10558_v61  ;;  %v1064_v34 = vpop.f32.mrb[11].mxu0  ;;  %v943_v35 = vadd.f32 %v10549_v59, %v942_v30  ;;  %v1362_v27 = vld [vmem:[#allocation3 + $0x8] sm:$0xff] }
 0x452   :  { %v1065_v37 = vadd.f32 %v10558_v61, %v1064_v34  ;;  %958 = vst.msk [vmem:[#allocation3 + $0x38] sm:$0xff] %vm828_vm6, %v948_v29 }
 0x453   :  { %1080 = vst.msk [vmem:[#allocation4 + $0x38] sm:$0xff] %vm828_vm6, %v1070_v33  ;;  %957 = vst.msk [vmem:[#allocation3 + $0x30] sm:$0xff] %vm828_vm6, %v943_v35  ;;  %v1174_v41 = vpop.f32.mrb[12].mxu1 }
 0x454   :  { %1079 = vst.msk [vmem:[#allocation4 + $0x30] sm:$0xff] %vm828_vm6, %v1065_v37  ;;  %v1326_v43 = vpop.f32.mrb[12].mxu0  ;;  %v1175_v44 = vadd.f32 %v15527_v36, %v1174_v41  ;;  %v11518_v45 = vpop.f32.mrb[13].mxu1  ;;  %2598 = vperm.xlu1 %13604, %v2596_v13  }
 0x455   :  { %v11540_v46 = vpop.f32.mrb[13].mxu0  ;;  %v1327_v61 = vadd.f32 %v15537_v58, %v1326_v43 }
 0x456   :  { %v1330_v47 = vadd.f32 %v1175_v44, %v1096_v40  ;;  %v1364_v44 = vld [vmem:[#allocation4 + $0x8] sm:$0xff] }
 0x458   :  { %v10570_v48 = vmul.f32 -1.442695, %v1330_v47  ;;  %3096 = vperm.xlu1 %13604, %v3094_v14  }
 0x45a   :  { %13605 = vpow2.f32 %v10570_v48 }
 0x45b   :  { %v1250_v50 = vpop.f32.mrb[14].mxu1 }
 0x45c   :  { %v1251_v51 = vadd.f32 %v15534_v49, %v1250_v50  ;;  %v11529_v52 = vpop.f32.mrb[15].mxu1 }
 0x45d   :  { %v15585_v52 = vpop.permute.xlu0 %1602 }
 0x45e   :  { %v1337_v54 = vadd.f32 %v1251_v51, %v1097_v53  ;;  %vm1604_vm12 = vcmp.eq.s32.totalorder %v15585_v52, 1 }
 0x460   :  { %v10571_v55 = vmul.f32 -1.442695, %v1337_v54 }
 0x462   :  { %13607 = vpow2.f32 %v10571_v55 }
 0x464   :  { %v13606_v56 = vpop.eup %13605 }
 0x465   :  { %v1334_v57 = vadd.f32 1.0, %v13606_v56 }
 0x467   :  { %13609 = vrcp.f32 %v1334_v57 }
 0x46c   :  { %v13608_v59 = vpop.eup %13607 }
 0x46d   :  { %v1341_v60 = vadd.f32 1.0, %v13608_v59 }
 0x46f   :  { %13611 = vrcp.f32 %v1341_v60 }
 0x471   :  { %v13610_v62 = vpop.eup %13609 }
 0x472   :  { %v1344_v63 = vmul.f32 %v13610_v62, %v1327_v61  ;;  %v1609_v61 = vld [vmem:[#allocation2 + $0x10] sm:$0xff] }
 0x474   :  { %v1345_v2 = vadd.f32 %v1344_v63, %v1098_v1 }
 0x476   :  { %13613 = vtanh.f32 %v1345_v2  ;;  %v1611_v2 = vld [vmem:[#allocation3 + $0x10] sm:$0xff] }
 0x479   :  { %v13612_v3 = vpop.eup %13611 }
 0x47a   :  { %v1347_v4 = vsub.f32 1.0, %v13612_v3  ;;  %v1349_v7 = vmul.f32 0.0, %v13612_v3 }
 0x480   :  { %v13614_v5 = vpop.eup %13613 }
 0x481   :  { %v1348_v6 = vmul.f32 %v13614_v5, %v1347_v4 }
 0x483   :  { %v1350_v9 = vadd.f32 %v1349_v7, %v1348_v6 }
 0x485   :  { %v15545_v10 = vsel %vm1356_vm7, %v1350_v9, 0.0 }
 0x486   :  { %1358 = vst.msk [vmem:[#allocation5] sm:$0xff] %vm828_vm6, %v15545_v10  ;;  %11550 = vmatmul.mubr.msk.f32.vlgmr.msra.gmra.mrb[16].mxu1 %vm828_vm6, %v15545_v10  ;;  %11561 = vmatmul.mubr.msk.f32.vlgmr.msra.gmra.mrb[14].mxu0 %vm828_vm6, %v15545_v10 }
 0x487   :  { %12845 = vmatpush3.bf16.msra.mxu1 %v15434_v28  ;;  %11571 = vmatprep.mubr.msk.f32.mxu1 %vm14880_vm5, %v14881_v38 }
 0x488   :  { %12846 = vmatprep.subr.bf16.mxu1 %v14879_v17  ;;  %12851 = vmatpush3.bf16.msra.mxu0 %v15428_v25 }
 0x489   :  { %12852 = vmatprep.subr.bf16.mxu0 %v14879_v17  ;;  %11582 = vmatprep.mubr.msk.f32.mxu0 %vm14880_vm5, %v14881_v38 }
 0x48b   :  { %12848 = vmatpush3.bf16.msra.mxu1 %v15449_v32 }
 0x48c   :  { %12855 = vmatprep.subr.bf16.mxu1 %v14879_v17  ;;  %12854 = vmatpush3.bf16.msra.mxu0 %v15442_v31 }
 0x48d   :  { %12861 = vmatprep.subr.bf16.mxu0 %v14879_v17 }
 0x48e   :  { %11572 = vmatmul.mubr.msk.f32.vlgmr.msra.gmra.mrb[18].mxu1 %vm828_vm6, %v15545_v10 }
 0x48f   :  { %12857 = vmatpush3.bf16.msra.mxu1 %v15478_v39  ;;  %11593 = vmatprep.mubr.msk.f32.mxu1 %vm14880_vm5, %v14881_v38 }
 0x490   :  { %12858 = vmatprep.subr.bf16.mxu1 %v14879_v17 }
 0x493   :  { %12860 = vmatpush3.bf16.msra.mxu1 %v15487_v42 }
 0x494   :  { %12867 = vmatprep.subr.bf16.mxu1 %v14879_v17 }
 0x559   :  { %v1434_v15 = vpop.f32.mrb[16].mxu1  ;;  %v1504_v18 = vpop.f32.mrb[14].mxu0 }
 0x55a   :  { %v1435_v19 = vadd.f32 %v15527_v36, %v1434_v15  ;;  %v11551_v20 = vpop.f32.mrb[17].mxu1  ;;  %v11562_v21 = vpop.f32.mrb[15].mxu0  ;;  %v1505_v23 = vadd.f32 %v15534_v49, %v1504_v18  ;;  %v1613_v15 = vld [vmem:[#allocation4 + $0x10] sm:$0xff] }
 0x55c   :  { %v1578_v24 = vadd.f32 %v1435_v19, %v1360_v22  ;;  %v1585_v29 = vadd.f32 %v1505_v23, %v1362_v27  ;;  %v15616_v22 = vpop.permute.xlu1 %1851 }
 0x55d   :  { %vm1853_vm13 = vcmp.eq.s32.totalorder %v15616_v22, 1 }
 0x55e   :  { %v10575_v26 = vmul.f32 -1.442695, %v1578_v24  ;;  %v10576_v33 = vmul.f32 -1.442695, %v1585_v29 }
 0x560   :  { %13615 = vpow2.f32 %v10575_v26 }
 0x561   :  { %v1574_v30 = vpop.f32.mrb[18].mxu1  ;;  %13617 = vpow2.f32 %v10576_v33 }
 0x562   :  { %v11573_v16 = vpop.f32.mrb[19].mxu1  ;;  %v1575_v40 = vadd.f32 %v15537_v58, %v1574_v30 }
 0x56a   :  { %v13616_v0 = vpop.eup %13615 }
 0x56b   :  { %v1582_v34 = vadd.f32 1.0, %v13616_v0  ;;  %v13618_v35 = vpop.eup %13617 }
 0x56c   :  { %v1589_v37 = vadd.f32 1.0, %v13618_v35 }
 0x56d   :  { %13619 = vrcp.f32 %v1582_v34  ;;  %v1858_v34 = vld [vmem:[#allocation2 + $0x18] sm:$0xff] }
 0x56e   :  { %13621 = vrcp.f32 %v1589_v37 }
 0x577   :  { %v13620_v41 = vpop.eup %13619 }
 0x578   :  { %v1592_v43 = vmul.f32 %v13620_v41, %v1575_v40  ;;  %v13622_v46 = vpop.eup %13621  ;;  %v1860_v41 = vld [vmem:[#allocation3 + $0x18] sm:$0xff] }
 0x579   :  { %v1595_v47 = vsub.f32 1.0, %v13622_v46  ;;  %v1597_v51 = vmul.f32 %v13622_v46, %v15545_v10 }
 0x57a   :  { %v1593_v45 = vadd.f32 %v1592_v43, %v1364_v44 }
 0x57c   :  { %13623 = vtanh.f32 %v1593_v45 }
 0x586   :  { %v13624_v48 = vpop.eup %13623 }
 0x587   :  { %v1596_v50 = vmul.f32 %v13624_v48, %v1595_v47 }
 0x589   :  { %v1598_v53 = vadd.f32 %v1597_v51, %v1596_v50 }
 0x58b   :  { %v1605_v54 = vsel %vm1604_vm12, %v1598_v53, %v15545_v10 }
 0x58c   :  { %1607 = vst.msk [vmem:[#allocation5 + $0x8] sm:$0xff] %vm828_vm6, %v1605_v54  ;;  %11583 = vmatmul.mubr.msk.f32.vlgmr.msra.gmra.mrb[16].mxu0 %vm828_vm6, %v1605_v54  ;;  %11594 = vmatmul.mubr.msk.f32.vlgmr.msra.gmra.mrb[20].mxu1 %vm828_vm6, %v1605_v54 }
 0x58d   :  { %12863 = vmatpush3.bf16.msra.mxu0 %v15434_v28  ;;  %11604 = vmatprep.mubr.msk.f32.mxu0 %vm14880_vm5, %v14881_v38 }
 0x58e   :  { %12864 = vmatprep.subr.bf16.mxu0 %v14879_v17  ;;  %12869 = vmatpush3.bf16.msra.mxu1 %v15428_v25 }
 0x58f   :  { %12870 = vmatprep.subr.bf16.mxu1 %v14879_v17  ;;  %11615 = vmatprep.mubr.msk.f32.mxu1 %vm14880_vm5, %v14881_v38 }
 0x591   :  { %12866 = vmatpush3.bf16.msra.mxu0 %v15449_v32 }
 0x592   :  { %12873 = vmatprep.subr.bf16.mxu0 %v14879_v17  ;;  %12872 = vmatpush3.bf16.msra.mxu1 %v15442_v31 }
 0x593   :  { %12879 = vmatprep.subr.bf16.mxu1 %v14879_v17 }
 0x594   :  { %11605 = vmatmul.mubr.msk.f32.vlgmr.msra.gmra.mrb[18].mxu0 %vm828_vm6, %v1605_v54 }
 0x595   :  { %12875 = vmatpush3.bf16.msra.mxu0 %v15478_v39  ;;  %11626 = vmatprep.mubr.msk.f32.mxu0 %vm14880_vm5, %v14881_v38 }
 0x596   :  { %12876 = vmatprep.subr.bf16.mxu0 %v14879_v17 }
 0x599   :  { %12878 = vmatpush3.bf16.msra.mxu0 %v15487_v42 }
 0x59a   :  { %12885 = vmatprep.subr.bf16.mxu0 %v14879_v17 }
 0x65f   :  { %v1683_v55 = vpop.f32.mrb[16].mxu0  ;;  %v1753_v56 = vpop.f32.mrb[20].mxu1 }
 0x660   :  { %v1684_v57 = vadd.f32 %v15527_v36, %v1683_v55  ;;  %v11584_v59 = vpop.f32.mrb[17].mxu0  ;;  %v11595_v60 = vpop.f32.mrb[21].mxu1  ;;  %v1754_v62 = vadd.f32 %v15534_v49, %v1753_v56  ;;  %v1862_v56 = vld [vmem:[#allocation4 + $0x18] sm:$0xff] }
 0x662   :  { %v1827_v63 = vadd.f32 %v1684_v57, %v1609_v61  ;;  %v1834_v3 = vadd.f32 %v1754_v62, %v1611_v2 }
 0x664   :  { %v10580_v1 = vmul.f32 -1.442695, %v1827_v63  ;;  %v10581_v6 = vmul.f32 -1.442695, %v1834_v3 }
 0x666   :  { %13625 = vpow2.f32 %v10580_v1  ;;  %v15646_v1 = vpop.permute.xlu1 %2100 }
 0x667   :  { %v1823_v4 = vpop.f32.mrb[18].mxu0  ;;  %13627 = vpow2.f32 %v10581_v6  ;;  %vm2102_vm14 = vcmp.eq.s32.totalorder %v15646_v1, 1 }
 0x668   :  { %v11606_v5 = vpop.f32.mrb[19].mxu0  ;;  %v1824_v12 = vadd.f32 %v15537_v58, %v1823_v4 }
 0x670   :  { %v13626_v7 = vpop.eup %13625 }
 0x671   :  { %v1831_v9 = vadd.f32 1.0, %v13626_v7  ;;  %v13628_v10 = vpop.eup %13627 }
 0x672   :  { %v1838_v11 = vadd.f32 1.0, %v13628_v10  ;;  %v2107_v10 = vld [vmem:[#allocation2 + $0x20] sm:$0xff] }
 0x673   :  { %13629 = vrcp.f32 %v1831_v9 }
 0x674   :  { %13631 = vrcp.f32 %v1838_v11 }
 0x67d   :  { %v13630_v13 = vpop.eup %13629 }
 0x67e   :  { %v1841_v14 = vmul.f32 %v13630_v13, %v1824_v12  ;;  %v13632_v19 = vpop.eup %13631 }
 0x67f   :  { %v1844_v20 = vsub.f32 1.0, %v13632_v19  ;;  %v1846_v24 = vmul.f32 %v13632_v19, %v1605_v54 }
 0x680   :  { %v1842_v18 = vadd.f32 %v1841_v14, %v1613_v15  ;;  %v2109_v14 = vld [vmem:[#allocation3 + $0x20] sm:$0xff] }
 0x682   :  { %13633 = vtanh.f32 %v1842_v18 }
 0x68c   :  { %v13634_v21 = vpop.eup %13633 }
 0x68d   :  { %v1845_v23 = vmul.f32 %v13634_v21, %v1844_v20 }
 0x68f   :  { %v1847_v26 = vadd.f32 %v1846_v24, %v1845_v23 }
 0x691   :  { %v1854_v27 = vsel %vm1853_vm13, %v1847_v26, %v1605_v54 }
 0x692   :  { %1856 = vst.msk [vmem:[#allocation5 + $0x10] sm:$0xff] %vm828_vm6, %v1854_v27  ;;  %11616 = vmatmul.mubr.msk.f32.vlgmr.msra.gmra.mrb[22].mxu1 %vm828_vm6, %v1854_v27  ;;  %11627 = vmatmul.mubr.msk.f32.vlgmr.msra.gmra.mrb[20].mxu0 %vm828_vm6, %v1854_v27 }
 0x693   :  { %12881 = vmatpush3.bf16.msra.mxu1 %v15434_v28  ;;  %11637 = vmatprep.mubr.msk.f32.mxu1 %vm14880_vm5, %v14881_v38 }
 0x694   :  { %12882 = vmatprep.subr.bf16.mxu1 %v14879_v17  ;;  %12887 = vmatpush3.bf16.msra.mxu0 %v15428_v25 }
 0x695   :  { %12888 = vmatprep.subr.bf16.mxu0 %v14879_v17  ;;  %11648 = vmatprep.mubr.msk.f32.mxu0 %vm14880_vm5, %v14881_v38 }
 0x697   :  { %12884 = vmatpush3.bf16.msra.mxu1 %v15449_v32 }
 0x698   :  { %12891 = vmatprep.subr.bf16.mxu1 %v14879_v17  ;;  %12890 = vmatpush3.bf16.msra.mxu0 %v15442_v31 }
 0x699   :  { %12897 = vmatprep.subr.bf16.mxu0 %v14879_v17 }
 0x69a   :  { %11638 = vmatmul.mubr.msk.f32.vlgmr.msra.gmra.mrb[24].mxu1 %vm828_vm6, %v1854_v27 }
 0x69b   :  { %12893 = vmatpush3.bf16.msra.mxu1 %v15478_v39  ;;  %11659 = vmatprep.mubr.msk.f32.mxu1 %vm14880_vm5, %v14881_v38 }
 0x69c   :  { %12894 = vmatprep.subr.bf16.mxu1 %v14879_v17 }
 0x69f   :  { %12896 = vmatpush3.bf16.msra.mxu1 %v15487_v42 }
 0x6a0   :  { %12903 = vmatprep.subr.bf16.mxu1 %v14879_v17 }
 0x765   :  { %v1932_v29 = vpop.f32.mrb[22].mxu1  ;;  %v2002_v30 = vpop.f32.mrb[20].mxu0 }
 0x766   :  { %v1933_v16 = vadd.f32 %v15527_v36, %v1932_v29  ;;  %v11617_v33 = vpop.f32.mrb[23].mxu1  ;;  %v11628_v0 = vpop.f32.mrb[21].mxu0  ;;  %v2003_v35 = vadd.f32 %v15534_v49, %v2002_v30 }
 0x768   :  { %v2076_v37 = vadd.f32 %v1933_v16, %v1858_v34  ;;  %v2083_v43 = vadd.f32 %v2003_v35, %v1860_v41  ;;  %v2111_v16 = vld [vmem:[#allocation4 + $0x20] sm:$0xff]  ;;  %v15676_v41 = vpop.permute.xlu0 %2349 }
 0x769   :  { %vm2351_vm15 = vcmp.eq.s32.totalorder %v15676_v41, 1 }
 0x76a   :  { %v10585_v40 = vmul.f32 -1.442695, %v2076_v37  ;;  %v10586_v46 = vmul.f32 -1.442695, %v2083_v43 }
 0x76c   :  { %13635 = vpow2.f32 %v10585_v40 }
 0x76d   :  { %v2072_v44 = vpop.f32.mrb[24].mxu1  ;;  %13637 = vpow2.f32 %v10586_v46 }
 0x76e   :  { %v11639_v45 = vpop.f32.mrb[25].mxu1  ;;  %v2073_v53 = vadd.f32 %v15537_v58, %v2072_v44 }
 0x776   :  { %v13636_v47 = vpop.eup %13635 }
 0x777   :  { %v2080_v48 = vadd.f32 1.0, %v13636_v47  ;;  %v13638_v50 = vpop.eup %13637 }
 0x778   :  { %v2087_v51 = vadd.f32 1.0, %v13638_v50 }
 0x779   :  { %13639 = vrcp.f32 %v2080_v48 }
 0x77a   :  { %13641 = vrcp.f32 %v2087_v51  ;;  %v2356_v51 = vld [vmem:[#allocation2 + $0x28] sm:$0xff] }
 0x783   :  { %v13640_v54 = vpop.eup %13639 }
 0x784   :  { %v2090_v55 = vmul.f32 %v13640_v54, %v2073_v53  ;;  %v13642_v59 = vpop.eup %13641 }
 0x785   :  { %v2093_v60 = vsub.f32 1.0, %v13642_v59  ;;  %v2095_v63 = vmul.f32 %v13642_v59, %v1854_v27 }
 0x786   :  { %v2091_v57 = vadd.f32 %v2090_v55, %v1862_v56  ;;  %v2358_v56 = vld [vmem:[#allocation3 + $0x28] sm:$0xff] }
 0x788   :  { %13643 = vtanh.f32 %v2091_v57 }
 0x792   :  { %v13644_v61 = vpop.eup %13643 }
 0x793   :  { %v2094_v62 = vmul.f32 %v13644_v61, %v2093_v60 }
 0x795   :  { %v2096_v2 = vadd.f32 %v2095_v63, %v2094_v62 }
 0x797   :  { %v2103_v3 = vsel %vm2102_vm14, %v2096_v2, %v1854_v27 }
 0x798   :  { %2105 = vst.msk [vmem:[#allocation5 + $0x18] sm:$0xff] %vm828_vm6, %v2103_v3  ;;  %11649 = vmatmul.mubr.msk.f32.vlgmr.msra.gmra.mrb[22].mxu0 %vm828_vm6, %v2103_v3  ;;  %11660 = vmatmul.mubr.msk.f32.vlgmr.msra.gmra.mrb[26].mxu1 %vm828_vm6, %v2103_v3 }
 0x799   :  { %12899 = vmatpush3.bf16.msra.mxu0 %v15434_v28  ;;  %11670 = vmatprep.mubr.msk.f32.mxu0 %vm14880_vm5, %v14881_v38 }
 0x79a   :  { %12900 = vmatprep.subr.bf16.mxu0 %v14879_v17  ;;  %12905 = vmatpush3.bf16.msra.mxu1 %v15428_v25 }
 0x79b   :  { %12906 = vmatprep.subr.bf16.mxu1 %v14879_v17  ;;  %11681 = vmatprep.mubr.msk.f32.mxu1 %vm14880_vm5, %v14881_v38 }
 0x79d   :  { %12902 = vmatpush3.bf16.msra.mxu0 %v15449_v32 }
 0x79e   :  { %12909 = vmatprep.subr.bf16.mxu0 %v14879_v17  ;;  %12908 = vmatpush3.bf16.msra.mxu1 %v15442_v31 }
 0x79f   :  { %12915 = vmatprep.subr.bf16.mxu1 %v14879_v17 }
 0x7a0   :  { %11671 = vmatmul.mubr.msk.f32.vlgmr.msra.gmra.mrb[24].mxu0 %vm828_vm6, %v2103_v3 }
 0x7a1   :  { %12911 = vmatpush3.bf16.msra.mxu0 %v15478_v39  ;;  %11692 = vmatprep.mubr.msk.f32.mxu0 %vm14880_vm5, %v14881_v38 }
 0x7a2   :  { %12912 = vmatprep.subr.bf16.mxu0 %v14879_v17 }
 0x7a5   :  { %12914 = vmatpush3.bf16.msra.mxu0 %v15487_v42 }
 0x7a6   :  { %12921 = vmatprep.subr.bf16.mxu0 %v14879_v17 }
 0x86b   :  { %v2181_v4 = vpop.f32.mrb[22].mxu0  ;;  %v2251_v5 = vpop.f32.mrb[26].mxu1 }
 0x86c   :  { %v2182_v6 = vadd.f32 %v15527_v36, %v2181_v4  ;;  %v11650_v7 = vpop.f32.mrb[23].mxu0  ;;  %v11661_v9 = vpop.f32.mrb[27].mxu1  ;;  %v2252_v11 = vadd.f32 %v15534_v49, %v2251_v5 }
 0x86d   :  { %v2360_v7 = vld [vmem:[#allocation4 + $0x28] sm:$0xff] }
 0x86e   :  { %v2325_v12 = vadd.f32 %v2182_v6, %v2107_v10  ;;  %v2332_v15 = vadd.f32 %v2252_v11, %v2109_v14 }
 0x870   :  { %v10590_v13 = vmul.f32 -1.442695, %v2325_v12  ;;  %v10591_v20 = vmul.f32 -1.442695, %v2332_v15  ;;  %v15706_v15 = vpop.permute.xlu1 %2598 }
 0x871   :  { %vm2600_vm0 = vcmp.eq.s32.totalorder %v15706_v15, 1 }
 0x872   :  { %13645 = vpow2.f32 %v10590_v13 }
 0x873   :  { %v2321_v18 = vpop.f32.mrb[24].mxu0  ;;  %13647 = vpow2.f32 %v10591_v20  ;;  %v3111_v20 = vld [vmem:[%s17006_s9 + $0x8] sm:$0xff] }
 0x874   :  { %v11672_v19 = vpop.f32.mrb[25].mxu0  ;;  %v2322_v27 = vadd.f32 %v15537_v58, %v2321_v18 }
 0x87c   :  { %v13646_v21 = vpop.eup %13645 }
 0x87d   :  { %v2329_v23 = vadd.f32 1.0, %v13646_v21  ;;  %v13648_v24 = vpop.eup %13647 }
 0x87e   :  { %v2336_v26 = vadd.f32 1.0, %v13648_v24 }
 0x87f   :  { %13649 = vrcp.f32 %v2329_v23 }
 0x880   :  { %13651 = vrcp.f32 %v2336_v26 }
 0x889   :  { %v13650_v29 = vpop.eup %13649 }
 0x88a   :  { %v2339_v30 = vmul.f32 %v13650_v29, %v2322_v27  ;;  %v13652_v0 = vpop.eup %13651  ;;  %v2605_v29 = vld [vmem:[#allocation2 + $0x30] sm:$0xff] }
 0x88b   :  { %v2342_v34 = vsub.f32 1.0, %v13652_v0  ;;  %v2344_v40 = vmul.f32 %v13652_v0, %v2103_v3 }
 0x88c   :  { %v2340_v33 = vadd.f32 %v2339_v30, %v2111_v16 }
 0x88e   :  { %13653 = vtanh.f32 %v2340_v33  ;;  %v2607_v33 = vld [vmem:[#allocation3 + $0x30] sm:$0xff] }
 0x898   :  { %v13654_v35 = vpop.eup %13653 }
 0x899   :  { %v2343_v37 = vmul.f32 %v13654_v35, %v2342_v34 }
 0x89b   :  { %v2345_v43 = vadd.f32 %v2344_v40, %v2343_v37 }
 0x89d   :  { %v2352_v44 = vsel %vm2351_vm15, %v2345_v43, %v2103_v3 }
 0x89e   :  { %2354 = vst.msk [vmem:[#allocation5 + $0x20] sm:$0xff] %vm828_vm6, %v2352_v44  ;;  %11682 = vmatmul.mubr.msk.f32.vlgmr.msra.gmra.mrb[28].mxu1 %vm828_vm6, %v2352_v44  ;;  %11693 = vmatmul.mubr.msk.f32.vlgmr.msra.gmra.mrb[26].mxu0 %vm828_vm6, %v2352_v44 }
 0x89f   :  { %12917 = vmatpush3.bf16.msra.mxu1 %v15434_v28  ;;  %11703 = vmatprep.mubr.msk.f32.mxu1 %vm14880_vm5, %v14881_v38 }
 0x8a0   :  { %12918 = vmatprep.subr.bf16.mxu1 %v14879_v17  ;;  %12923 = vmatpush3.bf16.msra.mxu0 %v15428_v25 }
 0x8a1   :  { %12924 = vmatprep.subr.bf16.mxu0 %v14879_v17  ;;  %11714 = vmatprep.mubr.msk.f32.mxu0 %vm14880_vm5, %v14881_v38 }
 0x8a3   :  { %12920 = vmatpush3.bf16.msra.mxu1 %v15449_v32 }
 0x8a4   :  { %12927 = vmatprep.subr.bf16.mxu1 %v14879_v17  ;;  %12926 = vmatpush3.bf16.msra.mxu0 %v15442_v31 }
 0x8a5   :  { %12933 = vmatprep.subr.bf16.mxu0 %v14879_v17 }
 0x8a6   :  { %11704 = vmatmul.mubr.msk.f32.vlgmr.msra.gmra.mrb[30].mxu1 %vm828_vm6, %v2352_v44 }
 0x8a7   :  { %12929 = vmatpush3.bf16.msra.mxu1 %v15478_v39  ;;  %11725 = vmatprep.mubr.msk.f32.mxu1 %vm14880_vm5, %v14881_v38 }
 0x8a8   :  { %12930 = vmatprep.subr.bf16.mxu1 %v14879_v17 }
 0x8ab   :  { %12932 = vmatpush3.bf16.msra.mxu1 %v15487_v42 }
 0x8ac   :  { %12939 = vmatprep.subr.bf16.mxu1 %v14879_v17 }
 0x971   :  { %v2430_v45 = vpop.f32.mrb[28].mxu1  ;;  %v2500_v46 = vpop.f32.mrb[26].mxu0 }
 0x972   :  { %v2431_v47 = vadd.f32 %v15527_v36, %v2430_v45  ;;  %v11683_v48 = vpop.f32.mrb[29].mxu1  ;;  %v11694_v50 = vpop.f32.mrb[27].mxu0  ;;  %v2501_v53 = vadd.f32 %v15534_v49, %v2500_v46 }
 0x973   :  { %v2609_v48 = vld [vmem:[#allocation4 + $0x30] sm:$0xff] }
 0x974   :  { %v2574_v54 = vadd.f32 %v2431_v47, %v2356_v51  ;;  %v2581_v57 = vadd.f32 %v2501_v53, %v2358_v56 }
 0x976   :  { %v10595_v55 = vmul.f32 -1.442695, %v2574_v54  ;;  %v10596_v61 = vmul.f32 -1.442695, %v2581_v57 }
 0x978   :  { %13655 = vpow2.f32 %v10595_v55  ;;  %v15737_v55 = vpop.permute.xlu0 %2847 }
 0x979   :  { %v2570_v59 = vpop.f32.mrb[30].mxu1  ;;  %13657 = vpow2.f32 %v10596_v61  ;;  %vm2849_vm1 = vcmp.eq.s32.totalorder %v15737_v55, 1  ;;  %v10151_v55 = vld [vmem:[%s17019_s12] sm:$0xff] }
 0x97a   :  { %v11705_v60 = vpop.f32.mrb[31].mxu1  ;;  %v2571_v4 = vadd.f32 %v15537_v58, %v2570_v59  ;;  %v3112_v59 = vld [vmem:[%s17006_s9 + $0x10] sm:$0xff] }
 0x97b   :  { %v3113_v60 = vld [vmem:[%s17006_s9 + $0x18] sm:$0xff] }
 0x982   :  { %v13656_v62 = vpop.eup %13655 }
 0x983   :  { %v2578_v63 = vadd.f32 1.0, %v13656_v62  ;;  %v13658_v2 = vpop.eup %13657 }
 0x984   :  { %v2585_v3 = vadd.f32 1.0, %v13658_v2  ;;  %v3258_v2 = vld [vmem:[%s17007_s0] sm:$0xff] }
 0x985   :  { %13659 = vrcp.f32 %v2578_v63  ;;  %v12961_v63 = vpack.c.bf16 %v3113_v60, %v3112_v59 }
 0x986   :  { %13661 = vrcp.f32 %v2585_v3  ;;  %v3259_v3 = vld [vmem:[%s17007_s0 + $0x8] sm:$0xff] }
 0x98f   :  { %v13660_v5 = vpop.eup %13659 }
 0x990   :  { %v2588_v6 = vmul.f32 %v13660_v5, %v2571_v4  ;;  %v13662_v10 = vpop.eup %13661  ;;  %v15755_v4 = vld [vmem:[#allocation5] sm:$0xff]  ;;  %v12965_v5 = vpack.c.bf16 %v3259_v3, %v3258_v2 }
 0x991   :  { %v2591_v11 = vsub.f32 1.0, %v13662_v10  ;;  %v2593_v14 = vmul.f32 %v13662_v10, %v2352_v44  ;;  %v15771_v10 = vld [vmem:[#allocation5 + $0x10] sm:$0xff] }
 0x992   :  { %v2589_v9 = vadd.f32 %v2588_v6, %v2360_v7  ;;  %v3260_v6 = vld [vmem:[%s17007_s0 + $0x10] sm:$0xff]  ;;  %v3261_v7 = vld [vmem:[%s17007_s0 + $0x18] sm:$0xff] }
 0x994   :  { %13663 = vtanh.f32 %v2589_v9  ;;  %v15765_v9 = vld [vmem:[#allocation5 + $0x8] sm:$0xff] }
 0x99e   :  { %v13664_v12 = vpop.eup %13663 }
 0x99f   :  { %v2592_v13 = vmul.f32 %v13664_v12, %v2591_v11  ;;  %v15781_v11 = vld [vmem:[#allocation5 + $0x20] sm:$0xff] }
 0x9a1   :  { %v2594_v18 = vadd.f32 %v2593_v14, %v2592_v13  ;;  %v3506_v14 = vld [vmem:[%s17008_s21] sm:$0xff] }
 0x9a3   :  { %v2601_v19 = vsel %vm2600_vm0, %v2594_v18, %v2352_v44  ;;  %v3507_v18 = vld [vmem:[%s17008_s21 + $0x8] sm:$0xff] }
 0x9a4   :  { %2603 = vst.msk [vmem:[#allocation5 + $0x28] sm:$0xff] %vm828_vm6, %v2601_v19  ;;  %11715 = vmatmul.mubr.msk.f32.vlgmr.msra.gmra.mrb[28].mxu0 %vm828_vm6, %v2601_v19  ;;  %11726 = vmatmul.mubr.msk.f32.vlgmr.msra.gmra.mrb[32].mxu1 %vm828_vm6, %v2601_v19 }
 0x9a5   :  { %12935 = vmatpush3.bf16.msra.mxu0 %v15434_v28  ;;  %11736 = vmatprep.mubr.msk.f32.mxu0 %vm14880_vm5, %v14881_v38 }
 0x9a6   :  { %12936 = vmatprep.subr.bf16.mxu0 %v14879_v17  ;;  %12941 = vmatpush3.bf16.msra.mxu1 %v15428_v25  ;;  %v3110_v25 = vld [vmem:[%s17006_s9] sm:$0xff] }
 0x9a7   :  { %12942 = vmatprep.subr.bf16.mxu1 %v14879_v17  ;;  %11747 = vmatprep.mubr.msk.f32.mxu1 %vm14880_vm5, %v14881_v38  ;;  %v12957_v21 = vpack.c.bf16 %v3111_v20, %v3110_v25  ;;  %v15809_v25 = vpack.c.bf16 %v3507_v18, %v3506_v14  ;;  %v3383_v20 = vld [vmem:[%s17009_s15 + $0x8] sm:$0xff] }
 0x9a9   :  { %12938 = vmatpush3.bf16.msra.mxu0 %v15449_v32 }
 0x9aa   :  { %12945 = vmatprep.subr.bf16.mxu0 %v14879_v17  ;;  %12944 = vmatpush3.bf16.msra.mxu1 %v15442_v31 }
 0x9ab   :  { %12951 = vmatprep.subr.bf16.mxu1 %v14879_v17  ;;  %v15786_v12 = vld [vmem:[#allocation5 + $0x28] sm:$0xff] }
 0x9ac   :  { %11737 = vmatmul.mubr.msk.f32.vlgmr.msra.gmra.mrb[30].mxu0 %vm828_vm6, %v2601_v19 }
 0x9ad   :  { %12947 = vmatpush3.bf16.msra.mxu0 %v15478_v39  ;;  %11758 = vmatprep.mubr.msk.f32.mxu0 %vm14880_vm5, %v14881_v38 }
 0x9ae   :  { %12948 = vmatprep.subr.bf16.mxu0 %v14879_v17 }
 0x9b1   :  { %12950 = vmatpush3.bf16.msra.mxu0 %v15487_v42 }
 0x9b2   :  { %12958 = vmatprep.subr.bf16.mxu0 %v12957_v21 }
 0xa77   :  { %v2679_v23 = vpop.f32.mrb[28].mxu0  ;;  %v2749_v24 = vpop.f32.mrb[32].mxu1 }
 0xa78   :  { %v2680_v31 = vadd.f32 %v15527_v36, %v2679_v23  ;;  %v11716_v26 = vpop.f32.mrb[29].mxu0  ;;  %v11727_v27 = vpop.f32.mrb[33].mxu1  ;;  %v2750_v39 = vadd.f32 %v15534_v49, %v2749_v24  ;;  %v3509_v23 = vld [vmem:[%s17008_s21 + $0x18] sm:$0xff] }
 0xa79   :  { %v3384_v26 = vld [vmem:[%s17009_s15 + $0x10] sm:$0xff]  ;;  %v3385_v27 = vld [vmem:[%s17009_s15 + $0x18] sm:$0xff] }
 0xa7a   :  { %v2823_v30 = vadd.f32 %v2680_v31, %v2605_v29  ;;  %v2830_v0 = vadd.f32 %v2750_v39, %v2607_v33  ;;  %v12977_v29 = vpack.c.bf16 %v3385_v27, %v3384_v26 }
 0xa7c   :  { %v10600_v16 = vmul.f32 -1.442695, %v2823_v30  ;;  %v10601_v35 = vmul.f32 -1.442695, %v2830_v0 }
 0xa7e   :  { %13665 = vpow2.f32 %v10600_v16 }
 0xa7f   :  { %v2819_v34 = vpop.f32.mrb[30].mxu0  ;;  %13667 = vpow2.f32 %v10601_v35 }
 0xa80   :  { %v11738_v42 = vpop.f32.mrb[31].mxu0  ;;  %v2820_v45 = vadd.f32 %v15537_v58, %v2819_v34  ;;  %v2854_v34 = vld [vmem:[#allocation2 + $0x38] sm:$0xff] }
 0xa88   :  { %v13666_v37 = vpop.eup %13665 }
 0xa89   :  { %v2827_v40 = vadd.f32 1.0, %v13666_v37  ;;  %v13668_v43 = vpop.eup %13667 }
 0xa8a   :  { %v2834_v44 = vadd.f32 1.0, %v13668_v43 }
 0xa8b   :  { %13669 = vrcp.f32 %v2827_v40  ;;  %v2856_v40 = vld [vmem:[#allocation3 + $0x38] sm:$0xff] }
 0xa8c   :  { %13671 = vrcp.f32 %v2834_v44  ;;  %v15825_v44 = vld [vmem:[#allocation20] ss:$0 sm:$0xff] }
 0xa95   :  { %v13670_v46 = vpop.eup %13669 }
 0xa96   :  { %v2837_v47 = vmul.f32 %v13670_v46, %v2820_v45  ;;  %v13672_v51 = vpop.eup %13671 }
 0xa97   :  { %v2840_v53 = vsub.f32 1.0, %v13672_v51  ;;  %v2842_v57 = vmul.f32 %v13672_v51, %v2601_v19 }
 0xa98   :  { %v2838_v50 = vadd.f32 %v2837_v47, %v2609_v48 }
 0xa9a   :  { %13673 = vtanh.f32 %v2838_v50 }
 0xaa4   :  { %v13674_v54 = vpop.eup %13673 }
 0xaa5   :  { %v2841_v56 = vmul.f32 %v13674_v54, %v2840_v53 }
 0xaa7   :  { %v2843_v61 = vadd.f32 %v2842_v57, %v2841_v56  ;;  %v15833_v57 = vld [vmem:[#allocation22] ss:$0 sm:$0xff] }
 0xaa9   :  { %v15744_v62 = vsel %vm2849_vm1, %v2843_v61, %v2601_v19  ;;  %v3382_v19 = vld [vmem:[%s17009_s15] sm:$0xff] }
 0xaaa   :  { %2852 = vst.msk [vmem:[#allocation5 + $0x30] sm:$0xff] %vm828_vm6, %v15744_v62  ;;  %11748 = vmatmul.mubr.msk.f32.vlgmr.msra.gmra.mrb[34].mxu1 %vm828_vm6, %v15744_v62  ;;  %11759 = vmatmul.mubr.msk.f32.vlgmr.msra.gmra.mrb[32].mxu0 %vm828_vm6, %v15744_v62  ;;  %v12973_v24 = vpack.c.bf16 %v3383_v20, %v3382_v19 }
 0xaab   :  { %12953 = vmatpush3.bf16.msra.mxu1 %v15434_v28  ;;  %12960 = vmatpush3.bf16.msra.mxu0 %v12957_v21  ;;  %v12969_v28 = vpack.c.bf16 %v3261_v7, %v3260_v6  ;;  %v3508_v21 = vld [vmem:[%s17008_s21 + $0x10] sm:$0xff] }
 0xaac   :  { %11780 = vmatprep.mubr.msk.f32.mxu0 %vm828_vm6, %v15755_v4  ;;  %12954 = vmatprep.subr.bf16.mxu1 %v14879_v17  ;;  %v15815_v31 = vpack.c.bf16 %v3509_v23, %v3508_v21 }
 0xaad   :  { %12962 = vmatprep.subr.bf16.mxu0 %v12961_v63  ;;  %11769 = vmatprep.mubr.msk.f32.mxu1 %vm14880_vm5, %v14881_v38 }
 0xaaf   :  { %12956 = vmatpush3.bf16.msra.mxu1 %v15449_v32  ;;  %12964 = vmatpush3.bf16.msra.mxu0 %v12961_v63  ;;  %v15777_v32 = vld [vmem:[#allocation5 + $0x18] sm:$0xff] }
 0xab0   :  { %12966 = vmatprep.subr.bf16.mxu1 %v12965_v5  ;;  %12974 = vmatprep.subr.bf16.mxu0 %v12973_v24 }
 0xab1   :  { %v15792_v13 = vld [vmem:[#allocation5 + $0x30] sm:$0xff] }
 0xab2   :  { %11770 = vmatmul.mubr.msk.f32.vlgmr.msra.gmra.mrb[36].mxu1 %vm828_vm6, %v15744_v62  ;;  %11781 = vmatmul.mubr.msk.f32.vlgmr.msra.gmra.mrb[34].mxu0 %vm828_vm6, %v15765_v9 }
 0xab3   :  { %11783 = vmatprep.mubr.msk.f32.mxu0 %vm828_vm6, %v15771_v10  ;;  %12968 = vmatpush3.bf16.msra.mxu1 %v12965_v5 }
 0xab4   :  { %11800 = vmatprep.mubr.msk.f32.mxu1 %vm828_vm6, %v15755_v4  ;;  %12970 = vmatprep.subr.bf16.mxu1 %v12969_v28 }
 0xab5   :  { %12976 = vmatpush3.bf16.msra.mxu0 %v12973_v24 }
 0xab6   :  { %11784 = vmatmul.mubr.msk.f32.gmra.mrb[36].mxu0 %vm828_vm6, %v15777_v32  ;;  %12978 = vmatprep.subr.bf16.mxu0 %v12977_v29 }
 0xab7   :  { %11786 = vmatprep.mubr.msk.f32.mxu0 %vm828_vm6, %v15781_v11  ;;  %12972 = vmatpush3.bf16.msra.mxu1 %v12969_v28 }
 0xab8   :  { %12981 = vmatprep.subr.bf16.mxu1 %v14879_v17 }
 0xab9   :  { %12980 = vmatpush3.bf16.msra.mxu0 %v12977_v29 }
 0xaba   :  { %11787 = vmatmul.mubr.msk.f32.gmra.mrb[38].mxu0 %vm828_vm6, %v15786_v12  ;;  %11801 = vmatmul.mubr.msk.f32.vlgmr.msra.gmra.mrb[38].mxu1 %vm828_vm6, %v15765_v9 }
 0xabb   :  { %11789 = vmatprep.mubr.msk.f32.mxu0 %vm828_vm6, %v15792_v13  ;;  %11803 = vmatprep.mubr.msk.f32.mxu1 %vm828_vm6, %v15771_v10 }
 0xabc   :  { %12983 = vmatpush3.bf16.msra.mxu1 %v15809_v25  ;;  %12993 = vmatprep.subr.bf16.mxu0 %v14879_v17 }
 0xabd   :  { %12984 = vmatprep.subr.bf16.mxu1 %v14879_v17 }
 0xabe   :  { %11804 = vmatmul.mubr.msk.f32.gmra.mrb[40].mxu1 %vm828_vm6, %v15777_v32 }
 0xabf   :  { %11806 = vmatprep.mubr.msk.f32.mxu1 %vm828_vm6, %v15781_v11 }
 0xac0   :  { %12986 = vmatpush3.bf16.msra.mxu1 %v15815_v31 }
 0xac1   :  { %12987 = vmatprep.subr.bf16.mxu1 %v14879_v17 }
 0xac2   :  { %11807 = vmatmul.mubr.msk.f32.gmra.mrb[42].mxu1 %vm828_vm6, %v15786_v12 }
 0xac3   :  { %11809 = vmatprep.mubr.msk.f32.mxu1 %vm828_vm6, %v15792_v13 }
 0xb7d   :  { %v2928_v39 = vpop.f32.mrb[34].mxu1  ;;  %v2998_v30 = vpop.f32.mrb[32].mxu0 }
 0xb7e   :  { %v2929_v16 = vadd.f32 %v15527_v36, %v2928_v39  ;;  %v11749_v33 = vpop.f32.mrb[35].mxu1  ;;  %v11760_v0 = vpop.f32.mrb[33].mxu0  ;;  %v2999_v42 = vadd.f32 %v15534_v49, %v2998_v30 }
 0xb7f   :  { %v2858_v33 = vld [vmem:[#allocation4 + $0x38] sm:$0xff] }
 0xb80   :  { %v3072_v35 = vadd.f32 %v2929_v16, %v2854_v34  ;;  %v3079_v43 = vadd.f32 %v2999_v42, %v2856_v40 }
 0xb82   :  { %v10605_v37 = vmul.f32 -1.442695, %v3072_v35  ;;  %v10606_v51 = vmul.f32 -1.442695, %v3079_v43 }
 0xb84   :  { %13675 = vpow2.f32 %v10605_v37  ;;  %v15854_v37 = vpop.permute.xlu1 %3096 }
 0xb85   :  { %v3068_v45 = vpop.f32.mrb[36].mxu1  ;;  %v11782_v46 = vpop.f32.mrb[34].mxu0  ;;  %13677 = vpow2.f32 %v10606_v51  ;;  %vm3098_vm2 = vcmp.eq.s32.totalorder %v15854_v37, 1  ;;  %v3515_v51 = vld [vmem:[%s17011_s3 + $0x8] sm:$0xff] }
 0xb86   :  { %v3217_v47 = vadd.f32 %v11782_v46, %v15825_v44  ;;  %v11771_v48 = vpop.f32.mrb[37].mxu1  ;;  %v3211_v50 = vpop.f32.mrb[35].mxu0  ;;  %v3069_v39 = vadd.f32 %v15537_v58, %v3068_v45  ;;  %v3510_v46 = vld [vmem:[%s17010_s16] sm:$0xff] }
 0xb87   :  { %v3212_v36 = vadd.f32 %v15825_v44, %v3211_v50  ;;  %v3514_v50 = vld [vmem:[%s17011_s3] sm:$0xff] }
 0xb88   :  { %3251 = vst.msk [vmem:[#allocation2 + $0x8] sm:$0xff] %vm828_vm6, %v3217_v47  ;;  %v3511_v47 = vld [vmem:[%s17010_s16 + $0x8] sm:$0xff] }
 0xb89   :  { %3250 = vst.msk [vmem:[#allocation2] sm:$0xff] %vm828_vm6, %v3212_v36  ;;  %v11785_v49 = vpop.f32.mrb[36].mxu0  ;;  %v3512_v36 = vld [vmem:[%s17010_s16 + $0x10] sm:$0xff] }
 0xb8a   :  { %v3227_v53 = vadd.f32 %v11785_v49, %v15825_v44  ;;  %v3221_v54 = vpop.f32.mrb[37].mxu0  ;;  %v3513_v49 = vld [vmem:[%s17010_s16 + $0x18] sm:$0xff] }
 0xb8b   :  { %v3222_v56 = vadd.f32 %v15825_v44, %v3221_v54  ;;  %v3516_v54 = vld [vmem:[%s17011_s3 + $0x10] sm:$0xff] }
 0xb8c   :  { %3253 = vst.msk [vmem:[#allocation2 + $0x18] sm:$0xff] %vm828_vm6, %v3227_v53  ;;  %v15879_v53 = vpack.c.bf16 %v3515_v51, %v3514_v50 }
 0xb8d   :  { %3252 = vst.msk [vmem:[#allocation2 + $0x10] sm:$0xff] %vm828_vm6, %v3222_v56  ;;  %v11788_v59 = vpop.f32.mrb[38].mxu0  ;;  %v11802_v60 = vpop.f32.mrb[38].mxu1  ;;  %v3517_v56 = vld [vmem:[%s17011_s3 + $0x18] sm:$0xff] }
 0xb8e   :  { %v13676_v61 = vpop.eup %13675  ;;  %v3237_v63 = vadd.f32 %v11788_v59, %v15825_v44  ;;  %v3341_v2 = vadd.f32 %v11802_v60, %v15833_v57  ;;  %v3231_v3 = vpop.f32.mrb[39].mxu0  ;;  %v15895_v59 = vpack.c.bf16 %v3517_v56, %v3516_v54 }
 0xb8f   :  { %v3335_v5 = vpop.f32.mrb[39].mxu1  ;;  %v3076_v6 = vadd.f32 1.0, %v13676_v61  ;;  %v3232_v7 = vadd.f32 %v15825_v44, %v3231_v3  ;;  %v13678_v21 = vpop.eup %13677 }
 0xb90   :  { %v3336_v28 = vadd.f32 %v15833_v57, %v3335_v5  ;;  %3255 = vst.msk [vmem:[#allocation2 + $0x28] sm:$0xff] %vm828_vm6, %v3237_v63  ;;  %3375 = vst.msk [vmem:[#allocation3 + $0x8] sm:$0xff] %vm828_vm6, %v3341_v2  ;;  %v3083_v29 = vadd.f32 1.0, %v13678_v21  ;;  %v10625_v63 = vld [vmem:[#allocation23] ss:$0 sm:$0xff] }
 0xb91   :  { %13679 = vrcp.f32 %v3076_v6  ;;  %3254 = vst.msk [vmem:[#allocation2 + $0x20] sm:$0xff] %vm828_vm6, %v3232_v7  ;;  %v11805_v14 = vpop.f32.mrb[40].mxu1  ;;  %v15931_v2 = vld [vmem:[#allocation25] ss:$0 sm:$0xff] }
 0xb92   :  { %3374 = vst.msk [vmem:[#allocation3] sm:$0xff] %vm828_vm6, %v3336_v28  ;;  %v3351_v18 = vadd.f32 %v11805_v14, %v15833_v57  ;;  %v3345_v19 = vpop.f32.mrb[41].mxu1  ;;  %13681 = vrcp.f32 %v3083_v29  ;;  %v3521_v14 = vld [vmem:[#allocation2] sm:$0xff] }
 0xb93   :  { %v3346_v20 = vadd.f32 %v15833_v57, %v3345_v19 }
 0xb94   :  { %3377 = vst.msk [vmem:[#allocation3 + $0x18] sm:$0xff] %vm828_vm6, %v3351_v18 }
 0xb95   :  { %3376 = vst.msk [vmem:[#allocation3 + $0x10] sm:$0xff] %vm828_vm6, %v3346_v20  ;;  %v11808_v23 = vpop.f32.mrb[42].mxu1 }
 0xb96   :  { %v3361_v24 = vadd.f32 %v11808_v23, %v15833_v57  ;;  %v3355_v26 = vpop.f32.mrb[43].mxu1 }
 0xb97   :  { %v3356_v27 = vadd.f32 %v15833_v57, %v3355_v26  ;;  %v15940_v26 = vld [vmem:[#allocation26] ss:$0 sm:$0xff] }
 0xb98   :  { %3379 = vst.msk [vmem:[#allocation3 + $0x28] sm:$0xff] %vm828_vm6, %v3361_v24 }
 0xb99   :  { %3378 = vst.msk [vmem:[#allocation3 + $0x20] sm:$0xff] %vm828_vm6, %v3356_v27 }
 0xb9b   :  { %v13680_v30 = vpop.eup %13679 }
 0xb9c   :  { %v3086_v16 = vmul.f32 %v13680_v30, %v3069_v39  ;;  %v13682_v34 = vpop.eup %13681 }
 0xb9d   :  { %v3089_v42 = vsub.f32 1.0, %v13682_v34  ;;  %v3091_v40 = vmul.f32 %v13682_v34, %v15744_v62 }
 0xb9e   :  { %v3087_v0 = vadd.f32 %v3086_v16, %v2858_v33 }
 0xba0   :  { %13683 = vtanh.f32 %v3087_v0  ;;  %v3522_v0 = vld [vmem:[#allocation3] sm:$0xff] }
 0xbaa   :  { %v13684_v35 = vpop.eup %13683 }
 0xbab   :  { %v3090_v43 = vmul.f32 %v13684_v35, %v3089_v42 }
 0xbad   :  { %v3092_v58 = vadd.f32 %v3091_v40, %v3090_v43 }
 0xbaf   :  { %v15861_v45 = vsel %vm3098_vm2, %v3092_v58, %v15744_v62  ;;  %v15875_v62 = vpack.c.bf16 %v3511_v47, %v3510_v46 }
 0xbb0   :  { %3101 = vst.msk [vmem:[#allocation5 + $0x38] sm:$0xff] %vm828_vm6, %v15861_v45 }
 0xbb7   :  { %v3109_v48 = vld [vmem:[#allocation5 + $0x38] sm:$0xff] }
 0xbb8   :  { %11790 = vmatmul.mubr.msk.f32.gmra.mrb[40].mxu0 %vm828_vm6, %v3109_v48  ;;  %11810 = vmatmul.mubr.msk.f32.gmra.mrb[44].mxu1 %vm828_vm6, %v3109_v48 }
 0xbb9   :  { %11820 = vmatprep.mubr.msk.f32.mxu0 %vm828_vm6, %v15755_v4  ;;  %11840 = vmatprep.mubr.msk.f32.mxu1 %vm14880_vm5, %v14881_v38  ;;  %v15889_v4 = vpack.c.bf16 %v3513_v49, %v3512_v36  ;;  %v15949_v36 = vld [vmem:[#allocation28] ss:$0 sm:$0xff] }
 0xbbc   :  { %11821 = vmatmul.mubr.msk.f32.vlgmr.msra.gmra.mrb[42].mxu0 %vm828_vm6, %v15765_v9  ;;  %11841 = vmatmul.mubr.f32.vlgmr.msra.gmra.mrb[46].mxu1 %v14881_v38 }
 0xbbd   :  { %12989 = vmatpush3.bf16.msra.mxu1 %v15875_v62  ;;  %11823 = vmatprep.mubr.msk.f32.mxu0 %vm828_vm6, %v15771_v10 }
 0xbbe   :  { %12990 = vmatprep.subr.bf16.mxu1 %v14879_v17  ;;  %11851 = vmatprep.mubr.msk.f32.mxu1 %vm14880_vm5, %v14881_v38 }
 0xbbf   :  { %12995 = vmatpush3.bf16.msra.mxu0 %v15879_v53 }
 0xbc0   :  { %11824 = vmatmul.mubr.msk.f32.gmra.mrb[44].mxu0 %vm828_vm6, %v15777_v32  ;;  %12996 = vmatprep.subr.bf16.mxu0 %v14879_v17 }
 0xbc1   :  { %12992 = vmatpush3.bf16.msra.mxu1 %v15889_v4  ;;  %11826 = vmatprep.mubr.msk.f32.mxu0 %vm828_vm6, %v15781_v11 }
 0xbc2   :  { %12999 = vmatprep.subr.bf16.mxu1 %v14879_v17 }
 0xbc3   :  { %12998 = vmatpush3.bf16.msra.mxu0 %v15895_v59 }
 0xbc4   :  { %11852 = vmatmul.mubr.f32.vlgmr.msra.gmra.mrb[48].mxu1 %v14881_v38  ;;  %11827 = vmatmul.mubr.msk.f32.gmra.mrb[46].mxu0 %vm828_vm6, %v15786_v12 }
 0xbc5   :  { %11829 = vmatprep.mubr.msk.f32.mxu0 %vm828_vm6, %v15792_v13  ;;  %13001 = vmatpush3.bf16.msra.mxu1 %v15809_v25 }
 0xbc6   :  { %13005 = vmatprep.subr.bf16.mxu0 %v14879_v17  ;;  %13002 = vmatprep.subr.bf16.mxu1 %v14879_v17 }
 0xbc7   :  { %11873 = vmatprep.mubr.msk.f32.mxu1 %vm14880_vm5, %v14881_v38 }
 0xbc8   :  { %11830 = vmatmul.mubr.msk.f32.gmra.mrb[48].mxu0 %vm828_vm6, %v3109_v48 }
 0xbc9   :  { %11862 = vmatprep.mubr.msk.f32.mxu0 %vm14880_vm5, %v14881_v38  ;;  %13004 = vmatpush3.bf16.msra.mxu1 %v15815_v31 }
 0xbca   :  { %13011 = vmatprep.subr.bf16.mxu1 %v14879_v17 }
 0xbcc   :  { %11863 = vmatmul.mubr.f32.vlgmr.msra.gmra.mrb[50].mxu0 %v14881_v38 }
 0xbcd   :  { %13007 = vmatpush3.bf16.msra.mxu0 %v15875_v62  ;;  %11884 = vmatprep.mubr.msk.f32.mxu0 %vm14880_vm5, %v14881_v38 }
 0xbce   :  { %13008 = vmatprep.subr.bf16.mxu0 %v14879_v17 }
 0xbd1   :  { %13010 = vmatpush3.bf16.msra.mxu0 %v15889_v4 }
 0xbd2   :  { %13017 = vmatprep.subr.bf16.mxu0 %v14879_v17 }
 0xc8b   :  { %v11791_v9 = vpop.f32.mrb[40].mxu0  ;;  %v11811_v10 = vpop.f32.mrb[44].mxu1 }
 0xc8c   :  { %v3247_v32 = vadd.f32 %v11791_v9, %v15825_v44  ;;  %v3371_v11 = vadd.f32 %v11811_v10, %v15833_v57  ;;  %v3241_v12 = vpop.f32.mrb[41].mxu0  ;;  %v3365_v13 = vpop.f32.mrb[45].mxu1 }
 0xc8d   :  { %v3242_v60 = vadd.f32 %v15825_v44, %v3241_v12  ;;  %v3366_v61 = vadd.f32 %v15833_v57, %v3365_v13 }
 0xc8e   :  { %3257 = vst.msk [vmem:[#allocation2 + $0x38] sm:$0xff] %vm828_vm6, %v3247_v32  ;;  %3381 = vst.msk [vmem:[#allocation3 + $0x38] sm:$0xff] %vm828_vm6, %v3371_v11 }
 0xc8f   :  { %3256 = vst.msk [vmem:[#allocation2 + $0x30] sm:$0xff] %vm828_vm6, %v3242_v60  ;;  %3380 = vst.msk [vmem:[#allocation3 + $0x30] sm:$0xff] %vm828_vm6, %v3366_v61  ;;  %v11822_v3 = vpop.f32.mrb[42].mxu0  ;;  %v3596_v5 = vpop.f32.mrb[46].mxu1 }
 0xc90   :  { %v3465_v6 = vadd.f32 %v11822_v3, %v10625_v63  ;;  %v3597_v7 = vadd.f32 %v15931_v2, %v3596_v5  ;;  %v3459_v28 = vpop.f32.mrb[43].mxu0  ;;  %v11842_v44 = vpop.f32.mrb[47].mxu1 }
 0xc91   :  { %v3460_v57 = vadd.f32 %v10625_v63, %v3459_v28 }
 0xc92   :  { %3499 = vst.msk [vmem:[#allocation4 + $0x8] sm:$0xff] %vm828_vm6, %v3465_v6  ;;  %v3752_v18 = vadd.f32 %v3597_v7, %v3521_v14 }
 0xc93   :  { %3498 = vst.msk [vmem:[#allocation4] sm:$0xff] %vm828_vm6, %v3460_v57  ;;  %v11825_v19 = vpop.f32.mrb[44].mxu0  ;;  %v3775_v57 = vld [vmem:[#allocation2 + $0x8] sm:$0xff] }
 0xc94   :  { %v10637_v20 = vmul.f32 -1.442695, %v3752_v18  ;;  %v3475_v21 = vadd.f32 %v11825_v19, %v10625_v63  ;;  %v3469_v23 = vpop.f32.mrb[45].mxu0 }
 0xc95   :  { %v3470_v24 = vadd.f32 %v10625_v63, %v3469_v23 }
 0xc96   :  { %13685 = vpow2.f32 %v10637_v20  ;;  %3501 = vst.msk [vmem:[#allocation4 + $0x18] sm:$0xff] %vm828_vm6, %v3475_v21  ;;  %v3776_v21 = vld [vmem:[#allocation3 + $0x8] sm:$0xff] }
 0xc97   :  { %3500 = vst.msk [vmem:[#allocation4 + $0x10] sm:$0xff] %vm828_vm6, %v3470_v24  ;;  %v3672_v27 = vpop.f32.mrb[48].mxu1  ;;  %v11828_v29 = vpop.f32.mrb[46].mxu0 }
 0xc98   :  { %v3673_v39 = vadd.f32 %v15940_v26, %v3672_v27  ;;  %v3485_v30 = vadd.f32 %v11828_v29, %v10625_v63  ;;  %v3479_v16 = vpop.f32.mrb[47].mxu0  ;;  %v11853_v33 = vpop.f32.mrb[49].mxu1 }
 0xc99   :  { %v3480_v34 = vadd.f32 %v10625_v63, %v3479_v16 }
 0xc9a   :  { %v3759_v42 = vadd.f32 %v3673_v39, %v3522_v0  ;;  %3503 = vst.msk [vmem:[#allocation4 + $0x28] sm:$0xff] %vm828_vm6, %v3485_v30  ;;  %v3523_v32 = vld [vmem:[#allocation4] sm:$0xff] }
 0xc9b   :  { %3502 = vst.msk [vmem:[#allocation4 + $0x20] sm:$0xff] %vm828_vm6, %v3480_v34  ;;  %v11831_v35 = vpop.f32.mrb[48].mxu0 }
 0xc9c   :  { %v10638_v40 = vmul.f32 -1.442695, %v3759_v42  ;;  %v3495_v43 = vadd.f32 %v11831_v35, %v10625_v63  ;;  %v3489_v58 = vpop.f32.mrb[49].mxu0  ;;  %v3777_v35 = vld [vmem:[#allocation4 + $0x8] sm:$0xff] }
 0xc9d   :  { %v3490_v46 = vadd.f32 %v10625_v63, %v3489_v58 }
 0xc9e   :  { %13687 = vpow2.f32 %v10638_v40  ;;  %3505 = vst.msk [vmem:[#allocation4 + $0x38] sm:$0xff] %vm828_vm6, %v3495_v43 }
 0xc9f   :  { %3504 = vst.msk [vmem:[#allocation4 + $0x30] sm:$0xff] %vm828_vm6, %v3490_v46  ;;  %v3748_v47 = vpop.f32.mrb[50].mxu0 }
 0xca0   :  { %v13686_v48 = vpop.eup %13685  ;;  %v11864_v50 = vpop.f32.mrb[51].mxu0  ;;  %v3749_v56 = vadd.f32 %v15949_v36, %v3748_v47 }
 0xca1   :  { %v3756_v51 = vadd.f32 1.0, %v13686_v48 }
 0xca3   :  { %13689 = vrcp.f32 %v3756_v51 }
 0xca8   :  { %v13688_v49 = vpop.eup %13687 }
 0xca9   :  { %v3763_v54 = vadd.f32 1.0, %v13688_v49 }
 0xcab   :  { %13691 = vrcp.f32 %v3763_v54 }
 0xcad   :  { %v13690_v9 = vpop.eup %13689 }
 0xcae   :  { %v3766_v10 = vmul.f32 %v13690_v9, %v3749_v56 }
 0xcb0   :  { %v3767_v11 = vadd.f32 %v3766_v10, %v3523_v32  ;;  %v4014_v32 = vld [vmem:[#allocation2 + $0x10] sm:$0xff] }
 0xcb2   :  { %13693 = vtanh.f32 %v3767_v11 }
 0xcb5   :  { %v13692_v12 = vpop.eup %13691 }
 0xcb6   :  { %v3769_v13 = vsub.f32 1.0, %v13692_v12  ;;  %v3771_v63 = vmul.f32 0.0, %v13692_v12 }
 0xcbc   :  { %v13694_v60 = vpop.eup %13693 }
 0xcbd   :  { %v3770_v61 = vmul.f32 %v13694_v60, %v3769_v13  ;;  %v4015_v60 = vld [vmem:[#allocation3 + $0x10] sm:$0xff] }
 0xcbf   :  { %v3772_v3 = vadd.f32 %v3771_v63, %v3770_v61 }
 0xcc1   :  { %v3773_v5 = vsel %vm1356_vm7, %v3772_v3, 0.0 }
 0xcc2   :  { %3774 = vst.msk [vmem:[#allocation5] sm:$0xff] %vm828_vm6, %v3773_v5  ;;  %11874 = vmatmul.mubr.msk.f32.vlgmr.msra.gmra.mrb[50].mxu1 %vm828_vm6, %v3773_v5  ;;  %11885 = vmatmul.mubr.msk.f32.vlgmr.msra.gmra.mrb[52].mxu0 %vm828_vm6, %v3773_v5 }
 0xcc3   :  { %13013 = vmatpush3.bf16.msra.mxu1 %v15879_v53  ;;  %11895 = vmatprep.mubr.msk.f32.mxu1 %vm14880_vm5, %v14881_v38 }
 0xcc4   :  { %13014 = vmatprep.subr.bf16.mxu1 %v14879_v17  ;;  %13019 = vmatpush3.bf16.msra.mxu0 %v15809_v25 }
 0xcc5   :  { %13020 = vmatprep.subr.bf16.mxu0 %v14879_v17  ;;  %11906 = vmatprep.mubr.msk.f32.mxu0 %vm14880_vm5, %v14881_v38 }
 0xcc7   :  { %13016 = vmatpush3.bf16.msra.mxu1 %v15895_v59 }
 0xcc8   :  { %13023 = vmatprep.subr.bf16.mxu1 %v14879_v17  ;;  %13022 = vmatpush3.bf16.msra.mxu0 %v15815_v31 }
 0xcc9   :  { %13029 = vmatprep.subr.bf16.mxu0 %v14879_v17 }
 0xcca   :  { %11896 = vmatmul.mubr.msk.f32.vlgmr.msra.gmra.mrb[52].mxu1 %vm828_vm6, %v3773_v5 }
 0xccb   :  { %13025 = vmatpush3.bf16.msra.mxu1 %v15875_v62  ;;  %11917 = vmatprep.mubr.msk.f32.mxu1 %vm14880_vm5, %v14881_v38 }
 0xccc   :  { %13026 = vmatprep.subr.bf16.mxu1 %v14879_v17 }
 0xccf   :  { %13028 = vmatpush3.bf16.msra.mxu1 %v15889_v4 }
 0xcd0   :  { %13035 = vmatprep.subr.bf16.mxu1 %v14879_v17 }
 0xd95   :  { %v3847_v6 = vpop.f32.mrb[50].mxu1  ;;  %v3917_v7 = vpop.f32.mrb[52].mxu0 }
 0xd96   :  { %v3848_v28 = vadd.f32 %v15931_v2, %v3847_v6  ;;  %v11875_v44 = vpop.f32.mrb[51].mxu1  ;;  %v11886_v14 = vpop.f32.mrb[53].mxu0  ;;  %v3918_v18 = vadd.f32 %v15940_v26, %v3917_v7 }
 0xd98   :  { %v3991_v19 = vadd.f32 %v3848_v28, %v3775_v57  ;;  %v3998_v23 = vadd.f32 %v3918_v18, %v3776_v21 }
 0xd9a   :  { %v10642_v20 = vmul.f32 -1.442695, %v3991_v19  ;;  %v10643_v29 = vmul.f32 -1.442695, %v3998_v23  ;;  %v4016_v19 = vld [vmem:[#allocation4 + $0x10] sm:$0xff] }
 0xd9c   :  { %13695 = vpow2.f32 %v10642_v20 }
 0xd9d   :  { %v3987_v24 = vpop.f32.mrb[52].mxu1  ;;  %13697 = vpow2.f32 %v10643_v29 }
 0xd9e   :  { %v11897_v27 = vpop.f32.mrb[53].mxu1  ;;  %v3988_v0 = vadd.f32 %v15949_v36, %v3987_v24 }
 0xda6   :  { %v13696_v39 = vpop.eup %13695 }
 0xda7   :  { %v3995_v30 = vadd.f32 1.0, %v13696_v39  ;;  %v13698_v16 = vpop.eup %13697 }
 0xda8   :  { %v4002_v33 = vadd.f32 1.0, %v13698_v16 }
 0xda9   :  { %13699 = vrcp.f32 %v3995_v30 }
 0xdaa   :  { %13701 = vrcp.f32 %v4002_v33 }
 0xdb3   :  { %v13700_v34 = vpop.eup %13699 }
 0xdb4   :  { %v4005_v42 = vmul.f32 %v13700_v34, %v3988_v0  ;;  %v13702_v43 = vpop.eup %13701 }
 0xdb5   :  { %v4008_v58 = vsub.f32 1.0, %v13702_v43  ;;  %v4010_v48 = vmul.f32 %v13702_v43, %v3773_v5 }
 0xdb6   :  { %v4006_v40 = vadd.f32 %v4005_v42, %v3777_v35  ;;  %v4253_v35 = vld [vmem:[#allocation2 + $0x18] sm:$0xff] }
 0xdb8   :  { %13703 = vtanh.f32 %v4006_v40 }
 0xdc2   :  { %v13704_v46 = vpop.eup %13703 }
 0xdc3   :  { %v4009_v47 = vmul.f32 %v13704_v46, %v4008_v58  ;;  %v4254_v46 = vld [vmem:[#allocation3 + $0x18] sm:$0xff] }
 0xdc5   :  { %v4011_v50 = vadd.f32 %v4010_v48, %v4009_v47 }
 0xdc7   :  { %v4012_v51 = vsel %vm1604_vm12, %v4011_v50, %v3773_v5 }
 0xdc8   :  { %4013 = vst.msk [vmem:[#allocation5 + $0x8] sm:$0xff] %vm828_vm6, %v4012_v51  ;;  %11907 = vmatmul.mubr.msk.f32.vlgmr.msra.gmra.mrb[54].mxu0 %vm828_vm6, %v4012_v51  ;;  %11918 = vmatmul.mubr.msk.f32.vlgmr.msra.gmra.mrb[54].mxu1 %vm828_vm6, %v4012_v51 }
 0xdc9   :  { %13031 = vmatpush3.bf16.msra.mxu0 %v15879_v53  ;;  %11928 = vmatprep.mubr.msk.f32.mxu0 %vm14880_vm5, %v14881_v38 }
 0xdca   :  { %13032 = vmatprep.subr.bf16.mxu0 %v14879_v17  ;;  %13037 = vmatpush3.bf16.msra.mxu1 %v15809_v25 }
 0xdcb   :  { %13038 = vmatprep.subr.bf16.mxu1 %v14879_v17  ;;  %11939 = vmatprep.mubr.msk.f32.mxu1 %vm14880_vm5, %v14881_v38 }
 0xdcd   :  { %13034 = vmatpush3.bf16.msra.mxu0 %v15895_v59 }
 0xdce   :  { %13041 = vmatprep.subr.bf16.mxu0 %v14879_v17  ;;  %13040 = vmatpush3.bf16.msra.mxu1 %v15815_v31 }
 0xdcf   :  { %13047 = vmatprep.subr.bf16.mxu1 %v14879_v17 }
 0xdd0   :  { %11929 = vmatmul.mubr.msk.f32.vlgmr.msra.gmra.mrb[56].mxu0 %vm828_vm6, %v4012_v51 }
 0xdd1   :  { %13043 = vmatpush3.bf16.msra.mxu0 %v15875_v62  ;;  %11950 = vmatprep.mubr.msk.f32.mxu0 %vm14880_vm5, %v14881_v38 }
 0xdd2   :  { %13044 = vmatprep.subr.bf16.mxu0 %v14879_v17 }
 0xdd5   :  { %13046 = vmatpush3.bf16.msra.mxu0 %v15889_v4 }
 0xdd6   :  { %13053 = vmatprep.subr.bf16.mxu0 %v14879_v17 }
 0xe9b   :  { %v4086_v49 = vpop.f32.mrb[54].mxu0  ;;  %v4156_v54 = vpop.f32.mrb[54].mxu1 }
 0xe9c   :  { %v4087_v56 = vadd.f32 %v15931_v2, %v4086_v49  ;;  %v11908_v9 = vpop.f32.mrb[55].mxu0  ;;  %v11919_v10 = vpop.f32.mrb[55].mxu1  ;;  %v4157_v11 = vadd.f32 %v15940_v26, %v4156_v54 }
 0xe9e   :  { %v4230_v12 = vadd.f32 %v4087_v56, %v4014_v32  ;;  %v4237_v61 = vadd.f32 %v4157_v11, %v4015_v60 }
 0xea0   :  { %v10647_v13 = vmul.f32 -1.442695, %v4230_v12  ;;  %v10648_v5 = vmul.f32 -1.442695, %v4237_v61  ;;  %v4255_v12 = vld [vmem:[#allocation4 + $0x18] sm:$0xff] }
 0xea2   :  { %13705 = vpow2.f32 %v10647_v13 }
 0xea3   :  { %v4226_v63 = vpop.f32.mrb[56].mxu0  ;;  %13707 = vpow2.f32 %v10648_v5 }
 0xea4   :  { %v11930_v3 = vpop.f32.mrb[57].mxu0  ;;  %v4227_v14 = vadd.f32 %v15949_v36, %v4226_v63 }
 0xeac   :  { %v13706_v6 = vpop.eup %13705 }
 0xead   :  { %v4234_v7 = vadd.f32 1.0, %v13706_v6  ;;  %v13708_v28 = vpop.eup %13707 }
 0xeae   :  { %v4241_v44 = vadd.f32 1.0, %v13708_v28 }
 0xeaf   :  { %13709 = vrcp.f32 %v4234_v7 }
 0xeb0   :  { %13711 = vrcp.f32 %v4241_v44 }
 0xeb9   :  { %v13710_v57 = vpop.eup %13709 }
 0xeba   :  { %v4244_v18 = vmul.f32 %v13710_v57, %v4227_v14  ;;  %v13712_v21 = vpop.eup %13711 }
 0xebb   :  { %v4247_v23 = vsub.f32 1.0, %v13712_v21  ;;  %v4249_v29 = vmul.f32 %v13712_v21, %v4012_v51 }
 0xebc   :  { %v4245_v20 = vadd.f32 %v4244_v18, %v4016_v19  ;;  %v4492_v19 = vld [vmem:[#allocation2 + $0x20] sm:$0xff] }
 0xebe   :  { %13713 = vtanh.f32 %v4245_v20 }
 0xec8   :  { %v13714_v24 = vpop.eup %13713 }
 0xec9   :  { %v4248_v27 = vmul.f32 %v13714_v24, %v4247_v23  ;;  %v4493_v24 = vld [vmem:[#allocation3 + $0x20] sm:$0xff] }
 0xecb   :  { %v4250_v39 = vadd.f32 %v4249_v29, %v4248_v27 }
 0xecd   :  { %v4251_v30 = vsel %vm1853_vm13, %v4250_v39, %v4012_v51 }
 0xece   :  { %4252 = vst.msk [vmem:[#allocation5 + $0x10] sm:$0xff] %vm828_vm6, %v4251_v30  ;;  %11940 = vmatmul.mubr.msk.f32.vlgmr.msra.gmra.mrb[56].mxu1 %vm828_vm6, %v4251_v30  ;;  %11951 = vmatmul.mubr.msk.f32.vlgmr.msra.gmra.mrb[58].mxu0 %vm828_vm6, %v4251_v30 }
 0xecf   :  { %13049 = vmatpush3.bf16.msra.mxu1 %v15879_v53  ;;  %11961 = vmatprep.mubr.msk.f32.mxu1 %vm14880_vm5, %v14881_v38 }
 0xed0   :  { %13050 = vmatprep.subr.bf16.mxu1 %v14879_v17  ;;  %13055 = vmatpush3.bf16.msra.mxu0 %v15809_v25 }
 0xed1   :  { %13056 = vmatprep.subr.bf16.mxu0 %v14879_v17  ;;  %11972 = vmatprep.mubr.msk.f32.mxu0 %vm14880_vm5, %v14881_v38 }
 0xed3   :  { %13052 = vmatpush3.bf16.msra.mxu1 %v15895_v59 }
 0xed4   :  { %13059 = vmatprep.subr.bf16.mxu1 %v14879_v17  ;;  %13058 = vmatpush3.bf16.msra.mxu0 %v15815_v31 }
 0xed5   :  { %13065 = vmatprep.subr.bf16.mxu0 %v14879_v17 }
 0xed6   :  { %11962 = vmatmul.mubr.msk.f32.vlgmr.msra.gmra.mrb[58].mxu1 %vm828_vm6, %v4251_v30 }
 0xed7   :  { %13061 = vmatpush3.bf16.msra.mxu1 %v15875_v62  ;;  %11983 = vmatprep.mubr.msk.f32.mxu1 %vm14880_vm5, %v14881_v38 }
 0xed8   :  { %13062 = vmatprep.subr.bf16.mxu1 %v14879_v17 }
 0xedb   :  { %13064 = vmatpush3.bf16.msra.mxu1 %v15889_v4 }
 0xedc   :  { %13071 = vmatprep.subr.bf16.mxu1 %v14879_v17 }
 0xfa1   :  { %v4325_v16 = vpop.f32.mrb[56].mxu1  ;;  %v4395_v33 = vpop.f32.mrb[58].mxu0 }
 0xfa2   :  { %v4326_v0 = vadd.f32 %v15931_v2, %v4325_v16  ;;  %v11941_v34 = vpop.f32.mrb[57].mxu1  ;;  %v11952_v42 = vpop.f32.mrb[59].mxu0  ;;  %v4396_v40 = vadd.f32 %v15940_v26, %v4395_v33 }
 0xfa4   :  { %v4469_v43 = vadd.f32 %v4326_v0, %v4253_v35  ;;  %v4476_v47 = vadd.f32 %v4396_v40, %v4254_v46 }
 0xfa6   :  { %v10652_v58 = vmul.f32 -1.442695, %v4469_v43  ;;  %v10653_v51 = vmul.f32 -1.442695, %v4476_v47  ;;  %v4494_v43 = vld [vmem:[#allocation4 + $0x20] sm:$0xff] }
 0xfa8   :  { %13715 = vpow2.f32 %v10652_v58 }
 0xfa9   :  { %v4465_v48 = vpop.f32.mrb[58].mxu1  ;;  %13717 = vpow2.f32 %v10653_v51 }
 0xfaa   :  { %v11963_v50 = vpop.f32.mrb[59].mxu1  ;;  %v4466_v10 = vadd.f32 %v15949_v36, %v4465_v48 }
 0xfb2   :  { %v13716_v49 = vpop.eup %13715 }
 0xfb3   :  { %v4473_v54 = vadd.f32 1.0, %v13716_v49  ;;  %v13718_v56 = vpop.eup %13717 }
 0xfb4   :  { %v4480_v9 = vadd.f32 1.0, %v13718_v56 }
 0xfb5   :  { %13719 = vrcp.f32 %v4473_v54 }
 0xfb6   :  { %13721 = vrcp.f32 %v4480_v9 }
 0xfbf   :  { %v13720_v32 = vpop.eup %13719 }
 0xfc0   :  { %v4483_v11 = vmul.f32 %v13720_v32, %v4466_v10  ;;  %v13722_v60 = vpop.eup %13721 }
 0xfc1   :  { %v4486_v61 = vsub.f32 1.0, %v13722_v60  ;;  %v4488_v5 = vmul.f32 %v13722_v60, %v4251_v30 }
 0xfc2   :  { %v4484_v13 = vadd.f32 %v4483_v11, %v4255_v12  ;;  %v4731_v12 = vld [vmem:[#allocation2 + $0x28] sm:$0xff] }
 0xfc4   :  { %13723 = vtanh.f32 %v4484_v13 }
 0xfce   :  { %v13724_v63 = vpop.eup %13723 }
 0xfcf   :  { %v4487_v3 = vmul.f32 %v13724_v63, %v4486_v61  ;;  %v4732_v63 = vld [vmem:[#allocation3 + $0x28] sm:$0xff] }
 0xfd1   :  { %v4489_v6 = vadd.f32 %v4488_v5, %v4487_v3 }
 0xfd3   :  { %v4490_v7 = vsel %vm2102_vm14, %v4489_v6, %v4251_v30 }
 0xfd4   :  { %4491 = vst.msk [vmem:[#allocation5 + $0x18] sm:$0xff] %vm828_vm6, %v4490_v7  ;;  %11973 = vmatmul.mubr.msk.f32.vlgmr.msra.gmra.mrb[60].mxu0 %vm828_vm6, %v4490_v7  ;;  %11984 = vmatmul.mubr.msk.f32.vlgmr.msra.gmra.mrb[60].mxu1 %vm828_vm6, %v4490_v7 }
 0xfd5   :  { %13067 = vmatpush3.bf16.msra.mxu0 %v15879_v53  ;;  %11994 = vmatprep.mubr.msk.f32.mxu0 %vm14880_vm5, %v14881_v38 }
 0xfd6   :  { %13068 = vmatprep.subr.bf16.mxu0 %v14879_v17  ;;  %13073 = vmatpush3.bf16.msra.mxu1 %v15809_v25 }
 0xfd7   :  { %13074 = vmatprep.subr.bf16.mxu1 %v14879_v17  ;;  %12005 = vmatprep.mubr.msk.f32.mxu1 %vm14880_vm5, %v14881_v38 }
 0xfd9   :  { %13070 = vmatpush3.bf16.msra.mxu0 %v15895_v59 }
 0xfda   :  { %13077 = vmatprep.subr.bf16.mxu0 %v14879_v17  ;;  %13076 = vmatpush3.bf16.msra.mxu1 %v15815_v31 }
 0xfdb   :  { %13083 = vmatprep.subr.bf16.mxu1 %v14879_v17 }
 0xfdc   :  { %11995 = vmatmul.mubr.msk.f32.vlgmr.msra.gmra.mrb[62].mxu0 %vm828_vm6, %v4490_v7 }
 0xfdd   :  { %13079 = vmatpush3.bf16.msra.mxu0 %v15875_v62  ;;  %12016 = vmatprep.mubr.msk.f32.mxu0 %vm14880_vm5, %v14881_v38 }
 0xfde   :  { %13080 = vmatprep.subr.bf16.mxu0 %v14879_v17 }
 0xfe1   :  { %13082 = vmatpush3.bf16.msra.mxu0 %v15889_v4 }
 0xfe2   :  { %13089 = vmatprep.subr.bf16.mxu0 %v14879_v17 }
0x10a7   :  { %v4564_v28 = vpop.f32.mrb[60].mxu0  ;;  %v4634_v44 = vpop.f32.mrb[60].mxu1 }
0x10a8   :  { %v4565_v14 = vadd.f32 %v15931_v2, %v4564_v28  ;;  %v11974_v57 = vpop.f32.mrb[61].mxu0  ;;  %v11985_v18 = vpop.f32.mrb[61].mxu1  ;;  %v4635_v20 = vadd.f32 %v15940_v26, %v4634_v44 }
0x10aa   :  { %v4708_v21 = vadd.f32 %v4565_v14, %v4492_v19  ;;  %v4715_v27 = vadd.f32 %v4635_v20, %v4493_v24 }
0x10ac   :  { %v10657_v23 = vmul.f32 -1.442695, %v4708_v21  ;;  %v10658_v30 = vmul.f32 -1.442695, %v4715_v27  ;;  %v4733_v21 = vld [vmem:[#allocation4 + $0x28] sm:$0xff] }
0x10ae   :  { %13725 = vpow2.f32 %v10657_v23 }
0x10af   :  { %v4704_v29 = vpop.f32.mrb[62].mxu0  ;;  %13727 = vpow2.f32 %v10658_v30 }
0x10b0   :  { %v11996_v39 = vpop.f32.mrb[63].mxu0  ;;  %v4705_v42 = vadd.f32 %v15949_v36, %v4704_v29 }
0x10b8   :  { %v13726_v16 = vpop.eup %13725 }
0x10b9   :  { %v4712_v33 = vadd.f32 1.0, %v13726_v16  ;;  %v13728_v0 = vpop.eup %13727 }
0x10ba   :  { %v4719_v34 = vadd.f32 1.0, %v13728_v0  ;;  %v5457_v0 = vld [vmem:[%s17012_s14 + $0x8] sm:$0xff] }
0x10bb   :  { %13729 = vrcp.f32 %v4712_v33 }
0x10bc   :  { %13731 = vrcp.f32 %v4719_v34 }
0x10c5   :  { %v13730_v35 = vpop.eup %13729 }
0x10c6   :  { %v4722_v40 = vmul.f32 %v13730_v35, %v4705_v42  ;;  %v13732_v46 = vpop.eup %13731 }
0x10c7   :  { %v4725_v47 = vsub.f32 1.0, %v13732_v46  ;;  %v4727_v51 = vmul.f32 %v13732_v46, %v4490_v7 }
0x10c8   :  { %v4723_v58 = vadd.f32 %v4722_v40, %v4494_v43 }
0x10ca   :  { %13733 = vtanh.f32 %v4723_v58  ;;  %v4970_v58 = vld [vmem:[#allocation2 + $0x30] sm:$0xff] }
0x10d4   :  { %v13734_v48 = vpop.eup %13733 }
0x10d5   :  { %v4726_v50 = vmul.f32 %v13734_v48, %v4725_v47  ;;  %v4971_v48 = vld [vmem:[#allocation3 + $0x30] sm:$0xff] }
0x10d7   :  { %v4728_v49 = vadd.f32 %v4727_v51, %v4726_v50 }
0x10d9   :  { %v4729_v54 = vsel %vm2351_vm15, %v4728_v49, %v4490_v7 }
0x10da   :  { %4730 = vst.msk [vmem:[#allocation5 + $0x20] sm:$0xff] %vm828_vm6, %v4729_v54  ;;  %12006 = vmatmul.mubr.msk.f32.vlgmr.msra.gmra.mrb[62].mxu1 %vm828_vm6, %v4729_v54  ;;  %12017 = vmatmul.mubr.msk.f32.vlgmr.msra.gmra.mrb[64].mxu0 %vm828_vm6, %v4729_v54 }
0x10db   :  { %13085 = vmatpush3.bf16.msra.mxu1 %v15879_v53  ;;  %12027 = vmatprep.mubr.msk.f32.mxu1 %vm14880_vm5, %v14881_v38 }
0x10dc   :  { %13086 = vmatprep.subr.bf16.mxu1 %v14879_v17  ;;  %13091 = vmatpush3.bf16.msra.mxu0 %v15809_v25 }
0x10dd   :  { %13092 = vmatprep.subr.bf16.mxu0 %v14879_v17  ;;  %12038 = vmatprep.mubr.msk.f32.mxu0 %vm14880_vm5, %v14881_v38 }
0x10df   :  { %13088 = vmatpush3.bf16.msra.mxu1 %v15895_v59 }
0x10e0   :  { %13095 = vmatprep.subr.bf16.mxu1 %v14879_v17  ;;  %13094 = vmatpush3.bf16.msra.mxu0 %v15815_v31 }
0x10e1   :  { %13101 = vmatprep.subr.bf16.mxu0 %v14879_v17 }
0x10e2   :  { %12028 = vmatmul.mubr.msk.f32.vlgmr.msra.gmra.mrb[64].mxu1 %vm828_vm6, %v4729_v54 }
0x10e3   :  { %13097 = vmatpush3.bf16.msra.mxu1 %v15875_v62  ;;  %12049 = vmatprep.mubr.msk.f32.mxu1 %vm14880_vm5, %v14881_v38 }
0x10e4   :  { %13098 = vmatprep.subr.bf16.mxu1 %v14879_v17 }
0x10e7   :  { %13100 = vmatpush3.bf16.msra.mxu1 %v15889_v4 }
0x10e8   :  { %13107 = vmatprep.subr.bf16.mxu1 %v14879_v17 }
0x11ad   :  { %v4803_v56 = vpop.f32.mrb[62].mxu1  ;;  %v4873_v9 = vpop.f32.mrb[64].mxu0 }
0x11ae   :  { %v4804_v10 = vadd.f32 %v15931_v2, %v4803_v56  ;;  %v12007_v32 = vpop.f32.mrb[63].mxu1  ;;  %v12018_v11 = vpop.f32.mrb[65].mxu0  ;;  %v4874_v13 = vadd.f32 %v15940_v26, %v4873_v9 }
0x11b0   :  { %v4947_v60 = vadd.f32 %v4804_v10, %v4731_v12  ;;  %v4954_v3 = vadd.f32 %v4874_v13, %v4732_v63  ;;  %v4972_v13 = vld [vmem:[#allocation4 + $0x30] sm:$0xff] }
0x11b2   :  { %v10662_v61 = vmul.f32 -1.442695, %v4947_v60  ;;  %v10663_v7 = vmul.f32 -1.442695, %v4954_v3 }
0x11b4   :  { %13735 = vpow2.f32 %v10662_v61 }
0x11b5   :  { %v4943_v5 = vpop.f32.mrb[64].mxu1  ;;  %13737 = vpow2.f32 %v10663_v7  ;;  %v5458_v7 = vld [vmem:[%s17012_s14 + $0x10] sm:$0xff] }
0x11b6   :  { %v12029_v6 = vpop.f32.mrb[65].mxu1  ;;  %v4944_v18 = vadd.f32 %v15949_v36, %v4943_v5 }
0x11be   :  { %v13736_v28 = vpop.eup %13735 }
0x11bf   :  { %v4951_v44 = vadd.f32 1.0, %v13736_v28  ;;  %v13738_v14 = vpop.eup %13737  ;;  %v5459_v28 = vld [vmem:[%s17012_s14 + $0x18] sm:$0xff] }
0x11c0   :  { %v4958_v57 = vadd.f32 1.0, %v13738_v14 }
0x11c1   :  { %13739 = vrcp.f32 %v4951_v44 }
0x11c2   :  { %13741 = vrcp.f32 %v4958_v57  ;;  %v13129_v57 = vpack.c.bf16 %v5459_v28, %v5458_v7  ;;  %v16208_v28 = vld [vmem:[#allocation32] ss:$0 sm:$0xff] }
0x11cb   :  { %v13740_v19 = vpop.eup %13739 }
0x11cc   :  { %v4961_v20 = vmul.f32 %v13740_v19, %v4944_v18  ;;  %v13742_v24 = vpop.eup %13741  ;;  %v5604_v18 = vld [vmem:[%s17013_s27] sm:$0xff]  ;;  %v5605_v19 = vld [vmem:[%s17013_s27 + $0x8] sm:$0xff] }
0x11cd   :  { %v4964_v27 = vsub.f32 1.0, %v13742_v24  ;;  %v4966_v30 = vmul.f32 %v13742_v24, %v4729_v54  ;;  %v5607_v24 = vld [vmem:[%s17013_s27 + $0x18] sm:$0xff] }
0x11ce   :  { %v4962_v23 = vadd.f32 %v4961_v20, %v4733_v21  ;;  %v16130_v20 = vld [vmem:[#allocation5] sm:$0xff]  ;;  %v13133_v21 = vpack.c.bf16 %v5605_v19, %v5604_v18 }
0x11d0   :  { %13743 = vtanh.f32 %v4962_v23  ;;  %v5606_v23 = vld [vmem:[%s17013_s27 + $0x10] sm:$0xff] }
0x11da   :  { %v13744_v29 = vpop.eup %13743 }
0x11db   :  { %v4965_v39 = vmul.f32 %v13744_v29, %v4964_v27  ;;  %v16140_v27 = vld [vmem:[#allocation5 + $0x8] sm:$0xff]  ;;  %v16146_v29 = vld [vmem:[#allocation5 + $0x10] sm:$0xff] }
0x11dd   :  { %v4967_v16 = vadd.f32 %v4966_v30, %v4965_v39  ;;  %v16156_v39 = vld [vmem:[#allocation5 + $0x20] sm:$0xff] }
0x11df   :  { %v4968_v33 = vsel %vm2600_vm0, %v4967_v16, %v4729_v54 }
0x11e0   :  { %4969 = vst.msk [vmem:[#allocation5 + $0x28] sm:$0xff] %vm828_vm6, %v4968_v33  ;;  %12039 = vmatmul.mubr.msk.f32.vlgmr.msra.gmra.mrb[66].mxu0 %vm828_vm6, %v4968_v33  ;;  %12050 = vmatmul.mubr.msk.f32.vlgmr.msra.gmra.mrb[66].mxu1 %vm828_vm6, %v4968_v33 }
0x11e1   :  { %13103 = vmatpush3.bf16.msra.mxu0 %v15879_v53  ;;  %12060 = vmatprep.mubr.msk.f32.mxu0 %vm14880_vm5, %v14881_v38 }
0x11e2   :  { %13104 = vmatprep.subr.bf16.mxu0 %v14879_v17  ;;  %13109 = vmatpush3.bf16.msra.mxu1 %v15809_v25  ;;  %v5456_v25 = vld [vmem:[%s17012_s14] sm:$0xff] }
0x11e3   :  { %13110 = vmatprep.subr.bf16.mxu1 %v14879_v17  ;;  %12071 = vmatprep.mubr.msk.f32.mxu1 %vm14880_vm5, %v14881_v38  ;;  %v13125_v34 = vpack.c.bf16 %v5457_v0, %v5456_v25  ;;  %v5853_v25 = vld [vmem:[%s17014_s22 + $0x8] sm:$0xff] }
0x11e5   :  { %13106 = vmatpush3.bf16.msra.mxu0 %v15895_v59 }
0x11e6   :  { %13113 = vmatprep.subr.bf16.mxu0 %v14879_v17  ;;  %13112 = vmatpush3.bf16.msra.mxu1 %v15815_v31 }
0x11e7   :  { %13119 = vmatprep.subr.bf16.mxu1 %v14879_v17  ;;  %v16161_v30 = vld [vmem:[#allocation5 + $0x28] sm:$0xff] }
0x11e8   :  { %12061 = vmatmul.mubr.msk.f32.vlgmr.msra.gmra.mrb[68].mxu0 %vm828_vm6, %v4968_v33 }
0x11e9   :  { %13115 = vmatpush3.bf16.msra.mxu0 %v15875_v62  ;;  %12082 = vmatprep.mubr.msk.f32.mxu0 %vm14880_vm5, %v14881_v38 }
0x11ea   :  { %13116 = vmatprep.subr.bf16.mxu0 %v14879_v17 }
0x11ed   :  { %13118 = vmatpush3.bf16.msra.mxu0 %v15889_v4 }
0x11ee   :  { %13126 = vmatprep.subr.bf16.mxu0 %v13125_v34 }
0x12b3   :  { %v5042_v42 = vpop.f32.mrb[66].mxu0  ;;  %v5112_v35 = vpop.f32.mrb[66].mxu1 }
0x12b4   :  { %v5043_v31 = vadd.f32 %v15931_v2, %v5042_v42  ;;  %v12040_v40 = vpop.f32.mrb[67].mxu0  ;;  %v12051_v43 = vpop.f32.mrb[67].mxu1  ;;  %v5113_v62 = vadd.f32 %v15940_v26, %v5112_v35  ;;  %v5729_v42 = vld [vmem:[%s17015_s8 + $0x8] sm:$0xff]  ;;  %v5854_v35 = vld [vmem:[%s17014_s22 + $0x10] sm:$0xff] }
0x12b5   :  { %v5855_v40 = vld [vmem:[%s17014_s22 + $0x18] sm:$0xff] }
0x12b6   :  { %v5186_v46 = vadd.f32 %v5043_v31, %v4970_v58  ;;  %v5193_v50 = vadd.f32 %v5113_v62, %v4971_v48  ;;  %v16191_v43 = vpack.c.bf16 %v5855_v40, %v5854_v35  ;;  %v5730_v58 = vld [vmem:[%s17015_s8 + $0x10] sm:$0xff]  ;;  %v5731_v62 = vld [vmem:[%s17015_s8 + $0x18] sm:$0xff] }
0x12b8   :  { %v10667_v47 = vmul.f32 -1.442695, %v5186_v46  ;;  %v10668_v49 = vmul.f32 -1.442695, %v5193_v50  ;;  %v13145_v46 = vpack.c.bf16 %v5731_v62, %v5730_v58 }
0x12ba   :  { %13745 = vpow2.f32 %v10667_v47 }
0x12bb   :  { %v5182_v51 = vpop.f32.mrb[68].mxu0  ;;  %13747 = vpow2.f32 %v10668_v49  ;;  %v5209_v49 = vld [vmem:[#allocation2 + $0x38] sm:$0xff] }
0x12bc   :  { %v12062_v4 = vpop.f32.mrb[69].mxu0  ;;  %v5183_v32 = vadd.f32 %v15949_v36, %v5182_v51 }
0x12c4   :  { %v13746_v54 = vpop.eup %13745 }
0x12c5   :  { %v5190_v56 = vadd.f32 1.0, %v13746_v54  ;;  %v13748_v9 = vpop.eup %13747 }
0x12c6   :  { %v5197_v10 = vadd.f32 1.0, %v13748_v9 }
0x12c7   :  { %13749 = vrcp.f32 %v5190_v56 }
0x12c8   :  { %13751 = vrcp.f32 %v5197_v10  ;;  %v5210_v10 = vld [vmem:[#allocation3 + $0x38] sm:$0xff] }
0x12d1   :  { %v13750_v11 = vpop.eup %13749 }
0x12d2   :  { %v5200_v12 = vmul.f32 %v13750_v11, %v5183_v32  ;;  %v13752_v61 = vpop.eup %13751  ;;  %v16200_v11 = vld [vmem:[#allocation31] ss:$0 sm:$0xff] }
0x12d3   :  { %v5203_v63 = vsub.f32 1.0, %v13752_v61  ;;  %v5205_v6 = vmul.f32 %v13752_v61, %v4968_v33 }
0x12d4   :  { %v5201_v60 = vadd.f32 %v5200_v12, %v4972_v13 }
0x12d6   :  { %13753 = vtanh.f32 %v5201_v60 }
0x12e0   :  { %v13754_v3 = vpop.eup %13753 }
0x12e1   :  { %v5204_v5 = vmul.f32 %v13754_v3, %v5203_v63 }
0x12e3   :  { %v5206_v44 = vadd.f32 %v5205_v6, %v5204_v5 }
0x12e5   :  { %v16119_v14 = vsel %vm2849_vm1, %v5206_v44, %v4968_v33  ;;  %v5852_v33 = vld [vmem:[%s17014_s22] sm:$0xff] }
0x12e6   :  { %5208 = vst.msk [vmem:[#allocation5 + $0x30] sm:$0xff] %vm828_vm6, %v16119_v14  ;;  %12072 = vmatmul.mubr.msk.f32.vlgmr.msra.gmra.mrb[68].mxu1 %vm828_vm6, %v16119_v14  ;;  %12083 = vmatmul.mubr.msk.f32.vlgmr.msra.gmra.mrb[70].mxu0 %vm828_vm6, %v16119_v14  ;;  %v16183_v0 = vpack.c.bf16 %v5853_v25, %v5852_v33 }
0x12e7   :  { %13121 = vmatpush3.bf16.msra.mxu1 %v15879_v53  ;;  %13128 = vmatpush3.bf16.msra.mxu0 %v13125_v34  ;;  %v13137_v53 = vpack.c.bf16 %v5607_v24, %v5606_v23  ;;  %v5728_v34 = vld [vmem:[%s17015_s8] sm:$0xff] }
0x12e8   :  { %12104 = vmatprep.mubr.msk.f32.mxu0 %vm828_vm6, %v16130_v20  ;;  %13122 = vmatprep.subr.bf16.mxu1 %v14879_v17  ;;  %v13141_v31 = vpack.c.bf16 %v5729_v42, %v5728_v34 }
0x12e9   :  { %13130 = vmatprep.subr.bf16.mxu0 %v13129_v57  ;;  %12093 = vmatprep.mubr.msk.f32.mxu1 %vm14880_vm5, %v14881_v38 }
0x12eb   :  { %13124 = vmatpush3.bf16.msra.mxu1 %v15895_v59  ;;  %13132 = vmatpush3.bf16.msra.mxu0 %v13129_v57  ;;  %v16152_v59 = vld [vmem:[#allocation5 + $0x18] sm:$0xff] }
0x12ec   :  { %13134 = vmatprep.subr.bf16.mxu1 %v13133_v21  ;;  %13142 = vmatprep.subr.bf16.mxu0 %v13141_v31 }
0x12ed   :  { %v16167_v16 = vld [vmem:[#allocation5 + $0x30] sm:$0xff] }
0x12ee   :  { %12094 = vmatmul.mubr.msk.f32.vlgmr.msra.gmra.mrb[70].mxu1 %vm828_vm6, %v16119_v14  ;;  %12105 = vmatmul.mubr.msk.f32.vlgmr.msra.gmra.mrb[72].mxu0 %vm828_vm6, %v16140_v27 }
0x12ef   :  { %12107 = vmatprep.mubr.msk.f32.mxu0 %vm828_vm6, %v16146_v29  ;;  %13136 = vmatpush3.bf16.msra.mxu1 %v13133_v21 }
0x12f0   :  { %12124 = vmatprep.mubr.msk.f32.mxu1 %vm828_vm6, %v16130_v20  ;;  %13138 = vmatprep.subr.bf16.mxu1 %v13137_v53 }
0x12f1   :  { %13144 = vmatpush3.bf16.msra.mxu0 %v13141_v31 }
0x12f2   :  { %12108 = vmatmul.mubr.msk.f32.gmra.mrb[74].mxu0 %vm828_vm6, %v16152_v59  ;;  %13146 = vmatprep.subr.bf16.mxu0 %v13145_v46 }
0x12f3   :  { %12110 = vmatprep.mubr.msk.f32.mxu0 %vm828_vm6, %v16156_v39  ;;  %13140 = vmatpush3.bf16.msra.mxu1 %v13137_v53 }
0x12f4   :  { %13149 = vmatprep.subr.bf16.mxu1 %v14879_v17 }
0x12f5   :  { %13148 = vmatpush3.bf16.msra.mxu0 %v13145_v46 }
0x12f6   :  { %12111 = vmatmul.mubr.msk.f32.gmra.mrb[76].mxu0 %vm828_vm6, %v16161_v30  ;;  %12125 = vmatmul.mubr.msk.f32.vlgmr.msra.gmra.mrb[72].mxu1 %vm828_vm6, %v16140_v27 }
0x12f7   :  { %12113 = vmatprep.mubr.msk.f32.mxu0 %vm828_vm6, %v16167_v16  ;;  %12127 = vmatprep.mubr.msk.f32.mxu1 %vm828_vm6, %v16146_v29 }
0x12f8   :  { %13151 = vmatpush3.bf16.msra.mxu1 %v16183_v0  ;;  %13161 = vmatprep.subr.bf16.mxu0 %v14879_v17 }
0x12f9   :  { %13152 = vmatprep.subr.bf16.mxu1 %v14879_v17 }
0x12fa   :  { %12128 = vmatmul.mubr.msk.f32.gmra.mrb[74].mxu1 %vm828_vm6, %v16152_v59 }
0x12fb   :  { %12130 = vmatprep.mubr.msk.f32.mxu1 %vm828_vm6, %v16156_v39 }
0x12fc   :  { %13154 = vmatpush3.bf16.msra.mxu1 %v16191_v43 }
0x12fd   :  { %13155 = vmatprep.subr.bf16.mxu1 %v14879_v17 }
0x12fe   :  { %12131 = vmatmul.mubr.msk.f32.gmra.mrb[76].mxu1 %vm828_vm6, %v16161_v30 }
0x12ff   :  { %12133 = vmatprep.mubr.msk.f32.mxu1 %vm828_vm6, %v16167_v16 }
0x13b9   :  { %v5281_v47 = vpop.f32.mrb[68].mxu1  ;;  %v5351_v48 = vpop.f32.mrb[70].mxu0 }
0x13ba   :  { %v5282_v50 = vadd.f32 %v15931_v2, %v5281_v47  ;;  %v12073_v51 = vpop.f32.mrb[69].mxu1  ;;  %v12084_v4 = vpop.f32.mrb[71].mxu0  ;;  %v5352_v54 = vadd.f32 %v15940_v26, %v5351_v48 }
0x13bc   :  { %v5425_v56 = vadd.f32 %v5282_v50, %v5209_v49  ;;  %v5432_v32 = vadd.f32 %v5352_v54, %v5210_v10  ;;  %v5211_v49 = vld [vmem:[#allocation4 + $0x38] sm:$0xff] }
0x13be   :  { %v10672_v9 = vmul.f32 -1.442695, %v5425_v56  ;;  %v10673_v3 = vmul.f32 -1.442695, %v5432_v32 }
0x13c0   :  { %13755 = vpow2.f32 %v10672_v9 }
0x13c1   :  { %v5421_v12 = vpop.f32.mrb[70].mxu1  ;;  %v12106_v13 = vpop.f32.mrb[72].mxu0  ;;  %13757 = vpow2.f32 %v10673_v3  ;;  %v5860_v3 = vld [vmem:[#allocation29] sm:$0xff] }
0x13c2   :  { %v5563_v60 = vadd.f32 %v12106_v13, %v16200_v11  ;;  %v12095_v61 = vpop.f32.mrb[71].mxu1  ;;  %v5557_v63 = vpop.f32.mrb[73].mxu0  ;;  %v5422_v50 = vadd.f32 %v15949_v36, %v5421_v12  ;;  %v5856_v12 = vld [vmem:[%s17016_s18] sm:$0xff] }
0x13c3   :  { %v5558_v2 = vadd.f32 %v16200_v11, %v5557_v63  ;;  %v5857_v61 = vld [vmem:[%s17016_s18 + $0x8] sm:$0xff] }
0x13c4   :  { %5597 = vst.msk [vmem:[#allocation2 + $0x8] sm:$0xff] %vm828_vm6, %v5563_v60 }
0x13c5   :  { %5596 = vst.msk [vmem:[#allocation2] sm:$0xff] %vm828_vm6, %v5558_v2  ;;  %v12109_v26 = vpop.f32.mrb[74].mxu0  ;;  %v5861_v2 = vld [vmem:[#allocation29 + $0x8] sm:$0xff] }
0x13c6   :  { %v5573_v5 = vadd.f32 %v12109_v26, %v16200_v11  ;;  %v5567_v6 = vpop.f32.mrb[75].mxu0  ;;  %v5858_v26 = vld [vmem:[%s17016_s18 + $0x10] sm:$0xff] }
0x13c7   :  { %v5568_v7 = vadd.f32 %v16200_v11, %v5567_v6  ;;  %v16246_v6 = vpack.c.bf16 %v5861_v2, %v5860_v3 }
0x13c8   :  { %5599 = vst.msk [vmem:[#allocation2 + $0x18] sm:$0xff] %vm828_vm6, %v5573_v5  ;;  %v5859_v5 = vld [vmem:[%s17016_s18 + $0x18] sm:$0xff] }
0x13c9   :  { %5598 = vst.msk [vmem:[#allocation2 + $0x10] sm:$0xff] %vm828_vm6, %v5568_v7  ;;  %v12112_v44 = vpop.f32.mrb[76].mxu0  ;;  %v12126_v57 = vpop.f32.mrb[72].mxu1  ;;  %v5862_v7 = vld [vmem:[#allocation29 + $0x10] sm:$0xff] }
0x13ca   :  { %v13756_v18 = vpop.eup %13755  ;;  %v5583_v19 = vadd.f32 %v12112_v44, %v16200_v11  ;;  %v5687_v21 = vadd.f32 %v12126_v57, %v16208_v28  ;;  %v5577_v23 = vpop.f32.mrb[77].mxu0  ;;  %v5863_v44 = vld [vmem:[#allocation29 + $0x18] sm:$0xff] }
0x13cb   :  { %v5681_v24 = vpop.f32.mrb[73].mxu1  ;;  %v5429_v53 = vadd.f32 1.0, %v13756_v18  ;;  %v5578_v33 = vadd.f32 %v16200_v11, %v5577_v23  ;;  %v13758_v40 = vpop.eup %13757  ;;  %v16260_v57 = vpack.c.bf16 %v5863_v44, %v5862_v7  ;;  %v16296_v23 = vld [vmem:[#allocation35] ss:$0 sm:$0xff] }
0x13cc   :  { %v5682_v25 = vadd.f32 %v16208_v28, %v5681_v24  ;;  %5601 = vst.msk [vmem:[#allocation2 + $0x28] sm:$0xff] %vm828_vm6, %v5583_v19  ;;  %5721 = vst.msk [vmem:[#allocation3 + $0x8] sm:$0xff] %vm828_vm6, %v5687_v21  ;;  %v5436_v48 = vadd.f32 1.0, %v13758_v40  ;;  %v10692_v21 = vld [vmem:[#allocation34] ss:$0 sm:$0xff] }
0x13cd   :  { %13759 = vrcp.f32 %v5429_v53  ;;  %5600 = vst.msk [vmem:[#allocation2 + $0x20] sm:$0xff] %vm828_vm6, %v5578_v33  ;;  %v12129_v34 = vpop.f32.mrb[74].mxu1 }
0x13ce   :  { %5720 = vst.msk [vmem:[#allocation3] sm:$0xff] %vm828_vm6, %v5682_v25  ;;  %v5697_v42 = vadd.f32 %v12129_v34, %v16208_v28  ;;  %v5691_v35 = vpop.f32.mrb[75].mxu1  ;;  %13761 = vrcp.f32 %v5436_v48 }
0x13cf   :  { %v5692_v31 = vadd.f32 %v16208_v28, %v5691_v35 }
0x13d0   :  { %5723 = vst.msk [vmem:[#allocation3 + $0x18] sm:$0xff] %vm828_vm6, %v5697_v42  ;;  %v5867_v42 = vld [vmem:[#allocation2] sm:$0xff] }
0x13d1   :  { %5722 = vst.msk [vmem:[#allocation3 + $0x10] sm:$0xff] %vm828_vm6, %v5692_v31  ;;  %v12132_v58 = vpop.f32.mrb[76].mxu1 }
0x13d2   :  { %v5707_v62 = vadd.f32 %v12132_v58, %v16208_v28  ;;  %v5701_v46 = vpop.f32.mrb[77].mxu1 }
0x13d3   :  { %v5702_v47 = vadd.f32 %v16208_v28, %v5701_v46 }
0x13d4   :  { %5725 = vst.msk [vmem:[#allocation3 + $0x28] sm:$0xff] %vm828_vm6, %v5707_v62 }
0x13d5   :  { %5724 = vst.msk [vmem:[#allocation3 + $0x20] sm:$0xff] %vm828_vm6, %v5702_v47  ;;  %v16305_v47 = vld [vmem:[#allocation37] ss:$0 sm:$0xff] }
0x13d7   :  { %v13760_v51 = vpop.eup %13759 }
0x13d8   :  { %v5439_v4 = vmul.f32 %v13760_v51, %v5422_v50  ;;  %v13762_v56 = vpop.eup %13761 }
0x13d9   :  { %v5442_v9 = vsub.f32 1.0, %v13762_v56  ;;  %v5444_v13 = vmul.f32 %v13762_v56, %v16119_v14  ;;  %v5868_v56 = vld [vmem:[#allocation3] sm:$0xff] }
0x13da   :  { %v5440_v54 = vadd.f32 %v5439_v4, %v5211_v49 }
0x13dc   :  { %13763 = vtanh.f32 %v5440_v54 }
0x13e6   :  { %v13764_v10 = vpop.eup %13763 }
0x13e7   :  { %v5443_v32 = vmul.f32 %v13764_v10, %v5442_v9 }
0x13e9   :  { %v5445_v60 = vadd.f32 %v5444_v13, %v5443_v32 }
0x13eb   :  { %v5446_v36 = vsel %vm3098_vm2, %v5445_v60, %v16119_v14  ;;  %v16242_v14 = vpack.c.bf16 %v5857_v61, %v5856_v12 }
0x13ec   :  { %10133 = vrot.lane.b32.xlu0 %v5446_v36, %s14882_s23  ;;  %5447 = vst.msk [vmem:[#allocation5 + $0x38] sm:$0xff] %vm828_vm6, %v5446_v36 }
0x13f3   :  { %v5455_v63 = vld [vmem:[#allocation5 + $0x38] sm:$0xff] }
0x13f4   :  { %12114 = vmatmul.mubr.msk.f32.gmra.mrb[78].mxu0 %vm828_vm6, %v5455_v63  ;;  %12134 = vmatmul.mubr.msk.f32.gmra.mrb[78].mxu1 %vm828_vm6, %v5455_v63 }
0x13f5   :  { %12144 = vmatprep.mubr.msk.f32.mxu0 %vm828_vm6, %v16130_v20  ;;  %12164 = vmatprep.mubr.msk.f32.mxu1 %vm14880_vm5, %v14881_v38  ;;  %v16254_v20 = vpack.c.bf16 %v5859_v5, %v5858_v26  ;;  %v16314_v26 = vld [vmem:[#allocation38] ss:$0 sm:$0xff] }
0x13f8   :  { %12145 = vmatmul.mubr.msk.f32.vlgmr.msra.gmra.mrb[80].mxu0 %vm828_vm6, %v16140_v27  ;;  %12165 = vmatmul.mubr.f32.vlgmr.msra.gmra.mrb[80].mxu1 %v14881_v38 }
0x13f9   :  { %13157 = vmatpush3.bf16.msra.mxu1 %v16242_v14  ;;  %12147 = vmatprep.mubr.msk.f32.mxu0 %vm828_vm6, %v16146_v29 }
0x13fa   :  { %13158 = vmatprep.subr.bf16.mxu1 %v14879_v17  ;;  %12175 = vmatprep.mubr.msk.f32.mxu1 %vm14880_vm5, %v14881_v38 }
0x13fb   :  { %13163 = vmatpush3.bf16.msra.mxu0 %v16246_v6 }
0x13fc   :  { %12148 = vmatmul.mubr.msk.f32.gmra.mrb[82].mxu0 %vm828_vm6, %v16152_v59  ;;  %13164 = vmatprep.subr.bf16.mxu0 %v14879_v17 }
0x13fd   :  { %13160 = vmatpush3.bf16.msra.mxu1 %v16254_v20  ;;  %12150 = vmatprep.mubr.msk.f32.mxu0 %vm828_vm6, %v16156_v39 }
0x13fe   :  { %13167 = vmatprep.subr.bf16.mxu1 %v14879_v17 }
0x13ff   :  { %13166 = vmatpush3.bf16.msra.mxu0 %v16260_v57 }
0x1400   :  { %12176 = vmatmul.mubr.f32.vlgmr.msra.gmra.mrb[82].mxu1 %v14881_v38  ;;  %12151 = vmatmul.mubr.msk.f32.gmra.mrb[84].mxu0 %vm828_vm6, %v16161_v30 }
0x1401   :  { %12153 = vmatprep.mubr.msk.f32.mxu0 %vm828_vm6, %v16167_v16  ;;  %13169 = vmatpush3.bf16.msra.mxu1 %v16183_v0 }
0x1402   :  { %13173 = vmatprep.subr.bf16.mxu0 %v14879_v17  ;;  %13170 = vmatprep.subr.bf16.mxu1 %v14879_v17 }
0x1403   :  { %12197 = vmatprep.mubr.msk.f32.mxu1 %vm14880_vm5, %v14881_v38 }
0x1404   :  { %12154 = vmatmul.mubr.msk.f32.gmra.mrb[86].mxu0 %vm828_vm6, %v5455_v63 }
0x1405   :  { %12186 = vmatprep.mubr.msk.f32.mxu0 %vm14880_vm5, %v14881_v38  ;;  %13172 = vmatpush3.bf16.msra.mxu1 %v16191_v43 }
0x1406   :  { %13179 = vmatprep.subr.bf16.mxu1 %v14879_v17 }
0x1408   :  { %12187 = vmatmul.mubr.f32.vlgmr.msra.gmra.mrb[88].mxu0 %v14881_v38 }
0x1409   :  { %13175 = vmatpush3.bf16.msra.mxu0 %v16242_v14  ;;  %12208 = vmatprep.mubr.msk.f32.mxu0 %vm14880_vm5, %v14881_v38 }
0x140a   :  { %13176 = vmatprep.subr.bf16.mxu0 %v14879_v17 }
0x140d   :  { %13178 = vmatpush3.bf16.msra.mxu0 %v16254_v20 }
0x140e   :  { %13185 = vmatprep.subr.bf16.mxu0 %v14879_v17 }
0x14c7   :  { %v12115_v27 = vpop.f32.mrb[78].mxu0  ;;  %v12135_v29 = vpop.f32.mrb[78].mxu1 }
0x14c8   :  { %v5593_v59 = vadd.f32 %v12115_v27, %v16200_v11  ;;  %v5717_v39 = vadd.f32 %v12135_v29, %v16208_v28  ;;  %v5587_v30 = vpop.f32.mrb[79].mxu0  ;;  %v5711_v16 = vpop.f32.mrb[79].mxu1 }
0x14c9   :  { %v5588_v18 = vadd.f32 %v16200_v11, %v5587_v30  ;;  %v5712_v19 = vadd.f32 %v16208_v28, %v5711_v16 }
0x14ca   :  { %5603 = vst.msk [vmem:[#allocation2 + $0x38] sm:$0xff] %vm828_vm6, %v5593_v59  ;;  %5727 = vst.msk [vmem:[#allocation3 + $0x38] sm:$0xff] %vm828_vm6, %v5717_v39 }
0x14cb   :  { %5602 = vst.msk [vmem:[#allocation2 + $0x30] sm:$0xff] %vm828_vm6, %v5588_v18  ;;  %5726 = vst.msk [vmem:[#allocation3 + $0x30] sm:$0xff] %vm828_vm6, %v5712_v19  ;;  %v12146_v24 = vpop.f32.mrb[80].mxu0  ;;  %v5942_v53 = vpop.f32.mrb[80].mxu1 }
0x14cc   :  { %v5811_v33 = vadd.f32 %v12146_v24, %v10692_v21  ;;  %v5943_v25 = vadd.f32 %v16296_v23, %v5942_v53  ;;  %v5805_v34 = vpop.f32.mrb[81].mxu0  ;;  %v12166_v11 = vpop.f32.mrb[81].mxu1 }
0x14cd   :  { %v5806_v28 = vadd.f32 %v10692_v21, %v5805_v34 }
0x14ce   :  { %5845 = vst.msk [vmem:[#allocation4 + $0x8] sm:$0xff] %vm828_vm6, %v5811_v33  ;;  %v6098_v35 = vadd.f32 %v5943_v25, %v5867_v42 }
0x14cf   :  { %5844 = vst.msk [vmem:[#allocation4] sm:$0xff] %vm828_vm6, %v5806_v28  ;;  %v12149_v31 = vpop.f32.mrb[82].mxu0  ;;  %v6121_v28 = vld [vmem:[#allocation2 + $0x8] sm:$0xff] }
0x14d0   :  { %v10704_v40 = vmul.f32 -1.442695, %v6098_v35  ;;  %v5821_v58 = vadd.f32 %v12149_v31, %v10692_v21  ;;  %v5815_v62 = vpop.f32.mrb[83].mxu0 }
0x14d1   :  { %v5816_v46 = vadd.f32 %v10692_v21, %v5815_v62 }
0x14d2   :  { %13765 = vpow2.f32 %v10704_v40  ;;  %5847 = vst.msk [vmem:[#allocation4 + $0x18] sm:$0xff] %vm828_vm6, %v5821_v58  ;;  %v6122_v58 = vld [vmem:[#allocation3 + $0x8] sm:$0xff] }
0x14d3   :  { %5846 = vst.msk [vmem:[#allocation4 + $0x10] sm:$0xff] %vm828_vm6, %v5816_v46  ;;  %v6018_v48 = vpop.f32.mrb[82].mxu1  ;;  %v12152_v50 = vpop.f32.mrb[84].mxu0 }
0x14d4   :  { %v6019_v51 = vadd.f32 %v16305_v47, %v6018_v48  ;;  %v5831_v4 = vadd.f32 %v12152_v50, %v10692_v21  ;;  %v5825_v49 = vpop.f32.mrb[85].mxu0  ;;  %v12177_v54 = vpop.f32.mrb[83].mxu1 }
0x14d5   :  { %v5826_v9 = vadd.f32 %v10692_v21, %v5825_v49 }
0x14d6   :  { %v6105_v10 = vadd.f32 %v6019_v51, %v5868_v56  ;;  %5849 = vst.msk [vmem:[#allocation4 + $0x28] sm:$0xff] %vm828_vm6, %v5831_v4  ;;  %v5869_v59 = vld [vmem:[#allocation4] sm:$0xff] }
0x14d7   :  { %5848 = vst.msk [vmem:[#allocation4 + $0x20] sm:$0xff] %vm828_vm6, %v5826_v9  ;;  %v12155_v32 = vpop.f32.mrb[86].mxu0 }
0x14d8   :  { %v10705_v13 = vmul.f32 -1.442695, %v6105_v10  ;;  %v5841_v60 = vadd.f32 %v12155_v32, %v10692_v21  ;;  %v5835_v36 = vpop.f32.mrb[87].mxu0  ;;  %v6123_v32 = vld [vmem:[#allocation4 + $0x8] sm:$0xff] }
0x14d9   :  { %v5836_v12 = vadd.f32 %v10692_v21, %v5835_v36 }
0x14da   :  { %13767 = vpow2.f32 %v10705_v13  ;;  %5851 = vst.msk [vmem:[#allocation4 + $0x38] sm:$0xff] %vm828_vm6, %v5841_v60 }
0x14db   :  { %5850 = vst.msk [vmem:[#allocation4 + $0x30] sm:$0xff] %vm828_vm6, %v5836_v12  ;;  %v6094_v61 = vpop.f32.mrb[88].mxu0 }
0x14dc   :  { %v13766_v63 = vpop.eup %13765  ;;  %v12188_v3 = vpop.f32.mrb[89].mxu0  ;;  %v6095_v44 = vadd.f32 %v16314_v26, %v6094_v61 }
0x14dd   :  { %v6102_v2 = vadd.f32 1.0, %v13766_v63 }
0x14df   :  { %13769 = vrcp.f32 %v6102_v2 }
0x14e4   :  { %v13768_v5 = vpop.eup %13767 }
0x14e5   :  { %v6109_v7 = vadd.f32 1.0, %v13768_v5 }
0x14e7   :  { %13771 = vrcp.f32 %v6109_v7 }
0x14e9   :  { %v13770_v27 = vpop.eup %13769 }
0x14ea   :  { %v6112_v29 = vmul.f32 %v13770_v27, %v6095_v44 }
0x14ec   :  { %v6113_v39 = vadd.f32 %v6112_v29, %v5869_v59  ;;  %v6360_v59 = vld [vmem:[#allocation2 + $0x10] sm:$0xff] }
0x14ee   :  { %13773 = vtanh.f32 %v6113_v39 }
0x14f1   :  { %v13772_v30 = vpop.eup %13771 }
0x14f2   :  { %v6115_v16 = vsub.f32 1.0, %v13772_v30  ;;  %v6117_v21 = vmul.f32 0.0, %v13772_v30 }
0x14f8   :  { %v13774_v18 = vpop.eup %13773 }
0x14f9   :  { %v6116_v19 = vmul.f32 %v13774_v18, %v6115_v16  ;;  %v6361_v18 = vld [vmem:[#allocation3 + $0x10] sm:$0xff] }
0x14fb   :  { %v6118_v24 = vadd.f32 %v6117_v21, %v6116_v19 }
0x14fd   :  { %v6119_v53 = vsel %vm1356_vm7, %v6118_v24, 0.0 }
0x14fe   :  { %6120 = vst.msk [vmem:[#allocation5] sm:$0xff] %vm828_vm6, %v6119_v53  ;;  %12198 = vmatmul.mubr.msk.f32.vlgmr.msra.gmra.mrb[84].mxu1 %vm828_vm6, %v6119_v53  ;;  %12209 = vmatmul.mubr.msk.f32.vlgmr.msra.gmra.mrb[90].mxu0 %vm828_vm6, %v6119_v53 }
0x14ff   :  { %13181 = vmatpush3.bf16.msra.mxu1 %v16246_v6  ;;  %12219 = vmatprep.mubr.msk.f32.mxu1 %vm14880_vm5, %v14881_v38 }
0x1500   :  { %13182 = vmatprep.subr.bf16.mxu1 %v14879_v17  ;;  %13187 = vmatpush3.bf16.msra.mxu0 %v16183_v0 }
0x1501   :  { %13188 = vmatprep.subr.bf16.mxu0 %v14879_v17  ;;  %12230 = vmatprep.mubr.msk.f32.mxu0 %vm14880_vm5, %v14881_v38 }
0x1503   :  { %13184 = vmatpush3.bf16.msra.mxu1 %v16260_v57 }
0x1504   :  { %13191 = vmatprep.subr.bf16.mxu1 %v14879_v17  ;;  %13190 = vmatpush3.bf16.msra.mxu0 %v16191_v43 }
0x1505   :  { %13197 = vmatprep.subr.bf16.mxu0 %v14879_v17 }
0x1506   :  { %12220 = vmatmul.mubr.msk.f32.vlgmr.msra.gmra.mrb[86].mxu1 %vm828_vm6, %v6119_v53 }
0x1507   :  { %13193 = vmatpush3.bf16.msra.mxu1 %v16242_v14  ;;  %12241 = vmatprep.mubr.msk.f32.mxu1 %vm14880_vm5, %v14881_v38 }
0x1508   :  { %13194 = vmatprep.subr.bf16.mxu1 %v14879_v17 }
0x150b   :  { %13196 = vmatpush3.bf16.msra.mxu1 %v16254_v20 }
0x150c   :  { %13203 = vmatprep.subr.bf16.mxu1 %v14879_v17 }
0x15d1   :  { %v6193_v33 = vpop.f32.mrb[84].mxu1  ;;  %v6263_v25 = vpop.f32.mrb[90].mxu0 }
0x15d2   :  { %v6194_v34 = vadd.f32 %v16296_v23, %v6193_v33  ;;  %v12199_v11 = vpop.f32.mrb[85].mxu1  ;;  %v12210_v42 = vpop.f32.mrb[91].mxu0  ;;  %v6264_v35 = vadd.f32 %v16305_v47, %v6263_v25 }
0x15d4   :  { %v6337_v31 = vadd.f32 %v6194_v34, %v6121_v28  ;;  %v6344_v62 = vadd.f32 %v6264_v35, %v6122_v58 }
0x15d6   :  { %v10709_v40 = vmul.f32 -1.442695, %v6337_v31  ;;  %v10710_v50 = vmul.f32 -1.442695, %v6344_v62  ;;  %v6362_v31 = vld [vmem:[#allocation4 + $0x10] sm:$0xff] }
0x15d8   :  { %13775 = vpow2.f32 %v10709_v40 }
0x15d9   :  { %v6333_v46 = vpop.f32.mrb[86].mxu1  ;;  %13777 = vpow2.f32 %v10710_v50 }
0x15da   :  { %v12221_v48 = vpop.f32.mrb[87].mxu1  ;;  %v6334_v56 = vadd.f32 %v16314_v26, %v6333_v46 }
0x15e2   :  { %v13776_v51 = vpop.eup %13775 }
0x15e3   :  { %v6341_v4 = vadd.f32 1.0, %v13776_v51  ;;  %v13778_v49 = vpop.eup %13777 }
0x15e4   :  { %v6348_v54 = vadd.f32 1.0, %v13778_v49 }
0x15e5   :  { %13779 = vrcp.f32 %v6341_v4 }
0x15e6   :  { %13781 = vrcp.f32 %v6348_v54 }
0x15ef   :  { %v13780_v9 = vpop.eup %13779 }
0x15f0   :  { %v6351_v10 = vmul.f32 %v13780_v9, %v6334_v56  ;;  %v13782_v60 = vpop.eup %13781 }
0x15f1   :  { %v6354_v36 = vsub.f32 1.0, %v13782_v60  ;;  %v6356_v63 = vmul.f32 %v13782_v60, %v6119_v53 }
0x15f2   :  { %v6352_v13 = vadd.f32 %v6351_v10, %v6123_v32  ;;  %v6599_v32 = vld [vmem:[#allocation2 + $0x18] sm:$0xff] }
0x15f4   :  { %13783 = vtanh.f32 %v6352_v13 }
0x15fe   :  { %v13784_v12 = vpop.eup %13783 }
0x15ff   :  { %v6355_v61 = vmul.f32 %v13784_v12, %v6354_v36  ;;  %v6600_v12 = vld [vmem:[#allocation3 + $0x18] sm:$0xff] }
0x1601   :  { %v6357_v3 = vadd.f32 %v6356_v63, %v6355_v61 }
0x1603   :  { %v6358_v2 = vsel %vm1604_vm12, %v6357_v3, %v6119_v53 }
0x1604   :  { %6359 = vst.msk [vmem:[#allocation5 + $0x8] sm:$0xff] %vm828_vm6, %v6358_v2  ;;  %12231 = vmatmul.mubr.msk.f32.vlgmr.msra.gmra.mrb[92].mxu0 %vm828_vm6, %v6358_v2  ;;  %12242 = vmatmul.mubr.msk.f32.vlgmr.msra.gmra.mrb[88].mxu1 %vm828_vm6, %v6358_v2 }
0x1605   :  { %13199 = vmatpush3.bf16.msra.mxu0 %v16246_v6  ;;  %12252 = vmatprep.mubr.msk.f32.mxu0 %vm14880_vm5, %v14881_v38 }
0x1606   :  { %13200 = vmatprep.subr.bf16.mxu0 %v14879_v17  ;;  %13205 = vmatpush3.bf16.msra.mxu1 %v16183_v0 }
0x1607   :  { %13206 = vmatprep.subr.bf16.mxu1 %v14879_v17  ;;  %12263 = vmatprep.mubr.msk.f32.mxu1 %vm14880_vm5, %v14881_v38 }
0x1609   :  { %13202 = vmatpush3.bf16.msra.mxu0 %v16260_v57 }
0x160a   :  { %13209 = vmatprep.subr.bf16.mxu0 %v14879_v17  ;;  %13208 = vmatpush3.bf16.msra.mxu1 %v16191_v43 }
0x160b   :  { %13215 = vmatprep.subr.bf16.mxu1 %v14879_v17 }
0x160c   :  { %12253 = vmatmul.mubr.msk.f32.vlgmr.msra.gmra.mrb[94].mxu0 %vm828_vm6, %v6358_v2 }
0x160d   :  { %13211 = vmatpush3.bf16.msra.mxu0 %v16242_v14  ;;  %12274 = vmatprep.mubr.msk.f32.mxu0 %vm14880_vm5, %v14881_v38 }
0x160e   :  { %13212 = vmatprep.subr.bf16.mxu0 %v14879_v17 }
0x1611   :  { %13214 = vmatpush3.bf16.msra.mxu0 %v16254_v20 }
0x1612   :  { %13221 = vmatprep.subr.bf16.mxu0 %v14879_v17 }
0x16d7   :  { %v6432_v5 = vpop.f32.mrb[92].mxu0  ;;  %v6502_v7 = vpop.f32.mrb[88].mxu1 }
0x16d8   :  { %v6433_v44 = vadd.f32 %v16296_v23, %v6432_v5  ;;  %v12232_v27 = vpop.f32.mrb[93].mxu0  ;;  %v12243_v29 = vpop.f32.mrb[89].mxu1  ;;  %v6503_v39 = vadd.f32 %v16305_v47, %v6502_v7 }
0x16da   :  { %v6576_v30 = vadd.f32 %v6433_v44, %v6360_v59  ;;  %v6583_v19 = vadd.f32 %v6503_v39, %v6361_v18 }
0x16dc   :  { %v10714_v16 = vmul.f32 -1.442695, %v6576_v30  ;;  %v10715_v53 = vmul.f32 -1.442695, %v6583_v19  ;;  %v6601_v30 = vld [vmem:[#allocation4 + $0x18] sm:$0xff] }
0x16de   :  { %13785 = vpow2.f32 %v10714_v16 }
0x16df   :  { %v6572_v21 = vpop.f32.mrb[94].mxu0  ;;  %13787 = vpow2.f32 %v10715_v53 }
0x16e0   :  { %v12254_v24 = vpop.f32.mrb[95].mxu0  ;;  %v6573_v42 = vadd.f32 %v16314_v26, %v6572_v21 }
0x16e8   :  { %v13786_v33 = vpop.eup %13785 }
0x16e9   :  { %v6580_v25 = vadd.f32 1.0, %v13786_v33  ;;  %v13788_v34 = vpop.eup %13787 }
0x16ea   :  { %v6587_v11 = vadd.f32 1.0, %v13788_v34 }
0x16eb   :  { %13789 = vrcp.f32 %v6580_v25 }
0x16ec   :  { %13791 = vrcp.f32 %v6587_v11 }
0x16f5   :  { %v13790_v28 = vpop.eup %13789 }
0x16f6   :  { %v6590_v35 = vmul.f32 %v13790_v28, %v6573_v42  ;;  %v13792_v58 = vpop.eup %13791 }
0x16f7   :  { %v6593_v62 = vsub.f32 1.0, %v13792_v58  ;;  %v6595_v50 = vmul.f32 %v13792_v58, %v6358_v2 }
0x16f8   :  { %v6591_v40 = vadd.f32 %v6590_v35, %v6362_v31  ;;  %v6838_v31 = vld [vmem:[#allocation2 + $0x20] sm:$0xff] }
0x16fa   :  { %13793 = vtanh.f32 %v6591_v40 }
0x1704   :  { %v13794_v46 = vpop.eup %13793 }
0x1705   :  { %v6594_v48 = vmul.f32 %v13794_v46, %v6593_v62  ;;  %v6839_v46 = vld [vmem:[#allocation3 + $0x20] sm:$0xff] }
0x1707   :  { %v6596_v51 = vadd.f32 %v6595_v50, %v6594_v48 }
0x1709   :  { %v6597_v4 = vsel %vm1853_vm13, %v6596_v51, %v6358_v2 }
0x170a   :  { %6598 = vst.msk [vmem:[#allocation5 + $0x10] sm:$0xff] %vm828_vm6, %v6597_v4  ;;  %12264 = vmatmul.mubr.msk.f32.vlgmr.msra.gmra.mrb[90].mxu1 %vm828_vm6, %v6597_v4  ;;  %12275 = vmatmul.mubr.msk.f32.vlgmr.msra.gmra.mrb[96].mxu0 %vm828_vm6, %v6597_v4 }
0x170b   :  { %13217 = vmatpush3.bf16.msra.mxu1 %v16246_v6  ;;  %12285 = vmatprep.mubr.msk.f32.mxu1 %vm14880_vm5, %v14881_v38 }
0x170c   :  { %13218 = vmatprep.subr.bf16.mxu1 %v14879_v17  ;;  %13223 = vmatpush3.bf16.msra.mxu0 %v16183_v0 }
0x170d   :  { %13224 = vmatprep.subr.bf16.mxu0 %v14879_v17  ;;  %12296 = vmatprep.mubr.msk.f32.mxu0 %vm14880_vm5, %v14881_v38 }
0x170f   :  { %13220 = vmatpush3.bf16.msra.mxu1 %v16260_v57 }
0x1710   :  { %13227 = vmatprep.subr.bf16.mxu1 %v14879_v17  ;;  %13226 = vmatpush3.bf16.msra.mxu0 %v16191_v43 }
0x1711   :  { %13233 = vmatprep.subr.bf16.mxu0 %v14879_v17 }
0x1712   :  { %12286 = vmatmul.mubr.msk.f32.vlgmr.msra.gmra.mrb[92].mxu1 %vm828_vm6, %v6597_v4 }
0x1713   :  { %13229 = vmatpush3.bf16.msra.mxu1 %v16242_v14  ;;  %12307 = vmatprep.mubr.msk.f32.mxu1 %vm14880_vm5, %v14881_v38 }
0x1714   :  { %13230 = vmatprep.subr.bf16.mxu1 %v14879_v17 }
0x1717   :  { %13232 = vmatpush3.bf16.msra.mxu1 %v16254_v20 }
0x1718   :  { %13239 = vmatprep.subr.bf16.mxu1 %v14879_v17 }
0x17dd   :  { %v6671_v49 = vpop.f32.mrb[90].mxu1  ;;  %v6741_v54 = vpop.f32.mrb[96].mxu0 }
0x17de   :  { %v6672_v56 = vadd.f32 %v16296_v23, %v6671_v49  ;;  %v12265_v9 = vpop.f32.mrb[91].mxu1  ;;  %v12276_v10 = vpop.f32.mrb[97].mxu0  ;;  %v6742_v13 = vadd.f32 %v16305_v47, %v6741_v54 }
0x17e0   :  { %v6815_v60 = vadd.f32 %v6672_v56, %v6599_v32  ;;  %v6822_v61 = vadd.f32 %v6742_v13, %v6600_v12 }
0x17e2   :  { %v10719_v36 = vmul.f32 -1.442695, %v6815_v60  ;;  %v10720_v2 = vmul.f32 -1.442695, %v6822_v61  ;;  %v6840_v60 = vld [vmem:[#allocation4 + $0x20] sm:$0xff] }
0x17e4   :  { %13795 = vpow2.f32 %v10719_v36 }
0x17e5   :  { %v6811_v63 = vpop.f32.mrb[92].mxu1  ;;  %13797 = vpow2.f32 %v10720_v2 }
0x17e6   :  { %v12287_v3 = vpop.f32.mrb[93].mxu1  ;;  %v6812_v29 = vadd.f32 %v16314_v26, %v6811_v63 }
0x17ee   :  { %v13796_v5 = vpop.eup %13795 }
0x17ef   :  { %v6819_v7 = vadd.f32 1.0, %v13796_v5  ;;  %v13798_v44 = vpop.eup %13797 }
0x17f0   :  { %v6826_v27 = vadd.f32 1.0, %v13798_v44 }
0x17f1   :  { %13799 = vrcp.f32 %v6819_v7 }
0x17f2   :  { %13801 = vrcp.f32 %v6826_v27 }
0x17fb   :  { %v13800_v59 = vpop.eup %13799 }
0x17fc   :  { %v6829_v39 = vmul.f32 %v13800_v59, %v6812_v29  ;;  %v13802_v18 = vpop.eup %13801 }
0x17fd   :  { %v6832_v19 = vsub.f32 1.0, %v13802_v18  ;;  %v6834_v53 = vmul.f32 %v13802_v18, %v6597_v4 }
0x17fe   :  { %v6830_v16 = vadd.f32 %v6829_v39, %v6601_v30  ;;  %v7077_v30 = vld [vmem:[#allocation2 + $0x28] sm:$0xff] }
0x1800   :  { %13803 = vtanh.f32 %v6830_v16 }
0x180a   :  { %v13804_v21 = vpop.eup %13803 }
0x180b   :  { %v6833_v24 = vmul.f32 %v13804_v21, %v6832_v19  ;;  %v7078_v21 = vld [vmem:[#allocation3 + $0x28] sm:$0xff] }
0x180d   :  { %v6835_v33 = vadd.f32 %v6834_v53, %v6833_v24 }
0x180f   :  { %v6836_v25 = vsel %vm2102_vm14, %v6835_v33, %v6597_v4 }
0x1810   :  { %6837 = vst.msk [vmem:[#allocation5 + $0x18] sm:$0xff] %vm828_vm6, %v6836_v25  ;;  %12297 = vmatmul.mubr.msk.f32.vlgmr.msra.gmra.mrb[98].mxu0 %vm828_vm6, %v6836_v25  ;;  %12308 = vmatmul.mubr.msk.f32.vlgmr.msra.gmra.mrb[94].mxu1 %vm828_vm6, %v6836_v25 }
0x1811   :  { %13235 = vmatpush3.bf16.msra.mxu0 %v16246_v6  ;;  %12318 = vmatprep.mubr.msk.f32.mxu0 %vm14880_vm5, %v14881_v38 }
0x1812   :  { %13236 = vmatprep.subr.bf16.mxu0 %v14879_v17  ;;  %13241 = vmatpush3.bf16.msra.mxu1 %v16183_v0 }
0x1813   :  { %13242 = vmatprep.subr.bf16.mxu1 %v14879_v17  ;;  %12329 = vmatprep.mubr.msk.f32.mxu1 %vm14880_vm5, %v14881_v38 }
0x1815   :  { %13238 = vmatpush3.bf16.msra.mxu0 %v16260_v57 }
0x1816   :  { %13245 = vmatprep.subr.bf16.mxu0 %v14879_v17  ;;  %13244 = vmatpush3.bf16.msra.mxu1 %v16191_v43 }
0x1817   :  { %13251 = vmatprep.subr.bf16.mxu1 %v14879_v17 }
0x1818   :  { %12319 = vmatmul.mubr.msk.f32.vlgmr.msra.gmra.mrb[100].mxu0 %vm828_vm6, %v6836_v25 }
0x1819   :  { %13247 = vmatpush3.bf16.msra.mxu0 %v16242_v14  ;;  %12340 = vmatprep.mubr.msk.f32.mxu0 %vm14880_vm5, %v14881_v38 }
0x181a   :  { %13248 = vmatprep.subr.bf16.mxu0 %v14879_v17 }
0x181d   :  { %13250 = vmatpush3.bf16.msra.mxu0 %v16254_v20 }
0x181e   :  { %13257 = vmatprep.subr.bf16.mxu0 %v14879_v17 }
0x18e3   :  { %v6910_v34 = vpop.f32.mrb[98].mxu0  ;;  %v6980_v11 = vpop.f32.mrb[94].mxu1 }
0x18e4   :  { %v6911_v42 = vadd.f32 %v16296_v23, %v6910_v34  ;;  %v12298_v28 = vpop.f32.mrb[99].mxu0  ;;  %v12309_v35 = vpop.f32.mrb[95].mxu1  ;;  %v6981_v40 = vadd.f32 %v16305_v47, %v6980_v11 }
0x18e6   :  { %v7054_v58 = vadd.f32 %v6911_v42, %v6838_v31  ;;  %v7061_v48 = vadd.f32 %v6981_v40, %v6839_v46 }
0x18e8   :  { %v10724_v62 = vmul.f32 -1.442695, %v7054_v58  ;;  %v10725_v4 = vmul.f32 -1.442695, %v7061_v48  ;;  %v7079_v58 = vld [vmem:[#allocation4 + $0x28] sm:$0xff] }
0x18ea   :  { %13805 = vpow2.f32 %v10724_v62 }
0x18eb   :  { %v7050_v50 = vpop.f32.mrb[100].mxu0  ;;  %13807 = vpow2.f32 %v10725_v4 }
0x18ec   :  { %v12320_v51 = vpop.f32.mrb[101].mxu0  ;;  %v7051_v10 = vadd.f32 %v16314_v26, %v7050_v50 }
0x18f4   :  { %v13806_v49 = vpop.eup %13805 }
0x18f5   :  { %v7058_v54 = vadd.f32 1.0, %v13806_v49  ;;  %v13808_v56 = vpop.eup %13807 }
0x18f6   :  { %v7065_v9 = vadd.f32 1.0, %v13808_v56  ;;  %v7803_v56 = vld [vmem:[%s17017_s20 + $0x8] sm:$0xff] }
0x18f7   :  { %13809 = vrcp.f32 %v7058_v54 }
0x18f8   :  { %13811 = vrcp.f32 %v7065_v9 }
0x1901   :  { %v13810_v32 = vpop.eup %13809 }
0x1902   :  { %v7068_v13 = vmul.f32 %v13810_v32, %v7051_v10  ;;  %v13812_v12 = vpop.eup %13811 }
0x1903   :  { %v7071_v61 = vsub.f32 1.0, %v13812_v12  ;;  %v7073_v2 = vmul.f32 %v13812_v12, %v6836_v25 }
0x1904   :  { %v7069_v36 = vadd.f32 %v7068_v13, %v6840_v60 }
0x1906   :  { %13813 = vtanh.f32 %v7069_v36  ;;  %v7316_v36 = vld [vmem:[#allocation2 + $0x30] sm:$0xff] }
0x1910   :  { %v13814_v63 = vpop.eup %13813 }
0x1911   :  { %v7072_v3 = vmul.f32 %v13814_v63, %v7071_v61  ;;  %v7317_v63 = vld [vmem:[#allocation3 + $0x30] sm:$0xff] }
0x1913   :  { %v7074_v5 = vadd.f32 %v7073_v2, %v7072_v3 }
0x1915   :  { %v7075_v7 = vsel %vm2351_vm15, %v7074_v5, %v6836_v25 }
0x1916   :  { %7076 = vst.msk [vmem:[#allocation5 + $0x20] sm:$0xff] %vm828_vm6, %v7075_v7  ;;  %12330 = vmatmul.mubr.msk.f32.vlgmr.msra.gmra.mrb[96].mxu1 %vm828_vm6, %v7075_v7  ;;  %12341 = vmatmul.mubr.msk.f32.vlgmr.msra.gmra.mrb[102].mxu0 %vm828_vm6, %v7075_v7 }
0x1917   :  { %13253 = vmatpush3.bf16.msra.mxu1 %v16246_v6  ;;  %12351 = vmatprep.mubr.msk.f32.mxu1 %vm14880_vm5, %v14881_v38 }
0x1918   :  { %13254 = vmatprep.subr.bf16.mxu1 %v14879_v17  ;;  %13259 = vmatpush3.bf16.msra.mxu0 %v16183_v0 }
0x1919   :  { %13260 = vmatprep.subr.bf16.mxu0 %v14879_v17  ;;  %12362 = vmatprep.mubr.msk.f32.mxu0 %vm14880_vm5, %v14881_v38 }
0x191b   :  { %13256 = vmatpush3.bf16.msra.mxu1 %v16260_v57 }
0x191c   :  { %13263 = vmatprep.subr.bf16.mxu1 %v14879_v17  ;;  %13262 = vmatpush3.bf16.msra.mxu0 %v16191_v43 }
0x191d   :  { %13269 = vmatprep.subr.bf16.mxu0 %v14879_v17 }
0x191e   :  { %12352 = vmatmul.mubr.msk.f32.vlgmr.msra.gmra.mrb[98].mxu1 %vm828_vm6, %v7075_v7 }
0x191f   :  { %13265 = vmatpush3.bf16.msra.mxu1 %v16242_v14  ;;  %12373 = vmatprep.mubr.msk.f32.mxu1 %vm14880_vm5, %v14881_v38 }
0x1920   :  { %13266 = vmatprep.subr.bf16.mxu1 %v14879_v17 }
0x1923   :  { %13268 = vmatpush3.bf16.msra.mxu1 %v16254_v20 }
0x1924   :  { %13275 = vmatprep.subr.bf16.mxu1 %v14879_v17 }
0x19e9   :  { %v7149_v44 = vpop.f32.mrb[96].mxu1  ;;  %v7219_v27 = vpop.f32.mrb[102].mxu0 }
0x19ea   :  { %v7150_v29 = vadd.f32 %v16296_v23, %v7149_v44  ;;  %v12331_v59 = vpop.f32.mrb[97].mxu1  ;;  %v12342_v39 = vpop.f32.mrb[103].mxu0  ;;  %v7220_v16 = vadd.f32 %v16305_v47, %v7219_v27 }
0x19ec   :  { %v7293_v18 = vadd.f32 %v7150_v29, %v7077_v30  ;;  %v7300_v24 = vadd.f32 %v7220_v16, %v7078_v21  ;;  %v7318_v16 = vld [vmem:[#allocation4 + $0x30] sm:$0xff] }
0x19ee   :  { %v10729_v19 = vmul.f32 -1.442695, %v7293_v18  ;;  %v10730_v25 = vmul.f32 -1.442695, %v7300_v24 }
0x19f0   :  { %13815 = vpow2.f32 %v10729_v19 }
0x19f1   :  { %v7289_v53 = vpop.f32.mrb[98].mxu1  ;;  %13817 = vpow2.f32 %v10730_v25  ;;  %v7804_v25 = vld [vmem:[%s17017_s20 + $0x10] sm:$0xff] }
0x19f2   :  { %v12353_v33 = vpop.f32.mrb[99].mxu1  ;;  %v7290_v35 = vadd.f32 %v16314_v26, %v7289_v53 }
0x19fa   :  { %v13816_v34 = vpop.eup %13815 }
0x19fb   :  { %v7297_v11 = vadd.f32 1.0, %v13816_v34  ;;  %v13818_v42 = vpop.eup %13817  ;;  %v7805_v34 = vld [vmem:[%s17017_s20 + $0x18] sm:$0xff] }
0x19fc   :  { %v7304_v28 = vadd.f32 1.0, %v13818_v42 }
0x19fd   :  { %13819 = vrcp.f32 %v7297_v11 }
0x19fe   :  { %13821 = vrcp.f32 %v7304_v28  ;;  %v13297_v28 = vpack.c.bf16 %v7805_v34, %v7804_v25  ;;  %v16565_v34 = vld [vmem:[#allocation47] ss:$0 sm:$0xff] }
0x1a07   :  { %v13820_v31 = vpop.eup %13819 }
0x1a08   :  { %v7307_v40 = vmul.f32 %v13820_v31, %v7290_v35  ;;  %v13822_v46 = vpop.eup %13821  ;;  %v7950_v35 = vld [vmem:[%s17018_s1] sm:$0xff]  ;;  %v7951_v31 = vld [vmem:[%s17018_s1 + $0x8] sm:$0xff] }
0x1a09   :  { %v7310_v48 = vsub.f32 1.0, %v13822_v46  ;;  %v7312_v4 = vmul.f32 %v13822_v46, %v7075_v7  ;;  %v7953_v46 = vld [vmem:[%s17018_s1 + $0x18] sm:$0xff] }
0x1a0a   :  { %v7308_v62 = vadd.f32 %v7307_v40, %v7079_v58  ;;  %v16495_v40 = vld [vmem:[#allocation5] sm:$0xff]  ;;  %v13301_v58 = vpack.c.bf16 %v7951_v31, %v7950_v35 }
0x1a0c   :  { %13823 = vtanh.f32 %v7308_v62  ;;  %v7952_v62 = vld [vmem:[%s17018_s1 + $0x10] sm:$0xff] }
0x1a16   :  { %v13824_v50 = vpop.eup %13823 }
0x1a17   :  { %v7311_v51 = vmul.f32 %v13824_v50, %v7310_v48  ;;  %v16505_v48 = vld [vmem:[#allocation5 + $0x8] sm:$0xff]  ;;  %v16511_v50 = vld [vmem:[#allocation5 + $0x10] sm:$0xff] }
0x1a19   :  { %v7313_v49 = vadd.f32 %v7312_v4, %v7311_v51  ;;  %v16521_v51 = vld [vmem:[#allocation5 + $0x20] sm:$0xff] }
0x1a1b   :  { %v7314_v54 = vsel %vm2600_vm0, %v7313_v49, %v7075_v7 }
0x1a1c   :  { %7315 = vst.msk [vmem:[#allocation5 + $0x28] sm:$0xff] %vm828_vm6, %v7314_v54  ;;  %12363 = vmatmul.mubr.msk.f32.vlgmr.msra.gmra.mrb[104].mxu0 %vm828_vm6, %v7314_v54  ;;  %12374 = vmatmul.mubr.msk.f32.vlgmr.msra.gmra.mrb[100].mxu1 %vm828_vm6, %v7314_v54 }
0x1a1d   :  { %13271 = vmatpush3.bf16.msra.mxu0 %v16246_v6  ;;  %12384 = vmatprep.mubr.msk.f32.mxu0 %vm14880_vm5, %v14881_v38 }
0x1a1e   :  { %13272 = vmatprep.subr.bf16.mxu0 %v14879_v17  ;;  %13277 = vmatpush3.bf16.msra.mxu1 %v16183_v0  ;;  %v7802_v0 = vld [vmem:[%s17017_s20] sm:$0xff] }
0x1a1f   :  { %13278 = vmatprep.subr.bf16.mxu1 %v14879_v17  ;;  %12395 = vmatprep.mubr.msk.f32.mxu1 %vm14880_vm5, %v14881_v38  ;;  %v13293_v9 = vpack.c.bf16 %v7803_v56, %v7802_v0  ;;  %v8199_v0 = vld [vmem:[#allocation41 + $0x8] sm:$0xff] }
0x1a21   :  { %13274 = vmatpush3.bf16.msra.mxu0 %v16260_v57 }
0x1a22   :  { %13281 = vmatprep.subr.bf16.mxu0 %v14879_v17  ;;  %13280 = vmatpush3.bf16.msra.mxu1 %v16191_v43 }
0x1a23   :  { %13287 = vmatprep.subr.bf16.mxu1 %v14879_v17  ;;  %v16526_v4 = vld [vmem:[#allocation5 + $0x28] sm:$0xff] }
0x1a24   :  { %12385 = vmatmul.mubr.msk.f32.vlgmr.msra.gmra.mrb[106].mxu0 %vm828_vm6, %v7314_v54 }
0x1a25   :  { %13283 = vmatpush3.bf16.msra.mxu0 %v16242_v14  ;;  %12406 = vmatprep.mubr.msk.f32.mxu0 %vm14880_vm5, %v14881_v38 }
0x1a26   :  { %13284 = vmatprep.subr.bf16.mxu0 %v14879_v17 }
0x1a29   :  { %13286 = vmatpush3.bf16.msra.mxu0 %v16254_v20 }
0x1a2a   :  { %13294 = vmatprep.subr.bf16.mxu0 %v13293_v9 }
0x1aef   :  { %v7388_v10 = vpop.f32.mrb[104].mxu0  ;;  %v7458_v32 = vpop.f32.mrb[100].mxu1 }
0x1af0   :  { %v7389_v43 = vadd.f32 %v16296_v23, %v7388_v10  ;;  %v12364_v13 = vpop.f32.mrb[105].mxu0  ;;  %v12375_v60 = vpop.f32.mrb[101].mxu1  ;;  %v7459_v14 = vadd.f32 %v16305_v47, %v7458_v32  ;;  %v8075_v10 = vld [vmem:[#allocation40 + $0x8] sm:$0xff]  ;;  %v8200_v32 = vld [vmem:[#allocation41 + $0x10] sm:$0xff] }
0x1af1   :  { %v8201_v13 = vld [vmem:[#allocation41 + $0x18] sm:$0xff] }
0x1af2   :  { %v7532_v12 = vadd.f32 %v7389_v43, %v7316_v36  ;;  %v7539_v3 = vadd.f32 %v7459_v14, %v7317_v63  ;;  %v16550_v60 = vpack.c.bf16 %v8201_v13, %v8200_v32  ;;  %v8076_v36 = vld [vmem:[#allocation40 + $0x10] sm:$0xff]  ;;  %v8077_v14 = vld [vmem:[#allocation40 + $0x18] sm:$0xff] }
0x1af4   :  { %v10734_v61 = vmul.f32 -1.442695, %v7532_v12  ;;  %v10735_v5 = vmul.f32 -1.442695, %v7539_v3  ;;  %v13313_v12 = vpack.c.bf16 %v8077_v14, %v8076_v36 }
0x1af6   :  { %13825 = vpow2.f32 %v10734_v61 }
0x1af7   :  { %v7528_v2 = vpop.f32.mrb[106].mxu0  ;;  %13827 = vpow2.f32 %v10735_v5  ;;  %v7555_v5 = vld [vmem:[#allocation2 + $0x38] sm:$0xff] }
0x1af8   :  { %v12386_v20 = vpop.f32.mrb[107].mxu0  ;;  %v7529_v59 = vadd.f32 %v16314_v26, %v7528_v2 }
0x1b00   :  { %v13826_v7 = vpop.eup %13825 }
0x1b01   :  { %v7536_v44 = vadd.f32 1.0, %v13826_v7  ;;  %v13828_v27 = vpop.eup %13827 }
0x1b02   :  { %v7543_v29 = vadd.f32 1.0, %v13828_v27 }
0x1b03   :  { %13829 = vrcp.f32 %v7536_v44 }
0x1b04   :  { %13831 = vrcp.f32 %v7543_v29  ;;  %v7556_v29 = vld [vmem:[#allocation3 + $0x38] sm:$0xff] }
0x1b0d   :  { %v13830_v39 = vpop.eup %13829 }
0x1b0e   :  { %v7546_v30 = vmul.f32 %v13830_v39, %v7529_v59  ;;  %v13832_v19 = vpop.eup %13831  ;;  %v16557_v39 = vld [vmem:[#allocation46] ss:$0 sm:$0xff] }
0x1b0f   :  { %v7549_v21 = vsub.f32 1.0, %v13832_v19  ;;  %v7551_v33 = vmul.f32 %v13832_v19, %v7314_v54 }
0x1b10   :  { %v7547_v18 = vadd.f32 %v7546_v30, %v7318_v16 }
0x1b12   :  { %13833 = vtanh.f32 %v7547_v18 }
0x1b1c   :  { %v13834_v24 = vpop.eup %13833 }
0x1b1d   :  { %v7550_v53 = vmul.f32 %v13834_v24, %v7549_v21 }
0x1b1f   :  { %v7552_v11 = vadd.f32 %v7551_v33, %v7550_v53 }
0x1b21   :  { %v16484_v42 = vsel %vm2849_vm1, %v7552_v11, %v7314_v54  ;;  %v8198_v54 = vld [vmem:[#allocation41] sm:$0xff] }
0x1b22   :  { %7554 = vst.msk [vmem:[#allocation5 + $0x30] sm:$0xff] %vm828_vm6, %v16484_v42  ;;  %12396 = vmatmul.mubr.msk.f32.vlgmr.msra.gmra.mrb[102].mxu1 %vm828_vm6, %v16484_v42  ;;  %12407 = vmatmul.mubr.msk.f32.vlgmr.msra.gmra.mrb[108].mxu0 %vm828_vm6, %v16484_v42  ;;  %v16546_v56 = vpack.c.bf16 %v8199_v0, %v8198_v54 }
0x1b23   :  { %13289 = vmatpush3.bf16.msra.mxu1 %v16246_v6  ;;  %13296 = vmatpush3.bf16.msra.mxu0 %v13293_v9  ;;  %v13305_v6 = vpack.c.bf16 %v7953_v46, %v7952_v62  ;;  %v8074_v9 = vld [vmem:[#allocation40] sm:$0xff] }
0x1b24   :  { %12428 = vmatprep.mubr.msk.f32.mxu0 %vm828_vm6, %v16495_v40  ;;  %13290 = vmatprep.subr.bf16.mxu1 %v14879_v17  ;;  %v13309_v43 = vpack.c.bf16 %v8075_v10, %v8074_v9 }
0x1b25   :  { %13298 = vmatprep.subr.bf16.mxu0 %v13297_v28  ;;  %12417 = vmatprep.mubr.msk.f32.mxu1 %vm14880_vm5, %v14881_v38 }
0x1b27   :  { %13292 = vmatpush3.bf16.msra.mxu1 %v16260_v57  ;;  %13300 = vmatpush3.bf16.msra.mxu0 %v13297_v28  ;;  %v16517_v57 = vld [vmem:[#allocation5 + $0x18] sm:$0xff] }
0x1b28   :  { %13302 = vmatprep.subr.bf16.mxu1 %v13301_v58  ;;  %13310 = vmatprep.subr.bf16.mxu0 %v13309_v43 }
0x1b29   :  { %v16532_v49 = vld [vmem:[#allocation5 + $0x30] sm:$0xff] }
0x1b2a   :  { %12418 = vmatmul.mubr.msk.f32.vlgmr.msra.gmra.mrb[104].mxu1 %vm828_vm6, %v16484_v42  ;;  %12429 = vmatmul.mubr.msk.f32.vlgmr.msra.gmra.mrb[110].mxu0 %vm828_vm6, %v16505_v48 }
0x1b2b   :  { %12431 = vmatprep.mubr.msk.f32.mxu0 %vm828_vm6, %v16511_v50  ;;  %13304 = vmatpush3.bf16.msra.mxu1 %v13301_v58 }
0x1b2c   :  { %12448 = vmatprep.mubr.msk.f32.mxu1 %vm828_vm6, %v16495_v40  ;;  %13306 = vmatprep.subr.bf16.mxu1 %v13305_v6 }
0x1b2d   :  { %13312 = vmatpush3.bf16.msra.mxu0 %v13309_v43 }
0x1b2e   :  { %12432 = vmatmul.mubr.msk.f32.gmra.mrb[112].mxu0 %vm828_vm6, %v16517_v57  ;;  %13314 = vmatprep.subr.bf16.mxu0 %v13313_v12 }
0x1b2f   :  { %12434 = vmatprep.mubr.msk.f32.mxu0 %vm828_vm6, %v16521_v51  ;;  %13308 = vmatpush3.bf16.msra.mxu1 %v13305_v6 }
0x1b30   :  { %13317 = vmatprep.subr.bf16.mxu1 %v14879_v17 }
0x1b31   :  { %13316 = vmatpush3.bf16.msra.mxu0 %v13313_v12 }
0x1b32   :  { %12435 = vmatmul.mubr.msk.f32.gmra.mrb[114].mxu0 %vm828_vm6, %v16526_v4  ;;  %12449 = vmatmul.mubr.msk.f32.vlgmr.msra.gmra.mrb[106].mxu1 %vm828_vm6, %v16505_v48 }
0x1b33   :  { %12437 = vmatprep.mubr.msk.f32.mxu0 %vm828_vm6, %v16532_v49  ;;  %12451 = vmatprep.mubr.msk.f32.mxu1 %vm828_vm6, %v16511_v50 }
0x1b34   :  { %13319 = vmatpush3.bf16.msra.mxu1 %v16546_v56  ;;  %13329 = vmatprep.subr.bf16.mxu0 %v14879_v17 }
0x1b35   :  { %13320 = vmatprep.subr.bf16.mxu1 %v14879_v17 }
0x1b36   :  { %12452 = vmatmul.mubr.msk.f32.gmra.mrb[108].mxu1 %vm828_vm6, %v16517_v57 }
0x1b37   :  { %12454 = vmatprep.mubr.msk.f32.mxu1 %vm828_vm6, %v16521_v51 }
0x1b38   :  { %13322 = vmatpush3.bf16.msra.mxu1 %v16550_v60 }
0x1b39   :  { %13323 = vmatprep.subr.bf16.mxu1 %v14879_v17 }
0x1b3a   :  { %12455 = vmatmul.mubr.msk.f32.gmra.mrb[110].mxu1 %vm828_vm6, %v16526_v4 }
0x1b3b   :  { %12457 = vmatprep.mubr.msk.f32.mxu1 %vm828_vm6, %v16532_v49 }
0x1bf5   :  { %v7627_v61 = vpop.f32.mrb[102].mxu1  ;;  %v7697_v63 = vpop.f32.mrb[108].mxu0 }
0x1bf6   :  { %v7628_v3 = vadd.f32 %v16296_v23, %v7627_v61  ;;  %v12397_v2 = vpop.f32.mrb[103].mxu1  ;;  %v12408_v20 = vpop.f32.mrb[109].mxu0  ;;  %v7698_v7 = vadd.f32 %v16305_v47, %v7697_v63 }
0x1bf8   :  { %v7771_v44 = vadd.f32 %v7628_v3, %v7555_v5  ;;  %v7778_v59 = vadd.f32 %v7698_v7, %v7556_v29  ;;  %v7557_v5 = vld [vmem:[#allocation4 + $0x38] sm:$0xff] }
0x1bfa   :  { %v10739_v27 = vmul.f32 -1.442695, %v7771_v44  ;;  %v10740_v24 = vmul.f32 -1.442695, %v7778_v59 }
0x1bfc   :  { %13835 = vpow2.f32 %v10739_v27 }
0x1bfd   :  { %v7767_v30 = vpop.f32.mrb[104].mxu1  ;;  %v12430_v16 = vpop.f32.mrb[110].mxu0  ;;  %13837 = vpow2.f32 %v10740_v24  ;;  %v8206_v24 = vld [vmem:[#allocation44] sm:$0xff] }
0x1bfe   :  { %v7909_v18 = vadd.f32 %v12430_v16, %v16557_v39  ;;  %v12419_v19 = vpop.f32.mrb[105].mxu1  ;;  %v7903_v21 = vpop.f32.mrb[111].mxu0  ;;  %v7768_v3 = vadd.f32 %v16314_v26, %v7767_v30  ;;  %v8202_v26 = vld [vmem:[#allocation43] sm:$0xff]  ;;  %v8203_v30 = vld [vmem:[#allocation43 + $0x8] sm:$0xff] }
0x1bff   :  { %v7904_v23 = vadd.f32 %v16557_v39, %v7903_v21 }
0x1c00   :  { %7943 = vst.msk [vmem:[#allocation2 + $0x8] sm:$0xff] %vm828_vm6, %v7909_v18 }
0x1c01   :  { %7942 = vst.msk [vmem:[#allocation2] sm:$0xff] %vm828_vm6, %v7904_v23  ;;  %v12433_v47 = vpop.f32.mrb[112].mxu0  ;;  %v8207_v23 = vld [vmem:[#allocation44 + $0x8] sm:$0xff] }
0x1c02   :  { %v7919_v53 = vadd.f32 %v12433_v47, %v16557_v39  ;;  %v7913_v33 = vpop.f32.mrb[113].mxu0  ;;  %v8204_v47 = vld [vmem:[#allocation43 + $0x10] sm:$0xff] }
0x1c03   :  { %v7914_v25 = vadd.f32 %v16557_v39, %v7913_v33  ;;  %v16599_v33 = vpack.c.bf16 %v8207_v23, %v8206_v24 }
0x1c04   :  { %7945 = vst.msk [vmem:[#allocation2 + $0x18] sm:$0xff] %vm828_vm6, %v7919_v53  ;;  %v8205_v53 = vld [vmem:[#allocation43 + $0x18] sm:$0xff] }
0x1c05   :  { %7944 = vst.msk [vmem:[#allocation2 + $0x10] sm:$0xff] %vm828_vm6, %v7914_v25  ;;  %v12436_v11 = vpop.f32.mrb[114].mxu0  ;;  %v12450_v28 = vpop.f32.mrb[106].mxu1  ;;  %v8208_v25 = vld [vmem:[#allocation44 + $0x10] sm:$0xff] }
0x1c06   :  { %v13836_v35 = vpop.eup %13835  ;;  %v7929_v31 = vadd.f32 %v12436_v11, %v16557_v39  ;;  %v8033_v58 = vadd.f32 %v12450_v28, %v16565_v34  ;;  %v7923_v62 = vpop.f32.mrb[115].mxu0  ;;  %v8209_v11 = vld [vmem:[#allocation44 + $0x18] sm:$0xff] }
0x1c07   :  { %v8027_v46 = vpop.f32.mrb[107].mxu1  ;;  %v7775_v6 = vadd.f32 1.0, %v13836_v35  ;;  %v7924_v54 = vadd.f32 %v16557_v39, %v7923_v62  ;;  %v13838_v13 = vpop.eup %13837  ;;  %v16613_v28 = vpack.c.bf16 %v8209_v11, %v8208_v25  ;;  %v16649_v62 = vld [vmem:[#allocation50] ss:$0 sm:$0xff] }
0x1c08   :  { %v8028_v0 = vadd.f32 %v16565_v34, %v8027_v46  ;;  %7947 = vst.msk [vmem:[#allocation2 + $0x28] sm:$0xff] %vm828_vm6, %v7929_v31  ;;  %8067 = vst.msk [vmem:[#allocation3 + $0x8] sm:$0xff] %vm828_vm6, %v8033_v58  ;;  %v7782_v63 = vadd.f32 1.0, %v13838_v13  ;;  %v10759_v58 = vld [vmem:[#allocation49] ss:$0 sm:$0xff] }
0x1c09   :  { %13839 = vrcp.f32 %v7775_v6  ;;  %7946 = vst.msk [vmem:[#allocation2 + $0x20] sm:$0xff] %vm828_vm6, %v7924_v54  ;;  %v12453_v9 = vpop.f32.mrb[108].mxu1 }
0x1c0a   :  { %8066 = vst.msk [vmem:[#allocation3] sm:$0xff] %vm828_vm6, %v8028_v0  ;;  %v8043_v10 = vadd.f32 %v12453_v9, %v16565_v34  ;;  %v8037_v32 = vpop.f32.mrb[109].mxu1  ;;  %13841 = vrcp.f32 %v7782_v63 }
0x1c0b   :  { %v8038_v43 = vadd.f32 %v16565_v34, %v8037_v32 }
0x1c0c   :  { %8069 = vst.msk [vmem:[#allocation3 + $0x18] sm:$0xff] %vm828_vm6, %v8043_v10  ;;  %v8213_v10 = vld [vmem:[#allocation2] sm:$0xff] }
0x1c0d   :  { %8068 = vst.msk [vmem:[#allocation3 + $0x10] sm:$0xff] %vm828_vm6, %v8038_v43  ;;  %v12456_v36 = vpop.f32.mrb[110].mxu1 }
0x1c0e   :  { %v8053_v14 = vadd.f32 %v12456_v36, %v16565_v34  ;;  %v8047_v12 = vpop.f32.mrb[111].mxu1 }
0x1c0f   :  { %v8048_v61 = vadd.f32 %v16565_v34, %v8047_v12 }
0x1c10   :  { %8071 = vst.msk [vmem:[#allocation3 + $0x28] sm:$0xff] %vm828_vm6, %v8053_v14 }
0x1c11   :  { %8070 = vst.msk [vmem:[#allocation3 + $0x20] sm:$0xff] %vm828_vm6, %v8048_v61  ;;  %v16658_v61 = vld [vmem:[#allocation52] ss:$0 sm:$0xff] }
0x1c13   :  { %v13840_v2 = vpop.eup %13839 }
0x1c14   :  { %v7785_v20 = vmul.f32 %v13840_v2, %v7768_v3  ;;  %v13842_v44 = vpop.eup %13841 }
0x1c15   :  { %v7788_v27 = vsub.f32 1.0, %v13842_v44  ;;  %v7790_v16 = vmul.f32 %v13842_v44, %v16484_v42  ;;  %v8214_v44 = vld [vmem:[#allocation3] sm:$0xff] }
0x1c16   :  { %v7786_v7 = vadd.f32 %v7785_v20, %v7557_v5 }
0x1c18   :  { %13843 = vtanh.f32 %v7786_v7 }
0x1c22   :  { %v13844_v29 = vpop.eup %13843 }
0x1c23   :  { %v7789_v59 = vmul.f32 %v13844_v29, %v7788_v27 }
0x1c25   :  { %v7791_v18 = vadd.f32 %v7790_v16, %v7789_v59 }
0x1c27   :  { %v7792_v19 = vsel %vm3098_vm2, %v7791_v18, %v16484_v42  ;;  %v16597_v42 = vpack.c.bf16 %v8203_v30, %v8202_v26 }
0x1c28   :  { %10137 = vrot.lane.b32.xlu1 %v7792_v19, %s14883_s4  ;;  %7793 = vst.msk [vmem:[#allocation5 + $0x38] sm:$0xff] %vm828_vm6, %v7792_v19 }
0x1c2f   :  { %v7801_v21 = vld [vmem:[#allocation5 + $0x38] sm:$0xff] }
0x1c30   :  { %12438 = vmatmul.mubr.msk.f32.gmra.mrb[116].mxu0 %vm828_vm6, %v7801_v21  ;;  %12458 = vmatmul.mubr.msk.f32.gmra.mrb[112].mxu1 %vm828_vm6, %v7801_v21 }
0x1c31   :  { %12468 = vmatprep.mubr.msk.f32.mxu0 %vm828_vm6, %v16495_v40  ;;  %12488 = vmatprep.mubr.msk.f32.mxu1 %vm14880_vm5, %v14881_v38  ;;  %v16607_v40 = vpack.c.bf16 %v8205_v53, %v8204_v47  ;;  %v16667_v47 = vld [vmem:[#allocation53] ss:$0 sm:$0xff] }
0x1c34   :  { %12469 = vmatmul.mubr.msk.f32.vlgmr.msra.gmra.mrb[118].mxu0 %vm828_vm6, %v16505_v48  ;;  %12489 = vmatmul.mubr.f32.vlgmr.msra.gmra.mrb[114].mxu1 %v14881_v38 }
0x1c35   :  { %13325 = vmatpush3.bf16.msra.mxu1 %v16597_v42  ;;  %12471 = vmatprep.mubr.msk.f32.mxu0 %vm828_vm6, %v16511_v50 }
0x1c36   :  { %13326 = vmatprep.subr.bf16.mxu1 %v14879_v17  ;;  %12499 = vmatprep.mubr.msk.f32.mxu1 %vm14880_vm5, %v14881_v38 }
0x1c37   :  { %13331 = vmatpush3.bf16.msra.mxu0 %v16599_v33 }
0x1c38   :  { %12472 = vmatmul.mubr.msk.f32.gmra.mrb[120].mxu0 %vm828_vm6, %v16517_v57  ;;  %13332 = vmatprep.subr.bf16.mxu0 %v14879_v17 }
0x1c39   :  { %13328 = vmatpush3.bf16.msra.mxu1 %v16607_v40  ;;  %12474 = vmatprep.mubr.msk.f32.mxu0 %vm828_vm6, %v16521_v51 }
0x1c3a   :  { %13335 = vmatprep.subr.bf16.mxu1 %v14879_v17 }
0x1c3b   :  { %13334 = vmatpush3.bf16.msra.mxu0 %v16613_v28 }
0x1c3c   :  { %12500 = vmatmul.mubr.f32.vlgmr.msra.gmra.mrb[116].mxu1 %v14881_v38  ;;  %12475 = vmatmul.mubr.msk.f32.gmra.mrb[122].mxu0 %vm828_vm6, %v16526_v4 }
0x1c3d   :  { %12477 = vmatprep.mubr.msk.f32.mxu0 %vm828_vm6, %v16532_v49  ;;  %13337 = vmatpush3.bf16.msra.mxu1 %v16546_v56 }
0x1c3e   :  { %13341 = vmatprep.subr.bf16.mxu0 %v14879_v17  ;;  %13338 = vmatprep.subr.bf16.mxu1 %v14879_v17 }
0x1c3f   :  { %12521 = vmatprep.mubr.msk.f32.mxu1 %vm14880_vm5, %v14881_v38 }
0x1c40   :  { %12478 = vmatmul.mubr.msk.f32.gmra.mrb[124].mxu0 %vm828_vm6, %v7801_v21 }
0x1c41   :  { %12510 = vmatprep.mubr.msk.f32.mxu0 %vm14880_vm5, %v14881_v38  ;;  %13340 = vmatpush3.bf16.msra.mxu1 %v16550_v60 }
0x1c42   :  { %13347 = vmatprep.subr.bf16.mxu1 %v14879_v17 }
0x1c44   :  { %12511 = vmatmul.mubr.f32.vlgmr.msra.gmra.mrb[126].mxu0 %v14881_v38 }
0x1c45   :  { %13343 = vmatpush3.bf16.msra.mxu0 %v16597_v42  ;;  %12532 = vmatprep.mubr.msk.f32.mxu0 %vm14880_vm5, %v14881_v38 }
0x1c46   :  { %13344 = vmatprep.subr.bf16.mxu0 %v14879_v17 }
0x1c49   :  { %13346 = vmatpush3.bf16.msra.mxu0 %v16607_v40 }
0x1c4a   :  { %13353 = vmatprep.subr.bf16.mxu0 %v14879_v17 }
0x1d03   :  { %v12439_v48 = vpop.f32.mrb[116].mxu0  ;;  %v12459_v50 = vpop.f32.mrb[112].mxu1 }
0x1d04   :  { %v7939_v57 = vadd.f32 %v12439_v48, %v16557_v39  ;;  %v8063_v51 = vadd.f32 %v12459_v50, %v16565_v34  ;;  %v7933_v4 = vpop.f32.mrb[117].mxu0  ;;  %v8057_v49 = vpop.f32.mrb[113].mxu1 }
0x1d05   :  { %v7934_v35 = vadd.f32 %v16557_v39, %v7933_v4  ;;  %v8058_v31 = vadd.f32 %v16565_v34, %v8057_v49 }
0x1d06   :  { %7949 = vst.msk [vmem:[#allocation2 + $0x38] sm:$0xff] %vm828_vm6, %v7939_v57  ;;  %8073 = vst.msk [vmem:[#allocation3 + $0x38] sm:$0xff] %vm828_vm6, %v8063_v51 }
0x1d07   :  { %7948 = vst.msk [vmem:[#allocation2 + $0x30] sm:$0xff] %vm828_vm6, %v7934_v35  ;;  %8072 = vst.msk [vmem:[#allocation3 + $0x30] sm:$0xff] %vm828_vm6, %v8058_v31  ;;  %v12470_v46 = vpop.f32.mrb[118].mxu0  ;;  %v8288_v6 = vpop.f32.mrb[114].mxu1 }
0x1d08   :  { %v8157_v54 = vadd.f32 %v12470_v46, %v10759_v58  ;;  %v8289_v0 = vadd.f32 %v16649_v62, %v8288_v6  ;;  %v8151_v9 = vpop.f32.mrb[119].mxu0  ;;  %v12490_v39 = vpop.f32.mrb[115].mxu1 }
0x1d09   :  { %v8152_v34 = vadd.f32 %v10759_v58, %v8151_v9 }
0x1d0a   :  { %8191 = vst.msk [vmem:[#allocation4 + $0x8] sm:$0xff] %vm828_vm6, %v8157_v54  ;;  %v8444_v32 = vadd.f32 %v8289_v0, %v8213_v10  ;;  %v8466_v10 = vld [vmem:[#allocation2 + $0x8] sm:$0xff] }
0x1d0b   :  { %8190 = vst.msk [vmem:[#allocation4] sm:$0xff] %vm828_vm6, %v8152_v34  ;;  %v12473_v43 = vpop.f32.mrb[120].mxu0 }
0x1d0c   :  { %v10771_v13 = vmul.f32 -1.442695, %v8444_v32  ;;  %v8167_v36 = vadd.f32 %v12473_v43, %v10759_v58  ;;  %v8161_v14 = vpop.f32.mrb[121].mxu0 }
0x1d0d   :  { %v8162_v12 = vadd.f32 %v10759_v58, %v8161_v14 }
0x1d0e   :  { %13845 = vpow2.f32 %v10771_v13  ;;  %8193 = vst.msk [vmem:[#allocation4 + $0x18] sm:$0xff] %vm828_vm6, %v8167_v36  ;;  %v8467_v13 = vld [vmem:[#allocation3 + $0x8] sm:$0xff] }
0x1d0f   :  { %8192 = vst.msk [vmem:[#allocation4 + $0x10] sm:$0xff] %vm828_vm6, %v8162_v12  ;;  %v8364_v63 = vpop.f32.mrb[116].mxu1  ;;  %v12476_v3 = vpop.f32.mrb[122].mxu0 }
0x1d10   :  { %v8365_v2 = vadd.f32 %v16658_v61, %v8364_v63  ;;  %v8177_v20 = vadd.f32 %v12476_v3, %v10759_v58  ;;  %v8171_v5 = vpop.f32.mrb[123].mxu0  ;;  %v12501_v7 = vpop.f32.mrb[117].mxu1 }
0x1d11   :  { %v8172_v27 = vadd.f32 %v10759_v58, %v8171_v5 }
0x1d12   :  { %v8451_v29 = vadd.f32 %v8365_v2, %v8214_v44  ;;  %8195 = vst.msk [vmem:[#allocation4 + $0x28] sm:$0xff] %vm828_vm6, %v8177_v20  ;;  %v8215_v57 = vld [vmem:[#allocation4] sm:$0xff] }
0x1d13   :  { %8194 = vst.msk [vmem:[#allocation4 + $0x20] sm:$0xff] %vm828_vm6, %v8172_v27  ;;  %v12479_v59 = vpop.f32.mrb[124].mxu0 }
0x1d14   :  { %v10772_v16 = vmul.f32 -1.442695, %v8451_v29  ;;  %v8187_v18 = vadd.f32 %v12479_v59, %v10759_v58  ;;  %v8181_v19 = vpop.f32.mrb[125].mxu0  ;;  %v8468_v29 = vld [vmem:[#allocation4 + $0x8] sm:$0xff] }
0x1d15   :  { %v8182_v26 = vadd.f32 %v10759_v58, %v8181_v19 }
0x1d16   :  { %13847 = vpow2.f32 %v10772_v16  ;;  %8197 = vst.msk [vmem:[#allocation4 + $0x38] sm:$0xff] %vm828_vm6, %v8187_v18 }
0x1d17   :  { %8196 = vst.msk [vmem:[#allocation4 + $0x30] sm:$0xff] %vm828_vm6, %v8182_v26  ;;  %v8440_v30 = vpop.f32.mrb[126].mxu0 }
0x1d18   :  { %v13846_v21 = vpop.eup %13845  ;;  %v12512_v24 = vpop.f32.mrb[127].mxu0  ;;  %v8441_v11 = vadd.f32 %v16667_v47, %v8440_v30 }
0x1d19   :  { %v8448_v23 = vadd.f32 1.0, %v13846_v21 }
0x1d1b   :  { %13849 = vrcp.f32 %v8448_v23 }
0x1d20   :  { %v13848_v53 = vpop.eup %13847 }
0x1d21   :  { %v8455_v25 = vadd.f32 1.0, %v13848_v53 }
0x1d23   :  { %13851 = vrcp.f32 %v8455_v25 }
0x1d25   :  { %v13850_v48 = vpop.eup %13849 }
0x1d26   :  { %v8458_v50 = vmul.f32 %v13850_v48, %v8441_v11  ;;  %v8704_v48 = vld [vmem:[#allocation2 + $0x10] sm:$0xff] }
0x1d28   :  { %v8459_v51 = vadd.f32 %v8458_v50, %v8215_v57 }
0x1d2a   :  { %13853 = vtanh.f32 %v8459_v51 }
0x1d2d   :  { %v13852_v4 = vpop.eup %13851 }
0x1d2e   :  { %v8461_v49 = vsub.f32 1.0, %v13852_v4  ;;  %v8463_v58 = vmul.f32 0.0, %v13852_v4  ;;  %v8705_v4 = vld [vmem:[#allocation3 + $0x10] sm:$0xff] }
0x1d34   :  { %v13854_v35 = vpop.eup %13853 }
0x1d35   :  { %v8462_v31 = vmul.f32 %v13854_v35, %v8461_v49 }
0x1d37   :  { %v8464_v46 = vadd.f32 %v8463_v58, %v8462_v31 }
0x1d39   :  { %v8465_v6 = vsel %vm1356_vm7, %v8464_v46, 0.0 }
0x1d3a   :  { %12522 = vmatmul.mubr.msk.f32.vlgmr.msra.gmra.mrb[118].mxu1 %vm828_vm6, %v8465_v6  ;;  %12533 = vmatmul.mubr.msk.f32.vlgmr.msra.gmra.mrb[128].mxu0 %vm828_vm6, %v8465_v6 }
0x1d3b   :  { %13349 = vmatpush3.bf16.msra.mxu1 %v16599_v33  ;;  %12543 = vmatprep.mubr.msk.f32.mxu1 %vm14880_vm5, %v14881_v38 }
0x1d3c   :  { %13350 = vmatprep.subr.bf16.mxu1 %v14879_v17  ;;  %13355 = vmatpush3.bf16.msra.mxu0 %v16546_v56 }
0x1d3d   :  { %13356 = vmatprep.subr.bf16.mxu0 %v14879_v17  ;;  %12554 = vmatprep.mubr.msk.f32.mxu0 %vm14880_vm5, %v14881_v38 }
0x1d3f   :  { %13352 = vmatpush3.bf16.msra.mxu1 %v16613_v28 }
0x1d40   :  { %13359 = vmatprep.subr.bf16.mxu1 %v14879_v17  ;;  %13358 = vmatpush3.bf16.msra.mxu0 %v16550_v60 }
0x1d41   :  { %13365 = vmatprep.subr.bf16.mxu0 %v14879_v17 }
0x1d42   :  { %12544 = vmatmul.mubr.msk.f32.vlgmr.msra.gmra.mrb[120].mxu1 %vm828_vm6, %v8465_v6 }
0x1d43   :  { %13361 = vmatpush3.bf16.msra.mxu1 %v16597_v42  ;;  %12565 = vmatprep.mubr.msk.f32.mxu1 %vm14880_vm5, %v14881_v38 }
0x1d44   :  { %13362 = vmatprep.subr.bf16.mxu1 %v14879_v17 }
0x1d47   :  { %13364 = vmatpush3.bf16.msra.mxu1 %v16607_v40 }
0x1d48   :  { %13371 = vmatprep.subr.bf16.mxu1 %v14879_v17 }
0x1e0d   :  { %v8538_v8 = vpop.f32.mrb[118].mxu1  ;;  %v8608_v54 = vpop.f32.mrb[128].mxu0 }
0x1e0e   :  { %v8539_v0 = vadd.f32 %v16649_v62, %v8538_v8  ;;  %v12523_v9 = vpop.f32.mrb[119].mxu1  ;;  %v12534_v39 = vpop.f32.mrb[129].mxu0  ;;  %v8609_v34 = vadd.f32 %v16658_v61, %v8608_v54 }
0x1e10   :  { %v8682_v32 = vadd.f32 %v8539_v0, %v8466_v10  ;;  %v8689_v36 = vadd.f32 %v8609_v34, %v8467_v13  ;;  %v8706_v10 = vld [vmem:[#allocation4 + $0x10] sm:$0xff] }
0x1e12   :  { %v10776_v43 = vmul.f32 -1.442695, %v8682_v32  ;;  %v10777_v63 = vmul.f32 -1.442695, %v8689_v36 }
0x1e14   :  { %13855 = vpow2.f32 %v10776_v43 }
0x1e15   :  { %v8678_v14 = vpop.f32.mrb[120].mxu1  ;;  %13857 = vpow2.f32 %v10777_v63 }
0x1e16   :  { %v12545_v12 = vpop.f32.mrb[121].mxu1  ;;  %v8679_v7 = vadd.f32 %v16667_v47, %v8678_v14 }
0x1e1e   :  { %v13856_v3 = vpop.eup %13855 }
0x1e1f   :  { %v8686_v2 = vadd.f32 1.0, %v13856_v3  ;;  %v13858_v20 = vpop.eup %13857 }
0x1e20   :  { %v8693_v5 = vadd.f32 1.0, %v13858_v20 }
0x1e21   :  { %13859 = vrcp.f32 %v8686_v2 }
0x1e22   :  { %13861 = vrcp.f32 %v8693_v5 }
0x1e2b   :  { %v13860_v44 = vpop.eup %13859 }
0x1e2c   :  { %v8696_v27 = vmul.f32 %v13860_v44, %v8679_v7  ;;  %v13862_v16 = vpop.eup %13861  ;;  %v8942_v7 = vld [vmem:[#allocation2 + $0x18] sm:$0xff] }
0x1e2d   :  { %v8699_v18 = vsub.f32 1.0, %v13862_v16  ;;  %v8701_v30 = vmul.f32 %v13862_v16, %v8465_v6 }
0x1e2e   :  { %v8697_v59 = vadd.f32 %v8696_v27, %v8468_v29 }
0x1e30   :  { %13863 = vtanh.f32 %v8697_v59  ;;  %v8943_v59 = vld [vmem:[#allocation3 + $0x18] sm:$0xff] }
0x1e3a   :  { %v13864_v19 = vpop.eup %13863 }
0x1e3b   :  { %v8700_v26 = vmul.f32 %v13864_v19, %v8699_v18 }
0x1e3d   :  { %v8702_v21 = vadd.f32 %v8701_v30, %v8700_v26 }
0x1e3f   :  { %v8703_v24 = vsel %vm1604_vm12, %v8702_v21, %v8465_v6 }
0x1e40   :  { %12555 = vmatmul.mubr.msk.f32.vlgmr.msra.gmra.mrb[130].mxu0 %vm828_vm6, %v8703_v24  ;;  %12566 = vmatmul.mubr.msk.f32.vlgmr.msra.gmra.mrb[122].mxu1 %vm828_vm6, %v8703_v24 }
0x1e41   :  { %13367 = vmatpush3.bf16.msra.mxu0 %v16599_v33  ;;  %12576 = vmatprep.mubr.msk.f32.mxu0 %vm14880_vm5, %v14881_v38 }
0x1e42   :  { %13368 = vmatprep.subr.bf16.mxu0 %v14879_v17  ;;  %13373 = vmatpush3.bf16.msra.mxu1 %v16546_v56 }
0x1e43   :  { %13374 = vmatprep.subr.bf16.mxu1 %v14879_v17  ;;  %12587 = vmatprep.mubr.msk.f32.mxu1 %vm14880_vm5, %v14881_v38 }
0x1e45   :  { %13370 = vmatpush3.bf16.msra.mxu0 %v16613_v28 }
0x1e46   :  { %13377 = vmatprep.subr.bf16.mxu0 %v14879_v17  ;;  %13376 = vmatpush3.bf16.msra.mxu1 %v16550_v60 }
0x1e47   :  { %13383 = vmatprep.subr.bf16.mxu1 %v14879_v17 }
0x1e48   :  { %12577 = vmatmul.mubr.msk.f32.vlgmr.msra.gmra.mrb[132].mxu0 %vm828_vm6, %v8703_v24 }
0x1e49   :  { %13379 = vmatpush3.bf16.msra.mxu0 %v16597_v42  ;;  %12598 = vmatprep.mubr.msk.f32.mxu0 %vm14880_vm5, %v14881_v38 }
0x1e4a   :  { %13380 = vmatprep.subr.bf16.mxu0 %v14879_v17 }
0x1e4d   :  { %13382 = vmatpush3.bf16.msra.mxu0 %v16607_v40 }
0x1e4e   :  { %13389 = vmatprep.subr.bf16.mxu0 %v14879_v17 }
0x1f13   :  { %v8776_v52 = vpop.f32.mrb[130].mxu0  ;;  %v8846_v23 = vpop.f32.mrb[122].mxu1 }
0x1f14   :  { %v8777_v53 = vadd.f32 %v16649_v62, %v8776_v52  ;;  %v12556_v25 = vpop.f32.mrb[131].mxu0  ;;  %v12567_v11 = vpop.f32.mrb[123].mxu1  ;;  %v8847_v50 = vadd.f32 %v16658_v61, %v8846_v23 }
0x1f15   :  { %v8944_v11 = vld [vmem:[#allocation4 + $0x18] sm:$0xff] }
0x1f16   :  { %v8920_v57 = vadd.f32 %v8777_v53, %v8704_v48  ;;  %v8927_v49 = vadd.f32 %v8847_v50, %v8705_v4 }
0x1f18   :  { %v10781_v51 = vmul.f32 -1.442695, %v8920_v57  ;;  %v10782_v58 = vmul.f32 -1.442695, %v8927_v49 }
0x1f1a   :  { %13865 = vpow2.f32 %v10781_v51 }
0x1f1b   :  { %v8916_v35 = vpop.f32.mrb[132].mxu0  ;;  %13867 = vpow2.f32 %v10782_v58 }
0x1f1c   :  { %v12578_v31 = vpop.f32.mrb[133].mxu0  ;;  %v8917_v0 = vadd.f32 %v16667_v47, %v8916_v35 }
0x1f24   :  { %v13866_v46 = vpop.eup %13865 }
0x1f25   :  { %v8924_v6 = vadd.f32 1.0, %v13866_v46  ;;  %v13868_v8 = vpop.eup %13867 }
0x1f26   :  { %v8931_v54 = vadd.f32 1.0, %v13868_v8 }
0x1f27   :  { %13869 = vrcp.f32 %v8924_v6 }
0x1f28   :  { %13871 = vrcp.f32 %v8931_v54  ;;  %v9180_v54 = vld [vmem:[#allocation2 + $0x20] sm:$0xff] }
0x1f31   :  { %v13870_v9 = vpop.eup %13869 }
0x1f32   :  { %v8934_v39 = vmul.f32 %v13870_v9, %v8917_v0  ;;  %v13872_v32 = vpop.eup %13871 }
0x1f33   :  { %v8937_v43 = vsub.f32 1.0, %v13872_v32  ;;  %v8939_v14 = vmul.f32 %v13872_v32, %v8703_v24 }
0x1f34   :  { %v8935_v34 = vadd.f32 %v8934_v39, %v8706_v10  ;;  %v9181_v10 = vld [vmem:[#allocation3 + $0x20] sm:$0xff] }
0x1f36   :  { %13873 = vtanh.f32 %v8935_v34 }
0x1f40   :  { %v13874_v13 = vpop.eup %13873 }
0x1f41   :  { %v8938_v36 = vmul.f32 %v13874_v13, %v8937_v43 }
0x1f43   :  { %v8940_v12 = vadd.f32 %v8939_v14, %v8938_v36 }
0x1f45   :  { %v8941_v63 = vsel %vm1853_vm13, %v8940_v12, %v8703_v24 }
0x1f46   :  { %12588 = vmatmul.mubr.msk.f32.vlgmr.msra.gmra.mrb[124].mxu1 %vm828_vm6, %v8941_v63  ;;  %12599 = vmatmul.mubr.msk.f32.vlgmr.msra.gmra.mrb[134].mxu0 %vm828_vm6, %v8941_v63 }
0x1f47   :  { %13385 = vmatpush3.bf16.msra.mxu1 %v16599_v33  ;;  %12609 = vmatprep.mubr.msk.f32.mxu1 %vm14880_vm5, %v14881_v38 }
0x1f48   :  { %13386 = vmatprep.subr.bf16.mxu1 %v14879_v17  ;;  %13391 = vmatpush3.bf16.msra.mxu0 %v16546_v56 }
0x1f49   :  { %13392 = vmatprep.subr.bf16.mxu0 %v14879_v17  ;;  %12620 = vmatprep.mubr.msk.f32.mxu0 %vm14880_vm5, %v14881_v38 }
0x1f4b   :  { %13388 = vmatpush3.bf16.msra.mxu1 %v16613_v28 }
0x1f4c   :  { %13395 = vmatprep.subr.bf16.mxu1 %v14879_v17  ;;  %13394 = vmatpush3.bf16.msra.mxu0 %v16550_v60 }
0x1f4d   :  { %13401 = vmatprep.subr.bf16.mxu0 %v14879_v17 }
0x1f4e   :  { %12610 = vmatmul.mubr.msk.f32.vlgmr.msra.gmra.mrb[126].mxu1 %vm828_vm6, %v8941_v63 }
0x1f4f   :  { %13397 = vmatpush3.bf16.msra.mxu1 %v16597_v42  ;;  %12631 = vmatprep.mubr.msk.f32.mxu1 %vm14880_vm5, %v14881_v38 }
0x1f50   :  { %13398 = vmatprep.subr.bf16.mxu1 %v14879_v17 }
0x1f53   :  { %13400 = vmatpush3.bf16.msra.mxu1 %v16607_v40 }
0x1f54   :  { %13407 = vmatprep.subr.bf16.mxu1 %v14879_v17 }
0x2019   :  { %v9014_v22 = vpop.f32.mrb[124].mxu1  ;;  %v9084_v3 = vpop.f32.mrb[134].mxu0 }
0x201a   :  { %v9015_v2 = vadd.f32 %v16649_v62, %v9014_v22  ;;  %v12589_v20 = vpop.f32.mrb[125].mxu1  ;;  %v12600_v5 = vpop.f32.mrb[135].mxu0  ;;  %v9085_v44 = vadd.f32 %v16658_v61, %v9084_v3 }
0x201b   :  { %v9182_v20 = vld [vmem:[#allocation4 + $0x20] sm:$0xff] }
0x201c   :  { %v9158_v27 = vadd.f32 %v9015_v2, %v8942_v7  ;;  %v9165_v16 = vadd.f32 %v9085_v44, %v8943_v59 }
0x201e   :  { %v10786_v29 = vmul.f32 -1.442695, %v9158_v27  ;;  %v10787_v26 = vmul.f32 -1.442695, %v9165_v16 }
0x2020   :  { %13875 = vpow2.f32 %v10786_v29 }
0x2021   :  { %v9154_v18 = vpop.f32.mrb[126].mxu1  ;;  %13877 = vpow2.f32 %v10787_v26 }
0x2022   :  { %v12611_v19 = vpop.f32.mrb[127].mxu1  ;;  %v9155_v23 = vadd.f32 %v16667_v47, %v9154_v18 }
0x202a   :  { %v13876_v30 = vpop.eup %13875 }
0x202b   :  { %v9162_v21 = vadd.f32 1.0, %v13876_v30  ;;  %v13878_v24 = vpop.eup %13877 }
0x202c   :  { %v9169_v52 = vadd.f32 1.0, %v13878_v24  ;;  %v9418_v24 = vld [vmem:[#allocation2 + $0x28] sm:$0xff] }
0x202d   :  { %13879 = vrcp.f32 %v9162_v21 }
0x202e   :  { %13881 = vrcp.f32 %v9169_v52 }
0x2037   :  { %v13880_v53 = vpop.eup %13879 }
0x2038   :  { %v9172_v25 = vmul.f32 %v13880_v53, %v9155_v23  ;;  %v13882_v50 = vpop.eup %13881 }
0x2039   :  { %v9175_v57 = vsub.f32 1.0, %v13882_v50  ;;  %v9177_v49 = vmul.f32 %v13882_v50, %v8941_v63 }
0x203a   :  { %v9173_v48 = vadd.f32 %v9172_v25, %v8944_v11  ;;  %v9419_v25 = vld [vmem:[#allocation3 + $0x28] sm:$0xff] }
0x203c   :  { %13883 = vtanh.f32 %v9173_v48 }
0x2046   :  { %v13884_v51 = vpop.eup %13883 }
0x2047   :  { %v9176_v4 = vmul.f32 %v13884_v51, %v9175_v57 }
0x2049   :  { %v9178_v35 = vadd.f32 %v9177_v49, %v9176_v4 }
0x204b   :  { %v9179_v31 = vsel %vm2102_vm14, %v9178_v35, %v8941_v63 }
0x204c   :  { %12621 = vmatmul.mubr.msk.f32.vlgmr.msra.gmra.mrb[136].mxu0 %vm828_vm6, %v9179_v31  ;;  %12632 = vmatmul.mubr.msk.f32.vlgmr.msra.gmra.mrb[128].mxu1 %vm828_vm6, %v9179_v31 }
0x204d   :  { %13403 = vmatpush3.bf16.msra.mxu0 %v16599_v33  ;;  %12642 = vmatprep.mubr.msk.f32.mxu0 %vm14880_vm5, %v14881_v38 }
0x204e   :  { %13404 = vmatprep.subr.bf16.mxu0 %v14879_v17  ;;  %13409 = vmatpush3.bf16.msra.mxu1 %v16546_v56 }
0x204f   :  { %13410 = vmatprep.subr.bf16.mxu1 %v14879_v17  ;;  %12653 = vmatprep.mubr.msk.f32.mxu1 %vm14880_vm5, %v14881_v38 }
0x2051   :  { %13406 = vmatpush3.bf16.msra.mxu0 %v16613_v28 }
0x2052   :  { %13413 = vmatprep.subr.bf16.mxu0 %v14879_v17  ;;  %13412 = vmatpush3.bf16.msra.mxu1 %v16550_v60 }
0x2053   :  { %13419 = vmatprep.subr.bf16.mxu1 %v14879_v17 }
0x2054   :  { %12643 = vmatmul.mubr.msk.f32.vlgmr.msra.gmra.mrb[138].mxu0 %vm828_vm6, %v9179_v31 }
0x2055   :  { %13415 = vmatpush3.bf16.msra.mxu0 %v16597_v42  ;;  %12664 = vmatprep.mubr.msk.f32.mxu0 %vm14880_vm5, %v14881_v38 }
0x2056   :  { %13416 = vmatprep.subr.bf16.mxu0 %v14879_v17 }
0x2059   :  { %13418 = vmatpush3.bf16.msra.mxu0 %v16607_v40 }
0x205a   :  { %13425 = vmatprep.subr.bf16.mxu0 %v14879_v17 }
0x211f   :  { %v9252_v1 = vpop.f32.mrb[136].mxu0  ;;  %v9322_v58 = vpop.f32.mrb[128].mxu1 }
0x2120   :  { %v9253_v46 = vadd.f32 %v16649_v62, %v9252_v1  ;;  %v12622_v6 = vpop.f32.mrb[137].mxu0  ;;  %v12633_v8 = vpop.f32.mrb[129].mxu1  ;;  %v9323_v0 = vadd.f32 %v16658_v61, %v9322_v58 }
0x2122   :  { %v9396_v9 = vadd.f32 %v9253_v46, %v9180_v54  ;;  %v9403_v34 = vadd.f32 %v9323_v0, %v9181_v10  ;;  %v9420_v46 = vld [vmem:[#allocation4 + $0x28] sm:$0xff] }
0x2124   :  { %v10791_v39 = vmul.f32 -1.442695, %v9396_v9  ;;  %v10792_v13 = vmul.f32 -1.442695, %v9403_v34 }
0x2126   :  { %13885 = vpow2.f32 %v10791_v39 }
0x2127   :  { %v9392_v32 = vpop.f32.mrb[138].mxu0  ;;  %13887 = vpow2.f32 %v10792_v13  ;;  %v9656_v13 = vld [vmem:[#allocation2 + $0x30] sm:$0xff] }
0x2128   :  { %v12644_v43 = vpop.f32.mrb[139].mxu0  ;;  %v9393_v22 = vadd.f32 %v16667_v47, %v9392_v32 }
0x2130   :  { %v13886_v36 = vpop.eup %13885 }
0x2131   :  { %v9400_v14 = vadd.f32 1.0, %v13886_v36  ;;  %v13888_v12 = vpop.eup %13887 }
0x2132   :  { %v9407_v63 = vadd.f32 1.0, %v13888_v12  ;;  %v9657_v12 = vld [vmem:[#allocation3 + $0x30] sm:$0xff] }
0x2133   :  { %13889 = vrcp.f32 %v9400_v14 }
0x2134   :  { %13891 = vrcp.f32 %v9407_v63 }
0x213d   :  { %v13890_v3 = vpop.eup %13889 }
0x213e   :  { %v9410_v2 = vmul.f32 %v13890_v3, %v9393_v22  ;;  %v13892_v7 = vpop.eup %13891 }
0x213f   :  { %v9413_v44 = vsub.f32 1.0, %v13892_v7  ;;  %v9415_v59 = vmul.f32 %v13892_v7, %v9179_v31 }
0x2140   :  { %v9411_v5 = vadd.f32 %v9410_v2, %v9182_v20 }
0x2142   :  { %13893 = vtanh.f32 %v9411_v5 }
0x214c   :  { %v13894_v27 = vpop.eup %13893 }
0x214d   :  { %v9414_v29 = vmul.f32 %v13894_v27, %v9413_v44 }
0x214f   :  { %v9416_v16 = vadd.f32 %v9415_v59, %v9414_v29  ;;  %v9658_v59 = vld [vmem:[#allocation4 + $0x30] sm:$0xff] }
0x2151   :  { %v9417_v18 = vsel %vm2351_vm15, %v9416_v16, %v9179_v31 }
0x2152   :  { %12654 = vmatmul.mubr.msk.f32.vlgmr.msra.gmra.mrb[130].mxu1 %vm828_vm6, %v9417_v18  ;;  %12665 = vmatmul.mubr.msk.f32.vlgmr.msra.gmra.mrb[140].mxu0 %vm828_vm6, %v9417_v18 }
0x2153   :  { %13421 = vmatpush3.bf16.msra.mxu1 %v16599_v33  ;;  %12675 = vmatprep.mubr.msk.f32.mxu1 %vm14880_vm5, %v14881_v38 }
0x2154   :  { %13422 = vmatprep.subr.bf16.mxu1 %v14879_v17  ;;  %13427 = vmatpush3.bf16.msra.mxu0 %v16546_v56 }
0x2155   :  { %13428 = vmatprep.subr.bf16.mxu0 %v14879_v17  ;;  %12686 = vmatprep.mubr.msk.f32.mxu0 %vm14880_vm5, %v14881_v38 }
0x2157   :  { %13424 = vmatpush3.bf16.msra.mxu1 %v16613_v28 }
0x2158   :  { %13431 = vmatprep.subr.bf16.mxu1 %v14879_v17  ;;  %13430 = vmatpush3.bf16.msra.mxu0 %v16550_v60 }
0x2159   :  { %13437 = vmatprep.subr.bf16.mxu0 %v14879_v17 }
0x215a   :  { %12676 = vmatmul.mubr.msk.f32.vlgmr.msra.gmra.mrb[132].mxu1 %vm828_vm6, %v9417_v18 }
0x215b   :  { %13433 = vmatpush3.bf16.msra.mxu1 %v16597_v42  ;;  %12697 = vmatprep.mubr.msk.f32.mxu1 %vm14880_vm5, %v14881_v38 }
0x215c   :  { %13434 = vmatprep.subr.bf16.mxu1 %v14879_v17 }
0x215f   :  { %13436 = vmatpush3.bf16.msra.mxu1 %v16607_v40 }
0x2160   :  { %13443 = vmatprep.subr.bf16.mxu1 %v14879_v17 }
0x2225   :  { %v9490_v41 = vpop.f32.mrb[130].mxu1  ;;  %v9560_v19 = vpop.f32.mrb[140].mxu0 }
0x2226   :  { %v9491_v26 = vadd.f32 %v16649_v62, %v9490_v41  ;;  %v12655_v30 = vpop.f32.mrb[131].mxu1  ;;  %v12666_v21 = vpop.f32.mrb[141].mxu0  ;;  %v9561_v52 = vadd.f32 %v16658_v61, %v9560_v19 }
0x2228   :  { %v9634_v23 = vadd.f32 %v9491_v26, %v9418_v24  ;;  %v9641_v11 = vadd.f32 %v9561_v52, %v9419_v25  ;;  %v10153_v52 = vld [vmem:[%s17019_s12 + $0x10] sm:$0xff] }
0x222a   :  { %v10796_v53 = vmul.f32 -1.442695, %v9634_v23  ;;  %v10797_v57 = vmul.f32 -1.442695, %v9641_v11  ;;  %v10156_v11 = vld [vmem:[%s17019_s12 + $0x28] sm:$0xff] }
0x222c   :  { %13895 = vpow2.f32 %v10796_v53  ;;  %v10154_v53 = vld [vmem:[%s17019_s12 + $0x18] sm:$0xff] }
0x222d   :  { %v9630_v48 = vpop.f32.mrb[132].mxu1  ;;  %13897 = vpow2.f32 %v10797_v57  ;;  %v13465_v25 = vpack.c.bf16 %v10154_v53, %v10153_v52  ;;  %v10158_v57 = vld [vmem:[%s17019_s12 + $0x38] sm:$0xff] }
0x222e   :  { %v12677_v50 = vpop.f32.mrb[133].mxu1  ;;  %v9631_v31 = vadd.f32 %v16667_v47, %v9630_v48 }
0x222f   :  { %v10157_v50 = vld [vmem:[%s17019_s12 + $0x30] sm:$0xff] }
0x2236   :  { %v13896_v51 = vpop.eup %13895 }
0x2237   :  { %v9638_v4 = vadd.f32 1.0, %v13896_v51  ;;  %v13898_v49 = vpop.eup %13897  ;;  %v13471_v51 = vpack.c.bf16 %v10158_v57, %v10157_v50  ;;  %v10274_v50 = vld [vmem:[%s17020_s29 + $0x8] sm:$0xff]  ;;  %v10275_v57 = vld [vmem:[%s17020_s29 + $0x10] sm:$0xff] }
0x2238   :  { %v9645_v35 = vadd.f32 1.0, %v13898_v49  ;;  %v10160_v49 = vld [vmem:[%s17019_s12 + $0x48] sm:$0xff] }
0x2239   :  { %13899 = vrcp.f32 %v9638_v4  ;;  %v10159_v4 = vld [vmem:[%s17019_s12 + $0x40] sm:$0xff] }
0x223a   :  { %13901 = vrcp.f32 %v9645_v35  ;;  %v13474_v35 = vpack.c.bf16 %v10160_v49, %v10159_v4  ;;  %v10276_v4 = vld [vmem:[%s17020_s29 + $0x18] sm:$0xff] }
0x223b   :  { %v13489_v49 = vpack.c.bf16 %v10276_v4, %v10275_v57 }
0x2243   :  { %v13900_v1 = vpop.eup %13899 }
0x2244   :  { %v9648_v58 = vmul.f32 %v13900_v1, %v9631_v31  ;;  %v13902_v8 = vpop.eup %13901  ;;  %v10161_v31 = vld [vmem:[%s17019_s12 + $0x50] sm:$0xff]  ;;  %v10162_v1 = vld [vmem:[%s17019_s12 + $0x58] sm:$0xff] }
0x2245   :  { %v9651_v54 = vsub.f32 1.0, %v13902_v8  ;;  %v9653_v39 = vmul.f32 %v13902_v8, %v9417_v18 }
0x2246   :  { %v9649_v6 = vadd.f32 %v9648_v58, %v9420_v46  ;;  %v13477_v58 = vpack.c.bf16 %v10162_v1, %v10161_v31  ;;  %v10163_v46 = vld [vmem:[%s17019_s12 + $0x60] sm:$0xff] }
0x2248   :  { %13903 = vtanh.f32 %v9649_v6  ;;  %v10164_v6 = vld [vmem:[%s17019_s12 + $0x68] sm:$0xff] }
0x2249   :  { %v13480_v8 = vpack.c.bf16 %v10164_v6, %v10163_v46  ;;  %v10809_v46 = vld [vmem:[#allocation56] ss:$0 sm:$0xff] }
0x2252   :  { %v13904_v0 = vpop.eup %13903 }
0x2253   :  { %v9652_v9 = vmul.f32 %v13904_v0, %v9651_v54  ;;  %v10165_v54 = vld [vmem:[%s17019_s12 + $0x70] sm:$0xff]  ;;  %v10166_v0 = vld [vmem:[%s17019_s12 + $0x78] sm:$0xff] }
0x2255   :  { %v9654_v10 = vadd.f32 %v9653_v39, %v9652_v9  ;;  %v13483_v9 = vpack.c.bf16 %v10166_v0, %v10165_v54 }
0x2257   :  { %v9655_v34 = vsel %vm2600_vm0, %v9654_v10, %v9417_v18 }
0x2258   :  { %12687 = vmatmul.mubr.msk.f32.vlgmr.msra.gmra.mrb[142].mxu0 %vm828_vm6, %v9655_v34  ;;  %12698 = vmatmul.mubr.msk.f32.vlgmr.msra.gmra.mrb[134].mxu1 %vm828_vm6, %v9655_v34 }
0x2259   :  { %13439 = vmatpush3.bf16.msra.mxu0 %v16599_v33  ;;  %12708 = vmatprep.mubr.msk.f32.mxu0 %vm14880_vm5, %v14881_v38 }
0x225a   :  { %13440 = vmatprep.subr.bf16.mxu0 %v14879_v17  ;;  %13445 = vmatpush3.bf16.msra.mxu1 %v16546_v56 }
0x225b   :  { %13446 = vmatprep.subr.bf16.mxu1 %v14879_v17  ;;  %12719 = vmatprep.mubr.msk.f32.mxu1 %vm14880_vm5, %v14881_v38 }
0x225d   :  { %13442 = vmatpush3.bf16.msra.mxu0 %v16613_v28 }
0x225e   :  { %13449 = vmatprep.subr.bf16.mxu0 %v14879_v17  ;;  %13448 = vmatpush3.bf16.msra.mxu1 %v16550_v60 }
0x225f   :  { %13455 = vmatprep.subr.bf16.mxu1 %v14879_v17 }
0x2260   :  { %12709 = vmatmul.mubr.msk.f32.vlgmr.msra.gmra.mrb[144].mxu0 %vm828_vm6, %v9655_v34 }
0x2261   :  { %13451 = vmatpush3.bf16.msra.mxu0 %v16597_v42  ;;  %12730 = vmatprep.mubr.msk.f32.mxu0 %vm14880_vm5, %v14881_v38 }
0x2262   :  { %13452 = vmatprep.subr.bf16.mxu0 %v14879_v17 }
0x2265   :  { %13454 = vmatpush3.bf16.msra.mxu0 %v16607_v40 }
0x2266   :  { %13461 = vmatprep.subr.bf16.mxu0 %v14879_v17 }
0x232b   :  { %v9728_v15 = vpop.f32.mrb[142].mxu0  ;;  %v9798_v56 = vpop.f32.mrb[134].mxu1 }
0x232c   :  { %v9729_v32 = vadd.f32 %v16649_v62, %v9728_v15  ;;  %v12688_v60 = vpop.f32.mrb[143].mxu0  ;;  %v12699_v43 = vpop.f32.mrb[135].mxu1  ;;  %v9799_v36 = vadd.f32 %v16658_v61, %v9798_v56 }
0x232e   :  { %v9872_v14 = vadd.f32 %v9729_v32, %v9656_v13  ;;  %v9879_v63 = vadd.f32 %v9799_v36, %v9657_v12  ;;  %v9894_v32 = vld [vmem:[#allocation2 + $0x38] sm:$0xff] }
0x232f   :  { %v9895_v36 = vld [vmem:[#allocation3 + $0x38] sm:$0xff] }
0x2330   :  { %v10801_v42 = vmul.f32 -1.442695, %v9872_v14  ;;  %v10802_v2 = vmul.f32 -1.442695, %v9879_v63 }
0x2332   :  { %13905 = vpow2.f32 %v10801_v42 }
0x2333   :  { %v9868_v22 = vpop.f32.mrb[144].mxu0  ;;  %13907 = vpow2.f32 %v10802_v2 }
0x2334   :  { %v12710_v3 = vpop.f32.mrb[145].mxu0  ;;  %v9869_v44 = vadd.f32 %v16667_v47, %v9868_v22 }
0x233c   :  { %v13906_v40 = vpop.eup %13905 }
0x233d   :  { %v9876_v20 = vadd.f32 1.0, %v13906_v40  ;;  %v13908_v5 = vpop.eup %13907 }
0x233e   :  { %v9883_v7 = vadd.f32 1.0, %v13908_v5 }
0x233f   :  { %13909 = vrcp.f32 %v9876_v20 }
0x2340   :  { %13911 = vrcp.f32 %v9883_v7 }
0x2349   :  { %v13910_v27 = vpop.eup %13909 }
0x234a   :  { %v9886_v29 = vmul.f32 %v13910_v27, %v9869_v44  ;;  %v13912_v18 = vpop.eup %13911 }
0x234b   :  { %v9889_v41 = vsub.f32 1.0, %v13912_v18  ;;  %v9891_v30 = vmul.f32 %v13912_v18, %v9655_v34 }
0x234c   :  { %v9887_v16 = vadd.f32 %v9886_v29, %v9658_v59 }
0x234e   :  { %13913 = vtanh.f32 %v9887_v16 }
0x2358   :  { %v13914_v19 = vpop.eup %13913 }
0x2359   :  { %v9890_v26 = vmul.f32 %v13914_v19, %v9889_v41  ;;  %v10138_v19 = vpop.permute.xlu1 %10137 }
0x235b   :  { %v9892_v21 = vadd.f32 %v9891_v30, %v9890_v26 }
0x235d   :  { %v16828_v24 = vsel %vm2849_vm1, %v9892_v21, %v9655_v34 }
0x235e   :  { %12720 = vmatmul.mubr.msk.f32.vlgmr.msra.gmra.mrb[136].mxu1 %vm828_vm6, %v16828_v24  ;;  %12731 = vmatmul.mubr.msk.f32.vlgmr.msra.gmra.mrb[146].mxu0 %vm828_vm6, %v16828_v24 }
0x235f   :  { %13457 = vmatpush3.bf16.msra.mxu1 %v16599_v33  ;;  %12741 = vmatprep.mubr.msk.f32.mxu1 %vm14880_vm5, %v14881_v38  ;;  %v10152_v33 = vld [vmem:[%s17019_s12 + $0x8] sm:$0xff] }
0x2360   :  { %13458 = vmatprep.subr.bf16.mxu1 %v14879_v17  ;;  %12776 = vmatprep.mubr.msk.f32.mxu0 %vm14880_vm5, %v14881_v38  ;;  %v13462_v23 = vpack.c.bf16 %v10152_v33, %v10151_v55  ;;  %v10808_v33 = vld [vmem:[#allocation55] ss:$0 sm:$0xff] }
0x2362   :  { %13463 = vmatpush3.bf16.msra.mxu0 %v13462_v23 }
0x2363   :  { %13460 = vmatpush3.bf16.msra.mxu1 %v16613_v28  ;;  %13464 = vmatprep.subr.bf16.mxu0 %v14879_v17  ;;  %v10155_v28 = vld [vmem:[%s17019_s12 + $0x20] sm:$0xff] }
0x2364   :  { %13485 = vmatprep.subr.bf16.mxu1 %v14879_v17  ;;  %v13468_v48 = vpack.c.bf16 %v10156_v11, %v10155_v28 }
0x2366   :  { %12742 = vmatmul.mubr.msk.f32.vlgmr.msra.gmra.mrb[138].mxu1 %vm828_vm6, %v16828_v24  ;;  %13466 = vmatpush3.bf16.msra.mxu0 %v13465_v25 }
0x2367   :  { %12787 = vmatprep.mubr.msk.f32.mxu1 %vm14880_vm5, %v14881_v38  ;;  %13467 = vmatprep.subr.bf16.mxu0 %v14879_v17 }
0x236a   :  { %13469 = vmatpush3.bf16.msra.mxu0 %v13468_v48  ;;  %v10273_v48 = vld [vmem:[%s17020_s29] sm:$0xff] }
0x236b   :  { %13470 = vmatprep.subr.bf16.mxu0 %v14879_v17 }
0x236e   :  { %13472 = vmatpush3.bf16.msra.mxu0 %v13471_v51  ;;  %v13486_v51 = vpack.c.bf16 %v10274_v50, %v10273_v48 }
0x236f   :  { %13473 = vmatprep.subr.bf16.mxu0 %v14879_v17 }
0x2370   :  { %13487 = vmatpush3.bf16.msra.mxu1 %v13486_v51 }
0x2371   :  { %13488 = vmatprep.subr.bf16.mxu1 %v14879_v17 }
0x2372   :  { %13475 = vmatpush3.bf16.msra.mxu0 %v13474_v35 }
0x2373   :  { %13476 = vmatprep.subr.bf16.mxu0 %v14879_v17 }
0x2374   :  { %13490 = vmatpush3.bf16.msra.mxu1 %v13489_v49 }
0x2375   :  { %13491 = vmatprep.subr.bf16.mxu1 %v14879_v17 }
0x2376   :  { %13478 = vmatpush3.bf16.msra.mxu0 %v13477_v58 }
0x2377   :  { %13479 = vmatprep.subr.bf16.mxu0 %v14879_v17 }
0x237a   :  { %13481 = vmatpush3.bf16.msra.mxu0 %v13480_v8  ;;  %v10810_v8 = vld [vmem:[#allocation58] ss:$0 sm:$0xff] }
0x237b   :  { %13482 = vmatprep.subr.bf16.mxu0 %v14879_v17 }
0x237e   :  { %13484 = vmatpush3.bf16.msra.mxu0 %v13483_v9 }
0x2431   :  { %v9966_v39 = vpop.f32.mrb[136].mxu1  ;;  %v10036_v10 = vpop.f32.mrb[146].mxu0 }
0x2432   :  { %v9967_v34 = vadd.f32 %v16649_v62, %v9966_v39  ;;  %v12721_v15 = vpop.f32.mrb[137].mxu1  ;;  %v12732_v56 = vpop.f32.mrb[147].mxu0  ;;  %v10037_v60 = vadd.f32 %v16658_v61, %v10036_v10  ;;  %v9896_v61 = vld [vmem:[#allocation4 + $0x38] sm:$0xff]  ;;  %v10811_v39 = vld [vmem:[#allocation59] ss:$0 sm:$0xff] }
0x2434   :  { %v10110_v43 = vadd.f32 %v9967_v34, %v9894_v32  ;;  %v10117_v14 = vadd.f32 %v10037_v60, %v9895_v36 }
0x2436   :  { %v10806_v13 = vmul.f32 -1.442695, %v10110_v43  ;;  %v10807_v63 = vmul.f32 -1.442695, %v10117_v14  ;;  %v10373_v14 = vld [vmem:[%s15173_s5] sm:$0xff] }
0x2438   :  { %13915 = vpow2.f32 %v10806_v13 }
0x2439   :  { %v10106_v42 = vpop.f32.mrb[138].mxu1  ;;  %13917 = vpow2.f32 %v10807_v63  ;;  %v10376_v63 = vld [vmem:[%s15173_s5 + $0x18] sm:$0xff] }
0x243a   :  { %v12743_v12 = vpop.f32.mrb[139].mxu1  ;;  %v10107_v62 = vadd.f32 %v16667_v47, %v10106_v42  ;;  %v10134_v47 = vpop.permute.xlu0 %10133  ;;  %v10374_v42 = vld [vmem:[%s15173_s5 + $0x8] sm:$0xff] }
0x243b   :  { %v10144_v26 = vsel %vm828_vm6, %v15861_v45, %v10134_v47  ;;  %v13492_v12 = vpack.c.bf16 %v10374_v42, %v10373_v14 }
0x243c   :  { %v10146_v30 = vsel %vm10145_vm3, %v10144_v26, %v10138_v19 }
0x2442   :  { %v13916_v22 = vpop.eup %13915 }
0x2443   :  { %v10114_v3 = vadd.f32 1.0, %v13916_v22  ;;  %v13918_v2 = vpop.eup %13917 }
0x2444   :  { %v10121_v40 = vadd.f32 1.0, %v13918_v2 }
0x2445   :  { %13919 = vrcp.f32 %v10114_v3 }
0x2446   :  { %13921 = vrcp.f32 %v10121_v40 }
0x244f   :  { %v13920_v20 = vpop.eup %13919 }
0x2450   :  { %v10124_v5 = vmul.f32 %v13920_v20, %v10107_v62  ;;  %v13922_v44 = vpop.eup %13921 }
0x2451   :  { %v10127_v27 = vsub.f32 1.0, %v13922_v44  ;;  %v10129_v16 = vmul.f32 %v13922_v44, %v16828_v24  ;;  %v10813_v44 = vld [vmem:[#allocation61] ss:$0 sm:$0xff] }
0x2452   :  { %v10125_v7 = vadd.f32 %v10124_v5, %v9896_v61 }
0x2454   :  { %13923 = vtanh.f32 %v10125_v7 }
0x245e   :  { %v13924_v29 = vpop.eup %13923 }
0x245f   :  { %v10128_v59 = vmul.f32 %v13924_v29, %v10127_v27 }
0x2461   :  { %v10130_v18 = vadd.f32 %v10129_v16, %v10128_v59 }
0x2463   :  { %v10131_v41 = vsel %vm3098_vm2, %v10130_v18, %v16828_v24 }
0x2464   :  { %10141 = vrot.lane.b32.xlu0 %v10131_v41, %s14884_s19 }
0x24d6   :  { %v10142_v21 = vpop.permute.xlu0 %10141 }
0x24d7   :  { %v10148_v55 = vsel %vm10147_vm4, %v10146_v30, %v10142_v21 }
0x24d8   :  { %12777 = vmatmul.mubr.f32.vlgmr.msra.gmra.mrb[148].mxu0 %v10148_v55 }
0x25ab   :  { %v10240_v37 = vpop.f32.mrb[148].mxu0 }
0x25ac   :  { %v10241_v24 = vadd.f32 %v10808_v33, %v10240_v37  ;;  %v12778_v52 = vpop.f32.mrb[149].mxu0 }
0x25ae   :  { %v10244_v23 = vsel %vm828_vm6, %v10241_v24, 0.0 }
0x25af   :  { %10245 = vadd.xlane.f32.xlu1 %v10244_v23 }
0x263c   :  { %v10246_v53 = vpop.xlane.xlu1 %10245 }
0x263d   :  { %v10248_v25 = vmul.f32 0.03125, %v10246_v53 }
0x263f   :  { %v10249_v28 = vsub.f32 %v10241_v24, %v10248_v25 }
0x2641   :  { %v10250_v11 = vmul.f32 %v10249_v28, %v10249_v28 }
0x2643   :  { %v10251_v45 = vsel %vm828_vm6, %v10250_v11, 0.0 }
0x2644   :  { %10252 = vadd.xlane.f32.xlu0 %v10251_v45 }
0x26d1   :  { %v10253_v35 = vpop.xlane.xlu0 %10252 }
0x26d2   :  { %v10254_v31 = vmul.f32 0.03125, %v10253_v35 }
0x26d4   :  { %v10255_v1 = vadd.f32 1e-05, %v10254_v31 }
0x26d6   :  { %13925 = vrsqrt.f32 %v10255_v1 }
0x26e0   :  { %v13926_v58 = vpop.eup %13925 }
0x26e1   :  { %v10257_v6 = vmul.f32 %v13926_v58, %v10249_v28 }
0x26e3   :  { %v10264_v54 = vmul.f32 %v10809_v46, %v10257_v6 }
0x26e5   :  { %v10271_v0 = vadd.f32 %v10810_v8, %v10264_v54 }
0x26e7   :  { %v10272_v9 = vmax.f32 %v10271_v0, 0.0 }
0x26e9   :  { %12788 = vmatmul.mubr.msk.f32.vlgmr.msra.gmra.mrb[140].mxu1 %vm828_vm6, %v10272_v9 }
0x26ea   :  { %12798 = vmatprep.mubr.msk.f32.mxu1 %vm14880_vm5, %v14881_v38  ;;  %v10375_v38 = vld [vmem:[%s15173_s5 + $0x10] sm:$0xff]  ;;  %13493 = vmatpush3.bf16.msra.mxu1 %v13492_v12  ;;  %vm10457_vm5 = vcmask 39936  }
0x26eb   :  { %v13495_v22 = vpack.c.bf16 %v10376_v63, %v10375_v38  ;;  %13494 = vmatprep.subr.bf16.mxu1 %v14879_v17 }
0x26ee   :  { %13496 = vmatpush3.bf16.msra.mxu1 %v13495_v22 }
0x27bc   :  { %v10353_v10 = vpop.f32.mrb[140].mxu1 }
0x27bd   :  { %v10354_v34 = vadd.f32 %v10811_v39, %v10353_v10  ;;  %v12789_v15 = vpop.f32.mrb[141].mxu1 }
0x27bf   :  { %v10357_v56 = vsel %vm828_vm6, %v10354_v34, 0.0 }
0x27c0   :  { %10358 = vadd.xlane.f32.xlu0 %v10357_v56 }
0x284d   :  { %v10359_v32 = vpop.xlane.xlu0 %10358 }
0x284e   :  { %v10360_v60 = vmul.f32 0.03125, %v10359_v32 }
0x2850   :  { %v10361_v43 = vsub.f32 %v10354_v34, %v10360_v60 }
0x2852   :  { %v10362_v13 = vmul.f32 %v10361_v43, %v10361_v43 }
0x2854   :  { %v10363_v36 = vsel %vm828_vm6, %v10362_v13, 0.0 }
0x2855   :  { %10364 = vadd.xlane.f32.xlu1 %v10363_v36 }
0x28e2   :  { %v10365_v3 = vpop.xlane.xlu1 %10364 }
0x28e3   :  { %v10366_v2 = vmul.f32 0.03125, %v10365_v3 }
0x28e5   :  { %v10367_v40 = vadd.f32 1e-05, %v10366_v2 }
0x28e7   :  { %13927 = vrsqrt.f32 %v10367_v40 }
0x28f1   :  { %v13928_v62 = vpop.eup %13927 }
0x28f2   :  { %v10369_v20 = vmul.f32 %v13928_v62, %v10361_v43 }
0x28f4   :  { %v10370_v5 = vmul.f32 %v10809_v46, %v10369_v20 }
0x28f6   :  { %v10371_v61 = vadd.f32 %v10810_v8, %v10370_v5 }
0x28f8   :  { %v10372_v7 = vmax.f32 %v10371_v61, 0.0 }
0x28fa   :  { %12799 = vmatmul.mubr.msk.f32.vlgmr.msra.gmra.mrb[142].mxu1 %vm828_vm6, %v10372_v7 }
0x29cd   :  { %v10453_v27 = vpop.f32.mrb[142].mxu1 }
0x29ce   :  { %v10454_v29 = vadd.f32 %v10813_v44, %v10453_v27  ;;  %v12800_v59 = vpop.f32.mrb[143].mxu1 }
0x29d0   :  { %10458 = vst.msk [vmem:[%s15183_s25] sm:$0xff] %vm10457_vm5, %v10454_v29 }
0x29d1   :  { %10463 = vsyncpa [#allocation7], 1 }
0x29d2   :  { %10464 = vsyncpa [#allocation9], 1 }
0x29d3   :  { %10465 = vsyncpa [#allocation12], 1 }
0x29d4   :  { %10466 = vsyncpa [#allocation15], 1 }
0x29d5   :  { %10467 = vsyncpa [#allocation18], 1 }
0x29d6   :  { %10468 = vsyncpa [#allocation21], 1 }
0x29d7   :  { %10469 = vsyncpa [#allocation24], 1 }
0x29d8   :  { %10470 = vsyncpa [#allocation27], 1 }
0x29d9   :  { %10471 = vsyncpa [#allocation30], 1 }
0x29da   :  { %10472 = vsyncpa [#allocation33], 1 }
0x29db   :  { %10473 = vsyncpa [#allocation36], 1 }
0x29dc   :  { %10474 = vsyncpa [#allocation39], 1 }
0x29dd   :  { %10475 = vsyncpa [#allocation42], 1 }
0x29de   :  { %10476 = vsyncpa [#allocation45], 1 }
0x29df   :  { %10477 = vsyncpa [#allocation48], 1 }
0x29e0   :  { %10478 = vsyncpa [#allocation51], 1 }
0x29e1   :  { %10479 = vsyncpa [#allocation54], 1 }
0x29e2   :  { %10480 = vsyncpa [#allocation57], 1 }
0x29e3   :  { %10481 = vsyncpa [#allocation60], 1 }

</bundles_post_ra>
